<compile_context>
chip_gen: v7x
topology: tpu7x:2x2x1
jax: 0.10.0
libtpu: 0.0.40
codegen_flags: <defaults>
</compile_context>

<pallas_src>
import functools

import jax
import jax.numpy as jnp
from jax.experimental import pallas as pl
from jax.experimental.pallas import tpu as pltpu

EPS = 1e-5        # nn.BatchNorm2d default eps
C1 = 128          # first Conv2dNormActivation output channels
C2 = 64           # second Conv2dNormActivation output channels
C2_PAD = 128      # second conv channels padded for lane-dense BN / stores / taps
C3 = 3            # final conv output channels (RGB)
C3_PAD = 128      # final conv channels padded for lane-dense output stores


# ----------------------------------------------------------------------------
# Fused Pallas kernel: the whole generator forward pass in one call.
# ----------------------------------------------------------------------------
def _dcgan_fused_kernel(
    x_ref,                      # (B, latent)                          f32
    wproj_ref, bproj_ref,       # (latent, s*s*latent) bf16, (1, s*s*latent) f32
    w1_ref, g1_ref, be1_ref,    # (9, latent, 128) bf16, (1, 128) f32 x2
    w2_ref, g2_ref, be2_ref,    # (9, 128, 128)   bf16, (1, 128) f32 x2
    w3_ref, b3_ref,             # (9, 128, 128)   bf16, (1, 128) f32
    out_ref,                    # (B * (4s)^2, 128)                    f32
    pad1, pad2, pad3,           # VMEM scratch: zero-padded activations per stage
    *, batch, latent, s,
):
    h1 = 2 * s                  # spatial size seen by conv1 (after 1st upsample)
    h2 = 4 * s                  # spatial size seen by conv2/conv3 (= output)
    c1 = g1_ref.shape[1]
    c2p = g2_ref.shape[1]

    def zero_border(pad_ref):
        """Zero only the 1-pixel border (interior is fully overwritten later)."""
        b, hp, wp, c = pad_ref.shape
        zrow = jnp.zeros((b, 1, wp, c), pad_ref.dtype)
        zcol = jnp.zeros((b, hp, 1, c), pad_ref.dtype)
        pad_ref[:, 0:1, :, :] = zrow
        pad_ref[:, hp - 1:hp, :, :] = zrow
        pad_ref[:, :, 0:1, :] = zcol
        pad_ref[:, :, wp - 1:wp, :] = zcol

    def conv3x3(pad_ref, w_ref, h, w):
        """3x3 'same' conv as 9 per-tap MXU matmuls accumulated in f32.

        Each tap is a shifted window load from the zero-padded VMEM buffer;
        the (B, h, w, Cin) -> (B*h*w, Cin) collapse keeps the minor (channel)
        dim fixed and w % 8 == 0, so it is a pure vreg regrouping.
        """
        rows = batch * h * w
        acc = None
        for k in range(9):
            dy, dx = divmod(k, 3)
            t = pad_ref[:, dy:dy + h, dx:dx + w, :]            # (B, h, w, Cin)
            t = t.reshape(rows, t.shape[-1]).astype(jnp.bfloat16)
            part = jnp.dot(t, w_ref[k], preferred_element_type=jnp.float32)
            acc = part if acc is None else acc + part
        return acc                                              # (rows, Cout) f32

    def bn_relu(acc, g_ref, b_ref):
        """Training-mode BatchNorm2d (biased stats over N*H*W) + ReLU, in f32."""
        mean = jnp.mean(acc, axis=0, keepdims=True)
        var = jnp.mean((acc - mean) ** 2, axis=0, keepdims=True)
        y = (acc - mean) * (g_ref[...] * jax.lax.rsqrt(var + EPS)) + b_ref[...]
        return jnp.maximum(y, 0.0)

    def upsample2x_into(src, pad_ref):
        """Vectorized nearest 2x upsample of src=(B,h,w,C) into the interior of
        pad_ref=(B,2h+2,2w+2,C); the 1-pixel border is zeroed (conv padding)."""
        b, h, w, c = src.shape
        # Row duplication: broadcast + leading-dim reshape (minor dims untouched).
        rd = jnp.broadcast_to(src[:, :, None, :, :], (b, h, 2, w, c))
        rd = rd.reshape(b, 2 * h, w, c)
        # Column duplication: register-level interleave via concat, ONE store.
        cols = []
        for j in range(w):
            col = rd[:, :, j:j + 1, :]                          # (B, 2h, 1, C)
            cols.append(col)
            cols.append(col)
        up = jnp.concatenate(cols, axis=2)                      # (B, 2h, 2w, C)
        zero_border(pad_ref)
        pad_ref[:, 1:2 * h + 1, 1:2 * w + 1, :] = up.astype(pad_ref.dtype)

    def pad_into(src, pad_ref):
        """Zero-pad src=(B,h,w,C) by one pixel into pad_ref with ONE dense store."""
        b, h, w, c = src.shape
        zero_border(pad_ref)
        pad_ref[:, 1:h + 1, 1:w + 1, :] = src.astype(pad_ref.dtype)

    # ---- noise projection (nn.Linear) fused with view + first 2x upsample ----
    # ONE matmul: wproj columns are pre-permuted to (i, j, c) order so column
    # block p = i*s + j holds the latent "pixel" (i, j).  The (B, s*s*latent)
    # result is relaid out to the upsampled NHWC image with static lane slices
    # + concats (no minor-dim-changing reshape), then stored once.
    xb = x_ref[...].astype(jnp.bfloat16)                        # (B, latent)
    y = jnp.dot(xb, wproj_ref[...],
                preferred_element_type=jnp.float32) + bproj_ref[...]
    row_blocks = []
    for i in range(s):
        blocks = []
        for j in range(s):
            p = i * s + j
            blk = y[:, p * latent:(p + 1) * latent]             # (B, latent)
            blk = jnp.broadcast_to(blk[:, None, None, :], (batch, 2, 2, latent))
            blocks.append(blk)
        row_blocks.append(jnp.concatenate(blocks, axis=2))      # (B, 2, 2s, latent)
    up1 = jnp.concatenate(row_blocks, axis=1)                   # (B, 2s, 2s, latent)
    zero_border(pad1)
    pad1[:, 1:h1 + 1, 1:h1 + 1, :] = up1.astype(pad1.dtype)

    # ---- stage 1: Conv3x3(latent -> 128) + BN + ReLU --------------------------
    a1 = bn_relu(conv3x3(pad1, w1_ref, h1, h1), g1_ref, be1_ref)  # (B*h1*h1, 128)
    a1 = a1.reshape(batch, h1, h1, c1)

    # ---- stage 2: Upsample 2x + Conv3x3(128 -> 64, padded to 128) + BN + ReLU -
    upsample2x_into(a1, pad2)
    a2 = bn_relu(conv3x3(pad2, w2_ref, h2, h2), g2_ref, be2_ref)  # (B*h2*h2, 128)
    a2 = a2.reshape(batch, h2, h2, c2p)

    # ---- stage 3: Conv3x3(64 -> 3, bias) + Tanh (Cin/Cout padded to 128) ------
    pad_into(a2, pad3)
    a3 = conv3x3(pad3, w3_ref, h2, h2) + b3_ref[...]              # (B*h2*h2, 128)
    out_ref[...] = jnp.tanh(a3)


# ----------------------------------------------------------------------------
# pallas_call plumbing
# ----------------------------------------------------------------------------
def _zeros_index_map(i, *, ndim):
    return (0,) * ndim


def _full_spec(shape):
    # whole-array block, single grid point (toy sizes fit VMEM with huge margin)
    return pl.BlockSpec(shape, functools.partial(_zeros_index_map, ndim=len(shape)))


# ----------------------------------------------------------------------------
# Parameter pre-processing (pure layout work, done once in XLA)
# ----------------------------------------------------------------------------
def _pack_conv_w(w_oihw, cin_pad=None, cout_pad=None):
    """(Cout, Cin, 3, 3) torch layout -> (9, Cin[_pad], Cout[_pad]) bf16 per-tap."""
    cout, cin = w_oihw.shape[0], w_oihw.shape[1]
    w = jnp.transpose(w_oihw, (2, 3, 1, 0)).reshape(9, cin, cout)
    if cin_pad is not None and cin_pad > cin:
        w = jnp.pad(w, ((0, 0), (0, cin_pad - cin), (0, 0)))
    if cout_pad is not None and cout_pad > cout:
        w = jnp.pad(w, ((0, 0), (0, 0), (0, cout_pad - cout)))
    return w.astype(jnp.bfloat16)


def _fuse_proj(w_proj, b_proj, latent, s):
    """Permute nn.Linear weights so ONE matmul yields (i, j, c)-ordered columns.

    w_proj: (latent_in, latent*s*s) stored transposed as (in, out) with output
    column o = c*s*s + i*s + j (the order implied by nn.Linear followed by
    .view(B, latent, s, s)).  NOTE: a raw PyTorch state_dict stores Linear
    weight as (out, in); transpose before use.
    Returns wproj (latent_in, s*s*latent) bf16 and bproj (1, s*s*latent) f32
    with column index p*latent + c, p = i*s + j.
    """
    w = w_proj.reshape(latent, latent, s * s)                   # (k, c, p)
    w = jnp.transpose(w, (0, 2, 1)).reshape(latent, s * s * latent)
    b = b_proj.reshape(latent, s * s)                           # (c, p)
    b = jnp.transpose(b, (1, 0)).reshape(1, s * s * latent)
    return w.astype(jnp.bfloat16), b.astype(jnp.float32)


# ----------------------------------------------------------------------------
# Model
# ----------------------------------------------------------------------------
def init_params(key, latent_dim=32, init_scale=4):
    """Random parameters in PyTorch layout (what DcganGenerator would hold)."""
    proj_dim = latent_dim * init_scale ** 2
    ks = jax.random.split(key, 6)
    sc = 0.05
    return {
        # nn.Linear(latent_dim, latent_dim * init_scale**2); stored transposed
        # as (in, out), out column o = c*s*s + i*s + j (view order).
        "w_proj": jax.random.normal(ks[0], (latent_dim, proj_dim), jnp.float32) * sc,
        "b_proj": jax.random.normal(ks[1], (1, proj_dim), jnp.float32) * sc,
        # Conv2dNormActivation(latent_dim, 128, 3): conv (no bias) + BN + ReLU
        "w1": jax.random.normal(ks[2], (C1, latent_dim, 3, 3), jnp.float32) * sc,
        "gamma1": jnp.ones((1, C1), jnp.float32),
        "beta1": jnp.zeros((1, C1), jnp.float32),
        # Conv2dNormActivation(128, 64, 3)
        "w2": jax.random.normal(ks[3], (C2, C1, 3, 3), jnp.float32) * sc,
        "gamma2": jnp.ones((1, C2), jnp.float32),
        "beta2": jnp.zeros((1, C2), jnp.float32),
        # nn.Conv2d(64, 3, 3, padding=1) with bias
        "w3": jax.random.normal(ks[4], (C3, C2, 3, 3), jnp.float32) * sc,
        "b3": jax.random.normal(ks[5], (1, C3), jnp.float32) * sc,
    }


@functools.partial(jax.jit, static_argnames=("latent_dim", "init_scale"))
def dcgan_generator(x, params, *, latent_dim=32, init_scale=4):
    """x: (B, latent_dim) latent vectors -> (B, 3, 4*init_scale, 4*init_scale)."""
    b = x.shape[0]
    s = init_scale
    h_out = 4 * s
    if (2 * s) % 8 != 0:
        # keeps all in-kernel reshapes as pure (8,128)-tile regroupings
        raise NotImplementedError("kernel assumes 2*init_scale % 8 == 0")

    wproj, bproj = _fuse_proj(params["w_proj"], params["b_proj"], latent_dim, s)
    w1 = _pack_conv_w(params["w1"])                              # (9, latent, 128)
    w2 = _pack_conv_w(params["w2"], cout_pad=C2_PAD)             # (9, 128, 128)
    w3 = _pack_conv_w(params["w3"], cin_pad=C2_PAD, cout_pad=C3_PAD)  # (9,128,128)
    g2 = jnp.pad(params["gamma2"], ((0, 0), (0, C2_PAD - C2)), constant_values=1.0)
    be2 = jnp.pad(params["beta2"], ((0, 0), (0, C2_PAD - C2)))
    b3 = jnp.pad(params["b3"], ((0, 0), (0, C3_PAD - C3))).astype(jnp.float32)

    kernel = functools.partial(_dcgan_fused_kernel, batch=b, latent=latent_dim, s=s)

    inputs = [
        x, wproj, bproj,
        w1, params["gamma1"], params["beta1"],
        w2, g2, be2,
        w3, b3,
    ]
    out = pl.pallas_call(
        kernel,
        grid=(1,),
        in_specs=[_full_spec(a.shape) for a in inputs],
        out_specs=_full_spec((b * h_out * h_out, C3_PAD)),
        out_shape=jax.ShapeDtypeStruct((b * h_out * h_out, C3_PAD), jnp.float32),
        scratch_shapes=[
            # zero-padded (and pre-upsampled) activations for each conv stage
            pltpu.VMEM((b, 2 * s + 2, 2 * s + 2, latent_dim), jnp.float32),
            pltpu.VMEM((b, 4 * s + 2, 4 * s + 2, C1), jnp.float32),
            pltpu.VMEM((b, 4 * s + 2, 4 * s + 2, C2_PAD), jnp.float32),
        ],
        compiler_params=pltpu.CompilerParams(
            dimension_semantics=("arbitrary",),
            vmem_limit_bytes=32 * 1024 * 1024,   # explicit, fits v5e/v6e/v7x
        ),
    )(*inputs)

    # lane-dense kernel output -> 3 real channels, back to PyTorch NCHW
    img = out[:, :C3].reshape(b, h_out, h_out, C3)
    return jnp.transpose(img, (0, 3, 1, 2))


if __name__ == "__main__":
    latent_dim, init_scale, batch = 32, 4, 2
    key = jax.random.PRNGKey(0)
    pkey, xkey = jax.random.split(key)

    params = init_params(pkey, latent_dim=latent_dim, init_scale=init_scale)
    x = jax.random.normal(xkey, (batch, latent_dim), jnp.float32)

    out = dcgan_generator(x, params, latent_dim=latent_dim, init_scale=init_scale)
    out = jax.block_until_ready(out)

    expected = (batch, 3, 4 * init_scale, 4 * init_scale)
    assert out.shape == expected, (out.shape, expected)
    assert bool(jnp.all(jnp.isfinite(out)))
    assert bool(jnp.all(jnp.abs(out) <= 1.0))  # tanh range
    print("KERNEL_OK")
</pallas_src>

<mosaic_0001>
module attributes {stable_mosaic.version = 11 : i64} {
  func.func @_dcgan_fused_kernel(%arg0: i32, %arg1: memref<2x32xf32, #tpu.memory_space<vmem>>, %arg2: memref<32x512xbf16, #tpu.memory_space<vmem>>, %arg3: memref<1x512xf32, #tpu.memory_space<vmem>>, %arg4: memref<9x32x128xbf16, #tpu.memory_space<vmem>>, %arg5: memref<1x128xf32, #tpu.memory_space<vmem>>, %arg6: memref<1x128xf32, #tpu.memory_space<vmem>>, %arg7: memref<9x128x128xbf16, #tpu.memory_space<vmem>>, %arg8: memref<1x128xf32, #tpu.memory_space<vmem>>, %arg9: memref<1x128xf32, #tpu.memory_space<vmem>>, %arg10: memref<9x128x128xbf16, #tpu.memory_space<vmem>>, %arg11: memref<1x128xf32, #tpu.memory_space<vmem>>, %arg12: memref<512x128xf32, #tpu.memory_space<vmem>>, %arg13: memref<2x10x10x32xf32, #tpu.memory_space<vmem>>, %arg14: memref<2x18x18x128xf32, #tpu.memory_space<vmem>>, %arg15: memref<2x18x18x128xf32, #tpu.memory_space<vmem>>) attributes {dimension_semantics = [#tpu.dimension_semantics<arbitrary>], iteration_bounds = array<i64: 1>, scalar_prefetch = 0 : i64, scratch_operands = 3 : i64, tpu.core_type = #tpu.core_type<tc>, window_params = [{pipeline_mode = #tpu.pipeline_mode<synchronous>, transform_indices = @transform_0, window_bounds = array<i64: 2, 32>}, {pipeline_mode = #tpu.pipeline_mode<synchronous>, transform_indices = @transform_1, window_bounds = array<i64: 32, 512>}, {pipeline_mode = #tpu.pipeline_mode<synchronous>, transform_indices = @transform_2, window_bounds = array<i64: 1, 512>}, {pipeline_mode = #tpu.pipeline_mode<synchronous>, transform_indices = @transform_3, window_bounds = array<i64: 9, 32, 128>}, {pipeline_mode = #tpu.pipeline_mode<synchronous>, transform_indices = @transform_4, window_bounds = array<i64: 1, 128>}, {pipeline_mode = #tpu.pipeline_mode<synchronous>, transform_indices = @transform_5, window_bounds = array<i64: 1, 128>}, {pipeline_mode = #tpu.pipeline_mode<synchronous>, transform_indices = @transform_6, window_bounds = array<i64: 9, 128, 128>}, {pipeline_mode = #tpu.pipeline_mode<synchronous>, transform_indices = @transform_7, window_bounds = array<i64: 1, 128>}, {pipeline_mode = #tpu.pipeline_mode<synchronous>, transform_indices = @transform_8, window_bounds = array<i64: 1, 128>}, {pipeline_mode = #tpu.pipeline_mode<synchronous>, transform_indices = @transform_9, window_bounds = array<i64: 9, 128, 128>}, {pipeline_mode = #tpu.pipeline_mode<synchronous>, transform_indices = @transform_10, window_bounds = array<i64: 1, 128>}, {pipeline_mode = #tpu.pipeline_mode<synchronous>, transform_indices = @transform_11, window_bounds = array<i64: 512, 128>}]} {
    %c0 = arith.constant 0 : index
    %c0_0 = arith.constant 0 : index
    %0 = vector.load %arg1[%c0, %c0_0] : memref<2x32xf32, #tpu.memory_space<vmem>>, vector<2x32xf32>
    %1 = arith.truncf %0 : vector<2x32xf32> to vector<2x32xbf16>
    %c0_1 = arith.constant 0 : index
    %c0_2 = arith.constant 0 : index
    %2 = vector.load %arg2[%c0_1, %c0_2] : memref<32x512xbf16, #tpu.memory_space<vmem>>, vector<32x512xbf16>
    %cst = arith.constant dense<0.000000e+00> : vector<2x512xf32>
    %3 = tpu.matmul %1, %2, %cst {dimension_numbers = #tpu.dot_dimension_numbers<[1], [0], [0], [1], [0, 0, 1, 1], [], []>} : vector<2x32xbf16>, vector<32x512xbf16>, vector<2x512xf32> -> vector<2x512xf32>
    %c0_3 = arith.constant 0 : index
    %c0_4 = arith.constant 0 : index
    %4 = vector.load %arg3[%c0_3, %c0_4] : memref<1x512xf32, #tpu.memory_space<vmem>>, vector<1x512xf32>
    %5 = vector.broadcast %4 : vector<1x512xf32> to vector<2x512xf32>
    %6 = arith.addf %3, %5 : vector<2x512xf32>
    %7 = vector.extract_strided_slice %6 {offsets = [0, 0], sizes = [2, 32], strides = [1, 1]} : vector<2x512xf32> to vector<2x32xf32>
    %8 = vector.shape_cast %7 : vector<2x32xf32> to vector<2x1x1x32xf32>
    %9 = vector.shape_cast %8 : vector<2x1x1x32xf32> to vector<2x1x1x32xf32>
    %10 = vector.broadcast %9 : vector<2x1x1x32xf32> to vector<2x2x2x32xf32>
    %11 = vector.extract_strided_slice %6 {offsets = [0, 32], sizes = [2, 32], strides = [1, 1]} : vector<2x512xf32> to vector<2x32xf32>
    %12 = vector.shape_cast %11 : vector<2x32xf32> to vector<2x1x1x32xf32>
    %13 = vector.shape_cast %12 : vector<2x1x1x32xf32> to vector<2x1x1x32xf32>
    %14 = vector.broadcast %13 : vector<2x1x1x32xf32> to vector<2x2x2x32xf32>
    %15 = vector.extract_strided_slice %6 {offsets = [0, 64], sizes = [2, 32], strides = [1, 1]} : vector<2x512xf32> to vector<2x32xf32>
    %16 = vector.shape_cast %15 : vector<2x32xf32> to vector<2x1x1x32xf32>
    %17 = vector.shape_cast %16 : vector<2x1x1x32xf32> to vector<2x1x1x32xf32>
    %18 = vector.broadcast %17 : vector<2x1x1x32xf32> to vector<2x2x2x32xf32>
    %19 = vector.extract_strided_slice %6 {offsets = [0, 96], sizes = [2, 32], strides = [1, 1]} : vector<2x512xf32> to vector<2x32xf32>
    %20 = vector.shape_cast %19 : vector<2x32xf32> to vector<2x1x1x32xf32>
    %21 = vector.shape_cast %20 : vector<2x1x1x32xf32> to vector<2x1x1x32xf32>
    %22 = vector.broadcast %21 : vector<2x1x1x32xf32> to vector<2x2x2x32xf32>
    %23 = tpu.concatenate %10, %14, %18, %22 in 2 : vector<2x2x2x32xf32>, vector<2x2x2x32xf32>, vector<2x2x2x32xf32>, vector<2x2x2x32xf32> -> vector<2x2x8x32xf32>
    %24 = vector.extract_strided_slice %6 {offsets = [0, 128], sizes = [2, 32], strides = [1, 1]} : vector<2x512xf32> to vector<2x32xf32>
    %25 = vector.shape_cast %24 : vector<2x32xf32> to vector<2x1x1x32xf32>
    %26 = vector.shape_cast %25 : vector<2x1x1x32xf32> to vector<2x1x1x32xf32>
    %27 = vector.broadcast %26 : vector<2x1x1x32xf32> to vector<2x2x2x32xf32>
    %28 = vector.extract_strided_slice %6 {offsets = [0, 160], sizes = [2, 32], strides = [1, 1]} : vector<2x512xf32> to vector<2x32xf32>
    %29 = vector.shape_cast %28 : vector<2x32xf32> to vector<2x1x1x32xf32>
    %30 = vector.shape_cast %29 : vector<2x1x1x32xf32> to vector<2x1x1x32xf32>
    %31 = vector.broadcast %30 : vector<2x1x1x32xf32> to vector<2x2x2x32xf32>
    %32 = vector.extract_strided_slice %6 {offsets = [0, 192], sizes = [2, 32], strides = [1, 1]} : vector<2x512xf32> to vector<2x32xf32>
    %33 = vector.shape_cast %32 : vector<2x32xf32> to vector<2x1x1x32xf32>
    %34 = vector.shape_cast %33 : vector<2x1x1x32xf32> to vector<2x1x1x32xf32>
    %35 = vector.broadcast %34 : vector<2x1x1x32xf32> to vector<2x2x2x32xf32>
    %36 = vector.extract_strided_slice %6 {offsets = [0, 224], sizes = [2, 32], strides = [1, 1]} : vector<2x512xf32> to vector<2x32xf32>
    %37 = vector.shape_cast %36 : vector<2x32xf32> to vector<2x1x1x32xf32>
    %38 = vector.shape_cast %37 : vector<2x1x1x32xf32> to vector<2x1x1x32xf32>
    %39 = vector.broadcast %38 : vector<2x1x1x32xf32> to vector<2x2x2x32xf32>
    %40 = tpu.concatenate %27, %31, %35, %39 in 2 : vector<2x2x2x32xf32>, vector<2x2x2x32xf32>, vector<2x2x2x32xf32>, vector<2x2x2x32xf32> -> vector<2x2x8x32xf32>
    %41 = vector.extract_strided_slice %6 {offsets = [0, 256], sizes = [2, 32], strides = [1, 1]} : vector<2x512xf32> to vector<2x32xf32>
    %42 = vector.shape_cast %41 : vector<2x32xf32> to vector<2x1x1x32xf32>
    %43 = vector.shape_cast %42 : vector<2x1x1x32xf32> to vector<2x1x1x32xf32>
    %44 = vector.broadcast %43 : vector<2x1x1x32xf32> to vector<2x2x2x32xf32>
    %45 = vector.extract_strided_slice %6 {offsets = [0, 288], sizes = [2, 32], strides = [1, 1]} : vector<2x512xf32> to vector<2x32xf32>
    %46 = vector.shape_cast %45 : vector<2x32xf32> to vector<2x1x1x32xf32>
    %47 = vector.shape_cast %46 : vector<2x1x1x32xf32> to vector<2x1x1x32xf32>
    %48 = vector.broadcast %47 : vector<2x1x1x32xf32> to vector<2x2x2x32xf32>
    %49 = vector.extract_strided_slice %6 {offsets = [0, 320], sizes = [2, 32], strides = [1, 1]} : vector<2x512xf32> to vector<2x32xf32>
    %50 = vector.shape_cast %49 : vector<2x32xf32> to vector<2x1x1x32xf32>
    %51 = vector.shape_cast %50 : vector<2x1x1x32xf32> to vector<2x1x1x32xf32>
    %52 = vector.broadcast %51 : vector<2x1x1x32xf32> to vector<2x2x2x32xf32>
    %53 = vector.extract_strided_slice %6 {offsets = [0, 352], sizes = [2, 32], strides = [1, 1]} : vector<2x512xf32> to vector<2x32xf32>
    %54 = vector.shape_cast %53 : vector<2x32xf32> to vector<2x1x1x32xf32>
    %55 = vector.shape_cast %54 : vector<2x1x1x32xf32> to vector<2x1x1x32xf32>
    %56 = vector.broadcast %55 : vector<2x1x1x32xf32> to vector<2x2x2x32xf32>
    %57 = tpu.concatenate %44, %48, %52, %56 in 2 : vector<2x2x2x32xf32>, vector<2x2x2x32xf32>, vector<2x2x2x32xf32>, vector<2x2x2x32xf32> -> vector<2x2x8x32xf32>
    %58 = vector.extract_strided_slice %6 {offsets = [0, 384], sizes = [2, 32], strides = [1, 1]} : vector<2x512xf32> to vector<2x32xf32>
    %59 = vector.shape_cast %58 : vector<2x32xf32> to vector<2x1x1x32xf32>
    %60 = vector.shape_cast %59 : vector<2x1x1x32xf32> to vector<2x1x1x32xf32>
    %61 = vector.broadcast %60 : vector<2x1x1x32xf32> to vector<2x2x2x32xf32>
    %62 = vector.extract_strided_slice %6 {offsets = [0, 416], sizes = [2, 32], strides = [1, 1]} : vector<2x512xf32> to vector<2x32xf32>
    %63 = vector.shape_cast %62 : vector<2x32xf32> to vector<2x1x1x32xf32>
    %64 = vector.shape_cast %63 : vector<2x1x1x32xf32> to vector<2x1x1x32xf32>
    %65 = vector.broadcast %64 : vector<2x1x1x32xf32> to vector<2x2x2x32xf32>
    %66 = vector.extract_strided_slice %6 {offsets = [0, 448], sizes = [2, 32], strides = [1, 1]} : vector<2x512xf32> to vector<2x32xf32>
    %67 = vector.shape_cast %66 : vector<2x32xf32> to vector<2x1x1x32xf32>
    %68 = vector.shape_cast %67 : vector<2x1x1x32xf32> to vector<2x1x1x32xf32>
    %69 = vector.broadcast %68 : vector<2x1x1x32xf32> to vector<2x2x2x32xf32>
    %70 = vector.extract_strided_slice %6 {offsets = [0, 480], sizes = [2, 32], strides = [1, 1]} : vector<2x512xf32> to vector<2x32xf32>
    %71 = vector.shape_cast %70 : vector<2x32xf32> to vector<2x1x1x32xf32>
    %72 = vector.shape_cast %71 : vector<2x1x1x32xf32> to vector<2x1x1x32xf32>
    %73 = vector.broadcast %72 : vector<2x1x1x32xf32> to vector<2x2x2x32xf32>
    %74 = tpu.concatenate %61, %65, %69, %73 in 2 : vector<2x2x2x32xf32>, vector<2x2x2x32xf32>, vector<2x2x2x32xf32>, vector<2x2x2x32xf32> -> vector<2x2x8x32xf32>
    %75 = tpu.concatenate %23, %40, %57, %74 in 1 : vector<2x2x8x32xf32>, vector<2x2x8x32xf32>, vector<2x2x8x32xf32>, vector<2x2x8x32xf32> -> vector<2x8x8x32xf32>
    %cst_5 = arith.constant 0.000000e+00 : f32
    %76 = vector.broadcast %cst_5 : f32 to vector<2x1x10x32xf32>
    %cst_6 = arith.constant 0.000000e+00 : f32
    %77 = vector.broadcast %cst_6 : f32 to vector<2x10x1x32xf32>
    %c0_7 = arith.constant 0 : index
    %c0_8 = arith.constant 0 : index
    %c0_9 = arith.constant 0 : index
    %c0_10 = arith.constant 0 : index
    %78 = vector.load %arg13[%c0_7, %c0_8, %c0_9, %c0_10] : memref<2x10x10x32xf32, #tpu.memory_space<vmem>>, vector<2x1x10x32xf32>
    tpu.vector_store %arg13[%c0_7, %c0_8, %c0_9, %c0_10], %76 {strides = array<i32>} : memref<2x10x10x32xf32, #tpu.memory_space<vmem>>, vector<2x1x10x32xf32>,
    %c0_11 = arith.constant 0 : index
    %c9 = arith.constant 9 : index
    %c0_12 = arith.constant 0 : index
    %c0_13 = arith.constant 0 : index
    %79 = vector.load %arg13[%c0_11, %c9, %c0_12, %c0_13] : memref<2x10x10x32xf32, #tpu.memory_space<vmem>>, vector<2x1x10x32xf32>
    tpu.vector_store %arg13[%c0_11, %c9, %c0_12, %c0_13], %76 {strides = array<i32>} : memref<2x10x10x32xf32, #tpu.memory_space<vmem>>, vector<2x1x10x32xf32>,
    %c0_14 = arith.constant 0 : index
    %c0_15 = arith.constant 0 : index
    %c0_16 = arith.constant 0 : index
    %c0_17 = arith.constant 0 : index
    %80 = vector.load %arg13[%c0_14, %c0_15, %c0_16, %c0_17] : memref<2x10x10x32xf32, #tpu.memory_space<vmem>>, vector<2x10x1x32xf32>
    tpu.vector_store %arg13[%c0_14, %c0_15, %c0_16, %c0_17], %77 {strides = array<i32>} : memref<2x10x10x32xf32, #tpu.memory_space<vmem>>, vector<2x10x1x32xf32>,
    %c0_18 = arith.constant 0 : index
    %c0_19 = arith.constant 0 : index
    %c9_20 = arith.constant 9 : index
    %c0_21 = arith.constant 0 : index
    %81 = vector.load %arg13[%c0_18, %c0_19, %c9_20, %c0_21] : memref<2x10x10x32xf32, #tpu.memory_space<vmem>>, vector<2x10x1x32xf32>
    tpu.vector_store %arg13[%c0_18, %c0_19, %c9_20, %c0_21], %77 {strides = array<i32>} : memref<2x10x10x32xf32, #tpu.memory_space<vmem>>, vector<2x10x1x32xf32>,
    %c0_22 = arith.constant 0 : index
    %c1 = arith.constant 1 : index
    %c1_23 = arith.constant 1 : index
    %c0_24 = arith.constant 0 : index
    %82 = vector.load %arg13[%c0_22, %c1, %c1_23, %c0_24] : memref<2x10x10x32xf32, #tpu.memory_space<vmem>>, vector<2x8x8x32xf32>
    tpu.vector_store %arg13[%c0_22, %c1, %c1_23, %c0_24], %75 {strides = array<i32>} : memref<2x10x10x32xf32, #tpu.memory_space<vmem>>, vector<2x8x8x32xf32>,
    %c0_25 = arith.constant 0 : index
    %c0_26 = arith.constant 0 : index
    %c0_27 = arith.constant 0 : index
    %c0_28 = arith.constant 0 : index
    %83 = vector.load %arg13[%c0_25, %c0_26, %c0_27, %c0_28] : memref<2x10x10x32xf32, #tpu.memory_space<vmem>>, vector<2x8x8x32xf32>
    %84 = vector.shape_cast %83 : vector<2x8x8x32xf32> to vector<128x32xf32>
    %85 = arith.truncf %84 : vector<128x32xf32> to vector<128x32xbf16>
    %c0_29 = arith.constant 0 : index
    %c0_30 = arith.constant 0 : index
    %c0_31 = arith.constant 0 : index
    %86 = vector.load %arg4[%c0_29, %c0_30, %c0_31] : memref<9x32x128xbf16, #tpu.memory_space<vmem>>, vector<1x32x128xbf16>
    %87 = vector.shape_cast %86 : vector<1x32x128xbf16> to vector<32x128xbf16>
    %cst_32 = arith.constant dense<0.000000e+00> : vector<128x128xf32>
    %88 = tpu.matmul %85, %87, %cst_32 {dimension_numbers = #tpu.dot_dimension_numbers<[1], [0], [0], [1], [0, 0, 1, 1], [], []>} : vector<128x32xbf16>, vector<32x128xbf16>, vector<128x128xf32> -> vector<128x128xf32>
    %c0_33 = arith.constant 0 : index
    %c0_34 = arith.constant 0 : index
    %c1_35 = arith.constant 1 : index
    %c0_36 = arith.constant 0 : index
    %89 = vector.load %arg13[%c0_33, %c0_34, %c1_35, %c0_36] : memref<2x10x10x32xf32, #tpu.memory_space<vmem>>, vector<2x8x8x32xf32>
    %90 = vector.shape_cast %89 : vector<2x8x8x32xf32> to vector<128x32xf32>
    %91 = arith.truncf %90 : vector<128x32xf32> to vector<128x32xbf16>
    %c1_37 = arith.constant 1 : index
    %c0_38 = arith.constant 0 : index
    %c0_39 = arith.constant 0 : index
    %92 = vector.load %arg4[%c1_37, %c0_38, %c0_39] : memref<9x32x128xbf16, #tpu.memory_space<vmem>>, vector<1x32x128xbf16>
    %93 = vector.shape_cast %92 : vector<1x32x128xbf16> to vector<32x128xbf16>
    %cst_40 = arith.constant dense<0.000000e+00> : vector<128x128xf32>
    %94 = tpu.matmul %91, %93, %cst_40 {dimension_numbers = #tpu.dot_dimension_numbers<[1], [0], [0], [1], [0, 0, 1, 1], [], []>} : vector<128x32xbf16>, vector<32x128xbf16>, vector<128x128xf32> -> vector<128x128xf32>
    %95 = arith.addf %88, %94 : vector<128x128xf32>
    %c0_41 = arith.constant 0 : index
    %c0_42 = arith.constant 0 : index
    %c2 = arith.constant 2 : index
    %c0_43 = arith.constant 0 : index
    %96 = vector.load %arg13[%c0_41, %c0_42, %c2, %c0_43] : memref<2x10x10x32xf32, #tpu.memory_space<vmem>>, vector<2x8x8x32xf32>
    %97 = vector.shape_cast %96 : vector<2x8x8x32xf32> to vector<128x32xf32>
    %98 = arith.truncf %97 : vector<128x32xf32> to vector<128x32xbf16>
    %c2_44 = arith.constant 2 : index
    %c0_45 = arith.constant 0 : index
    %c0_46 = arith.constant 0 : index
    %99 = vector.load %arg4[%c2_44, %c0_45, %c0_46] : memref<9x32x128xbf16, #tpu.memory_space<vmem>>, vector<1x32x128xbf16>
    %100 = vector.shape_cast %99 : vector<1x32x128xbf16> to vector<32x128xbf16>
    %cst_47 = arith.constant dense<0.000000e+00> : vector<128x128xf32>
    %101 = tpu.matmul %98, %100, %cst_47 {dimension_numbers = #tpu.dot_dimension_numbers<[1], [0], [0], [1], [0, 0, 1, 1], [], []>} : vector<128x32xbf16>, vector<32x128xbf16>, vector<128x128xf32> -> vector<128x128xf32>
    %102 = arith.addf %95, %101 : vector<128x128xf32>
    %c0_48 = arith.constant 0 : index
    %c1_49 = arith.constant 1 : index
    %c0_50 = arith.constant 0 : index
    %c0_51 = arith.constant 0 : index
    %103 = vector.load %arg13[%c0_48, %c1_49, %c0_50, %c0_51] : memref<2x10x10x32xf32, #tpu.memory_space<vmem>>, vector<2x8x8x32xf32>
    %104 = vector.shape_cast %103 : vector<2x8x8x32xf32> to vector<128x32xf32>
    %105 = arith.truncf %104 : vector<128x32xf32> to vector<128x32xbf16>
    %c3 = arith.constant 3 : index
    %c0_52 = arith.constant 0 : index
    %c0_53 = arith.constant 0 : index
    %106 = vector.load %arg4[%c3, %c0_52, %c0_53] : memref<9x32x128xbf16, #tpu.memory_space<vmem>>, vector<1x32x128xbf16>
    %107 = vector.shape_cast %106 : vector<1x32x128xbf16> to vector<32x128xbf16>
    %cst_54 = arith.constant dense<0.000000e+00> : vector<128x128xf32>
    %108 = tpu.matmul %105, %107, %cst_54 {dimension_numbers = #tpu.dot_dimension_numbers<[1], [0], [0], [1], [0, 0, 1, 1], [], []>} : vector<128x32xbf16>, vector<32x128xbf16>, vector<128x128xf32> -> vector<128x128xf32>
    %109 = arith.addf %102, %108 : vector<128x128xf32>
    %c0_55 = arith.constant 0 : index
    %c1_56 = arith.constant 1 : index
    %c1_57 = arith.constant 1 : index
    %c0_58 = arith.constant 0 : index
    %110 = vector.load %arg13[%c0_55, %c1_56, %c1_57, %c0_58] : memref<2x10x10x32xf32, #tpu.memory_space<vmem>>, vector<2x8x8x32xf32>
    %111 = vector.shape_cast %110 : vector<2x8x8x32xf32> to vector<128x32xf32>
    %112 = arith.truncf %111 : vector<128x32xf32> to vector<128x32xbf16>
    %c4 = arith.constant 4 : index
    %c0_59 = arith.constant 0 : index
    %c0_60 = arith.constant 0 : index
    %113 = vector.load %arg4[%c4, %c0_59, %c0_60] : memref<9x32x128xbf16, #tpu.memory_space<vmem>>, vector<1x32x128xbf16>
    %114 = vector.shape_cast %113 : vector<1x32x128xbf16> to vector<32x128xbf16>
    %cst_61 = arith.constant dense<0.000000e+00> : vector<128x128xf32>
    %115 = tpu.matmul %112, %114, %cst_61 {dimension_numbers = #tpu.dot_dimension_numbers<[1], [0], [0], [1], [0, 0, 1, 1], [], []>} : vector<128x32xbf16>, vector<32x128xbf16>, vector<128x128xf32> -> vector<128x128xf32>
    %116 = arith.addf %109, %115 : vector<128x128xf32>
    %c0_62 = arith.constant 0 : index
    %c1_63 = arith.constant 1 : index
    %c2_64 = arith.constant 2 : index
    %c0_65 = arith.constant 0 : index
    %117 = vector.load %arg13[%c0_62, %c1_63, %c2_64, %c0_65] : memref<2x10x10x32xf32, #tpu.memory_space<vmem>>, vector<2x8x8x32xf32>
    %118 = vector.shape_cast %117 : vector<2x8x8x32xf32> to vector<128x32xf32>
    %119 = arith.truncf %118 : vector<128x32xf32> to vector<128x32xbf16>
    %c5 = arith.constant 5 : index
    %c0_66 = arith.constant 0 : index
    %c0_67 = arith.constant 0 : index
    %120 = vector.load %arg4[%c5, %c0_66, %c0_67] : memref<9x32x128xbf16, #tpu.memory_space<vmem>>, vector<1x32x128xbf16>
    %121 = vector.shape_cast %120 : vector<1x32x128xbf16> to vector<32x128xbf16>
    %cst_68 = arith.constant dense<0.000000e+00> : vector<128x128xf32>
    %122 = tpu.matmul %119, %121, %cst_68 {dimension_numbers = #tpu.dot_dimension_numbers<[1], [0], [0], [1], [0, 0, 1, 1], [], []>} : vector<128x32xbf16>, vector<32x128xbf16>, vector<128x128xf32> -> vector<128x128xf32>
    %123 = arith.addf %116, %122 : vector<128x128xf32>
    %c0_69 = arith.constant 0 : index
    %c2_70 = arith.constant 2 : index
    %c0_71 = arith.constant 0 : index
    %c0_72 = arith.constant 0 : index
    %124 = vector.load %arg13[%c0_69, %c2_70, %c0_71, %c0_72] : memref<2x10x10x32xf32, #tpu.memory_space<vmem>>, vector<2x8x8x32xf32>
    %125 = vector.shape_cast %124 : vector<2x8x8x32xf32> to vector<128x32xf32>
    %126 = arith.truncf %125 : vector<128x32xf32> to vector<128x32xbf16>
    %c6 = arith.constant 6 : index
    %c0_73 = arith.constant 0 : index
    %c0_74 = arith.constant 0 : index
    %127 = vector.load %arg4[%c6, %c0_73, %c0_74] : memref<9x32x128xbf16, #tpu.memory_space<vmem>>, vector<1x32x128xbf16>
    %128 = vector.shape_cast %127 : vector<1x32x128xbf16> to vector<32x128xbf16>
    %cst_75 = arith.constant dense<0.000000e+00> : vector<128x128xf32>
    %129 = tpu.matmul %126, %128, %cst_75 {dimension_numbers = #tpu.dot_dimension_numbers<[1], [0], [0], [1], [0, 0, 1, 1], [], []>} : vector<128x32xbf16>, vector<32x128xbf16>, vector<128x128xf32> -> vector<128x128xf32>
    %130 = arith.addf %123, %129 : vector<128x128xf32>
    %c0_76 = arith.constant 0 : index
    %c2_77 = arith.constant 2 : index
    %c1_78 = arith.constant 1 : index
    %c0_79 = arith.constant 0 : index
    %131 = vector.load %arg13[%c0_76, %c2_77, %c1_78, %c0_79] : memref<2x10x10x32xf32, #tpu.memory_space<vmem>>, vector<2x8x8x32xf32>
    %132 = vector.shape_cast %131 : vector<2x8x8x32xf32> to vector<128x32xf32>
    %133 = arith.truncf %132 : vector<128x32xf32> to vector<128x32xbf16>
    %c7 = arith.constant 7 : index
    %c0_80 = arith.constant 0 : index
    %c0_81 = arith.constant 0 : index
    %134 = vector.load %arg4[%c7, %c0_80, %c0_81] : memref<9x32x128xbf16, #tpu.memory_space<vmem>>, vector<1x32x128xbf16>
    %135 = vector.shape_cast %134 : vector<1x32x128xbf16> to vector<32x128xbf16>
    %cst_82 = arith.constant dense<0.000000e+00> : vector<128x128xf32>
    %136 = tpu.matmul %133, %135, %cst_82 {dimension_numbers = #tpu.dot_dimension_numbers<[1], [0], [0], [1], [0, 0, 1, 1], [], []>} : vector<128x32xbf16>, vector<32x128xbf16>, vector<128x128xf32> -> vector<128x128xf32>
    %137 = arith.addf %130, %136 : vector<128x128xf32>
    %c0_83 = arith.constant 0 : index
    %c2_84 = arith.constant 2 : index
    %c2_85 = arith.constant 2 : index
    %c0_86 = arith.constant 0 : index
    %138 = vector.load %arg13[%c0_83, %c2_84, %c2_85, %c0_86] : memref<2x10x10x32xf32, #tpu.memory_space<vmem>>, vector<2x8x8x32xf32>
    %139 = vector.shape_cast %138 : vector<2x8x8x32xf32> to vector<128x32xf32>
    %140 = arith.truncf %139 : vector<128x32xf32> to vector<128x32xbf16>
    %c8 = arith.constant 8 : index
    %c0_87 = arith.constant 0 : index
    %c0_88 = arith.constant 0 : index
    %141 = vector.load %arg4[%c8, %c0_87, %c0_88] : memref<9x32x128xbf16, #tpu.memory_space<vmem>>, vector<1x32x128xbf16>
    %142 = vector.shape_cast %141 : vector<1x32x128xbf16> to vector<32x128xbf16>
    %cst_89 = arith.constant dense<0.000000e+00> : vector<128x128xf32>
    %143 = tpu.matmul %140, %142, %cst_89 {dimension_numbers = #tpu.dot_dimension_numbers<[1], [0], [0], [1], [0, 0, 1, 1], [], []>} : vector<128x32xbf16>, vector<32x128xbf16>, vector<128x128xf32> -> vector<128x128xf32>
    %144 = arith.addf %137, %143 : vector<128x128xf32>
    %cst_90 = arith.constant dense<0.000000e+00> : vector<128xf32>
    %145 = vector.multi_reduction <add>, %144, %cst_90 [0] : vector<128x128xf32> to vector<128xf32>
    %146 = vector.shape_cast %145 : vector<128xf32> to vector<1x128xf32>
    %cst_91 = arith.constant 1.280000e+02 : f32
    %147 = vector.broadcast %cst_91 : f32 to vector<1x128xf32>
    %148 = arith.divf %146, %147 : vector<1x128xf32>
    %149 = vector.broadcast %148 : vector<1x128xf32> to vector<128x128xf32>
    %150 = arith.subf %144, %149 : vector<128x128xf32>
    %151 = arith.mulf %150, %150 : vector<128x128xf32>
    %cst_92 = arith.constant dense<0.000000e+00> : vector<128xf32>
    %152 = vector.multi_reduction <add>, %151, %cst_92 [0] : vector<128x128xf32> to vector<128xf32>
    %153 = vector.shape_cast %152 : vector<128xf32> to vector<1x128xf32>
    %cst_93 = arith.constant 1.280000e+02 : f32
    %154 = vector.broadcast %cst_93 : f32 to vector<1x128xf32>
    %155 = arith.divf %153, %154 : vector<1x128xf32>
    %156 = vector.broadcast %148 : vector<1x128xf32> to vector<128x128xf32>
    %157 = arith.subf %144, %156 : vector<128x128xf32>
    %c0_94 = arith.constant 0 : index
    %c0_95 = arith.constant 0 : index
    %158 = vector.load %arg5[%c0_94, %c0_95] : memref<1x128xf32, #tpu.memory_space<vmem>>, vector<1x128xf32>
    %cst_96 = arith.constant 9.99999974E-6 : f32
    %159 = vector.broadcast %cst_96 : f32 to vector<1x128xf32>
    %160 = arith.addf %155, %159 : vector<1x128xf32>
    %161 = math.rsqrt %160 : vector<1x128xf32>
    %162 = arith.mulf %158, %161 : vector<1x128xf32>
    %163 = vector.broadcast %162 : vector<1x128xf32> to vector<128x128xf32>
    %164 = arith.mulf %157, %163 : vector<128x128xf32>
    %c0_97 = arith.constant 0 : index
    %c0_98 = arith.constant 0 : index
    %165 = vector.load %arg6[%c0_97, %c0_98] : memref<1x128xf32, #tpu.memory_space<vmem>>, vector<1x128xf32>
    %166 = vector.broadcast %165 : vector<1x128xf32> to vector<128x128xf32>
    %167 = arith.addf %164, %166 : vector<128x128xf32>
    %cst_99 = arith.constant 0.000000e+00 : f32
    %168 = vector.broadcast %cst_99 : f32 to vector<128x128xf32>
    %169 = arith.maximumf %167, %168 : vector<128x128xf32>
    %170 = vector.shape_cast %169 : vector<128x128xf32> to vector<2x8x8x128xf32>
    %171 = vector.shape_cast %170 : vector<2x8x8x128xf32> to vector<2x8x1x8x128xf32>
    %172 = vector.shape_cast %171 : vector<2x8x1x8x128xf32> to vector<2x8x1x8x128xf32>
    %173 = vector.broadcast %172 : vector<2x8x1x8x128xf32> to vector<2x8x2x8x128xf32>
    %174 = vector.shape_cast %173 : vector<2x8x2x8x128xf32> to vector<2x16x8x128xf32>
    %175 = vector.extract_strided_slice %174 {offsets = [0, 0, 0, 0], sizes = [2, 16, 1, 128], strides = [1, 1, 1, 1]} : vector<2x16x8x128xf32> to vector<2x16x1x128xf32>
    %176 = vector.extract_strided_slice %174 {offsets = [0, 0, 1, 0], sizes = [2, 16, 1, 128], strides = [1, 1, 1, 1]} : vector<2x16x8x128xf32> to vector<2x16x1x128xf32>
    %177 = vector.extract_strided_slice %174 {offsets = [0, 0, 2, 0], sizes = [2, 16, 1, 128], strides = [1, 1, 1, 1]} : vector<2x16x8x128xf32> to vector<2x16x1x128xf32>
    %178 = vector.extract_strided_slice %174 {offsets = [0, 0, 3, 0], sizes = [2, 16, 1, 128], strides = [1, 1, 1, 1]} : vector<2x16x8x128xf32> to vector<2x16x1x128xf32>
    %179 = vector.extract_strided_slice %174 {offsets = [0, 0, 4, 0], sizes = [2, 16, 1, 128], strides = [1, 1, 1, 1]} : vector<2x16x8x128xf32> to vector<2x16x1x128xf32>
    %180 = vector.extract_strided_slice %174 {offsets = [0, 0, 5, 0], sizes = [2, 16, 1, 128], strides = [1, 1, 1, 1]} : vector<2x16x8x128xf32> to vector<2x16x1x128xf32>
    %181 = vector.extract_strided_slice %174 {offsets = [0, 0, 6, 0], sizes = [2, 16, 1, 128], strides = [1, 1, 1, 1]} : vector<2x16x8x128xf32> to vector<2x16x1x128xf32>
    %182 = vector.extract_strided_slice %174 {offsets = [0, 0, 7, 0], sizes = [2, 16, 1, 128], strides = [1, 1, 1, 1]} : vector<2x16x8x128xf32> to vector<2x16x1x128xf32>
    %183 = tpu.concatenate %175, %175, %176, %176, %177, %177, %178, %178, %179, %179, %180, %180, %181, %181, %182, %182 in 2 : vector<2x16x1x128xf32>, vector<2x16x1x128xf32>, vector<2x16x1x128xf32>, vector<2x16x1x128xf32>, vector<2x16x1x128xf32>, vector<2x16x1x128xf32>, vector<2x16x1x128xf32>, vector<2x16x1x128xf32>, vector<2x16x1x128xf32>, vector<2x16x1x128xf32>, vector<2x16x1x128xf32>, vector<2x16x1x128xf32>, vector<2x16x1x128xf32>, vector<2x16x1x128xf32>, vector<2x16x1x128xf32>, vector<2x16x1x128xf32> -> vector<2x16x16x128xf32>
    %cst_100 = arith.constant 0.000000e+00 : f32
    %184 = vector.broadcast %cst_100 : f32 to vector<2x1x18x128xf32>
    %cst_101 = arith.constant 0.000000e+00 : f32
    %185 = vector.broadcast %cst_101 : f32 to vector<2x18x1x128xf32>
    %c0_102 = arith.constant 0 : index
    %c0_103 = arith.constant 0 : index
    %c0_104 = arith.constant 0 : index
    %c0_105 = arith.constant 0 : index
    %186 = vector.load %arg14[%c0_102, %c0_103, %c0_104, %c0_105] : memref<2x18x18x128xf32, #tpu.memory_space<vmem>>, vector<2x1x18x128xf32>
    tpu.vector_store %arg14[%c0_102, %c0_103, %c0_104, %c0_105], %184 {strides = array<i32>} : memref<2x18x18x128xf32, #tpu.memory_space<vmem>>, vector<2x1x18x128xf32>,
    %c0_106 = arith.constant 0 : index
    %c17 = arith.constant 17 : index
    %c0_107 = arith.constant 0 : index
    %c0_108 = arith.constant 0 : index
    %187 = vector.load %arg14[%c0_106, %c17, %c0_107, %c0_108] : memref<2x18x18x128xf32, #tpu.memory_space<vmem>>, vector<2x1x18x128xf32>
    tpu.vector_store %arg14[%c0_106, %c17, %c0_107, %c0_108], %184 {strides = array<i32>} : memref<2x18x18x128xf32, #tpu.memory_space<vmem>>, vector<2x1x18x128xf32>,
    %c0_109 = arith.constant 0 : index
    %c0_110 = arith.constant 0 : index
    %c0_111 = arith.constant 0 : index
    %c0_112 = arith.constant 0 : index
    %188 = vector.load %arg14[%c0_109, %c0_110, %c0_111, %c0_112] : memref<2x18x18x128xf32, #tpu.memory_space<vmem>>, vector<2x18x1x128xf32>
    tpu.vector_store %arg14[%c0_109, %c0_110, %c0_111, %c0_112], %185 {strides = array<i32>} : memref<2x18x18x128xf32, #tpu.memory_space<vmem>>, vector<2x18x1x128xf32>,
    %c0_113 = arith.constant 0 : index
    %c0_114 = arith.constant 0 : index
    %c17_115 = arith.constant 17 : index
    %c0_116 = arith.constant 0 : index
    %189 = vector.load %arg14[%c0_113, %c0_114, %c17_115, %c0_116] : memref<2x18x18x128xf32, #tpu.memory_space<vmem>>, vector<2x18x1x128xf32>
    tpu.vector_store %arg14[%c0_113, %c0_114, %c17_115, %c0_116], %185 {strides = array<i32>} : memref<2x18x18x128xf32, #tpu.memory_space<vmem>>, vector<2x18x1x128xf32>,
    %c0_117 = arith.constant 0 : index
    %c1_118 = arith.constant 1 : index
    %c1_119 = arith.constant 1 : index
    %c0_120 = arith.constant 0 : index
    %190 = vector.load %arg14[%c0_117, %c1_118, %c1_119, %c0_120] : memref<2x18x18x128xf32, #tpu.memory_space<vmem>>, vector<2x16x16x128xf32>
    tpu.vector_store %arg14[%c0_117, %c1_118, %c1_119, %c0_120], %183 {strides = array<i32>} : memref<2x18x18x128xf32, #tpu.memory_space<vmem>>, vector<2x16x16x128xf32>,
    %c0_121 = arith.constant 0 : index
    %c0_122 = arith.constant 0 : index
    %c0_123 = arith.constant 0 : index
    %c0_124 = arith.constant 0 : index
    %191 = vector.load %arg14[%c0_121, %c0_122, %c0_123, %c0_124] : memref<2x18x18x128xf32, #tpu.memory_space<vmem>>, vector<2x16x16x128xf32>
    %192 = vector.shape_cast %191 : vector<2x16x16x128xf32> to vector<512x128xf32>
    %193 = arith.truncf %192 : vector<512x128xf32> to vector<512x128xbf16>
    %c0_125 = arith.constant 0 : index
    %c0_126 = arith.constant 0 : index
    %c0_127 = arith.constant 0 : index
    %194 = vector.load %arg7[%c0_125, %c0_126, %c0_127] : memref<9x128x128xbf16, #tpu.memory_space<vmem>>, vector<1x128x128xbf16>
    %195 = vector.shape_cast %194 : vector<1x128x128xbf16> to vector<128x128xbf16>
    %cst_128 = arith.constant dense<0.000000e+00> : vector<512x128xf32>
    %196 = tpu.matmul %193, %195, %cst_128 {dimension_numbers = #tpu.dot_dimension_numbers<[1], [0], [0], [1], [0, 0, 1, 1], [], []>} : vector<512x128xbf16>, vector<128x128xbf16>, vector<512x128xf32> -> vector<512x128xf32>
    %c0_129 = arith.constant 0 : index
    %c0_130 = arith.constant 0 : index
    %c1_131 = arith.constant 1 : index
    %c0_132 = arith.constant 0 : index
    %197 = vector.load %arg14[%c0_129, %c0_130, %c1_131, %c0_132] : memref<2x18x18x128xf32, #tpu.memory_space<vmem>>, vector<2x16x16x128xf32>
    %198 = vector.shape_cast %197 : vector<2x16x16x128xf32> to vector<512x128xf32>
    %199 = arith.truncf %198 : vector<512x128xf32> to vector<512x128xbf16>
    %c1_133 = arith.constant 1 : index
    %c0_134 = arith.constant 0 : index
    %c0_135 = arith.constant 0 : index
    %200 = vector.load %arg7[%c1_133, %c0_134, %c0_135] : memref<9x128x128xbf16, #tpu.memory_space<vmem>>, vector<1x128x128xbf16>
    %201 = vector.shape_cast %200 : vector<1x128x128xbf16> to vector<128x128xbf16>
    %cst_136 = arith.constant dense<0.000000e+00> : vector<512x128xf32>
    %202 = tpu.matmul %199, %201, %cst_136 {dimension_numbers = #tpu.dot_dimension_numbers<[1], [0], [0], [1], [0, 0, 1, 1], [], []>} : vector<512x128xbf16>, vector<128x128xbf16>, vector<512x128xf32> -> vector<512x128xf32>
    %203 = arith.addf %196, %202 : vector<512x128xf32>
    %c0_137 = arith.constant 0 : index
    %c0_138 = arith.constant 0 : index
    %c2_139 = arith.constant 2 : index
    %c0_140 = arith.constant 0 : index
    %204 = vector.load %arg14[%c0_137, %c0_138, %c2_139, %c0_140] : memref<2x18x18x128xf32, #tpu.memory_space<vmem>>, vector<2x16x16x128xf32>
    %205 = vector.shape_cast %204 : vector<2x16x16x128xf32> to vector<512x128xf32>
    %206 = arith.truncf %205 : vector<512x128xf32> to vector<512x128xbf16>
    %c2_141 = arith.constant 2 : index
    %c0_142 = arith.constant 0 : index
    %c0_143 = arith.constant 0 : index
    %207 = vector.load %arg7[%c2_141, %c0_142, %c0_143] : memref<9x128x128xbf16, #tpu.memory_space<vmem>>, vector<1x128x128xbf16>
    %208 = vector.shape_cast %207 : vector<1x128x128xbf16> to vector<128x128xbf16>
    %cst_144 = arith.constant dense<0.000000e+00> : vector<512x128xf32>
    %209 = tpu.matmul %206, %208, %cst_144 {dimension_numbers = #tpu.dot_dimension_numbers<[1], [0], [0], [1], [0, 0, 1, 1], [], []>} : vector<512x128xbf16>, vector<128x128xbf16>, vector<512x128xf32> -> vector<512x128xf32>
    %210 = arith.addf %203, %209 : vector<512x128xf32>
    %c0_145 = arith.constant 0 : index
    %c1_146 = arith.constant 1 : index
    %c0_147 = arith.constant 0 : index
    %c0_148 = arith.constant 0 : index
    %211 = vector.load %arg14[%c0_145, %c1_146, %c0_147, %c0_148] : memref<2x18x18x128xf32, #tpu.memory_space<vmem>>, vector<2x16x16x128xf32>
    %212 = vector.shape_cast %211 : vector<2x16x16x128xf32> to vector<512x128xf32>
    %213 = arith.truncf %212 : vector<512x128xf32> to vector<512x128xbf16>
    %c3_149 = arith.constant 3 : index
    %c0_150 = arith.constant 0 : index
    %c0_151 = arith.constant 0 : index
    %214 = vector.load %arg7[%c3_149, %c0_150, %c0_151] : memref<9x128x128xbf16, #tpu.memory_space<vmem>>, vector<1x128x128xbf16>
    %215 = vector.shape_cast %214 : vector<1x128x128xbf16> to vector<128x128xbf16>
    %cst_152 = arith.constant dense<0.000000e+00> : vector<512x128xf32>
    %216 = tpu.matmul %213, %215, %cst_152 {dimension_numbers = #tpu.dot_dimension_numbers<[1], [0], [0], [1], [0, 0, 1, 1], [], []>} : vector<512x128xbf16>, vector<128x128xbf16>, vector<512x128xf32> -> vector<512x128xf32>
    %217 = arith.addf %210, %216 : vector<512x128xf32>
    %c0_153 = arith.constant 0 : index
    %c1_154 = arith.constant 1 : index
    %c1_155 = arith.constant 1 : index
    %c0_156 = arith.constant 0 : index
    %218 = vector.load %arg14[%c0_153, %c1_154, %c1_155, %c0_156] : memref<2x18x18x128xf32, #tpu.memory_space<vmem>>, vector<2x16x16x128xf32>
    %219 = vector.shape_cast %218 : vector<2x16x16x128xf32> to vector<512x128xf32>
    %220 = arith.truncf %219 : vector<512x128xf32> to vector<512x128xbf16>
    %c4_157 = arith.constant 4 : index
    %c0_158 = arith.constant 0 : index
    %c0_159 = arith.constant 0 : index
    %221 = vector.load %arg7[%c4_157, %c0_158, %c0_159] : memref<9x128x128xbf16, #tpu.memory_space<vmem>>, vector<1x128x128xbf16>
    %222 = vector.shape_cast %221 : vector<1x128x128xbf16> to vector<128x128xbf16>
    %cst_160 = arith.constant dense<0.000000e+00> : vector<512x128xf32>
    %223 = tpu.matmul %220, %222, %cst_160 {dimension_numbers = #tpu.dot_dimension_numbers<[1], [0], [0], [1], [0, 0, 1, 1], [], []>} : vector<512x128xbf16>, vector<128x128xbf16>, vector<512x128xf32> -> vector<512x128xf32>
    %224 = arith.addf %217, %223 : vector<512x128xf32>
    %c0_161 = arith.constant 0 : index
    %c1_162 = arith.constant 1 : index
    %c2_163 = arith.constant 2 : index
    %c0_164 = arith.constant 0 : index
    %225 = vector.load %arg14[%c0_161, %c1_162, %c2_163, %c0_164] : memref<2x18x18x128xf32, #tpu.memory_space<vmem>>, vector<2x16x16x128xf32>
    %226 = vector.shape_cast %225 : vector<2x16x16x128xf32> to vector<512x128xf32>
    %227 = arith.truncf %226 : vector<512x128xf32> to vector<512x128xbf16>
    %c5_165 = arith.constant 5 : index
    %c0_166 = arith.constant 0 : index
    %c0_167 = arith.constant 0 : index
    %228 = vector.load %arg7[%c5_165, %c0_166, %c0_167] : memref<9x128x128xbf16, #tpu.memory_space<vmem>>, vector<1x128x128xbf16>
    %229 = vector.shape_cast %228 : vector<1x128x128xbf16> to vector<128x128xbf16>
    %cst_168 = arith.constant dense<0.000000e+00> : vector<512x128xf32>
    %230 = tpu.matmul %227, %229, %cst_168 {dimension_numbers = #tpu.dot_dimension_numbers<[1], [0], [0], [1], [0, 0, 1, 1], [], []>} : vector<512x128xbf16>, vector<128x128xbf16>, vector<512x128xf32> -> vector<512x128xf32>
    %231 = arith.addf %224, %230 : vector<512x128xf32>
    %c0_169 = arith.constant 0 : index
    %c2_170 = arith.constant 2 : index
    %c0_171 = arith.constant 0 : index
    %c0_172 = arith.constant 0 : index
    %232 = vector.load %arg14[%c0_169, %c2_170, %c0_171, %c0_172] : memref<2x18x18x128xf32, #tpu.memory_space<vmem>>, vector<2x16x16x128xf32>
    %233 = vector.shape_cast %232 : vector<2x16x16x128xf32> to vector<512x128xf32>
    %234 = arith.truncf %233 : vector<512x128xf32> to vector<512x128xbf16>
    %c6_173 = arith.constant 6 : index
    %c0_174 = arith.constant 0 : index
    %c0_175 = arith.constant 0 : index
    %235 = vector.load %arg7[%c6_173, %c0_174, %c0_175] : memref<9x128x128xbf16, #tpu.memory_space<vmem>>, vector<1x128x128xbf16>
    %236 = vector.shape_cast %235 : vector<1x128x128xbf16> to vector<128x128xbf16>
    %cst_176 = arith.constant dense<0.000000e+00> : vector<512x128xf32>
    %237 = tpu.matmul %234, %236, %cst_176 {dimension_numbers = #tpu.dot_dimension_numbers<[1], [0], [0], [1], [0, 0, 1, 1], [], []>} : vector<512x128xbf16>, vector<128x128xbf16>, vector<512x128xf32> -> vector<512x128xf32>
    %238 = arith.addf %231, %237 : vector<512x128xf32>
    %c0_177 = arith.constant 0 : index
    %c2_178 = arith.constant 2 : index
    %c1_179 = arith.constant 1 : index
    %c0_180 = arith.constant 0 : index
    %239 = vector.load %arg14[%c0_177, %c2_178, %c1_179, %c0_180] : memref<2x18x18x128xf32, #tpu.memory_space<vmem>>, vector<2x16x16x128xf32>
    %240 = vector.shape_cast %239 : vector<2x16x16x128xf32> to vector<512x128xf32>
    %241 = arith.truncf %240 : vector<512x128xf32> to vector<512x128xbf16>
    %c7_181 = arith.constant 7 : index
    %c0_182 = arith.constant 0 : index
    %c0_183 = arith.constant 0 : index
    %242 = vector.load %arg7[%c7_181, %c0_182, %c0_183] : memref<9x128x128xbf16, #tpu.memory_space<vmem>>, vector<1x128x128xbf16>
    %243 = vector.shape_cast %242 : vector<1x128x128xbf16> to vector<128x128xbf16>
    %cst_184 = arith.constant dense<0.000000e+00> : vector<512x128xf32>
    %244 = tpu.matmul %241, %243, %cst_184 {dimension_numbers = #tpu.dot_dimension_numbers<[1], [0], [0], [1], [0, 0, 1, 1], [], []>} : vector<512x128xbf16>, vector<128x128xbf16>, vector<512x128xf32> -> vector<512x128xf32>
    %245 = arith.addf %238, %244 : vector<512x128xf32>
    %c0_185 = arith.constant 0 : index
    %c2_186 = arith.constant 2 : index
    %c2_187 = arith.constant 2 : index
    %c0_188 = arith.constant 0 : index
    %246 = vector.load %arg14[%c0_185, %c2_186, %c2_187, %c0_188] : memref<2x18x18x128xf32, #tpu.memory_space<vmem>>, vector<2x16x16x128xf32>
    %247 = vector.shape_cast %246 : vector<2x16x16x128xf32> to vector<512x128xf32>
    %248 = arith.truncf %247 : vector<512x128xf32> to vector<512x128xbf16>
    %c8_189 = arith.constant 8 : index
    %c0_190 = arith.constant 0 : index
    %c0_191 = arith.constant 0 : index
    %249 = vector.load %arg7[%c8_189, %c0_190, %c0_191] : memref<9x128x128xbf16, #tpu.memory_space<vmem>>, vector<1x128x128xbf16>
    %250 = vector.shape_cast %249 : vector<1x128x128xbf16> to vector<128x128xbf16>
    %cst_192 = arith.constant dense<0.000000e+00> : vector<512x128xf32>
    %251 = tpu.matmul %248, %250, %cst_192 {dimension_numbers = #tpu.dot_dimension_numbers<[1], [0], [0], [1], [0, 0, 1, 1], [], []>} : vector<512x128xbf16>, vector<128x128xbf16>, vector<512x128xf32> -> vector<512x128xf32>
    %252 = arith.addf %245, %251 : vector<512x128xf32>
    %cst_193 = arith.constant dense<0.000000e+00> : vector<128xf32>
    %253 = vector.multi_reduction <add>, %252, %cst_193 [0] : vector<512x128xf32> to vector<128xf32>
    %254 = vector.shape_cast %253 : vector<128xf32> to vector<1x128xf32>
    %cst_194 = arith.constant 5.120000e+02 : f32
    %255 = vector.broadcast %cst_194 : f32 to vector<1x128xf32>
    %256 = arith.divf %254, %255 : vector<1x128xf32>
    %257 = vector.broadcast %256 : vector<1x128xf32> to vector<512x128xf32>
    %258 = arith.subf %252, %257 : vector<512x128xf32>
    %259 = arith.mulf %258, %258 : vector<512x128xf32>
    %cst_195 = arith.constant dense<0.000000e+00> : vector<128xf32>
    %260 = vector.multi_reduction <add>, %259, %cst_195 [0] : vector<512x128xf32> to vector<128xf32>
    %261 = vector.shape_cast %260 : vector<128xf32> to vector<1x128xf32>
    %cst_196 = arith.constant 5.120000e+02 : f32
    %262 = vector.broadcast %cst_196 : f32 to vector<1x128xf32>
    %263 = arith.divf %261, %262 : vector<1x128xf32>
    %264 = vector.broadcast %256 : vector<1x128xf32> to vector<512x128xf32>
    %265 = arith.subf %252, %264 : vector<512x128xf32>
    %c0_197 = arith.constant 0 : index
    %c0_198 = arith.constant 0 : index
    %266 = vector.load %arg8[%c0_197, %c0_198] : memref<1x128xf32, #tpu.memory_space<vmem>>, vector<1x128xf32>
    %cst_199 = arith.constant 9.99999974E-6 : f32
    %267 = vector.broadcast %cst_199 : f32 to vector<1x128xf32>
    %268 = arith.addf %263, %267 : vector<1x128xf32>
    %269 = math.rsqrt %268 : vector<1x128xf32>
    %270 = arith.mulf %266, %269 : vector<1x128xf32>
    %271 = vector.broadcast %270 : vector<1x128xf32> to vector<512x128xf32>
    %272 = arith.mulf %265, %271 : vector<512x128xf32>
    %c0_200 = arith.constant 0 : index
    %c0_201 = arith.constant 0 : index
    %273 = vector.load %arg9[%c0_200, %c0_201] : memref<1x128xf32, #tpu.memory_space<vmem>>, vector<1x128xf32>
    %274 = vector.broadcast %273 : vector<1x128xf32> to vector<512x128xf32>
    %275 = arith.addf %272, %274 : vector<512x128xf32>
    %cst_202 = arith.constant 0.000000e+00 : f32
    %276 = vector.broadcast %cst_202 : f32 to vector<512x128xf32>
    %277 = arith.maximumf %275, %276 : vector<512x128xf32>
    %278 = vector.shape_cast %277 : vector<512x128xf32> to vector<2x16x16x128xf32>
    %cst_203 = arith.constant 0.000000e+00 : f32
    %279 = vector.broadcast %cst_203 : f32 to vector<2x1x18x128xf32>
    %cst_204 = arith.constant 0.000000e+00 : f32
    %280 = vector.broadcast %cst_204 : f32 to vector<2x18x1x128xf32>
    %c0_205 = arith.constant 0 : index
    %c0_206 = arith.constant 0 : index
    %c0_207 = arith.constant 0 : index
    %c0_208 = arith.constant 0 : index
    %281 = vector.load %arg15[%c0_205, %c0_206, %c0_207, %c0_208] : memref<2x18x18x128xf32, #tpu.memory_space<vmem>>, vector<2x1x18x128xf32>
    tpu.vector_store %arg15[%c0_205, %c0_206, %c0_207, %c0_208], %279 {strides = array<i32>} : memref<2x18x18x128xf32, #tpu.memory_space<vmem>>, vector<2x1x18x128xf32>,
    %c0_209 = arith.constant 0 : index
    %c17_210 = arith.constant 17 : index
    %c0_211 = arith.constant 0 : index
    %c0_212 = arith.constant 0 : index
    %282 = vector.load %arg15[%c0_209, %c17_210, %c0_211, %c0_212] : memref<2x18x18x128xf32, #tpu.memory_space<vmem>>, vector<2x1x18x128xf32>
    tpu.vector_store %arg15[%c0_209, %c17_210, %c0_211, %c0_212], %279 {strides = array<i32>} : memref<2x18x18x128xf32, #tpu.memory_space<vmem>>, vector<2x1x18x128xf32>,
    %c0_213 = arith.constant 0 : index
    %c0_214 = arith.constant 0 : index
    %c0_215 = arith.constant 0 : index
    %c0_216 = arith.constant 0 : index
    %283 = vector.load %arg15[%c0_213, %c0_214, %c0_215, %c0_216] : memref<2x18x18x128xf32, #tpu.memory_space<vmem>>, vector<2x18x1x128xf32>
    tpu.vector_store %arg15[%c0_213, %c0_214, %c0_215, %c0_216], %280 {strides = array<i32>} : memref<2x18x18x128xf32, #tpu.memory_space<vmem>>, vector<2x18x1x128xf32>,
    %c0_217 = arith.constant 0 : index
    %c0_218 = arith.constant 0 : index
    %c17_219 = arith.constant 17 : index
    %c0_220 = arith.constant 0 : index
    %284 = vector.load %arg15[%c0_217, %c0_218, %c17_219, %c0_220] : memref<2x18x18x128xf32, #tpu.memory_space<vmem>>, vector<2x18x1x128xf32>
    tpu.vector_store %arg15[%c0_217, %c0_218, %c17_219, %c0_220], %280 {strides = array<i32>} : memref<2x18x18x128xf32, #tpu.memory_space<vmem>>, vector<2x18x1x128xf32>,
    %c0_221 = arith.constant 0 : index
    %c1_222 = arith.constant 1 : index
    %c1_223 = arith.constant 1 : index
    %c0_224 = arith.constant 0 : index
    %285 = vector.load %arg15[%c0_221, %c1_222, %c1_223, %c0_224] : memref<2x18x18x128xf32, #tpu.memory_space<vmem>>, vector<2x16x16x128xf32>
    tpu.vector_store %arg15[%c0_221, %c1_222, %c1_223, %c0_224], %278 {strides = array<i32>} : memref<2x18x18x128xf32, #tpu.memory_space<vmem>>, vector<2x16x16x128xf32>,
    %c0_225 = arith.constant 0 : index
    %c0_226 = arith.constant 0 : index
    %c0_227 = arith.constant 0 : index
    %c0_228 = arith.constant 0 : index
    %286 = vector.load %arg15[%c0_225, %c0_226, %c0_227, %c0_228] : memref<2x18x18x128xf32, #tpu.memory_space<vmem>>, vector<2x16x16x128xf32>
    %287 = vector.shape_cast %286 : vector<2x16x16x128xf32> to vector<512x128xf32>
    %288 = arith.truncf %287 : vector<512x128xf32> to vector<512x128xbf16>
    %c0_229 = arith.constant 0 : index
    %c0_230 = arith.constant 0 : index
    %c0_231 = arith.constant 0 : index
    %289 = vector.load %arg10[%c0_229, %c0_230, %c0_231] : memref<9x128x128xbf16, #tpu.memory_space<vmem>>, vector<1x128x128xbf16>
    %290 = vector.shape_cast %289 : vector<1x128x128xbf16> to vector<128x128xbf16>
    %cst_232 = arith.constant dense<0.000000e+00> : vector<512x128xf32>
    %291 = tpu.matmul %288, %290, %cst_232 {dimension_numbers = #tpu.dot_dimension_numbers<[1], [0], [0], [1], [0, 0, 1, 1], [], []>} : vector<512x128xbf16>, vector<128x128xbf16>, vector<512x128xf32> -> vector<512x128xf32>
    %c0_233 = arith.constant 0 : index
    %c0_234 = arith.constant 0 : index
    %c1_235 = arith.constant 1 : index
    %c0_236 = arith.constant 0 : index
    %292 = vector.load %arg15[%c0_233, %c0_234, %c1_235, %c0_236] : memref<2x18x18x128xf32, #tpu.memory_space<vmem>>, vector<2x16x16x128xf32>
    %293 = vector.shape_cast %292 : vector<2x16x16x128xf32> to vector<512x128xf32>
    %294 = arith.truncf %293 : vector<512x128xf32> to vector<512x128xbf16>
    %c1_237 = arith.constant 1 : index
    %c0_238 = arith.constant 0 : index
    %c0_239 = arith.constant 0 : index
    %295 = vector.load %arg10[%c1_237, %c0_238, %c0_239] : memref<9x128x128xbf16, #tpu.memory_space<vmem>>, vector<1x128x128xbf16>
    %296 = vector.shape_cast %295 : vector<1x128x128xbf16> to vector<128x128xbf16>
    %cst_240 = arith.constant dense<0.000000e+00> : vector<512x128xf32>
    %297 = tpu.matmul %294, %296, %cst_240 {dimension_numbers = #tpu.dot_dimension_numbers<[1], [0], [0], [1], [0, 0, 1, 1], [], []>} : vector<512x128xbf16>, vector<128x128xbf16>, vector<512x128xf32> -> vector<512x128xf32>
    %298 = arith.addf %291, %297 : vector<512x128xf32>
    %c0_241 = arith.constant 0 : index
    %c0_242 = arith.constant 0 : index
    %c2_243 = arith.constant 2 : index
    %c0_244 = arith.constant 0 : index
    %299 = vector.load %arg15[%c0_241, %c0_242, %c2_243, %c0_244] : memref<2x18x18x128xf32, #tpu.memory_space<vmem>>, vector<2x16x16x128xf32>
    %300 = vector.shape_cast %299 : vector<2x16x16x128xf32> to vector<512x128xf32>
    %301 = arith.truncf %300 : vector<512x128xf32> to vector<512x128xbf16>
    %c2_245 = arith.constant 2 : index
    %c0_246 = arith.constant 0 : index
    %c0_247 = arith.constant 0 : index
    %302 = vector.load %arg10[%c2_245, %c0_246, %c0_247] : memref<9x128x128xbf16, #tpu.memory_space<vmem>>, vector<1x128x128xbf16>
    %303 = vector.shape_cast %302 : vector<1x128x128xbf16> to vector<128x128xbf16>
    %cst_248 = arith.constant dense<0.000000e+00> : vector<512x128xf32>
    %304 = tpu.matmul %301, %303, %cst_248 {dimension_numbers = #tpu.dot_dimension_numbers<[1], [0], [0], [1], [0, 0, 1, 1], [], []>} : vector<512x128xbf16>, vector<128x128xbf16>, vector<512x128xf32> -> vector<512x128xf32>
    %305 = arith.addf %298, %304 : vector<512x128xf32>
    %c0_249 = arith.constant 0 : index
    %c1_250 = arith.constant 1 : index
    %c0_251 = arith.constant 0 : index
    %c0_252 = arith.constant 0 : index
    %306 = vector.load %arg15[%c0_249, %c1_250, %c0_251, %c0_252] : memref<2x18x18x128xf32, #tpu.memory_space<vmem>>, vector<2x16x16x128xf32>
    %307 = vector.shape_cast %306 : vector<2x16x16x128xf32> to vector<512x128xf32>
    %308 = arith.truncf %307 : vector<512x128xf32> to vector<512x128xbf16>
    %c3_253 = arith.constant 3 : index
    %c0_254 = arith.constant 0 : index
    %c0_255 = arith.constant 0 : index
    %309 = vector.load %arg10[%c3_253, %c0_254, %c0_255] : memref<9x128x128xbf16, #tpu.memory_space<vmem>>, vector<1x128x128xbf16>
    %310 = vector.shape_cast %309 : vector<1x128x128xbf16> to vector<128x128xbf16>
    %cst_256 = arith.constant dense<0.000000e+00> : vector<512x128xf32>
    %311 = tpu.matmul %308, %310, %cst_256 {dimension_numbers = #tpu.dot_dimension_numbers<[1], [0], [0], [1], [0, 0, 1, 1], [], []>} : vector<512x128xbf16>, vector<128x128xbf16>, vector<512x128xf32> -> vector<512x128xf32>
    %312 = arith.addf %305, %311 : vector<512x128xf32>
    %c0_257 = arith.constant 0 : index
    %c1_258 = arith.constant 1 : index
    %c1_259 = arith.constant 1 : index
    %c0_260 = arith.constant 0 : index
    %313 = vector.load %arg15[%c0_257, %c1_258, %c1_259, %c0_260] : memref<2x18x18x128xf32, #tpu.memory_space<vmem>>, vector<2x16x16x128xf32>
    %314 = vector.shape_cast %313 : vector<2x16x16x128xf32> to vector<512x128xf32>
    %315 = arith.truncf %314 : vector<512x128xf32> to vector<512x128xbf16>
    %c4_261 = arith.constant 4 : index
    %c0_262 = arith.constant 0 : index
    %c0_263 = arith.constant 0 : index
    %316 = vector.load %arg10[%c4_261, %c0_262, %c0_263] : memref<9x128x128xbf16, #tpu.memory_space<vmem>>, vector<1x128x128xbf16>
    %317 = vector.shape_cast %316 : vector<1x128x128xbf16> to vector<128x128xbf16>
    %cst_264 = arith.constant dense<0.000000e+00> : vector<512x128xf32>
    %318 = tpu.matmul %315, %317, %cst_264 {dimension_numbers = #tpu.dot_dimension_numbers<[1], [0], [0], [1], [0, 0, 1, 1], [], []>} : vector<512x128xbf16>, vector<128x128xbf16>, vector<512x128xf32> -> vector<512x128xf32>
    %319 = arith.addf %312, %318 : vector<512x128xf32>
    %c0_265 = arith.constant 0 : index
    %c1_266 = arith.constant 1 : index
    %c2_267 = arith.constant 2 : index
    %c0_268 = arith.constant 0 : index
    %320 = vector.load %arg15[%c0_265, %c1_266, %c2_267, %c0_268] : memref<2x18x18x128xf32, #tpu.memory_space<vmem>>, vector<2x16x16x128xf32>
    %321 = vector.shape_cast %320 : vector<2x16x16x128xf32> to vector<512x128xf32>
    %322 = arith.truncf %321 : vector<512x128xf32> to vector<512x128xbf16>
    %c5_269 = arith.constant 5 : index
    %c0_270 = arith.constant 0 : index
    %c0_271 = arith.constant 0 : index
    %323 = vector.load %arg10[%c5_269, %c0_270, %c0_271] : memref<9x128x128xbf16, #tpu.memory_space<vmem>>, vector<1x128x128xbf16>
    %324 = vector.shape_cast %323 : vector<1x128x128xbf16> to vector<128x128xbf16>
    %cst_272 = arith.constant dense<0.000000e+00> : vector<512x128xf32>
    %325 = tpu.matmul %322, %324, %cst_272 {dimension_numbers = #tpu.dot_dimension_numbers<[1], [0], [0], [1], [0, 0, 1, 1], [], []>} : vector<512x128xbf16>, vector<128x128xbf16>, vector<512x128xf32> -> vector<512x128xf32>
    %326 = arith.addf %319, %325 : vector<512x128xf32>
    %c0_273 = arith.constant 0 : index
    %c2_274 = arith.constant 2 : index
    %c0_275 = arith.constant 0 : index
    %c0_276 = arith.constant 0 : index
    %327 = vector.load %arg15[%c0_273, %c2_274, %c0_275, %c0_276] : memref<2x18x18x128xf32, #tpu.memory_space<vmem>>, vector<2x16x16x128xf32>
    %328 = vector.shape_cast %327 : vector<2x16x16x128xf32> to vector<512x128xf32>
    %329 = arith.truncf %328 : vector<512x128xf32> to vector<512x128xbf16>
    %c6_277 = arith.constant 6 : index
    %c0_278 = arith.constant 0 : index
    %c0_279 = arith.constant 0 : index
    %330 = vector.load %arg10[%c6_277, %c0_278, %c0_279] : memref<9x128x128xbf16, #tpu.memory_space<vmem>>, vector<1x128x128xbf16>
    %331 = vector.shape_cast %330 : vector<1x128x128xbf16> to vector<128x128xbf16>
    %cst_280 = arith.constant dense<0.000000e+00> : vector<512x128xf32>
    %332 = tpu.matmul %329, %331, %cst_280 {dimension_numbers = #tpu.dot_dimension_numbers<[1], [0], [0], [1], [0, 0, 1, 1], [], []>} : vector<512x128xbf16>, vector<128x128xbf16>, vector<512x128xf32> -> vector<512x128xf32>
    %333 = arith.addf %326, %332 : vector<512x128xf32>
    %c0_281 = arith.constant 0 : index
    %c2_282 = arith.constant 2 : index
    %c1_283 = arith.constant 1 : index
    %c0_284 = arith.constant 0 : index
    %334 = vector.load %arg15[%c0_281, %c2_282, %c1_283, %c0_284] : memref<2x18x18x128xf32, #tpu.memory_space<vmem>>, vector<2x16x16x128xf32>
    %335 = vector.shape_cast %334 : vector<2x16x16x128xf32> to vector<512x128xf32>
    %336 = arith.truncf %335 : vector<512x128xf32> to vector<512x128xbf16>
    %c7_285 = arith.constant 7 : index
    %c0_286 = arith.constant 0 : index
    %c0_287 = arith.constant 0 : index
    %337 = vector.load %arg10[%c7_285, %c0_286, %c0_287] : memref<9x128x128xbf16, #tpu.memory_space<vmem>>, vector<1x128x128xbf16>
    %338 = vector.shape_cast %337 : vector<1x128x128xbf16> to vector<128x128xbf16>
    %cst_288 = arith.constant dense<0.000000e+00> : vector<512x128xf32>
    %339 = tpu.matmul %336, %338, %cst_288 {dimension_numbers = #tpu.dot_dimension_numbers<[1], [0], [0], [1], [0, 0, 1, 1], [], []>} : vector<512x128xbf16>, vector<128x128xbf16>, vector<512x128xf32> -> vector<512x128xf32>
    %340 = arith.addf %333, %339 : vector<512x128xf32>
    %c0_289 = arith.constant 0 : index
    %c2_290 = arith.constant 2 : index
    %c2_291 = arith.constant 2 : index
    %c0_292 = arith.constant 0 : index
    %341 = vector.load %arg15[%c0_289, %c2_290, %c2_291, %c0_292] : memref<2x18x18x128xf32, #tpu.memory_space<vmem>>, vector<2x16x16x128xf32>
    %342 = vector.shape_cast %341 : vector<2x16x16x128xf32> to vector<512x128xf32>
    %343 = arith.truncf %342 : vector<512x128xf32> to vector<512x128xbf16>
    %c8_293 = arith.constant 8 : index
    %c0_294 = arith.constant 0 : index
    %c0_295 = arith.constant 0 : index
    %344 = vector.load %arg10[%c8_293, %c0_294, %c0_295] : memref<9x128x128xbf16, #tpu.memory_space<vmem>>, vector<1x128x128xbf16>
    %345 = vector.shape_cast %344 : vector<1x128x128xbf16> to vector<128x128xbf16>
    %cst_296 = arith.constant dense<0.000000e+00> : vector<512x128xf32>
    %346 = tpu.matmul %343, %345, %cst_296 {dimension_numbers = #tpu.dot_dimension_numbers<[1], [0], [0], [1], [0, 0, 1, 1], [], []>} : vector<512x128xbf16>, vector<128x128xbf16>, vector<512x128xf32> -> vector<512x128xf32>
    %347 = arith.addf %340, %346 : vector<512x128xf32>
    %c0_297 = arith.constant 0 : index
    %c0_298 = arith.constant 0 : index
    %348 = vector.load %arg11[%c0_297, %c0_298] : memref<1x128xf32, #tpu.memory_space<vmem>>, vector<1x128xf32>
    %349 = vector.broadcast %348 : vector<1x128xf32> to vector<512x128xf32>
    %350 = arith.addf %347, %349 : vector<512x128xf32>
    %351 = math.tanh %350 : vector<512x128xf32>
    %c0_299 = arith.constant 0 : index
    %c0_300 = arith.constant 0 : index
    %352 = vector.load %arg12[%c0_299, %c0_300] : memref<512x128xf32, #tpu.memory_space<vmem>>, vector<512x128xf32>
    tpu.vector_store %arg12[%c0_299, %c0_300], %351 {strides = array<i32>} : memref<512x128xf32, #tpu.memory_space<vmem>>, vector<512x128xf32>,
    return
  }
  func.func @transform_0(%arg0: i32) -> (i32, i32) {
    %c0_i32 = arith.constant 0 : i32
    %c0_i32_0 = arith.constant 0 : i32
    %c0_i32_1 = arith.constant 0 : i32
    return %c0_i32, %c0_i32_0 : i32, i32
  }
  func.func @transform_1(%arg0: i32) -> (i32, i32) {
    %c0_i32 = arith.constant 0 : i32
    %c0_i32_0 = arith.constant 0 : i32
    %c0_i32_1 = arith.constant 0 : i32
    return %c0_i32, %c0_i32_0 : i32, i32
  }
  func.func @transform_2(%arg0: i32) -> (i32, i32) {
    %c0_i32 = arith.constant 0 : i32
    %c0_i32_0 = arith.constant 0 : i32
    %c0_i32_1 = arith.constant 0 : i32
    return %c0_i32, %c0_i32_0 : i32, i32
  }
  func.func @transform_3(%arg0: i32) -> (i32, i32, i32) {
    %c0_i32 = arith.constant 0 : i32
    %c0_i32_0 = arith.constant 0 : i32
    %c0_i32_1 = arith.constant 0 : i32
    %c0_i32_2 = arith.constant 0 : i32
    return %c0_i32, %c0_i32_0, %c0_i32_1 : i32, i32, i32
  }
  func.func @transform_4(%arg0: i32) -> (i32, i32) {
    %c0_i32 = arith.constant 0 : i32
    %c0_i32_0 = arith.constant 0 : i32
    %c0_i32_1 = arith.constant 0 : i32
    return %c0_i32, %c0_i32_0 : i32, i32
  }
  func.func @transform_5(%arg0: i32) -> (i32, i32) {
    %c0_i32 = arith.constant 0 : i32
    %c0_i32_0 = arith.constant 0 : i32
    %c0_i32_1 = arith.constant 0 : i32
    return %c0_i32, %c0_i32_0 : i32, i32
  }
  func.func @transform_6(%arg0: i32) -> (i32, i32, i32) {
    %c0_i32 = arith.constant 0 : i32
    %c0_i32_0 = arith.constant 0 : i32
    %c0_i32_1 = arith.constant 0 : i32
    %c0_i32_2 = arith.constant 0 : i32
    return %c0_i32, %c0_i32_0, %c0_i32_1 : i32, i32, i32
  }
  func.func @transform_7(%arg0: i32) -> (i32, i32) {
    %c0_i32 = arith.constant 0 : i32
    %c0_i32_0 = arith.constant 0 : i32
    %c0_i32_1 = arith.constant 0 : i32
    return %c0_i32, %c0_i32_0 : i32, i32
  }
  func.func @transform_8(%arg0: i32) -> (i32, i32) {
    %c0_i32 = arith.constant 0 : i32
    %c0_i32_0 = arith.constant 0 : i32
    %c0_i32_1 = arith.constant 0 : i32
    return %c0_i32, %c0_i32_0 : i32, i32
  }
  func.func @transform_9(%arg0: i32) -> (i32, i32, i32) {
    %c0_i32 = arith.constant 0 : i32
    %c0_i32_0 = arith.constant 0 : i32
    %c0_i32_1 = arith.constant 0 : i32
    %c0_i32_2 = arith.constant 0 : i32
    return %c0_i32, %c0_i32_0, %c0_i32_1 : i32, i32, i32
  }
  func.func @transform_10(%arg0: i32) -> (i32, i32) {
    %c0_i32 = arith.constant 0 : i32
    %c0_i32_0 = arith.constant 0 : i32
    %c0_i32_1 = arith.constant 0 : i32
    return %c0_i32, %c0_i32_0 : i32, i32
  }
  func.func @transform_11(%arg0: i32) -> (i32, i32) {
    %c0_i32 = arith.constant 0 : i32
    %c0_i32_0 = arith.constant 0 : i32
    %c0_i32_1 = arith.constant 0 : i32
    return %c0_i32, %c0_i32_0 : i32, i32
  }
}

</mosaic_0001>

<bundles_post_ra>
// kernel: dcgan_generator.1
= control target key start
LH: loop header
LB: loop body
LE: loop exit
PB: predicated region body
PF: predicated region fallthrough
CT: control target
= control target key end

     0   :  { %v17087_v1 = vmov 0   ;;  %vm111_vm0 = vcmask 261120   ;;  %v51_v11 = vlaneseq  ;;  %v17088_v13 = vmov 1966171168   ;;  %s17092_s17 = smov 64   ;;  %s21655_s1 = inlined_call_operand.vmem [shape: bf16[32,512], index: 1, kind: input, shape index: {}]   ;;  %s21656_s0 = inlined_call_operand.vmem [shape: f32[2,32], index: 0, kind: input, shape index: {}]   ;;  %s21657_s2 = inlined_call_operand.vmem [shape: f32[1,512], index: 2, kind: input, shape index: {}]   ;;  %s21658_s3 = inlined_call_operand.vmem [shape: bf16[9,32,128], index: 3, kind: input, shape index: {}]   ;;  %s21659_s6 = inlined_call_operand.vmem [shape: bf16[9,128,128], index: 6, kind: input, shape index: {}]   ;;  %s21660_s4 = inlined_call_operand.vmem [shape: f32[1,128], index: 4, kind: input, shape index: {}]   ;;  %s21661_s5 = inlined_call_operand.vmem [shape: f32[1,128], index: 5, kind: input, shape index: {}]   ;;  %s21662_s9 = inlined_call_operand.vmem [shape: bf16[9,128,128], index: 9, kind: input, shape index: {}]   ;;  %s21663_s7 = inlined_call_operand.vmem [shape: f32[1,128], index: 7, kind: input, shape index: {}]   ;;  %s21664_s8 = inlined_call_operand.vmem [shape: f32[1,128], index: 8, kind: input, shape index: {}]   ;;  %s21665_s10 = inlined_call_operand.vmem [shape: f32[1,128], index: 10, kind: input, shape index: {}]   ;;  %s21666_s11 = inlined_call_operand.vmem [shape: f32[512,128], index: 11, kind: output, shape index: {}]  }
   0x1   :  { %v16776_v0 = vld [vmem:[%s21655_s1 + $0x4] ss:$16 sps:$4 sm:$0xff]   ;;  %147 = vmatprep.mubr.bf16.mxu0 %v17087_v1  ;;  %188 = vmatprep.mubr.bf16.mxu1 %v17087_v1  ;;  %v16778_v2 = vld [vmem:[%s21655_s1] ss:$16 sps:$4 sm:$0xff]   ;;  %v16779_v3 = vld [vmem:[%s21655_s1 + $0xc] ss:$16 sps:$4 sm:$0xff]   ;;  %v199_v14 = vunpack.c.l.s4 %v17088_v13 }
   0x2   :  { %115 = vmatprep.subr.bf16.mxu0 %v16776_v0  ;;  %v16781_v4 = vld [vmem:[%s21655_s1 + $0x8] ss:$16 sps:$4 sm:$0xff]   ;;  %v16782_v5 = vld [vmem:[%s21655_s1 + $0x24] ss:$16 sps:$4 sm:$0xff]   ;;  %v16784_v6 = vld [vmem:[%s21655_s1 + $0x20] ss:$16 sps:$4 sm:$0xff]   ;;  %156 = vmatprep.subr.bf16.mxu1 %v16779_v3 }
   0x3   :  { %116 = vmatpush1.bf16.msra.mxu0 %v16778_v2  ;;  %v16785_v7 = vld [vmem:[%s21655_s1 + $0x2c] ss:$16 sps:$4 sm:$0xff]   ;;  %157 = vmatpush1.bf16.msra.mxu1 %v16781_v4  ;;  %v16787_v8 = vld [vmem:[%s21655_s1 + $0x28] ss:$16 sps:$4 sm:$0xff]   ;;  %v39_v9 = vld [vmem:[%s21656_s0] sm:$0x3]  ;;  %v200_v17 = vunpack.c.0.s8 %v199_v14 }
   0x4   :  { %117 = vmatprep.subr.bf16.mxu0 %v16782_v5  ;;  %158 = vmatprep.subr.bf16.mxu1 %v16785_v7  ;;  %v40_v10 = vpack.c.bf16 %v39_v9, %v39_v9  ;;  %v17182_v12 = vshrl.u32 %v51_v11, 7  ;;  %v17190_v16 = vld [vmem:[%s21657_s2] sm:$0xf]  ;;  %vm429_vm1 = vcmask 254976   ;;  %v17089_v26 = vmov 0.0   ;;  %s17090_s0 = smov 32  }
   0x5   :  { %428 = vst.msk [vmem:[#allocation2] sm:$0xff] %vm111_vm0, %v17089_v26  ;;  %431 = vst.msk [vmem:[#allocation2 + $0xa0] sm:$0xff] %vm111_vm0, %v17089_v26  ;;  %vm438_vm2 = vcmask 253952   ;;  %s17091_s2 = smov 96   ;;  %v16788_v46 = vld [vmem:[%s21658_s3 + $0x10] sm:$0xff]   ;;  %v16789_v49 = vld [vmem:[%s21658_s3 + $0x18] sm:$0xff]  }
   0x6   :  { %v17185_v15 = vsub.s32 0, %v17182_v12  ;;  %v61_v18 = vsub.s32 2, %v17182_v12  ;;  %v17196_v20 = vsub.s32 %v200_v17, %v17182_v12  ;;  %v57_v21 = vsub.s32 1, %v17182_v12  ;;  %430 = vst.msk [vmem:[#allocation2 + $0x8] sm:$0x3] %vm429_vm1, %v17089_v26  ;;  %2676 = vst [vmem:[#allocation3] sm:$0xff] %v17089_v26 }
   0x7   :  { %118 = vmatpush1.bf16.msra.mxu0 %v16784_v6  ;;  %159 = vmatpush1.bf16.msra.mxu1 %v16787_v8  ;;  %432 = vst.msk [vmem:[#allocation2 + $0xa8] sm:$0x3] %vm429_vm1, %v17089_v26  ;;  %435 = vst.msk [vmem:[#allocation2 + $0x98] sm:$0x3] %vm429_vm1, %v17089_v26  ;;  %v65_v33 = vsub.s32 3, %v17182_v12  ;;  %v17518_v54 = vld [vmem:[%s21658_s3] sm:$0xff]  }
   0x8   :  { %21767 = vst [vmem:[#allocation5_spill] sm:$0xff] %v17185_v15  ;;  %v54_v19 = vrot.slane %v17190_v16, %v17185_v15  ;;  %v17200_v22 = vrot.slane %v17190_v16, %v61_v18  ;;  %434 = vst.msk [vmem:[#allocation2 + $0x90] sm:$0xff] %vm111_vm0, %v17089_v26  ;;  %v58_v30 = vrot.slane %v17190_v16, %v57_v21  ;;  %13998 = vmatprep.subr.bf16.mxu0 %v16788_v46  ;;  %vm248_vm3 = vcmask 1041408  }
   0x9   :  { %436 = vst.msk [vmem:[#allocation2 + $0x130] sm:$0xff] %vm111_vm0, %v17089_v26  ;;  %2677 = vst [vmem:[#allocation3 + $0x8] sm:$0xff] %v17089_v26  ;;  %v66_v42 = vrot.slane %v17190_v16, %v65_v33  ;;  %vm251_vm4 = vcmask 1043456   ;;  %vm254_vm5 = vcmask 1045504   ;;  %vm2448_vm6 = vcmask 1040384  }
   0xa   :  { %12661 = vmatmul.mubr.msk.bf16.vlgmr.msra.gmra.mrb[0].mxu0 %vm111_vm0, %v40_v10  ;;  %12662 = vmatmul.mubr.msk.bf16.vlgmr.msra.gmra.mrb[0].mxu1 %vm111_vm0, %v40_v10  ;;  %437 = vst.msk [vmem:[#allocation2 + $0x138] sm:$0x3] %vm429_vm1, %v17089_v26  ;;  %2678 = vst [vmem:[#allocation3 + $0x10] sm:$0x3] %v17089_v26  ;;  %vm2481_vm7 = vcmask 1042432   ;;  %vm2514_vm8 = vcmask 1044480  }
   0xb   :  { %2679 = vst [vmem:[#allocation3 + $0x1b0] sm:$0xff] %v17089_v26  ;;  %2680 = vst [vmem:[#allocation3 + $0x1b8] sm:$0xff] %v17089_v26  ;;  %13999 = vmatpush3.bf16.msra.mxu0 %v16788_v46  ;;  %vm2547_vm9 = vcmask 1046528  }
   0xc   :  { %2681 = vst [vmem:[#allocation3 + $0x1c0] sm:$0x3] %v17089_v26  ;;  %2683 = vst [vmem:[#allocation3 + $0x198] sm:$0xff] %v17089_v26  ;;  %14000 = vmatprep.subr.bf16.mxu0 %v16789_v49 }
   0xd   :  { %2684 = vst [vmem:[#allocation3 + $0x1a0] sm:$0xff] %v17089_v26  ;;  %2685 = vst [vmem:[#allocation3 + $0x1a8] sm:$0x3] %v17089_v26  ;;  %v524_v17 = vld [vmem:[#allocation2 + $0x1] sm:$0xff] }
   0xe   :  { %2686 = vst [vmem:[#allocation3 + $0x348] sm:$0xff] %v17089_v26  ;;  %2687 = vst [vmem:[#allocation3 + $0x350] sm:$0xff] %v17089_v26 }
   0xf   :  { %2688 = vst [vmem:[#allocation3 + $0x358] sm:$0x3] %v17089_v26  ;;  %2690 = vst [vmem:[#allocation3 + $0x18] sm:$0x1] %v17089_v26  ;;  %14001 = vmatpush3.bf16.msra.mxu0 %v16789_v49 }
  0x10   :  { %2691 = vst [vmem:[#allocation3 + $0x30] sm:$0x1] %v17089_v26  ;;  %2692 = vst [vmem:[#allocation3 + $0x48] sm:$0x1] %v17089_v26  ;;  %14018 = vmatprep.subr.bf16.mxu0 %v17518_v54 }
  0x11   :  { %2693 = vst [vmem:[#allocation3 + $0x60] sm:$0x1] %v17089_v26  ;;  %2694 = vst [vmem:[#allocation3 + $0x78] sm:$0x1] %v17089_v26 }
  0x12   :  { %2695 = vst [vmem:[#allocation3 + $0x90] sm:$0x1] %v17089_v26  ;;  %2696 = vst [vmem:[#allocation3 + $0xa8] sm:$0x1] %v17089_v26 }
  0x13   :  { %2697 = vst [vmem:[#allocation3 + $0xc0] sm:$0x1] %v17089_v26  ;;  %2698 = vst [vmem:[#allocation3 + $0xd8] sm:$0x1] %v17089_v26 }
  0x14   :  { %2699 = vst [vmem:[#allocation3 + $0xf0] sm:$0x1] %v17089_v26  ;;  %2700 = vst [vmem:[#allocation3 + $0x108] sm:$0x1] %v17089_v26 }
  0x15   :  { %2701 = vst [vmem:[#allocation3 + $0x120] sm:$0x1] %v17089_v26  ;;  %2702 = vst [vmem:[#allocation3 + $0x138] sm:$0x1] %v17089_v26 }
  0x16   :  { %2703 = vst [vmem:[#allocation3 + $0x150] sm:$0x1] %v17089_v26  ;;  %2704 = vst [vmem:[#allocation3 + $0x168] sm:$0x1] %v17089_v26 }
  0x17   :  { %2705 = vst [vmem:[#allocation3 + $0x180] sm:$0x1] %v17089_v26  ;;  %2708 = vst [vmem:[#allocation3 + $0x1c8] sm:$0x1] %v17089_v26 }
  0x18   :  { %2709 = vst [vmem:[#allocation3 + $0x1e0] sm:$0x1] %v17089_v26  ;;  %2710 = vst [vmem:[#allocation3 + $0x1f8] sm:$0x1] %v17089_v26 }
  0x19   :  { %2711 = vst [vmem:[#allocation3 + $0x210] sm:$0x1] %v17089_v26  ;;  %2712 = vst [vmem:[#allocation3 + $0x228] sm:$0x1] %v17089_v26 }
  0x1a   :  { %2713 = vst [vmem:[#allocation3 + $0x240] sm:$0x1] %v17089_v26  ;;  %2714 = vst [vmem:[#allocation3 + $0x258] sm:$0x1] %v17089_v26 }
  0x1b   :  { %2715 = vst [vmem:[#allocation3 + $0x270] sm:$0x1] %v17089_v26  ;;  %2716 = vst [vmem:[#allocation3 + $0x288] sm:$0x1] %v17089_v26 }
  0x1c   :  { %2717 = vst [vmem:[#allocation3 + $0x2a0] sm:$0x1] %v17089_v26  ;;  %2718 = vst [vmem:[#allocation3 + $0x2b8] sm:$0x1] %v17089_v26 }
  0x1d   :  { %2719 = vst [vmem:[#allocation3 + $0x2d0] sm:$0x1] %v17089_v26  ;;  %2720 = vst [vmem:[#allocation3 + $0x2e8] sm:$0x1] %v17089_v26 }
  0x1e   :  { %2721 = vst [vmem:[#allocation3 + $0x300] sm:$0x1] %v17089_v26  ;;  %2722 = vst [vmem:[#allocation3 + $0x318] sm:$0x1] %v17089_v26 }
  0x1f   :  { %2723 = vst [vmem:[#allocation3 + $0x330] sm:$0x1] %v17089_v26  ;;  %2726 = vst [vmem:[#allocation3 + $0x29] sm:$0x1] %v17089_v26 }
  0x20   :  { %2727 = vst [vmem:[#allocation3 + $0x41] sm:$0x1] %v17089_v26  ;;  %2728 = vst [vmem:[#allocation3 + $0x59] sm:$0x1] %v17089_v26 }
  0x21   :  { %2729 = vst [vmem:[#allocation3 + $0x71] sm:$0x1] %v17089_v26  ;;  %2730 = vst [vmem:[#allocation3 + $0x89] sm:$0x1] %v17089_v26 }
  0x22   :  { %2731 = vst [vmem:[#allocation3 + $0xa1] sm:$0x1] %v17089_v26  ;;  %2732 = vst [vmem:[#allocation3 + $0xb9] sm:$0x1] %v17089_v26 }
  0x23   :  { %2733 = vst [vmem:[#allocation3 + $0xd1] sm:$0x1] %v17089_v26  ;;  %2734 = vst [vmem:[#allocation3 + $0xe9] sm:$0x1] %v17089_v26 }
  0x24   :  { %2735 = vst [vmem:[#allocation3 + $0x101] sm:$0x1] %v17089_v26  ;;  %2736 = vst [vmem:[#allocation3 + $0x119] sm:$0x1] %v17089_v26 }
  0x25   :  { %2737 = vst [vmem:[#allocation3 + $0x131] sm:$0x1] %v17089_v26  ;;  %2738 = vst [vmem:[#allocation3 + $0x149] sm:$0x1] %v17089_v26 }
  0x26   :  { %2739 = vst [vmem:[#allocation3 + $0x161] sm:$0x1] %v17089_v26  ;;  %2740 = vst [vmem:[#allocation3 + $0x179] sm:$0x1] %v17089_v26 }
  0x27   :  { %2741 = vst [vmem:[#allocation3 + $0x191] sm:$0x1] %v17089_v26  ;;  %2744 = vst [vmem:[#allocation3 + $0x1d9] sm:$0x1] %v17089_v26 }
  0x28   :  { %2745 = vst [vmem:[#allocation3 + $0x1f1] sm:$0x1] %v17089_v26  ;;  %2746 = vst [vmem:[#allocation3 + $0x209] sm:$0x1] %v17089_v26 }
  0x29   :  { %2747 = vst [vmem:[#allocation3 + $0x221] sm:$0x1] %v17089_v26  ;;  %2748 = vst [vmem:[#allocation3 + $0x239] sm:$0x1] %v17089_v26 }
  0x2a   :  { %2749 = vst [vmem:[#allocation3 + $0x251] sm:$0x1] %v17089_v26  ;;  %2750 = vst [vmem:[#allocation3 + $0x269] sm:$0x1] %v17089_v26 }
  0x2b   :  { %2751 = vst [vmem:[#allocation3 + $0x281] sm:$0x1] %v17089_v26  ;;  %2752 = vst [vmem:[#allocation3 + $0x299] sm:$0x1] %v17089_v26 }
  0x2c   :  { %2753 = vst [vmem:[#allocation3 + $0x2b1] sm:$0x1] %v17089_v26  ;;  %2754 = vst [vmem:[#allocation3 + $0x2c9] sm:$0x1] %v17089_v26 }
  0x2d   :  { %2755 = vst [vmem:[#allocation3 + $0x2e1] sm:$0x1] %v17089_v26  ;;  %2756 = vst [vmem:[#allocation3 + $0x2f9] sm:$0x1] %v17089_v26 }
  0x2e   :  { %2757 = vst [vmem:[#allocation3 + $0x311] sm:$0x1] %v17089_v26  ;;  %2758 = vst [vmem:[#allocation3 + $0x329] sm:$0x1] %v17089_v26 }
  0x2f   :  { %2759 = vst [vmem:[#allocation3 + $0x341] sm:$0x1] %v17089_v26  ;;  %7802 = vst [vmem:[#allocation4] sm:$0xff] %v17089_v26 }
  0x30   :  { %7803 = vst [vmem:[#allocation4 + $0x8] sm:$0xff] %v17089_v26  ;;  %7804 = vst [vmem:[#allocation4 + $0x10] sm:$0x3] %v17089_v26 }
  0x31   :  { %7805 = vst [vmem:[#allocation4 + $0x1b0] sm:$0xff] %v17089_v26  ;;  %7806 = vst [vmem:[#allocation4 + $0x1b8] sm:$0xff] %v17089_v26 }
  0x32   :  { %7807 = vst [vmem:[#allocation4 + $0x1c0] sm:$0x3] %v17089_v26  ;;  %7809 = vst [vmem:[#allocation4 + $0x198] sm:$0xff] %v17089_v26 }
  0x33   :  { %7810 = vst [vmem:[#allocation4 + $0x1a0] sm:$0xff] %v17089_v26  ;;  %7811 = vst [vmem:[#allocation4 + $0x1a8] sm:$0x3] %v17089_v26 }
  0x34   :  { %7812 = vst [vmem:[#allocation4 + $0x348] sm:$0xff] %v17089_v26  ;;  %7813 = vst [vmem:[#allocation4 + $0x350] sm:$0xff] %v17089_v26 }
  0x35   :  { %7814 = vst [vmem:[#allocation4 + $0x358] sm:$0x3] %v17089_v26  ;;  %7816 = vst [vmem:[#allocation4 + $0x18] sm:$0x1] %v17089_v26 }
  0x36   :  { %7817 = vst [vmem:[#allocation4 + $0x30] sm:$0x1] %v17089_v26  ;;  %7818 = vst [vmem:[#allocation4 + $0x48] sm:$0x1] %v17089_v26 }
  0x37   :  { %7819 = vst [vmem:[#allocation4 + $0x60] sm:$0x1] %v17089_v26  ;;  %7820 = vst [vmem:[#allocation4 + $0x78] sm:$0x1] %v17089_v26 }
  0x38   :  { %7821 = vst [vmem:[#allocation4 + $0x90] sm:$0x1] %v17089_v26  ;;  %7822 = vst [vmem:[#allocation4 + $0xa8] sm:$0x1] %v17089_v26 }
  0x39   :  { %7823 = vst [vmem:[#allocation4 + $0xc0] sm:$0x1] %v17089_v26  ;;  %7824 = vst [vmem:[#allocation4 + $0xd8] sm:$0x1] %v17089_v26 }
  0x3a   :  { %7825 = vst [vmem:[#allocation4 + $0xf0] sm:$0x1] %v17089_v26  ;;  %7826 = vst [vmem:[#allocation4 + $0x108] sm:$0x1] %v17089_v26 }
  0x3b   :  { %7827 = vst [vmem:[#allocation4 + $0x120] sm:$0x1] %v17089_v26  ;;  %7828 = vst [vmem:[#allocation4 + $0x138] sm:$0x1] %v17089_v26 }
  0x3c   :  { %7829 = vst [vmem:[#allocation4 + $0x150] sm:$0x1] %v17089_v26  ;;  %7830 = vst [vmem:[#allocation4 + $0x168] sm:$0x1] %v17089_v26 }
  0x3d   :  { %7831 = vst [vmem:[#allocation4 + $0x180] sm:$0x1] %v17089_v26  ;;  %7834 = vst [vmem:[#allocation4 + $0x1c8] sm:$0x1] %v17089_v26 }
  0x3e   :  { %7835 = vst [vmem:[#allocation4 + $0x1e0] sm:$0x1] %v17089_v26  ;;  %7836 = vst [vmem:[#allocation4 + $0x1f8] sm:$0x1] %v17089_v26 }
  0x3f   :  { %7837 = vst [vmem:[#allocation4 + $0x210] sm:$0x1] %v17089_v26  ;;  %7838 = vst [vmem:[#allocation4 + $0x228] sm:$0x1] %v17089_v26 }
  0x40   :  { %7839 = vst [vmem:[#allocation4 + $0x240] sm:$0x1] %v17089_v26  ;;  %7840 = vst [vmem:[#allocation4 + $0x258] sm:$0x1] %v17089_v26 }
  0x41   :  { %7841 = vst [vmem:[#allocation4 + $0x270] sm:$0x1] %v17089_v26  ;;  %7842 = vst [vmem:[#allocation4 + $0x288] sm:$0x1] %v17089_v26 }
  0x42   :  { %7843 = vst [vmem:[#allocation4 + $0x2a0] sm:$0x1] %v17089_v26  ;;  %7844 = vst [vmem:[#allocation4 + $0x2b8] sm:$0x1] %v17089_v26 }
  0x43   :  { %7845 = vst [vmem:[#allocation4 + $0x2d0] sm:$0x1] %v17089_v26  ;;  %7846 = vst [vmem:[#allocation4 + $0x2e8] sm:$0x1] %v17089_v26 }
  0x44   :  { %7847 = vst [vmem:[#allocation4 + $0x300] sm:$0x1] %v17089_v26  ;;  %7848 = vst [vmem:[#allocation4 + $0x318] sm:$0x1] %v17089_v26 }
  0x45   :  { %7849 = vst [vmem:[#allocation4 + $0x330] sm:$0x1] %v17089_v26  ;;  %7852 = vst [vmem:[#allocation4 + $0x29] sm:$0x1] %v17089_v26 }
  0x46   :  { %7853 = vst [vmem:[#allocation4 + $0x41] sm:$0x1] %v17089_v26  ;;  %7854 = vst [vmem:[#allocation4 + $0x59] sm:$0x1] %v17089_v26 }
  0x47   :  { %7855 = vst [vmem:[#allocation4 + $0x71] sm:$0x1] %v17089_v26  ;;  %7856 = vst [vmem:[#allocation4 + $0x89] sm:$0x1] %v17089_v26 }
  0x48   :  { %7857 = vst [vmem:[#allocation4 + $0xa1] sm:$0x1] %v17089_v26  ;;  %7858 = vst [vmem:[#allocation4 + $0xb9] sm:$0x1] %v17089_v26 }
  0x49   :  { %7859 = vst [vmem:[#allocation4 + $0xd1] sm:$0x1] %v17089_v26  ;;  %7860 = vst [vmem:[#allocation4 + $0xe9] sm:$0x1] %v17089_v26 }
  0x4a   :  { %7861 = vst [vmem:[#allocation4 + $0x101] sm:$0x1] %v17089_v26  ;;  %7862 = vst [vmem:[#allocation4 + $0x119] sm:$0x1] %v17089_v26 }
  0x4b   :  { %7863 = vst [vmem:[#allocation4 + $0x131] sm:$0x1] %v17089_v26  ;;  %7864 = vst [vmem:[#allocation4 + $0x149] sm:$0x1] %v17089_v26 }
  0x4c   :  { %7865 = vst [vmem:[#allocation4 + $0x161] sm:$0x1] %v17089_v26  ;;  %7866 = vst [vmem:[#allocation4 + $0x179] sm:$0x1] %v17089_v26 }
  0x4d   :  { %7867 = vst [vmem:[#allocation4 + $0x191] sm:$0x1] %v17089_v26  ;;  %7870 = vst [vmem:[#allocation4 + $0x1d9] sm:$0x1] %v17089_v26 }
  0x4e   :  { %7871 = vst [vmem:[#allocation4 + $0x1f1] sm:$0x1] %v17089_v26  ;;  %7872 = vst [vmem:[#allocation4 + $0x209] sm:$0x1] %v17089_v26 }
  0x4f   :  { %7873 = vst [vmem:[#allocation4 + $0x221] sm:$0x1] %v17089_v26  ;;  %7874 = vst [vmem:[#allocation4 + $0x239] sm:$0x1] %v17089_v26 }
  0x50   :  { %7875 = vst [vmem:[#allocation4 + $0x251] sm:$0x1] %v17089_v26  ;;  %7876 = vst [vmem:[#allocation4 + $0x269] sm:$0x1] %v17089_v26 }
  0x51   :  { %7877 = vst [vmem:[#allocation4 + $0x281] sm:$0x1] %v17089_v26  ;;  %7878 = vst [vmem:[#allocation4 + $0x299] sm:$0x1] %v17089_v26 }
  0x52   :  { %7879 = vst [vmem:[#allocation4 + $0x2b1] sm:$0x1] %v17089_v26  ;;  %7880 = vst [vmem:[#allocation4 + $0x2c9] sm:$0x1] %v17089_v26 }
  0x53   :  { %7881 = vst [vmem:[#allocation4 + $0x2e1] sm:$0x1] %v17089_v26  ;;  %7882 = vst [vmem:[#allocation4 + $0x2f9] sm:$0x1] %v17089_v26 }
  0x54   :  { %7883 = vst [vmem:[#allocation4 + $0x311] sm:$0x1] %v17089_v26  ;;  %7884 = vst [vmem:[#allocation4 + $0x329] sm:$0x1] %v17089_v26 }
  0x55   :  { %7885 = vst [vmem:[#allocation4 + $0x341] sm:$0x1] %v17089_v26  ;;  %2689 = vst [vmem:[#allocation3] sm:$0x1] %v17089_v26 }
  0x56   :  { %2706 = vst [vmem:[#allocation3 + $0x198] sm:$0x1] %v17089_v26  ;;  %2707 = vst [vmem:[#allocation3 + $0x1b0] sm:$0x1] %v17089_v26 }
  0x57   :  { %2724 = vst [vmem:[#allocation3 + $0x348] sm:$0x1] %v17089_v26  ;;  %2725 = vst [vmem:[#allocation3 + $0x11] sm:$0x1] %v17089_v26 }
  0x58   :  { %2742 = vst [vmem:[#allocation3 + $0x1a9] sm:$0x1] %v17089_v26  ;;  %2743 = vst [vmem:[#allocation3 + $0x1c1] sm:$0x1] %v17089_v26 }
  0x59   :  { %2760 = vst [vmem:[#allocation3 + $0x359] sm:$0x1] %v17089_v26  ;;  %7815 = vst [vmem:[#allocation4] sm:$0x1] %v17089_v26 }
  0x5a   :  { %7832 = vst [vmem:[#allocation4 + $0x198] sm:$0x1] %v17089_v26  ;;  %7833 = vst [vmem:[#allocation4 + $0x1b0] sm:$0x1] %v17089_v26 }
  0x5b   :  { %7850 = vst [vmem:[#allocation4 + $0x348] sm:$0x1] %v17089_v26  ;;  %7851 = vst [vmem:[#allocation4 + $0x11] sm:$0x1] %v17089_v26 }
  0x5c   :  { %7868 = vst [vmem:[#allocation4 + $0x1a9] sm:$0x1] %v17089_v26  ;;  %7869 = vst [vmem:[#allocation4 + $0x1c1] sm:$0x1] %v17089_v26 }
  0x5d   :  { %7886 = vst [vmem:[#allocation4 + $0x359] sm:$0x1] %v17089_v26  ;;  %439 = vst.msk [vmem:[#allocation2] sm:$0x1] %vm438_vm2, %v17089_v26 }
  0x5e   :  { %440 = vst.msk [vmem:[#allocation2 + $0x10] sm:$0x1] %vm438_vm2, %v17089_v26  ;;  %441 = vst.msk [vmem:[#allocation2 + $0x20] sm:$0x1] %vm438_vm2, %v17089_v26 }
  0x5f   :  { %442 = vst.msk [vmem:[#allocation2 + $0x30] sm:$0x1] %vm438_vm2, %v17089_v26  ;;  %443 = vst.msk [vmem:[#allocation2 + $0x40] sm:$0x1] %vm438_vm2, %v17089_v26 }
  0x60   :  { %444 = vst.msk [vmem:[#allocation2 + $0x50] sm:$0x1] %vm438_vm2, %v17089_v26  ;;  %445 = vst.msk [vmem:[#allocation2 + $0x60] sm:$0x1] %vm438_vm2, %v17089_v26 }
  0x61   :  { %446 = vst.msk [vmem:[#allocation2 + $0x70] sm:$0x1] %vm438_vm2, %v17089_v26  ;;  %447 = vst.msk [vmem:[#allocation2 + $0x80] sm:$0x1] %vm438_vm2, %v17089_v26 }
  0x62   :  { %448 = vst.msk [vmem:[#allocation2 + $0x90] sm:$0x1] %vm438_vm2, %v17089_v26  ;;  %449 = vst.msk [vmem:[#allocation2 + $0xa0] sm:$0x1] %vm438_vm2, %v17089_v26 }
  0x63   :  { %450 = vst.msk [vmem:[#allocation2 + $0xb0] sm:$0x1] %vm438_vm2, %v17089_v26  ;;  %451 = vst.msk [vmem:[#allocation2 + $0xc0] sm:$0x1] %vm438_vm2, %v17089_v26 }
  0x64   :  { %452 = vst.msk [vmem:[#allocation2 + $0xd0] sm:$0x1] %vm438_vm2, %v17089_v26  ;;  %453 = vst.msk [vmem:[#allocation2 + $0xe0] sm:$0x1] %vm438_vm2, %v17089_v26 }
  0x65   :  { %454 = vst.msk [vmem:[#allocation2 + $0xf0] sm:$0x1] %vm438_vm2, %v17089_v26  ;;  %455 = vst.msk [vmem:[#allocation2 + $0x100] sm:$0x1] %vm438_vm2, %v17089_v26 }
  0x66   :  { %456 = vst.msk [vmem:[#allocation2 + $0x110] sm:$0x1] %vm438_vm2, %v17089_v26  ;;  %457 = vst.msk [vmem:[#allocation2 + $0x120] sm:$0x1] %vm438_vm2, %v17089_v26 }
  0x67   :  { %458 = vst.msk [vmem:[#allocation2 + $0x130] sm:$0x1] %vm438_vm2, %v17089_v26  ;;  %459 = vst.msk [vmem:[#allocation2 + $0x9] sm:$0x1] %vm438_vm2, %v17089_v26 }
  0x68   :  { %460 = vst.msk [vmem:[#allocation2 + $0x19] sm:$0x1] %vm438_vm2, %v17089_v26  ;;  %461 = vst.msk [vmem:[#allocation2 + $0x29] sm:$0x1] %vm438_vm2, %v17089_v26 }
  0x69   :  { %462 = vst.msk [vmem:[#allocation2 + $0x39] sm:$0x1] %vm438_vm2, %v17089_v26  ;;  %463 = vst.msk [vmem:[#allocation2 + $0x49] sm:$0x1] %vm438_vm2, %v17089_v26 }
  0x6a   :  { %464 = vst.msk [vmem:[#allocation2 + $0x59] sm:$0x1] %vm438_vm2, %v17089_v26  ;;  %465 = vst.msk [vmem:[#allocation2 + $0x69] sm:$0x1] %vm438_vm2, %v17089_v26 }
  0x6b   :  { %466 = vst.msk [vmem:[#allocation2 + $0x79] sm:$0x1] %vm438_vm2, %v17089_v26  ;;  %467 = vst.msk [vmem:[#allocation2 + $0x89] sm:$0x1] %vm438_vm2, %v17089_v26 }
  0x6c   :  { %468 = vst.msk [vmem:[#allocation2 + $0x99] sm:$0x1] %vm438_vm2, %v17089_v26  ;;  %469 = vst.msk [vmem:[#allocation2 + $0xa9] sm:$0x1] %vm438_vm2, %v17089_v26 }
  0x6d   :  { %470 = vst.msk [vmem:[#allocation2 + $0xb9] sm:$0x1] %vm438_vm2, %v17089_v26  ;;  %471 = vst.msk [vmem:[#allocation2 + $0xc9] sm:$0x1] %vm438_vm2, %v17089_v26 }
  0x6e   :  { %472 = vst.msk [vmem:[#allocation2 + $0xd9] sm:$0x1] %vm438_vm2, %v17089_v26  ;;  %473 = vst.msk [vmem:[#allocation2 + $0xe9] sm:$0x1] %vm438_vm2, %v17089_v26 }
  0x6f   :  { %474 = vst.msk [vmem:[#allocation2 + $0xf9] sm:$0x1] %vm438_vm2, %v17089_v26  ;;  %475 = vst.msk [vmem:[#allocation2 + $0x109] sm:$0x1] %vm438_vm2, %v17089_v26 }
  0x70   :  { %476 = vst.msk [vmem:[#allocation2 + $0x119] sm:$0x1] %vm438_vm2, %v17089_v26  ;;  %477 = vst.msk [vmem:[#allocation2 + $0x129] sm:$0x1] %vm438_vm2, %v17089_v26 }
  0x71   :  { %478 = vst.msk [vmem:[#allocation2 + $0x139] sm:$0x1] %vm438_vm2, %v17089_v26 }
  0xdd   :  { %v149_v23 = vpop.f32.mrb[0].mxu0  ;;  %v190_v28 = vpop.f32.mrb[0].mxu1 }
  0xde   :  { %v17202_v24 = vadd.f32 %v149_v23, %v54_v19  ;;  %v17204_v25 = vpop.f32.mrb[1].mxu0  ;;  %v191_v31 = vadd.f32 %v190_v28, %v17200_v22  ;;  %v192_v34 = vpop.f32.mrb[1].mxu1  ;;  %v16795_v28 = vld [vmem:[%s21658_s3 + $0x38] sm:$0xff]  }
  0xdf   :  { %v153_v27 = vpop.f32.mrb[2].mxu0  ;;  %v194_v35 = vpop.f32.mrb[2].mxu1  ;;  %v152_v40 = vadd.f32 %v17204_v25, %v58_v30  ;;  %v193_v45 = vadd.f32 %v192_v34, %v66_v42 }
  0xe0   :  { %v204_v29 = vrot.slane %v17202_v24, %v17196_v20  ;;  %v154_v32 = vpop.f32.mrb[3].mxu0  ;;  %v321_v37 = vrot.slane %v191_v31, %v17196_v20  ;;  %v195_v38 = vpop.f32.mrb[3].mxu1 }
  0xe1   :  { %v264_v44 = vrot.slane %v152_v40, %v17196_v20  ;;  %v378_v48 = vrot.slane %v193_v45, %v17196_v20 }
  0xe2   :  { %v212_v36 = vrot.slane %v204_v29, %v17196_v20  ;;  %v329_v41 = vrot.slane %v321_v37, %v17196_v20  ;;  %v205_v52 = vcombine.high %v204_v29, %v204_v29  ;;  %v322_v56 = vcombine.high %v321_v37, %v321_v37 }
  0xe3   :  { %v272_v47 = vrot.slane %v264_v44, %v17196_v20  ;;  %v386_v51 = vrot.slane %v378_v48, %v17196_v20  ;;  %v265_v57 = vcombine.high %v264_v44, %v264_v44  ;;  %v379_v62 = vcombine.high %v378_v48, %v378_v48  ;;  %v16791_v48 = vld [vmem:[%s21658_s3 + $0x8] sm:$0xff]  }
  0xe4   :  { %v17476_v39 = vrot.slane %v212_v36, %v17185_v15  ;;  %v17482_v43 = vrot.slane %v329_v41, %v17185_v15  ;;  %v219_v55 = vrot.slane %v205_v52, %v17196_v20  ;;  %v336_v58 = vrot.slane %v322_v56, %v17196_v20 }
  0xe5   :  { %v283_v50 = vrot.slane %v272_v47, %v17185_v15  ;;  %v17510_v53 = vrot.slane %v386_v51, %v17185_v15  ;;  %v279_v60 = vrot.slane %v265_v57, %v17196_v20  ;;  %v393_v0 = vrot.slane %v379_v62, %v17196_v20 }
  0xe6   :  { %242 = vrot.lane.b32.xlu1 %v17476_v39, %s17090_s0  ;;  %230 = vrot.lane.b32.xlu0 %v17476_v39, %s17091_s2  ;;  %v17528_v59 = vrot.slane %v219_v55, %v17185_v15  ;;  %v17536_v61 = vrot.slane %v336_v58, %v17185_v15  ;;  %v17651_v58 = vld [vmem:[%s21658_s3 + $0x20] sm:$0xff]  }
  0xe7   :  { %v17543_v63 = vrot.slane %v279_v60, %v17185_v15  ;;  %v17555_v1 = vrot.slane %v393_v0, %v17185_v15  ;;  %v16797_v15 = vld [vmem:[%s21658_s3 + $0x48] sm:$0xff]  }
  0xea   :  { %353 = vrot.lane.b32.xlu1 %v17482_v43, %s17092_s17  ;;  %236 = vrot.lane.b32.xlu0 %v17476_v39, %s17092_s17 }
  0xee   :  { %359 = vrot.lane.b32.xlu1 %v17482_v43, %s17090_s0  ;;  %347 = vrot.lane.b32.xlu0 %v17482_v43, %s17091_s2 }
  0xf2   :  { %290 = vrot.lane.b32.xlu1 %v283_v50, %s17091_s2  ;;  %296 = vrot.lane.b32.xlu0 %v283_v50, %s17092_s17 }
  0xf6   :  { %302 = vrot.lane.b32.xlu1 %v283_v50, %s17090_s0  ;;  %404 = vrot.lane.b32.xlu0 %v17510_v53, %s17091_s2 }
  0xfa   :  { %416 = vrot.lane.b32.xlu1 %v17510_v53, %s17090_s0  ;;  %410 = vrot.lane.b32.xlu0 %v17510_v53, %s17092_s17 }
  0xfe   :  { %238 = vrot.lane.b32.xlu1 %v17528_v59, %s17092_s17  ;;  %232 = vrot.lane.b32.xlu0 %v17528_v59, %s17091_s2 }
 0x102   :  { %244 = vrot.lane.b32.xlu1 %v17528_v59, %s17090_s0  ;;  %349 = vrot.lane.b32.xlu0 %v17536_v61, %s17091_s2 }
 0x106   :  { %355 = vrot.lane.b32.xlu1 %v17536_v61, %s17092_s17  ;;  %292 = vrot.lane.b32.xlu0 %v17543_v63, %s17091_s2 }
 0x10a   :  { %304 = vrot.lane.b32.xlu1 %v17543_v63, %s17090_s0  ;;  %298 = vrot.lane.b32.xlu0 %v17543_v63, %s17092_s17 }
 0x10e   :  { %361 = vrot.lane.b32.xlu1 %v17536_v61, %s17090_s0  ;;  %406 = vrot.lane.b32.xlu0 %v17555_v1, %s17091_s2 }
 0x112   :  { %418 = vrot.lane.b32.xlu1 %v17555_v1, %s17090_s0  ;;  %412 = vrot.lane.b32.xlu0 %v17555_v1, %s17092_s17 }
 0x158   :  { %v243_v2 = vpop.permute.xlu1 %242  ;;  %v231_v3 = vpop.permute.xlu0 %230 }
 0x159   :  { %v249_v4 = vsel %vm248_vm3, %v17476_v39, %v231_v3 }
 0x15c   :  { %v354_v5 = vpop.permute.xlu1 %353  ;;  %v237_v6 = vpop.permute.xlu0 %236 }
 0x15d   :  { %v252_v7 = vsel %vm251_vm4, %v249_v4, %v237_v6 }
 0x15e   :  { %v255_v8 = vsel %vm254_vm5, %v252_v7, %v243_v2 }
 0x15f   :  { %480 = vst.msk [vmem:[#allocation2 + $0x11] sm:$0xff] %vm111_vm0, %v255_v8  ;;  %481 = vst.msk [vmem:[#allocation2 + $0x21] sm:$0xff] %vm111_vm0, %v255_v8 }
 0x160   :  { %v360_v9 = vpop.permute.xlu1 %359  ;;  %v348_v10 = vpop.permute.xlu0 %347 }
 0x161   :  { %v365_v11 = vsel %vm248_vm3, %v17482_v43, %v348_v10 }
 0x162   :  { %v367_v12 = vsel %vm251_vm4, %v365_v11, %v354_v5 }
 0x163   :  { %v369_v13 = vsel %vm254_vm5, %v367_v12, %v360_v9 }
 0x164   :  { %484 = vst.msk [vmem:[#allocation2 + $0x51] sm:$0xff] %vm111_vm0, %v369_v13  ;;  %485 = vst.msk [vmem:[#allocation2 + $0x61] sm:$0xff] %vm111_vm0, %v369_v13  ;;  %v291_v14 = vpop.permute.xlu1 %290  ;;  %v297_v16 = vpop.permute.xlu0 %296 }
 0x165   :  { %v308_v18 = vsel %vm248_vm3, %v283_v50, %v291_v14 }
 0x166   :  { %v17578_v19 = vld [vmem:[#allocation2 + $0x11] sm:$0xff]  ;;  %v17580_v20 = vld [vmem:[#allocation2 + $0x21] sm:$0xff]  ;;  %v310_v25 = vsel %vm251_vm4, %v308_v18, %v297_v16 }
 0x167   :  { %v540_v21 = vpack.c.bf16 %v17578_v19, %v524_v17  ;;  %v17583_v22 = vld [vmem:[#allocation2 + $0x12] sm:$0xff]  ;;  %v17585_v23 = vld [vmem:[#allocation2 + $0x22] sm:$0xff] }
 0x168   :  { %v303_v26 = vpop.permute.xlu1 %302  ;;  %v405_v27 = vpop.permute.xlu0 %404 }
 0x169   :  { %v312_v29 = vsel %vm254_vm5, %v310_v25, %v303_v26  ;;  %14002 = vmatprep.mubr.msk.bf16.mxu0 %vm111_vm0, %v540_v21  ;;  %v422_v32 = vsel %vm248_vm3, %v17510_v53, %v405_v27 }
 0x16a   :  { %482 = vst.msk [vmem:[#allocation2 + $0x31] sm:$0xff] %vm111_vm0, %v312_v29  ;;  %483 = vst.msk [vmem:[#allocation2 + $0x41] sm:$0xff] %vm111_vm0, %v312_v29 }
 0x16b   :  { %v17596_v30 = vld [vmem:[#allocation2 + $0x51] sm:$0xff]  ;;  %v17598_v31 = vld [vmem:[#allocation2 + $0x61] sm:$0xff] }
 0x16c   :  { %v417_v33 = vpop.permute.xlu1 %416  ;;  %v411_v34 = vpop.permute.xlu0 %410  ;;  %v17602_v35 = vld [vmem:[#allocation2 + $0x52] sm:$0xff]  ;;  %v17604_v36 = vld [vmem:[#allocation2 + $0x62] sm:$0xff] }
 0x16d   :  { %v424_v38 = vsel %vm251_vm4, %v422_v32, %v411_v34 }
 0x16e   :  { %v426_v40 = vsel %vm254_vm5, %v424_v38, %v417_v33  ;;  %v827_v38 = vld [vmem:[#allocation2 + $0xa2] sm:$0xff] }
 0x16f   :  { %486 = vst.msk [vmem:[#allocation2 + $0x71] sm:$0xff] %vm111_vm0, %v426_v40  ;;  %487 = vst.msk [vmem:[#allocation2 + $0x81] sm:$0xff] %vm111_vm0, %v426_v40 }
 0x170   :  { %v239_v41 = vpop.permute.xlu1 %238  ;;  %v233_v42 = vpop.permute.xlu0 %232 }
 0x171   :  { %v250_v43 = vsel %vm248_vm3, %v17528_v59, %v233_v42  ;;  %v17616_v44 = vld [vmem:[#allocation2 + $0x31] sm:$0xff]  ;;  %v17618_v45 = vld [vmem:[#allocation2 + $0x41] sm:$0xff] }
 0x172   :  { %v17622_v46 = vpack.c.bf16 %v17616_v44, %v17580_v20  ;;  %v17626_v47 = vpack.c.bf16 %v17596_v30, %v17618_v45  ;;  %v17631_v49 = vld [vmem:[#allocation2 + $0x32] sm:$0xff]  ;;  %v17633_v50 = vld [vmem:[#allocation2 + $0x42] sm:$0xff]  ;;  %v253_v52 = vsel %vm251_vm4, %v250_v43, %v239_v41 }
 0x173   :  { %v17793_v56 = vpack.c.bf16 %v17631_v49, %v17585_v23 }
 0x174   :  { %14003 = vmatmul.mubr.msk.bf16.vlgmr.msra.gmra.mrb[4].mxu0 %vm111_vm0, %v17622_v46  ;;  %v245_v51 = vpop.permute.xlu1 %244  ;;  %v350_v53 = vpop.permute.xlu0 %349 }
 0x175   :  { %v256_v57 = vsel %vm254_vm5, %v253_v52, %v245_v51  ;;  %14006 = vmatprep.mubr.msk.bf16.mxu0 %vm111_vm0, %v17626_v47  ;;  %14019 = vmatpush3.bf16.msra.mxu0 %v17518_v54  ;;  %v532_v54 = vld [vmem:[#allocation2 + $0xa1] sm:$0xff]  ;;  %v366_v12 = vsel %vm248_vm3, %v17536_v61, %v350_v53  ;;  %v17800_v52 = vpack.c.bf16 %v17602_v35, %v17633_v50 }
 0x176   :  { %488 = vst.msk [vmem:[#allocation2 + $0xb1] sm:$0xff] %vm111_vm0, %v256_v57  ;;  %489 = vst.msk [vmem:[#allocation2 + $0xc1] sm:$0xff] %vm111_vm0, %v256_v57  ;;  %14020 = vmatprep.subr.bf16.mxu0 %v16791_v48  ;;  %v17653_v59 = vld [vmem:[#allocation2 + $0x71] sm:$0xff]  ;;  %v496_v57 = vld [vmem:[#allocation2] sm:$0xff] }
 0x177   :  { %v17657_v0 = vpack.c.bf16 %v17653_v59, %v17598_v31 }
 0x178   :  { %v356_v60 = vpop.permute.xlu1 %355  ;;  %v293_v62 = vpop.permute.xlu0 %292 }
 0x179   :  { %14021 = vmatpush3.bf16.msra.mxu0 %v16791_v48  ;;  %v309_v2 = vsel %vm248_vm3, %v17543_v63, %v293_v62  ;;  %v368_v14 = vsel %vm251_vm4, %v366_v12, %v356_v60  ;;  %v17730_v60 = vld [vmem:[#allocation2 + $0x10] sm:$0xff]  ;;  %v16793_v12 = vld [vmem:[%s21658_s3 + $0x28] sm:$0xff]  }
 0x17a   :  { %14038 = vmatprep.subr.bf16.mxu0 %v17651_v58 }
 0x17c   :  { %14007 = vmatmul.mubr.msk.bf16.gmra.mrb[8].mxu0 %vm111_vm0, %v17657_v0  ;;  %v305_v3 = vpop.permute.xlu1 %304  ;;  %v299_v4 = vpop.permute.xlu0 %298 }
 0x17d   :  { %v311_v5 = vsel %vm251_vm4, %v309_v2, %v299_v4  ;;  %v17665_v6 = vld [vmem:[#allocation2 + $0xb1] sm:$0xff]  ;;  %v17667_v7 = vld [vmem:[#allocation2 + $0xc1] sm:$0xff]  ;;  %v512_v2 = vpack.c.bf16 %v17730_v60, %v496_v57 }
 0x17e   :  { %v313_v8 = vsel %vm254_vm5, %v311_v5, %v305_v3  ;;  %v544_v9 = vpack.c.bf16 %v17665_v6, %v532_v54  ;;  %v17671_v10 = vld [vmem:[#allocation2 + $0xb2] sm:$0xff]  ;;  %v17673_v11 = vld [vmem:[#allocation2 + $0xc2] sm:$0xff] }
 0x17f   :  { %490 = vst.msk [vmem:[#allocation2 + $0xd1] sm:$0xff] %vm111_vm0, %v313_v8  ;;  %491 = vst.msk [vmem:[#allocation2 + $0xe1] sm:$0xff] %vm111_vm0, %v313_v8  ;;  %v17742_v3 = vld [vmem:[#allocation2 + $0x30] sm:$0xff]  ;;  %v17744_v4 = vld [vmem:[#allocation2 + $0x40] sm:$0xff]  ;;  %v839_v37 = vpack.c.bf16 %v17671_v10, %v827_v38 }
 0x180   :  { %v362_v16 = vpop.permute.xlu1 %361  ;;  %14010 = vmatprep.mubr.msk.bf16.mxu0 %vm111_vm0, %v544_v9  ;;  %v407_v17 = vpop.permute.xlu0 %406  ;;  %v498_v5 = vld [vmem:[#allocation2 + $0x20] sm:$0xff]  ;;  %v17749_v9 = vld [vmem:[#allocation2 + $0x50] sm:$0xff]  ;;  %v1014_v24 = vpack.c.bf16 %v17744_v4, %v17742_v3 }
 0x181   :  { %v370_v18 = vsel %vm254_vm5, %v368_v14, %v362_v16  ;;  %v423_v61 = vsel %vm248_vm3, %v17555_v1, %v407_v17  ;;  %v17747_v8 = vpack.c.bf16 %v17742_v3, %v498_v5  ;;  %v17756_v14 = vpack.c.bf16 %v17749_v9, %v17744_v4  ;;  %v16794_v16 = vld [vmem:[%s21658_s3 + $0x30] sm:$0xff]   ;;  %v506_v57 = vld [vmem:[#allocation2 + $0xc0] sm:$0xff] }
 0x182   :  { %492 = vst.msk [vmem:[#allocation2 + $0xf1] sm:$0xff] %vm111_vm0, %v370_v18  ;;  %493 = vst.msk [vmem:[#allocation2 + $0x101] sm:$0xff] %vm111_vm0, %v370_v18  ;;  %v17766_v17 = vld [vmem:[#allocation2 + $0x70] sm:$0xff]  ;;  %v504_v18 = vld [vmem:[#allocation2 + $0xa0] sm:$0xff] }
 0x184   :  { %v419_v21 = vpop.permute.xlu1 %418  ;;  %v413_v25 = vpop.permute.xlu0 %412 }
 0x185   :  { %v425_v26 = vsel %vm251_vm4, %v423_v61, %v413_v25  ;;  %v17768_v61 = vld [vmem:[#allocation2 + $0xb0] sm:$0xff] }
 0x186   :  { %v427_v27 = vsel %vm254_vm5, %v425_v26, %v419_v21  ;;  %v17692_v29 = vld [vmem:[#allocation2 + $0xd1] sm:$0xff]  ;;  %v17694_v32 = vld [vmem:[#allocation2 + $0xe1] sm:$0xff]  ;;  %v1017_v4 = vpack.c.bf16 %v506_v57, %v17768_v61 }
 0x187   :  { %494 = vst.msk [vmem:[#allocation2 + $0x111] sm:$0xff] %vm111_vm0, %v427_v27  ;;  %495 = vst.msk [vmem:[#allocation2 + $0x121] sm:$0xff] %vm111_vm0, %v427_v27  ;;  %v17700_v33 = vpack.c.bf16 %v17692_v29, %v17667_v7  ;;  %v17702_v34 = vld [vmem:[#allocation2 + $0xd2] sm:$0xff]  ;;  %v17704_v1 = vld [vmem:[#allocation2 + $0xe2] sm:$0xff] }
 0x188   :  { %v502_v21 = vld [vmem:[#allocation2 + $0x60] sm:$0xff]  ;;  %v507_v26 = vld [vmem:[#allocation2 + $0xd0] sm:$0xff] }
 0x189   :  { %14011 = vmatmul.mubr.msk.bf16.gmra.mrb[12].mxu0 %vm111_vm0, %v17700_v33  ;;  %v17712_v41 = vld [vmem:[#allocation2 + $0xf1] sm:$0xff]  ;;  %v17714_v42 = vld [vmem:[#allocation2 + $0x101] sm:$0xff]  ;;  %v17771_v25 = vpack.c.bf16 %v17766_v17, %v502_v21 }
 0x18a   :  { %v17718_v43 = vpack.c.bf16 %v17712_v41, %v17694_v32  ;;  %v17720_v48 = vld [vmem:[#allocation2 + $0xf2] sm:$0xff]  ;;  %v17722_v51 = vld [vmem:[#allocation2 + $0x102] sm:$0xff] }
 0x18b   :  { %v509_v27 = vld [vmem:[#allocation2 + $0xf0] sm:$0xff]  ;;  %v508_v53 = vld [vmem:[#allocation2 + $0xe0] sm:$0xff]  ;;  %v17825_v55 = vpack.c.bf16 %v17720_v48, %v17704_v1 }
 0x18c   :  { %14014 = vmatprep.mubr.msk.bf16.mxu0 %vm111_vm0, %v17718_v43  ;;  %v17779_v40 = vpack.c.bf16 %v509_v27, %v508_v53  ;;  %v510_v13 = vld [vmem:[#allocation2 + $0x100] sm:$0xff] }
 0x18d   :  { %21768 = vst [vmem:[#allocation6_spill] sm:$0xff] %v17825_v55 }
 0x18e   :  { %v17732_v62 = vld [vmem:[#allocation2 + $0x111] sm:$0xff] }
 0x18f   :  { %v17736_v54 = vpack.c.bf16 %v17732_v62, %v17714_v42 }
 0x191   :  { %14015 = vmatmul.mubr.msk.bf16.gmra.mrb[16].mxu0 %vm111_vm0, %v17736_v54 }
 0x192   :  { %14022 = vmatprep.mubr.msk.bf16.mxu0 %vm111_vm0, %v512_v2  ;;  %v17777_v2 = vpack.c.bf16 %v507_v26, %v506_v57 }
 0x199   :  { %14023 = vmatmul.mubr.msk.bf16.vlgmr.msra.gmra.mrb[4].mxu0 %vm111_vm0, %v17747_v8 }
 0x19a   :  { %14039 = vmatpush3.bf16.msra.mxu0 %v17651_v58  ;;  %14026 = vmatprep.mubr.msk.bf16.mxu0 %vm111_vm0, %v17756_v14  ;;  %v516_v58 = vpack.c.bf16 %v17768_v61, %v504_v18  ;;  %v819_v18 = vld [vmem:[#allocation2 + $0x2] sm:$0xff] }
 0x19b   :  { %14040 = vmatprep.subr.bf16.mxu0 %v16793_v12 }
 0x19e   :  { %14041 = vmatpush3.bf16.msra.mxu0 %v16793_v12  ;;  %v511_v12 = vld [vmem:[#allocation2 + $0x110] sm:$0xff] }
 0x19f   :  { %14058 = vmatprep.subr.bf16.mxu0 %v16794_v16  ;;  %v17785_v39 = vpack.c.bf16 %v511_v12, %v510_v13 }
 0x1a1   :  { %14027 = vmatmul.mubr.msk.bf16.gmra.mrb[8].mxu0 %vm111_vm0, %v17771_v25 }
 0x1a2   :  { %14030 = vmatprep.mubr.msk.bf16.mxu0 %vm111_vm0, %v516_v58  ;;  %v835_v58 = vpack.c.bf16 %v17583_v22, %v819_v18  ;;  %v16796_v18 = vld [vmem:[%s21658_s3 + $0x40] sm:$0xff]  }
 0x1a9   :  { %14031 = vmatmul.mubr.msk.bf16.gmra.mrb[12].mxu0 %vm111_vm0, %v17777_v2 }
 0x1aa   :  { %14034 = vmatprep.mubr.msk.bf16.mxu0 %vm111_vm0, %v17779_v40 }
 0x1b1   :  { %14035 = vmatmul.mubr.msk.bf16.gmra.mrb[16].mxu0 %vm111_vm0, %v17785_v39 }
 0x1b2   :  { %14042 = vmatprep.mubr.msk.bf16.mxu0 %vm111_vm0, %v835_v58  ;;  %v17809_v58 = vld [vmem:[#allocation2 + $0x72] sm:$0xff] }
 0x1b3   :  { %v17813_v63 = vpack.c.bf16 %v17809_v58, %v17604_v36 }
 0x1b9   :  { %14043 = vmatmul.mubr.msk.bf16.vlgmr.msra.gmra.mrb[4].mxu0 %vm111_vm0, %v17793_v56 }
 0x1ba   :  { %14059 = vmatpush3.bf16.msra.mxu0 %v16794_v16  ;;  %14046 = vmatprep.mubr.msk.bf16.mxu0 %vm111_vm0, %v17800_v52  ;;  %v17821_v16 = vpack.c.bf16 %v17702_v34, %v17673_v11 }
 0x1bb   :  { %14060 = vmatprep.subr.bf16.mxu0 %v16795_v28 }
 0x1be   :  { %14061 = vmatpush3.bf16.msra.mxu0 %v16795_v28  ;;  %v17831_v28 = vld [vmem:[#allocation2 + $0x112] sm:$0xff] }
 0x1bf   :  { %14078 = vmatprep.subr.bf16.mxu0 %v16796_v18  ;;  %v17835_v38 = vpack.c.bf16 %v17831_v28, %v17722_v51 }
 0x1c1   :  { %14047 = vmatmul.mubr.msk.bf16.gmra.mrb[8].mxu0 %vm111_vm0, %v17813_v63 }
 0x1c2   :  { %14050 = vmatprep.mubr.msk.bf16.mxu0 %vm111_vm0, %v839_v37  ;;  %v1013_v37 = vpack.c.bf16 %v498_v5, %v17730_v60  ;;  %v16798_v60 = vld [vmem:[%s21658_s3 + $0x50] sm:$0xff]   ;;  %v1004_v5 = vld [vmem:[#allocation2 + $0x80] sm:$0xff] }
 0x1c3   :  { %v1016_v3 = vpack.c.bf16 %v1004_v5, %v17766_v17  ;;  %v16799_v17 = vld [vmem:[%s21658_s3 + $0x58] sm:$0xff]  }
 0x1c9   :  { %14051 = vmatmul.mubr.msk.bf16.gmra.mrb[12].mxu0 %vm111_vm0, %v17821_v16 }
 0x1ca   :  { %14054 = vmatprep.mubr.msk.bf16.mxu0 %vm111_vm0, %v17825_v55  ;;  %v1015_v55 = vpack.c.bf16 %v502_v21, %v17749_v9  ;;  %v1019_v9 = vpack.c.bf16 %v510_v13, %v509_v27  ;;  %v21770_v13 = vpack.c.bf16 %v17618_v45, %v17616_v44  ;;  %v21772_v44 = vpack.c.bf16 %v17667_v7, %v17665_v6  ;;  %v1190_v45 = vld [vmem:[#allocation2 + $0x121] sm:$0xff] }
 0x1cb   :  { %v21775_v6 = vpack.c.bf16 %v17585_v23, %v17583_v22  ;;  %v16801_v7 = vld [vmem:[%s21658_s3 + $0x68] sm:$0xff]   ;;  %v16802_v22 = vld [vmem:[%s21658_s3 + $0x70] sm:$0xff]  }
 0x1cc   :  { %v1360_v23 = vld [vmem:[#allocation2 + $0x82] sm:$0xff] }
 0x1d1   :  { %14055 = vmatmul.mubr.msk.bf16.gmra.mrb[16].mxu0 %vm111_vm0, %v17835_v38 }
 0x1d2   :  { %14062 = vmatprep.mubr.msk.bf16.mxu0 %vm111_vm0, %v1013_v37 }
 0x1d9   :  { %14063 = vmatmul.mubr.msk.bf16.vlgmr.msra.gmra.mrb[4].mxu0 %vm111_vm0, %v1014_v24  ;;  %v1018_v24 = vpack.c.bf16 %v508_v53, %v507_v26  ;;  %v21771_v53 = vpack.c.bf16 %v17598_v31, %v17596_v30  ;;  %v21773_v30 = vpack.c.bf16 %v17694_v32, %v17692_v29  ;;  %v21774_v31 = vpack.c.bf16 %v17714_v42, %v17712_v41  ;;  %v16811_v26 = vld [vmem:[%s21659_s6 + $0x68] sm:$0xff]  }
 0x1da   :  { %14079 = vmatpush3.bf16.msra.mxu0 %v16796_v18  ;;  %14066 = vmatprep.mubr.msk.bf16.mxu0 %vm111_vm0, %v1015_v55  ;;  %v1012_v55 = vld [vmem:[#allocation2 + $0x120] sm:$0xff]  ;;  %v21776_v29 = vpack.c.bf16 %v17633_v50, %v17631_v49  ;;  %v21777_v32 = vpack.c.bf16 %v17604_v36, %v17602_v35  ;;  %v1372_v41 = vpack.c.bf16 %v1360_v23, %v17809_v58  ;;  %v16812_v18 = vld [vmem:[%s21659_s6 + $0x70] sm:$0xff]  }
 0x1db   :  { %14080 = vmatprep.subr.bf16.mxu0 %v16797_v15  ;;  %v1020_v21 = vpack.c.bf16 %v1012_v55, %v511_v12  ;;  %v21778_v49 = vpack.c.bf16 %v17673_v11, %v17671_v10  ;;  %v21779_v35 = vpack.c.bf16 %v17704_v1, %v17702_v34  ;;  %v21780_v36 = vpack.c.bf16 %v17722_v51, %v17720_v48  ;;  %v1368_v50 = vld [vmem:[#allocation2 + $0x122] sm:$0xff]  ;;  %v16803_v10 = vld [vmem:[%s21658_s3 + $0x78] sm:$0xff]   ;;  %v1539_v34 = vld [vmem:[#allocation2 + $0x90] sm:$0xff] }
 0x1dc   :  { %v1376_v42 = vpack.c.bf16 %v1368_v50, %v17831_v28  ;;  %v16804_v11 = vld [vmem:[%s21658_s3 + $0x80] sm:$0xff]   ;;  %v1551_v1 = vpack.c.bf16 %v1539_v34, %v1004_v5  ;;  %v1547_v48 = vld [vmem:[#allocation2 + $0x130] sm:$0xff] }
 0x1dd   :  { %v1555_v51 = vpack.c.bf16 %v1547_v48, %v1012_v55  ;;  %v2938_v28 = vld [vmem:[#allocation3 + $0x1] sm:$0xff] }
 0x1de   :  { %14081 = vmatpush3.bf16.msra.mxu0 %v16797_v15  ;;  %v21769_v15 = vpack.c.bf16 %v17580_v20, %v17578_v19  ;;  %v16800_v19 = vld [vmem:[%s21658_s3 + $0x60] sm:$0xff]  }
 0x1df   :  { %14098 = vmatprep.subr.bf16.mxu0 %v16798_v60  ;;  %v1182_v20 = vld [vmem:[#allocation2 + $0x81] sm:$0xff] }
 0x1e0   :  { %v1194_v61 = vpack.c.bf16 %v1182_v20, %v17653_v59  ;;  %v1198_v59 = vpack.c.bf16 %v1190_v45, %v17732_v62  ;;  %v16805_v62 = vld [vmem:[%s21658_s3 + $0x88] sm:$0xff]   ;;  %v18005_v5 = vld [vmem:[%s21659_s6] sm:$0xff]  }
 0x1e1   :  { %14067 = vmatmul.mubr.msk.bf16.gmra.mrb[8].mxu0 %vm111_vm0, %v1016_v3 }
 0x1e2   :  { %14070 = vmatprep.mubr.msk.bf16.mxu0 %vm111_vm0, %v1017_v4 }
 0x1e9   :  { %14071 = vmatmul.mubr.msk.bf16.gmra.mrb[12].mxu0 %vm111_vm0, %v1018_v24 }
 0x1ea   :  { %14074 = vmatprep.mubr.msk.bf16.mxu0 %vm111_vm0, %v1019_v9 }
 0x1f1   :  { %14075 = vmatmul.mubr.msk.bf16.gmra.mrb[16].mxu0 %vm111_vm0, %v1020_v21 }
 0x1f2   :  { %14082 = vmatprep.mubr.msk.bf16.mxu0 %vm111_vm0, %v21769_v15 }
 0x1f9   :  { %14083 = vmatmul.mubr.msk.bf16.vlgmr.msra.gmra.mrb[4].mxu0 %vm111_vm0, %v21770_v13 }
 0x1fa   :  { %14099 = vmatpush3.bf16.msra.mxu0 %v16798_v60  ;;  %14086 = vmatprep.mubr.msk.bf16.mxu0 %vm111_vm0, %v21771_v53 }
 0x1fb   :  { %14100 = vmatprep.subr.bf16.mxu0 %v16799_v17 }
 0x1fe   :  { %14101 = vmatpush3.bf16.msra.mxu0 %v16799_v17 }
 0x1ff   :  { %14118 = vmatprep.subr.bf16.mxu0 %v16800_v19 }
 0x201   :  { %14087 = vmatmul.mubr.msk.bf16.gmra.mrb[8].mxu0 %vm111_vm0, %v1194_v61 }
 0x202   :  { %14090 = vmatprep.mubr.msk.bf16.mxu0 %vm111_vm0, %v21772_v44 }
 0x209   :  { %14091 = vmatmul.mubr.msk.bf16.gmra.mrb[12].mxu0 %vm111_vm0, %v21773_v30 }
 0x20a   :  { %14094 = vmatprep.mubr.msk.bf16.mxu0 %vm111_vm0, %v21774_v31 }
 0x211   :  { %14095 = vmatmul.mubr.msk.bf16.gmra.mrb[16].mxu0 %vm111_vm0, %v1198_v59 }
 0x212   :  { %14102 = vmatprep.mubr.msk.bf16.mxu0 %vm111_vm0, %v21775_v6 }
 0x219   :  { %14103 = vmatmul.mubr.msk.bf16.vlgmr.msra.gmra.mrb[4].mxu0 %vm111_vm0, %v21776_v29 }
 0x21a   :  { %14119 = vmatpush3.bf16.msra.mxu0 %v16800_v19  ;;  %14106 = vmatprep.mubr.msk.bf16.mxu0 %vm111_vm0, %v21777_v32 }
 0x21b   :  { %14120 = vmatprep.subr.bf16.mxu0 %v16801_v7 }
 0x21e   :  { %14121 = vmatpush3.bf16.msra.mxu0 %v16801_v7 }
 0x21f   :  { %14138 = vmatprep.subr.bf16.mxu0 %v16802_v22 }
 0x221   :  { %14107 = vmatmul.mubr.msk.bf16.gmra.mrb[8].mxu0 %vm111_vm0, %v1372_v41 }
 0x222   :  { %14110 = vmatprep.mubr.msk.bf16.mxu0 %vm111_vm0, %v21778_v49 }
 0x229   :  { %14111 = vmatmul.mubr.msk.bf16.gmra.mrb[12].mxu0 %vm111_vm0, %v21779_v35 }
 0x22a   :  { %14114 = vmatprep.mubr.msk.bf16.mxu0 %vm111_vm0, %v21780_v36 }
 0x231   :  { %14115 = vmatmul.mubr.msk.bf16.gmra.mrb[16].mxu0 %vm111_vm0, %v1376_v42 }
 0x232   :  { %14122 = vmatprep.mubr.msk.bf16.mxu0 %vm111_vm0, %v17747_v8  ;;  %v16808_v8 = vld [vmem:[%s21659_s6 + $0x50] sm:$0xff]  }
 0x239   :  { %14123 = vmatmul.mubr.msk.bf16.vlgmr.msra.gmra.mrb[4].mxu0 %vm111_vm0, %v17756_v14  ;;  %v16809_v14 = vld [vmem:[%s21659_s6 + $0x58] sm:$0xff]  }
 0x23a   :  { %14139 = vmatpush3.bf16.msra.mxu0 %v16802_v22  ;;  %14126 = vmatprep.mubr.msk.bf16.mxu0 %vm111_vm0, %v17771_v25  ;;  %v16810_v25 = vld [vmem:[%s21659_s6 + $0x60] sm:$0xff]  }
 0x23b   :  { %14140 = vmatprep.subr.bf16.mxu0 %v16803_v10 }
 0x23e   :  { %14141 = vmatpush3.bf16.msra.mxu0 %v16803_v10 }
 0x23f   :  { %14158 = vmatprep.subr.bf16.mxu0 %v16804_v11 }
 0x241   :  { %14127 = vmatmul.mubr.msk.bf16.gmra.mrb[8].mxu0 %vm111_vm0, %v1551_v1 }
 0x242   :  { %14130 = vmatprep.mubr.msk.bf16.mxu0 %vm111_vm0, %v17777_v2 }
 0x249   :  { %14131 = vmatmul.mubr.msk.bf16.gmra.mrb[12].mxu0 %vm111_vm0, %v17779_v40 }
 0x24a   :  { %14134 = vmatprep.mubr.msk.bf16.mxu0 %vm111_vm0, %v17785_v39  ;;  %v1717_v39 = vld [vmem:[#allocation2 + $0x91] sm:$0xff] }
 0x24b   :  { %v1729_v40 = vpack.c.bf16 %v1717_v39, %v1182_v20 }
 0x251   :  { %14135 = vmatmul.mubr.msk.bf16.gmra.mrb[16].mxu0 %vm111_vm0, %v1555_v51 }
 0x252   :  { %14142 = vmatprep.mubr.msk.bf16.mxu0 %vm111_vm0, %v17622_v46  ;;  %v1725_v46 = vld [vmem:[#allocation2 + $0x131] sm:$0xff] }
 0x259   :  { %14143 = vmatmul.mubr.msk.bf16.vlgmr.msra.gmra.mrb[4].mxu0 %vm111_vm0, %v17626_v47  ;;  %v1733_v47 = vpack.c.bf16 %v1725_v46, %v1190_v45 }
 0x25a   :  { %14159 = vmatpush3.bf16.msra.mxu0 %v16804_v11  ;;  %14146 = vmatprep.mubr.msk.bf16.mxu0 %vm111_vm0, %v17657_v0  ;;  %v1895_v0 = vld [vmem:[#allocation2 + $0x92] sm:$0xff] }
 0x25b   :  { %14160 = vmatprep.subr.bf16.mxu0 %v16805_v62 }
 0x25e   :  { %14161 = vmatpush3.bf16.msra.mxu0 %v16805_v62 }
 0x261   :  { %14147 = vmatmul.mubr.msk.bf16.gmra.mrb[8].mxu0 %vm111_vm0, %v1729_v40 }
 0x262   :  { %14150 = vmatprep.mubr.msk.bf16.mxu0 %vm111_vm0, %v17700_v33  ;;  %v1907_v33 = vpack.c.bf16 %v1895_v0, %v1360_v23 }
 0x269   :  { %14151 = vmatmul.mubr.msk.bf16.gmra.mrb[12].mxu0 %vm111_vm0, %v17718_v43  ;;  %v21781_v43 = vld [vmem:[#allocation6_spill] sm:$0xff] }
 0x26a   :  { %14154 = vmatprep.mubr.msk.bf16.mxu0 %vm111_vm0, %v17736_v54 }
 0x271   :  { %14155 = vmatmul.mubr.msk.bf16.gmra.mrb[16].mxu0 %vm111_vm0, %v1733_v47 }
 0x272   :  { %14162 = vmatprep.mubr.msk.bf16.mxu0 %vm111_vm0, %v17793_v56  ;;  %v1903_v56 = vld [vmem:[#allocation2 + $0x132] sm:$0xff] }
 0x273   :  { %v1911_v54 = vpack.c.bf16 %v1903_v56, %v1368_v50 }
 0x279   :  { %14163 = vmatmul.mubr.msk.bf16.vlgmr.msra.gmra.mrb[4].mxu0 %vm111_vm0, %v17800_v52  ;;  %v16807_v52 = vld [vmem:[%s21659_s6 + $0x48] sm:$0xff]  }
 0x27a   :  { %14166 = vmatprep.mubr.msk.bf16.mxu0 %vm111_vm0, %v17813_v63  ;;  %v16806_v63 = vld [vmem:[%s21659_s6 + $0x40] sm:$0xff]  }
 0x27b   :  { %14178 = vmatprep.subr.bf16.mxu1 %v16806_v63 }
 0x27c   :  { %14179 = vmatpush3.bf16.msra.mxu1 %v16806_v63 }
 0x27d   :  { %14180 = vmatprep.subr.bf16.mxu1 %v16807_v52 }
 0x280   :  { %14181 = vmatpush3.bf16.msra.mxu1 %v16807_v52 }
 0x281   :  { %14167 = vmatmul.mubr.msk.bf16.gmra.mrb[8].mxu0 %vm111_vm0, %v1907_v33  ;;  %14182 = vmatprep.subr.bf16.mxu1 %v16808_v8 }
 0x282   :  { %14170 = vmatprep.mubr.msk.bf16.mxu0 %vm111_vm0, %v17821_v16  ;;  %v16813_v16 = vld [vmem:[%s21659_s6 + $0x78] sm:$0xff]  }
 0x284   :  { %14183 = vmatpush3.bf16.msra.mxu1 %v16808_v8 }
 0x285   :  { %14184 = vmatprep.subr.bf16.mxu1 %v16809_v14 }
 0x288   :  { %14185 = vmatpush3.bf16.msra.mxu1 %v16809_v14 }
 0x289   :  { %14171 = vmatmul.mubr.msk.bf16.gmra.mrb[12].mxu0 %vm111_vm0, %v21781_v43  ;;  %14186 = vmatprep.subr.bf16.mxu1 %v16810_v25 }
 0x28a   :  { %14174 = vmatprep.mubr.msk.bf16.mxu0 %vm111_vm0, %v17835_v38  ;;  %v2939_v38 = vld [vmem:[#allocation3 + $0x9] sm:$0xff] }
 0x28b   :  { %v3002_v60 = vpack.c.bf16 %v2939_v38, %v2938_v28 }
 0x28c   :  { %14187 = vmatpush3.bf16.msra.mxu1 %v16810_v25 }
 0x28d   :  { %14188 = vmatprep.subr.bf16.mxu1 %v16811_v26  ;;  %14194 = vmatprep.mubr.bf16.mxu1 %v3002_v60 }
 0x290   :  { %14189 = vmatpush3.bf16.msra.mxu1 %v16811_v26 }
 0x291   :  { %14175 = vmatmul.mubr.msk.bf16.gmra.mrb[16].mxu0 %vm111_vm0, %v1911_v54  ;;  %14190 = vmatprep.subr.bf16.mxu1 %v16812_v18 }
 0x294   :  { %14191 = vmatpush3.bf16.msra.mxu1 %v16812_v18 }
 0x295   :  { %14192 = vmatprep.subr.bf16.mxu1 %v16813_v16 }
 0x298   :  { %14193 = vmatpush3.bf16.msra.mxu1 %v16813_v16 }
 0x299   :  { %14258 = vmatprep.subr.bf16.mxu1 %v18005_v5 }
 0x34c   :  { %v14164_v27 = vpop.f32.mrb[4].mxu0 }
 0x34d   :  { %v1987_v57 = vpop.f32.mrb[5].mxu0 }
 0x34e   :  { %v14165_v2 = vpop.f32.mrb[6].mxu0 }
 0x34f   :  { %v1990_v12 = vpop.f32.mrb[7].mxu0 }
 0x350   :  { %v2066_v58 = vadd.f32 %v1990_v12, %v1987_v57 }
 0x352   :  { %v2067_v37 = vadd.f32 %v14164_v27, %v2066_v58 }
 0x354   :  { %v14168_v3 = vpop.f32.mrb[8].mxu0  ;;  %v2068_v4 = vadd.f32 %v14165_v2, %v2067_v37 }
 0x355   :  { %v2003_v24 = vpop.f32.mrb[9].mxu0 }
 0x356   :  { %v2069_v9 = vadd.f32 %v2068_v4, %v2003_v24  ;;  %v14169_v55 = vpop.f32.mrb[10].mxu0 }
 0x357   :  { %v2006_v21 = vpop.f32.mrb[11].mxu0 }
 0x358   :  { %v2070_v15 = vadd.f32 %v2069_v9, %v2006_v21 }
 0x35a   :  { %v2071_v17 = vadd.f32 %v14168_v3, %v2070_v15 }
 0x35c   :  { %v14172_v13 = vpop.f32.mrb[12].mxu0  ;;  %v2072_v53 = vadd.f32 %v14169_v55, %v2071_v17 }
 0x35d   :  { %v2019_v19 = vpop.f32.mrb[13].mxu0 }
 0x35e   :  { %v2073_v20 = vadd.f32 %v2072_v53, %v2019_v19  ;;  %v14173_v61 = vpop.f32.mrb[14].mxu0 }
 0x35f   :  { %v2022_v44 = vpop.f32.mrb[15].mxu0 }
 0x360   :  { %v2074_v30 = vadd.f32 %v2073_v20, %v2022_v44 }
 0x362   :  { %v2075_v31 = vadd.f32 %v14172_v13, %v2074_v30 }
 0x364   :  { %v14176_v45 = vpop.f32.mrb[16].mxu0  ;;  %v2076_v59 = vadd.f32 %v14173_v61, %v2075_v31 }
 0x365   :  { %v2035_v6 = vpop.f32.mrb[17].mxu0 }
 0x366   :  { %v2077_v7 = vadd.f32 %v2076_v59, %v2035_v6  ;;  %v14177_v29 = vpop.f32.mrb[18].mxu0 }
 0x367   :  { %v2038_v32 = vpop.f32.mrb[19].mxu0 }
 0x368   :  { %v2078_v22 = vadd.f32 %v2077_v7, %v2038_v32 }
 0x36a   :  { %v2079_v23 = vadd.f32 %v14176_v45, %v2078_v22 }
 0x36c   :  { %v2080_v41 = vadd.f32 %v14177_v29, %v2079_v23 }
 0x36e   :  { %v2081_v49 = vrot.slane %v2080_v41, 4 }
 0x370   :  { %v2082_v35 = vadd.f32 %v2081_v49, %v2080_v41  ;;  %v2143_v41 = vld [vmem:[%s21660_s4] sm:$0x1] }
 0x372   :  { %v2083_v36 = vrot.slane %v2082_v35, 2 }
 0x374   :  { %v2084_v50 = vadd.f32 %v2083_v36, %v2082_v35  ;;  %v21782_v36 = vld [vmem:[#allocation5_spill] sm:$0xff] }
 0x376   :  { %v2085_v42 = vrot.slane %v2084_v50, 1 }
 0x378   :  { %v2086_v10 = vadd.f32 %v2085_v42, %v2084_v50 }
 0x37a   :  { %v2088_v11 = vmul.f32 0.0078125, %v2086_v10 }
 0x37c   :  { %v2089_v34 = vsub.f32 %v1987_v57, %v2088_v11  ;;  %v2090_v1 = vsub.f32 %v1990_v12, %v2088_v11  ;;  %v2091_v48 = vsub.f32 %v14164_v27, %v2088_v11  ;;  %v2092_v51 = vsub.f32 %v14165_v2, %v2088_v11 }
 0x37d   :  { %v2093_v62 = vsub.f32 %v2003_v24, %v2088_v11  ;;  %v2094_v39 = vsub.f32 %v2006_v21, %v2088_v11  ;;  %v2095_v40 = vsub.f32 %v14168_v3, %v2088_v11  ;;  %v2096_v46 = vsub.f32 %v14169_v55, %v2088_v11 }
 0x37e   :  { %v18008_v47 = vsub.f32 %v2019_v19, %v2088_v11  ;;  %v18010_v0 = vsub.f32 %v2022_v44, %v2088_v11  ;;  %v18012_v33 = vsub.f32 %v14172_v13, %v2088_v11  ;;  %v18014_v43 = vsub.f32 %v14173_v61, %v2088_v11 }
 0x37f   :  { %v18016_v56 = vsub.f32 %v2035_v6, %v2088_v11  ;;  %v18018_v54 = vsub.f32 %v2038_v32, %v2088_v11  ;;  %v18020_v63 = vsub.f32 %v14176_v45, %v2088_v11  ;;  %v18022_v52 = vsub.f32 %v14177_v29, %v2088_v11 }
 0x380   :  { %v2105_v8 = vmul.f32 %v2089_v34, %v2089_v34  ;;  %v2106_v14 = vmul.f32 %v2090_v1, %v2090_v1  ;;  %v2107_v25 = vmul.f32 %v2091_v48, %v2091_v48  ;;  %v2108_v27 = vmul.f32 %v2092_v51, %v2092_v51 }
 0x381   :  { %v2109_v2 = vmul.f32 %v2093_v62, %v2093_v62  ;;  %v2110_v18 = vmul.f32 %v2094_v39, %v2094_v39  ;;  %v2111_v16 = vmul.f32 %v2095_v40, %v2095_v40  ;;  %v2112_v38 = vmul.f32 %v2096_v46, %v2096_v46 }
 0x382   :  { %v2121_v26 = vadd.f32 %v2106_v14, %v2105_v8  ;;  %v2113_v60 = vmul.f32 %v18008_v47, %v18008_v47  ;;  %v2114_v4 = vmul.f32 %v18010_v0, %v18010_v0  ;;  %v2115_v9 = vmul.f32 %v18012_v33, %v18012_v33 }
 0x383   :  { %v2116_v21 = vmul.f32 %v18014_v43, %v18014_v43  ;;  %v2117_v17 = vmul.f32 %v18016_v56, %v18016_v56  ;;  %v2118_v53 = vmul.f32 %v18018_v54, %v18018_v54  ;;  %v2119_v20 = vmul.f32 %v18020_v63, %v18020_v63 }
 0x384   :  { %v2122_v57 = vadd.f32 %v2121_v26, %v2107_v25  ;;  %v2120_v44 = vmul.f32 %v18022_v52, %v18022_v52 }
 0x386   :  { %v2123_v12 = vadd.f32 %v2122_v57, %v2108_v27  ;;  %v12785_v57 = vld [vmem:[%s21661_s5] ss:$0 sm:$0xff] }
 0x388   :  { %v2124_v58 = vadd.f32 %v2123_v12, %v2109_v2 }
 0x38a   :  { %v2125_v28 = vadd.f32 %v2124_v58, %v2110_v18 }
 0x38c   :  { %v2126_v37 = vadd.f32 %v2125_v28, %v2111_v16 }
 0x38e   :  { %v2127_v3 = vadd.f32 %v2126_v37, %v2112_v38 }
 0x390   :  { %v2128_v24 = vadd.f32 %v2127_v3, %v2113_v60 }
 0x392   :  { %v2129_v55 = vadd.f32 %v2128_v24, %v2114_v4 }
 0x394   :  { %v2130_v15 = vadd.f32 %v2129_v55, %v2115_v9 }
 0x396   :  { %v2131_v13 = vadd.f32 %v2130_v15, %v2116_v21 }
 0x398   :  { %v2132_v19 = vadd.f32 %v2131_v13, %v2117_v17 }
 0x39a   :  { %v2133_v61 = vadd.f32 %v2132_v19, %v2118_v53 }
 0x39c   :  { %v2134_v30 = vadd.f32 %v2133_v61, %v2119_v20 }
 0x39e   :  { %v2135_v31 = vadd.f32 %v2134_v30, %v2120_v44 }
 0x3a0   :  { %v2136_v45 = vrot.slane %v2135_v31, 4 }
 0x3a2   :  { %v2137_v59 = vadd.f32 %v2136_v45, %v2135_v31 }
 0x3a4   :  { %v2138_v6 = vrot.slane %v2137_v59, 2 }
 0x3a6   :  { %v2139_v7 = vadd.f32 %v2138_v6, %v2137_v59 }
 0x3a8   :  { %v2140_v29 = vrot.slane %v2139_v7, 1 }
 0x3aa   :  { %v2141_v32 = vadd.f32 %v2140_v29, %v2139_v7 }
 0x3ac   :  { %v2142_v22 = vmul.f32 0.0078125, %v2141_v32 }
 0x3ae   :  { %v2144_v23 = vadd.f32 1e-05, %v2142_v22 }
 0x3b0   :  { %16950 = vrsqrt.f32 %v2144_v23 }
 0x3ba   :  { %v16951_v49 = vpop.eup %16950 }
 0x3bb   :  { %v2146_v35 = vmul.f32 %v16951_v49, %v2143_v41 }
 0x3bd   :  { %v2151_v50 = vrot.slane %v2146_v35, %v21782_v36 }
 0x3bf   :  { %v2153_v42 = vmul.f32 %v2151_v50, %v2089_v34  ;;  %v2154_v10 = vmul.f32 %v2151_v50, %v2090_v1  ;;  %v2155_v11 = vmul.f32 %v2151_v50, %v2091_v48  ;;  %v2156_v8 = vmul.f32 %v2151_v50, %v2092_v51 }
 0x3c0   :  { %v2157_v14 = vmul.f32 %v2151_v50, %v2093_v62  ;;  %v2158_v25 = vmul.f32 %v2151_v50, %v2094_v39  ;;  %v2159_v26 = vmul.f32 %v2151_v50, %v2095_v40  ;;  %v2160_v27 = vmul.f32 %v2151_v50, %v2096_v46 }
 0x3c1   :  { %v2161_v2 = vmul.f32 %v2151_v50, %v18008_v47  ;;  %v2162_v12 = vmul.f32 %v2151_v50, %v18010_v0  ;;  %v2163_v18 = vmul.f32 %v2151_v50, %v18012_v33  ;;  %v2164_v58 = vmul.f32 %v2151_v50, %v18014_v43  ;;  %v18055_v33 = vld [vmem:[#allocation3 + $0x1b1] sm:$0xff]  ;;  %v18057_v43 = vld [vmem:[#allocation3 + $0x1b9] sm:$0xff] }
 0x3c2   :  { %v2165_v34 = vmul.f32 %v2151_v50, %v18016_v56  ;;  %v2166_v1 = vmul.f32 %v2151_v50, %v18018_v54  ;;  %v2167_v48 = vmul.f32 %v2151_v50, %v18020_v63  ;;  %v2168_v51 = vmul.f32 %v2151_v50, %v18022_v52 }
 0x3c3   :  { %v2176_v62 = vadd.f32 %v12785_v57, %v2153_v42  ;;  %v2177_v39 = vadd.f32 %v12785_v57, %v2154_v10  ;;  %v2178_v40 = vadd.f32 %v12785_v57, %v2155_v11  ;;  %v2179_v46 = vadd.f32 %v12785_v57, %v2156_v8 }
 0x3c4   :  { %v2180_v47 = vadd.f32 %v12785_v57, %v2157_v14  ;;  %v2181_v16 = vadd.f32 %v12785_v57, %v2158_v25  ;;  %v2182_v0 = vadd.f32 %v12785_v57, %v2159_v26  ;;  %v2183_v28 = vadd.f32 %v12785_v57, %v2160_v27 }
 0x3c5   :  { %v2184_v56 = vadd.f32 %v12785_v57, %v2161_v2  ;;  %v2185_v38 = vadd.f32 %v12785_v57, %v2162_v12  ;;  %v2186_v54 = vadd.f32 %v12785_v57, %v2163_v18  ;;  %v2187_v37 = vadd.f32 %v12785_v57, %v2164_v58 }
 0x3c6   :  { %v2188_v63 = vadd.f32 %v12785_v57, %v2165_v34  ;;  %v2189_v60 = vadd.f32 %v12785_v57, %v2166_v1  ;;  %v2190_v52 = vadd.f32 %v12785_v57, %v2167_v48  ;;  %v2191_v3 = vadd.f32 %v12785_v57, %v2168_v51 }
 0x3c7   :  { %v2192_v4 = vmax.f32 %v2176_v62, 0.0  ;;  %v3018_v24 = vpack.c.bf16 %v18057_v43, %v18055_v33  ;;  %v18061_v9 = vmax.f32 %v2177_v39, 0.0  ;;  %v18063_v55 = vmax.f32 %v2178_v40, 0.0 }
 0x3c8   :  { %v18065_v21 = vmax.f32 %v2179_v46, 0.0  ;;  %v18067_v15 = vmax.f32 %v2180_v47, 0.0  ;;  %v18069_v17 = vmax.f32 %v2181_v16, 0.0  ;;  %v18071_v13 = vmax.f32 %v2182_v0, 0.0 }
 0x3c9   :  { %v18073_v53 = vmax.f32 %v2183_v28, 0.0  ;;  %v18075_v19 = vmax.f32 %v2184_v56, 0.0  ;;  %v18077_v20 = vmax.f32 %v2185_v38, 0.0  ;;  %v18079_v61 = vmax.f32 %v2186_v54, 0.0 }
 0x3ca   :  { %v18081_v44 = vmax.f32 %v2187_v37, 0.0  ;;  %v18083_v30 = vmax.f32 %v2189_v60, 0.0  ;;  %v18085_v31 = vmax.f32 %v2188_v63, 0.0  ;;  %v18087_v45 = vmax.f32 %v2190_v52, 0.0 }
 0x3cb   :  { %v2224_v59 = vrot.slane %v2192_v4, 7  ;;  %v2320_v6 = vrot.slane %v2192_v4, 4  ;;  %v18089_v7 = vmax.f32 %v2191_v3, 0.0  ;;  %v2256_v32 = vrot.slane %v2192_v4, 6 }
 0x3cc   :  { %v2237_v29 = vrot.slane %v18083_v30, 7  ;;  %v2288_v22 = vrot.slane %v2192_v4, 5  ;;  %v2269_v23 = vrot.slane %v18083_v30, 6  ;;  %v2365_v41 = vrot.slane %v18083_v30, 3 }
 0x3cd   :  { %v2352_v49 = vrot.slane %v2192_v4, 3  ;;  %v2449_v35 = vsel %vm2448_vm6, %v2192_v4, %v2224_v59  ;;  %v2384_v50 = vrot.slane %v2192_v4, 2  ;;  %v2416_v42 = vrot.slane %v2192_v4, 1 }
 0x3ce   :  { %v2465_v10 = vsel %vm248_vm3, %v2449_v35, %v2224_v59  ;;  %v2225_v11 = vrot.slane %v18061_v9, 7  ;;  %v2257_v25 = vrot.slane %v18061_v9, 6  ;;  %v2289_v26 = vrot.slane %v18061_v9, 5 }
 0x3cf   :  { %v2482_v8 = vsel %vm2481_vm7, %v2465_v10, %v2256_v32  ;;  %v2564_v14 = vsel %vm2448_vm6, %v2320_v6, %v2352_v49  ;;  %v2321_v2 = vrot.slane %v18061_v9, 4  ;;  %v2353_v12 = vrot.slane %v18061_v9, 3 }
 0x3d0   :  { %v2498_v27 = vsel %vm251_vm4, %v2482_v8, %v2256_v32  ;;  %v2580_v57 = vsel %vm248_vm3, %v2564_v14, %v2352_v49  ;;  %v2385_v34 = vrot.slane %v18061_v9, 2  ;;  %v2417_v1 = vrot.slane %v18061_v9, 1 }
 0x3d1   :  { %v2515_v18 = vsel %vm2514_vm8, %v2498_v27, %v2288_v22  ;;  %v2596_v58 = vsel %vm2481_vm7, %v2580_v57, %v2384_v50  ;;  %v2450_v62 = vsel %vm2448_vm6, %v18061_v9, %v2225_v11  ;;  %v2565_v39 = vsel %vm2448_vm6, %v2321_v2, %v2353_v12 }
 0x3d2   :  { %v2531_v48 = vsel %vm254_vm5, %v2515_v18, %v2288_v22  ;;  %v2612_v51 = vsel %vm251_vm4, %v2596_v58, %v2384_v50  ;;  %v2466_v47 = vsel %vm248_vm3, %v2450_v62, %v2225_v11  ;;  %v2581_v16 = vsel %vm248_vm3, %v2565_v39, %v2353_v12 }
 0x3d3   :  { %v2548_v40 = vsel %vm2547_vm9, %v2531_v48, %v2320_v6  ;;  %v2628_v46 = vsel %vm2514_vm8, %v2612_v51, %v2416_v42  ;;  %v2483_v28 = vsel %vm2481_vm7, %v2466_v47, %v2257_v25  ;;  %v2597_v56 = vsel %vm2481_vm7, %v2581_v16, %v2385_v34  ;;  %v16815_v6 = vld [vmem:[%s21659_s6 + $0x8] sm:$0xff]  }
 0x3d4   :  { %v2644_v0 = vsel %vm254_vm5, %v2628_v46, %v2416_v42  ;;  %2762 = vst [vmem:[#allocation3 + $0x19] sm:$0xff] %v2548_v40  ;;  %2764 = vst [vmem:[#allocation3 + $0x31] sm:$0xff] %v2548_v40  ;;  %v2226_v38 = vrot.slane %v18063_v55, 7  ;;  %v2499_v37 = vsel %vm251_vm4, %v2483_v28, %v2257_v25  ;;  %v2613_v63 = vsel %vm251_vm4, %v2597_v56, %v2385_v34 }
 0x3d5   :  { %v2660_v54 = vsel %vm2547_vm9, %v2644_v0, %v2192_v4  ;;  %v2258_v60 = vrot.slane %v18063_v55, 6  ;;  %v2516_v3 = vsel %vm2514_vm8, %v2499_v37, %v2289_v26  ;;  %v2629_v59 = vsel %vm2514_vm8, %v2613_v63, %v2417_v1 }
 0x3d6   :  { %2763 = vst [vmem:[#allocation3 + $0x21] sm:$0xff] %v2660_v54  ;;  %v3003_v52 = vpack.c.bf16 %v2660_v54, %v2548_v40  ;;  %2765 = vst [vmem:[#allocation3 + $0x39] sm:$0xff] %v2660_v54  ;;  %v2290_v32 = vrot.slane %v18063_v55, 5  ;;  %v2532_v4 = vsel %vm254_vm5, %v2516_v3, %v2289_v26  ;;  %v2645_v22 = vsel %vm254_vm5, %v2629_v59, %v2417_v1 }
 0x3d7   :  { %v2322_v49 = vrot.slane %v18063_v55, 4  ;;  %v2354_v35 = vrot.slane %v18063_v55, 3  ;;  %v2549_v50 = vsel %vm2547_vm9, %v2532_v4, %v2321_v2  ;;  %v2661_v42 = vsel %vm2547_vm9, %v2645_v22, %v18061_v9  ;;  %v16816_v2 = vld [vmem:[%s21659_s6 + $0x10] sm:$0xff]  }
 0x3d8   :  { %14195 = vmatmul.mubr.bf16.vlgmr.msra.gmra.mrb[4].mxu1 %v3003_v52  ;;  %v2386_v10 = vrot.slane %v18063_v55, 2  ;;  %v2418_v11 = vrot.slane %v18063_v55, 1  ;;  %2766 = vst [vmem:[#allocation3 + $0x49] sm:$0xff] %v2549_v50  ;;  %2767 = vst [vmem:[#allocation3 + $0x51] sm:$0xff] %v2661_v42  ;;  %v3005_v8 = vpack.c.bf16 %v2661_v42, %v2549_v50  ;;  %v2451_v14 = vsel %vm2448_vm6, %v18063_v55, %v2226_v38 }
 0x3d9   :  { %14259 = vmatpush3.bf16.msra.mxu1 %v18005_v5  ;;  %14198 = vmatprep.mubr.bf16.mxu1 %v3003_v52  ;;  %2768 = vst [vmem:[#allocation3 + $0x61] sm:$0xff] %v2549_v50  ;;  %2769 = vst [vmem:[#allocation3 + $0x69] sm:$0xff] %v2661_v42  ;;  %v2566_v25 = vsel %vm2448_vm6, %v2322_v49, %v2354_v35  ;;  %v2227_v26 = vrot.slane %v18065_v21, 7  ;;  %v2467_v9 = vsel %vm248_vm3, %v2451_v14, %v2226_v38  ;;  %v16817_v38 = vld [vmem:[%s21659_s6 + $0x18] sm:$0xff]  }
 0x3da   :  { %14260 = vmatprep.subr.bf16.mxu1 %v16815_v6  ;;  %v2582_v27 = vsel %vm248_vm3, %v2566_v25, %v2354_v35  ;;  %v2259_v5 = vrot.slane %v18065_v21, 6  ;;  %v2291_v57 = vrot.slane %v18065_v21, 5  ;;  %v2484_v12 = vsel %vm2481_vm7, %v2467_v9, %v2258_v60 }
 0x3db   :  { %v2598_v18 = vsel %vm2481_vm7, %v2582_v27, %v2386_v10  ;;  %v2323_v58 = vrot.slane %v18065_v21, 4  ;;  %v2355_v34 = vrot.slane %v18065_v21, 3  ;;  %v2500_v1 = vsel %vm251_vm4, %v2484_v12, %v2258_v60 }
 0x3dc   :  { %v2614_v48 = vsel %vm251_vm4, %v2598_v18, %v2386_v10  ;;  %v2387_v51 = vrot.slane %v18065_v21, 2  ;;  %v2419_v62 = vrot.slane %v18065_v21, 1  ;;  %v2517_v39 = vsel %vm2514_vm8, %v2500_v1, %v2290_v32  ;;  %v16818_v10 = vld [vmem:[%s21659_s6 + $0x20] sm:$0xff]  }
 0x3dd   :  { %v2630_v40 = vsel %vm2514_vm8, %v2614_v48, %v2418_v11  ;;  %14261 = vmatpush3.bf16.msra.mxu1 %v16815_v6  ;;  %v2452_v46 = vsel %vm2448_vm6, %v18065_v21, %v2227_v26  ;;  %v2567_v47 = vsel %vm2448_vm6, %v2323_v58, %v2355_v34  ;;  %v2533_v16 = vsel %vm254_vm5, %v2517_v39, %v2290_v32 }
 0x3de   :  { %v2646_v0 = vsel %vm254_vm5, %v2630_v40, %v2418_v11  ;;  %v2468_v28 = vsel %vm248_vm3, %v2452_v46, %v2227_v26  ;;  %v2583_v56 = vsel %vm248_vm3, %v2567_v47, %v2355_v34  ;;  %14262 = vmatprep.subr.bf16.mxu1 %v16816_v2  ;;  %v2550_v54 = vsel %vm2547_vm9, %v2533_v16, %v2322_v49  ;;  %v16819_v40 = vld [vmem:[%s21659_s6 + $0x28] sm:$0xff]  }
 0x3df   :  { %v2662_v37 = vsel %vm2547_vm9, %v2646_v0, %v18063_v55  ;;  %v2485_v63 = vsel %vm2481_vm7, %v2468_v28, %v2259_v5  ;;  %v2599_v60 = vsel %vm2481_vm7, %v2583_v56, %v2387_v51  ;;  %v2397_v52 = vrot.slane %v18083_v30, 2  ;;  %2770 = vst [vmem:[#allocation3 + $0x79] sm:$0xff] %v2550_v54  ;;  %2772 = vst [vmem:[#allocation3 + $0x91] sm:$0xff] %v2550_v54 }
 0x3e0   :  { %14199 = vmatmul.mubr.bf16.gmra.mrb[8].mxu1 %v3005_v8  ;;  %2771 = vst [vmem:[#allocation3 + $0x81] sm:$0xff] %v2662_v37  ;;  %2773 = vst [vmem:[#allocation3 + $0x99] sm:$0xff] %v2662_v37  ;;  %v2501_v3 = vsel %vm251_vm4, %v2485_v63, %v2259_v5  ;;  %v2615_v59 = vsel %vm251_vm4, %v2599_v60, %v2387_v51  ;;  %v2228_v6 = vrot.slane %v18067_v15, 7  ;;  %v2260_v22 = vrot.slane %v18067_v15, 6 }
 0x3e1   :  { %14202 = vmatprep.mubr.bf16.mxu1 %v3005_v8  ;;  %v3007_v32 = vpack.c.bf16 %v2662_v37, %v2550_v54  ;;  %v2518_v55 = vsel %vm2514_vm8, %v2501_v3, %v2291_v57  ;;  %v2631_v4 = vsel %vm2514_vm8, %v2615_v59, %v2419_v62  ;;  %14263 = vmatpush3.bf16.msra.mxu1 %v16816_v2  ;;  %v2324_v50 = vrot.slane %v18067_v15, 4 }
 0x3e2   :  { %v2534_v49 = vsel %vm254_vm5, %v2518_v55, %v2291_v57  ;;  %v2647_v35 = vsel %vm254_vm5, %v2631_v4, %v2419_v62  ;;  %v2356_v42 = vrot.slane %v18067_v15, 3  ;;  %14264 = vmatprep.subr.bf16.mxu1 %v16817_v38  ;;  %v2292_v14 = vrot.slane %v18067_v15, 5  ;;  %v16820_v55 = vld [vmem:[%s21659_s6 + $0x30] sm:$0xff]  }
 0x3e3   :  { %v2551_v11 = vsel %vm2547_vm9, %v2534_v49, %v2323_v58  ;;  %v2663_v8 = vsel %vm2547_vm9, %v2647_v35, %v18065_v21  ;;  %v2388_v25 = vrot.slane %v18067_v15, 2  ;;  %v2420_v26 = vrot.slane %v18067_v15, 1 }
 0x3e4   :  { %2774 = vst [vmem:[#allocation3 + $0xa9] sm:$0xff] %v2551_v11  ;;  %2775 = vst [vmem:[#allocation3 + $0xb1] sm:$0xff] %v2663_v8  ;;  %v2453_v9 = vsel %vm2448_vm6, %v18067_v15, %v2228_v6  ;;  %v2568_v27 = vsel %vm2448_vm6, %v2324_v50, %v2356_v42  ;;  %v2229_v5 = vrot.slane %v18069_v17, 7  ;;  %v2261_v2 = vrot.slane %v18069_v17, 6 }
 0x3e5   :  { %2776 = vst [vmem:[#allocation3 + $0xc1] sm:$0xff] %v2551_v11  ;;  %2777 = vst [vmem:[#allocation3 + $0xc9] sm:$0xff] %v2663_v8  ;;  %v2469_v57 = vsel %vm248_vm3, %v2453_v9, %v2228_v6  ;;  %v2584_v21 = vsel %vm248_vm3, %v2568_v27, %v2356_v42  ;;  %v2293_v12 = vrot.slane %v18069_v17, 5  ;;  %14265 = vmatpush3.bf16.msra.mxu1 %v16817_v38  ;;  %v2325_v34 = vrot.slane %v18069_v17, 4 }
 0x3e6   :  { %v2486_v18 = vsel %vm2481_vm7, %v2469_v57, %v2260_v22  ;;  %v2600_v58 = vsel %vm2481_vm7, %v2584_v21, %v2388_v25  ;;  %v2357_v1 = vrot.slane %v18069_v17, 3  ;;  %14266 = vmatprep.subr.bf16.mxu1 %v16818_v10  ;;  %v2389_v62 = vrot.slane %v18069_v17, 2 }
 0x3e7   :  { %v2502_v48 = vsel %vm251_vm4, %v2486_v18, %v2260_v22  ;;  %v2616_v51 = vsel %vm251_vm4, %v2600_v58, %v2388_v25  ;;  %v2421_v39 = vrot.slane %v18069_v17, 1  ;;  %v2454_v16 = vsel %vm2448_vm6, %v18069_v17, %v2229_v5 }
 0x3e8   :  { %14203 = vmatmul.mubr.bf16.gmra.mrb[12].mxu1 %v3007_v32  ;;  %v2519_v46 = vsel %vm2514_vm8, %v2502_v48, %v2292_v14  ;;  %v2632_v47 = vsel %vm2514_vm8, %v2616_v51, %v2420_v26  ;;  %v2569_v0 = vsel %vm2448_vm6, %v2325_v34, %v2357_v1  ;;  %v2470_v38 = vsel %vm248_vm3, %v2454_v16, %v2229_v5 }
 0x3e9   :  { %14206 = vmatprep.mubr.bf16.mxu1 %v3007_v32  ;;  %v2535_v28 = vsel %vm254_vm5, %v2519_v46, %v2292_v14  ;;  %v2648_v56 = vsel %vm254_vm5, %v2632_v47, %v2420_v26  ;;  %v2585_v54 = vsel %vm248_vm3, %v2569_v0, %v2357_v1  ;;  %v2487_v60 = vsel %vm2481_vm7, %v2470_v38, %v2261_v2 }
 0x3ea   :  { %v18227_v37 = vsel %vm2547_vm9, %v2535_v28, %v2324_v50  ;;  %v18231_v63 = vsel %vm2547_vm9, %v2648_v56, %v18067_v15  ;;  %v2601_v3 = vsel %vm2481_vm7, %v2585_v54, %v2389_v62  ;;  %14267 = vmatpush3.bf16.msra.mxu1 %v16818_v10  ;;  %v18239_v59 = vsel %vm2448_vm6, %v18083_v30, %v2237_v29  ;;  %v18291_v28 = vld [vmem:[%s21659_s6 + $0x80] sm:$0xff]  }
 0x3eb   :  { %2778 = vst [vmem:[#allocation3 + $0xd9] sm:$0xff] %v18227_v37  ;;  %2779 = vst [vmem:[#allocation3 + $0xe1] sm:$0xff] %v18231_v63  ;;  %v2503_v15 = vsel %vm251_vm4, %v2487_v60, %v2261_v2  ;;  %v2617_v6 = vsel %vm251_vm4, %v2601_v3, %v2389_v62  ;;  %v2230_v32 = vrot.slane %v18071_v13, 7  ;;  %14268 = vmatprep.subr.bf16.mxu1 %v16819_v40  ;;  %v2262_v35 = vrot.slane %v18071_v13, 6 }
 0x3ec   :  { %2780 = vst [vmem:[#allocation3 + $0xf1] sm:$0xff] %v18227_v37  ;;  %2781 = vst [vmem:[#allocation3 + $0xf9] sm:$0xff] %v18231_v63  ;;  %v3009_v4 = vpack.c.bf16 %v2663_v8, %v2551_v11  ;;  %v2520_v22 = vsel %vm2514_vm8, %v2503_v15, %v2293_v12  ;;  %v2633_v49 = vsel %vm2514_vm8, %v2617_v6, %v2421_v39  ;;  %v2326_v10 = vrot.slane %v18071_v13, 4 }
 0x3ed   :  { %v2536_v50 = vsel %vm254_vm5, %v2520_v22, %v2293_v12  ;;  %v2649_v42 = vsel %vm254_vm5, %v2633_v49, %v2421_v39  ;;  %v2358_v14 = vrot.slane %v18071_v13, 3  ;;  %v2294_v11 = vrot.slane %v18071_v13, 5 }
 0x3ee   :  { %v2553_v25 = vsel %vm2547_vm9, %v2536_v50, %v2325_v34  ;;  %v2665_v26 = vsel %vm2547_vm9, %v2649_v42, %v18069_v17  ;;  %v2390_v8 = vrot.slane %v18071_v13, 2  ;;  %14269 = vmatpush3.bf16.msra.mxu1 %v16819_v40  ;;  %v2422_v9 = vrot.slane %v18071_v13, 1  ;;  %v16821_v17 = vld [vmem:[%s21659_s6 + $0x38] sm:$0xff]  }
 0x3ef   :  { %2782 = vst [vmem:[#allocation3 + $0x109] sm:$0xff] %v2553_v25  ;;  %2783 = vst [vmem:[#allocation3 + $0x111] sm:$0xff] %v2665_v26  ;;  %v2455_v27 = vsel %vm2448_vm6, %v18071_v13, %v2230_v32  ;;  %v2570_v5 = vsel %vm2448_vm6, %v2326_v10, %v2358_v14  ;;  %v2231_v57 = vrot.slane %v18073_v53, 7  ;;  %14270 = vmatprep.subr.bf16.mxu1 %v16820_v55  ;;  %v2263_v12 = vrot.slane %v18073_v53, 6 }
 0x3f0   :  { %2784 = vst [vmem:[#allocation3 + $0x121] sm:$0xff] %v2553_v25  ;;  %2785 = vst [vmem:[#allocation3 + $0x129] sm:$0xff] %v2665_v26  ;;  %14207 = vmatmul.mubr.bf16.gmra.mrb[16].mxu1 %v3009_v4  ;;  %v2471_v21 = vsel %vm248_vm3, %v2455_v27, %v2230_v32  ;;  %v2586_v2 = vsel %vm248_vm3, %v2570_v5, %v2358_v14  ;;  %v2295_v18 = vrot.slane %v18073_v53, 5  ;;  %v2327_v1 = vrot.slane %v18073_v53, 4 }
 0x3f1   :  { %14210 = vmatprep.mubr.bf16.mxu1 %v3009_v4  ;;  %v2488_v58 = vsel %vm2481_vm7, %v2471_v21, %v2262_v35  ;;  %v2602_v34 = vsel %vm2481_vm7, %v2586_v2, %v2390_v8  ;;  %v2359_v48 = vrot.slane %v18073_v53, 3  ;;  %v2391_v39 = vrot.slane %v18073_v53, 2 }
 0x3f2   :  { %v2504_v51 = vsel %vm251_vm4, %v2488_v58, %v2262_v35  ;;  %v2618_v62 = vsel %vm251_vm4, %v2602_v34, %v2390_v8  ;;  %v2423_v40 = vrot.slane %v18073_v53, 1  ;;  %14271 = vmatpush3.bf16.msra.mxu1 %v16820_v55  ;;  %v2456_v16 = vsel %vm2448_vm6, %v18073_v53, %v2231_v57 }
 0x3f3   :  { %v2521_v46 = vsel %vm2514_vm8, %v2504_v51, %v2294_v11  ;;  %v2634_v47 = vsel %vm2514_vm8, %v2618_v62, %v2422_v9  ;;  %v2571_v0 = vsel %vm2448_vm6, %v2327_v1, %v2359_v48  ;;  %14272 = vmatprep.subr.bf16.mxu1 %v16821_v17  ;;  %v2472_v54 = vsel %vm248_vm3, %v2456_v16, %v2231_v57 }
 0x3f4   :  { %v2537_v56 = vsel %vm254_vm5, %v2521_v46, %v2294_v11  ;;  %v2650_v38 = vsel %vm254_vm5, %v2634_v47, %v2422_v9  ;;  %v2587_v60 = vsel %vm248_vm3, %v2571_v0, %v2359_v48  ;;  %v2489_v6 = vsel %vm2481_vm7, %v2472_v54, %v2263_v12 }
 0x3f5   :  { %v18298_v3 = vsel %vm2547_vm9, %v2537_v56, %v2326_v10  ;;  %v18302_v15 = vsel %vm2547_vm9, %v2650_v38, %v18071_v13  ;;  %v2603_v32 = vsel %vm2481_vm7, %v2587_v60, %v2391_v39  ;;  %v3011_v55 = vpack.c.bf16 %v18231_v63, %v18227_v37 }
 0x3f6   :  { %2786 = vst [vmem:[#allocation3 + $0x139] sm:$0xff] %v18298_v3  ;;  %2787 = vst [vmem:[#allocation3 + $0x141] sm:$0xff] %v18302_v15  ;;  %v2505_v4 = vsel %vm251_vm4, %v2489_v6, %v2263_v12  ;;  %v2619_v13 = vsel %vm251_vm4, %v2603_v32, %v2391_v39  ;;  %v2232_v22 = vrot.slane %v18075_v19, 7  ;;  %14273 = vmatpush3.bf16.msra.mxu1 %v16821_v17  ;;  %v2264_v63 = vrot.slane %v18075_v19, 6 }
 0x3f7   :  { %2788 = vst [vmem:[#allocation3 + $0x151] sm:$0xff] %v18298_v3  ;;  %2789 = vst [vmem:[#allocation3 + $0x159] sm:$0xff] %v18302_v15  ;;  %v3013_v49 = vpack.c.bf16 %v2665_v26, %v2553_v25  ;;  %v2522_v35 = vsel %vm2514_vm8, %v2505_v4, %v2295_v18  ;;  %v2635_v37 = vsel %vm2514_vm8, %v2619_v13, %v2423_v40  ;;  %14338 = vmatprep.subr.bf16.mxu1 %v18291_v28 }
 0x3f8   :  { %14211 = vmatmul.mubr.bf16.gmra.mrb[20].mxu1 %v3011_v55  ;;  %v2538_v50 = vsel %vm254_vm5, %v2522_v35, %v2295_v18  ;;  %v2651_v42 = vsel %vm254_vm5, %v2635_v37, %v2423_v40  ;;  %v2328_v10 = vrot.slane %v18075_v19, 4  ;;  %v2360_v14 = vrot.slane %v18075_v19, 3 }
 0x3f9   :  { %14214 = vmatprep.mubr.bf16.mxu1 %v3011_v55  ;;  %v18324_v25 = vsel %vm2547_vm9, %v2538_v50, %v2327_v1  ;;  %v18328_v26 = vsel %vm2547_vm9, %v2651_v42, %v18073_v53  ;;  %v2296_v11 = vrot.slane %v18075_v19, 5  ;;  %v2392_v8 = vrot.slane %v18075_v19, 2 }
 0x3fa   :  { %2790 = vst [vmem:[#allocation3 + $0x169] sm:$0xff] %v18324_v25  ;;  %2791 = vst [vmem:[#allocation3 + $0x171] sm:$0xff] %v18328_v26  ;;  %v2424_v9 = vrot.slane %v18075_v19, 1  ;;  %v2457_v27 = vsel %vm2448_vm6, %v18075_v19, %v2232_v22  ;;  %v2572_v53 = vsel %vm2448_vm6, %v2328_v10, %v2360_v14  ;;  %v2233_v5 = vrot.slane %v18077_v20, 7 }
 0x3fb   :  { %2792 = vst [vmem:[#allocation3 + $0x181] sm:$0xff] %v18324_v25  ;;  %2793 = vst [vmem:[#allocation3 + $0x189] sm:$0xff] %v18328_v26  ;;  %v2473_v57 = vsel %vm248_vm3, %v2457_v27, %v2232_v22  ;;  %v2588_v17 = vsel %vm248_vm3, %v2572_v53, %v2360_v14  ;;  %v2265_v21 = vrot.slane %v18077_v20, 6  ;;  %v2297_v2 = vrot.slane %v18077_v20, 5 }
 0x3fc   :  { %v2490_v12 = vsel %vm2481_vm7, %v2473_v57, %v2264_v63  ;;  %v2604_v18 = vsel %vm2481_vm7, %v2588_v17, %v2392_v8  ;;  %v2329_v58 = vrot.slane %v18077_v20, 4  ;;  %v2361_v34 = vrot.slane %v18077_v20, 3 }
 0x3fd   :  { %v2506_v1 = vsel %vm251_vm4, %v2490_v12, %v2264_v63  ;;  %v2620_v48 = vsel %vm251_vm4, %v2604_v18, %v2392_v8  ;;  %v2393_v51 = vrot.slane %v18077_v20, 2  ;;  %v2425_v62 = vrot.slane %v18077_v20, 1 }
 0x3fe   :  { %v2523_v39 = vsel %vm2514_vm8, %v2506_v1, %v2296_v11  ;;  %v2636_v40 = vsel %vm2514_vm8, %v2620_v48, %v2424_v9  ;;  %v2458_v46 = vsel %vm2448_vm6, %v18077_v20, %v2233_v5  ;;  %v2573_v47 = vsel %vm2448_vm6, %v2329_v58, %v2361_v34 }
 0x3ff   :  { %v2539_v16 = vsel %vm254_vm5, %v2523_v39, %v2296_v11  ;;  %v2652_v0 = vsel %vm254_vm5, %v2636_v40, %v2424_v9  ;;  %v2474_v56 = vsel %vm248_vm3, %v2458_v46, %v2233_v5  ;;  %v2589_v38 = vsel %vm248_vm3, %v2573_v47, %v2361_v34 }
 0x400   :  { %14215 = vmatmul.mubr.bf16.gmra.mrb[24].mxu1 %v3013_v49  ;;  %v18363_v54 = vsel %vm2547_vm9, %v2539_v16, %v2328_v10  ;;  %v18367_v60 = vsel %vm2547_vm9, %v2652_v0, %v18075_v19  ;;  %v2491_v6 = vsel %vm2481_vm7, %v2474_v56, %v2265_v21  ;;  %v2605_v32 = vsel %vm2481_vm7, %v2589_v38, %v2393_v51 }
 0x401   :  { %v18375_v55 = vsel %vm248_vm3, %v18239_v59, %v2237_v29  ;;  %14218 = vmatprep.mubr.bf16.mxu1 %v3013_v49  ;;  %2794 = vst [vmem:[#allocation3 + $0x1c9] sm:$0xff] %v18363_v54  ;;  %2795 = vst [vmem:[#allocation3 + $0x1d1] sm:$0xff] %v18367_v60  ;;  %v2507_v19 = vsel %vm251_vm4, %v2491_v6, %v2265_v21  ;;  %v2621_v4 = vsel %vm251_vm4, %v2605_v32, %v2393_v51 }
 0x402   :  { %2796 = vst [vmem:[#allocation3 + $0x1e1] sm:$0xff] %v18363_v54  ;;  %2797 = vst [vmem:[#allocation3 + $0x1e9] sm:$0xff] %v18367_v60  ;;  %v2234_v13 = vrot.slane %v18079_v61, 7  ;;  %v3015_v22 = vpack.c.bf16 %v18302_v15, %v18298_v3  ;;  %v2524_v29 = vsel %vm2514_vm8, %v2507_v19, %v2297_v2  ;;  %v2637_v59 = vsel %vm2514_vm8, %v2621_v4, %v2425_v62 }
 0x403   :  { %v2266_v49 = vrot.slane %v18079_v61, 6  ;;  %v2540_v35 = vsel %vm254_vm5, %v2524_v29, %v2297_v2  ;;  %v2653_v37 = vsel %vm254_vm5, %v2637_v59, %v2425_v62  ;;  %v2330_v63 = vrot.slane %v18079_v61, 4 }
 0x404   :  { %v2362_v50 = vrot.slane %v18079_v61, 3  ;;  %v18394_v42 = vsel %vm2547_vm9, %v2540_v35, %v2329_v58  ;;  %v18398_v3 = vsel %vm2547_vm9, %v2653_v37, %v18077_v20  ;;  %v2298_v15 = vrot.slane %v18079_v61, 5 }
 0x405   :  { %v2394_v10 = vrot.slane %v18079_v61, 2  ;;  %2798 = vst [vmem:[#allocation3 + $0x1f9] sm:$0xff] %v18394_v42  ;;  %2799 = vst [vmem:[#allocation3 + $0x201] sm:$0xff] %v18398_v3  ;;  %v2426_v14 = vrot.slane %v18079_v61, 1  ;;  %v2459_v11 = vsel %vm2448_vm6, %v18079_v61, %v2234_v13  ;;  %v2235_v8 = vrot.slane %v18081_v44, 7 }
 0x406   :  { %2800 = vst [vmem:[#allocation3 + $0x211] sm:$0xff] %v18394_v42  ;;  %2801 = vst [vmem:[#allocation3 + $0x219] sm:$0xff] %v18398_v3  ;;  %v2574_v20 = vsel %vm2448_vm6, %v2330_v63, %v2362_v50  ;;  %v2475_v9 = vsel %vm248_vm3, %v2459_v11, %v2234_v13  ;;  %v2267_v53 = vrot.slane %v18081_v44, 6  ;;  %v2299_v5 = vrot.slane %v18081_v44, 5 }
 0x407   :  { %v2590_v27 = vsel %vm248_vm3, %v2574_v20, %v2362_v50  ;;  %v2492_v57 = vsel %vm2481_vm7, %v2475_v9, %v2266_v49  ;;  %v2331_v21 = vrot.slane %v18081_v44, 4  ;;  %v2363_v2 = vrot.slane %v18081_v44, 3 }
 0x408   :  { %v2606_v17 = vsel %vm2481_vm7, %v2590_v27, %v2394_v10  ;;  %14219 = vmatmul.mubr.bf16.gmra.mrb[28].mxu1 %v3015_v22  ;;  %v2508_v12 = vsel %vm251_vm4, %v2492_v57, %v2266_v49  ;;  %v2395_v58 = vrot.slane %v18081_v44, 2  ;;  %v2427_v34 = vrot.slane %v18081_v44, 1 }
 0x409   :  { %v2622_v18 = vsel %vm251_vm4, %v2606_v17, %v2394_v10  ;;  %14222 = vmatprep.mubr.bf16.mxu1 %v3015_v22  ;;  %v2525_v1 = vsel %vm2514_vm8, %v2508_v12, %v2298_v15  ;;  %v2460_v51 = vsel %vm2448_vm6, %v18081_v44, %v2235_v8  ;;  %v2575_v62 = vsel %vm2448_vm6, %v2331_v21, %v2363_v2 }
 0x40a   :  { %v2638_v48 = vsel %vm2514_vm8, %v2622_v18, %v2426_v14  ;;  %v2541_v39 = vsel %vm254_vm5, %v2525_v1, %v2298_v15  ;;  %v2476_v46 = vsel %vm248_vm3, %v2460_v51, %v2235_v8  ;;  %v2591_v47 = vsel %vm248_vm3, %v2575_v62, %v2363_v2 }
 0x40b   :  { %v2654_v40 = vsel %vm254_vm5, %v2638_v48, %v2426_v14  ;;  %v18433_v16 = vsel %vm2547_vm9, %v2541_v39, %v2330_v63  ;;  %v2493_v56 = vsel %vm2481_vm7, %v2476_v46, %v2267_v53  ;;  %v2607_v38 = vsel %vm2481_vm7, %v2591_v47, %v2395_v58 }
 0x40c   :  { %v18437_v0 = vsel %vm2547_vm9, %v2654_v40, %v18079_v61  ;;  %v3017_v6 = vpack.c.bf16 %v18328_v26, %v18324_v25  ;;  %2802 = vst [vmem:[#allocation3 + $0x229] sm:$0xff] %v18433_v16  ;;  %2804 = vst [vmem:[#allocation3 + $0x241] sm:$0xff] %v18433_v16  ;;  %v2509_v32 = vsel %vm251_vm4, %v2493_v56, %v2267_v53  ;;  %v2236_v19 = vrot.slane %v18085_v31, 7 }
 0x40d   :  { %2803 = vst [vmem:[#allocation3 + $0x231] sm:$0xff] %v18437_v0  ;;  %2805 = vst [vmem:[#allocation3 + $0x249] sm:$0xff] %v18437_v0  ;;  %v2623_v61 = vsel %vm251_vm4, %v2607_v38, %v2395_v58  ;;  %v3019_v4 = vpack.c.bf16 %v18367_v60, %v18363_v54  ;;  %v2526_v13 = vsel %vm2514_vm8, %v2509_v32, %v2299_v5  ;;  %v2268_v26 = vrot.slane %v18085_v31, 6 }
 0x40e   :  { %v2639_v25 = vsel %vm2514_vm8, %v2623_v61, %v2427_v34  ;;  %v2542_v22 = vsel %vm254_vm5, %v2526_v13, %v2299_v5  ;;  %v2332_v59 = vrot.slane %v18085_v31, 4  ;;  %v2364_v49 = vrot.slane %v18085_v31, 3 }
 0x40f   :  { %v2655_v29 = vsel %vm254_vm5, %v2639_v25, %v2427_v34  ;;  %v18460_v35 = vsel %vm2547_vm9, %v2542_v22, %v2331_v21  ;;  %v2300_v60 = vrot.slane %v18085_v31, 5  ;;  %v2396_v37 = vrot.slane %v18085_v31, 2 }
 0x410   :  { %v18464_v54 = vsel %vm2547_vm9, %v2655_v29, %v18081_v44  ;;  %14223 = vmatmul.mubr.bf16.gmra.mrb[32].mxu1 %v3017_v6  ;;  %2806 = vst [vmem:[#allocation3 + $0x259] sm:$0xff] %v18460_v35  ;;  %2808 = vst [vmem:[#allocation3 + $0x271] sm:$0xff] %v18460_v35  ;;  %v2428_v63 = vrot.slane %v18085_v31, 1  ;;  %v2461_v50 = vsel %vm2448_vm6, %v18085_v31, %v2236_v19  ;;  %v2301_v15 = vrot.slane %v18083_v30, 5 }
 0x411   :  { %2807 = vst [vmem:[#allocation3 + $0x261] sm:$0xff] %v18464_v54  ;;  %2809 = vst [vmem:[#allocation3 + $0x279] sm:$0xff] %v18464_v54  ;;  %v2576_v44 = vsel %vm2448_vm6, %v2332_v59, %v2364_v49  ;;  %14226 = vmatprep.mubr.bf16.mxu1 %v3018_v24  ;;  %v2477_v10 = vsel %vm248_vm3, %v2461_v50, %v2236_v19  ;;  %v2333_v11 = vrot.slane %v18083_v30, 4  ;;  %v2429_v20 = vrot.slane %v18083_v30, 1 }
 0x412   :  { %v2592_v14 = vsel %vm248_vm3, %v2576_v44, %v2364_v49  ;;  %v2494_v8 = vsel %vm2481_vm7, %v2477_v10, %v2268_v26  ;;  %v2495_v27 = vsel %vm2481_vm7, %v18375_v55, %v2269_v23  ;;  %v2238_v33 = vrot.slane %v18087_v45, 7 }
 0x413   :  { %v2608_v9 = vsel %vm2481_vm7, %v2592_v14, %v2396_v37  ;;  %v2510_v43 = vsel %vm251_vm4, %v2494_v8, %v2268_v26  ;;  %v2511_v53 = vsel %vm251_vm4, %v2495_v27, %v2269_v23  ;;  %v2577_v5 = vsel %vm2448_vm6, %v2333_v11, %v2365_v41 }
 0x414   :  { %v2624_v24 = vsel %vm251_vm4, %v2608_v9, %v2396_v37  ;;  %v2527_v57 = vsel %vm2514_vm8, %v2510_v43, %v2300_v60  ;;  %v2528_v55 = vsel %vm2514_vm8, %v2511_v53, %v2301_v15  ;;  %v2593_v21 = vsel %vm248_vm3, %v2577_v5, %v2365_v41 }
 0x415   :  { %v2640_v17 = vsel %vm2514_vm8, %v2624_v24, %v2428_v63  ;;  %v2543_v2 = vsel %vm254_vm5, %v2527_v57, %v2300_v60  ;;  %v2544_v23 = vsel %vm254_vm5, %v2528_v55, %v2301_v15  ;;  %v2609_v18 = vsel %vm2481_vm7, %v2593_v21, %v2397_v52 }
 0x416   :  { %v2656_v12 = vsel %vm254_vm5, %v2640_v17, %v2428_v63  ;;  %v18512_v58 = vsel %vm2547_vm9, %v2543_v2, %v2332_v59  ;;  %v18519_v1 = vsel %vm2547_vm9, %v2544_v23, %v2333_v11  ;;  %v2625_v41 = vsel %vm251_vm4, %v2609_v18, %v2397_v52  ;;  %v2830_v23 = vld [vmem:[#allocation3 + $0x30] sm:$0xff]  ;;  %v2831_v18 = vld [vmem:[#allocation3 + $0x38] sm:$0xff] }
 0x417   :  { %v18516_v34 = vsel %vm2547_vm9, %v2656_v12, %v18085_v31  ;;  %v3021_v48 = vpack.c.bf16 %v18398_v3, %v18394_v42  ;;  %2810 = vst [vmem:[#allocation3 + $0x289] sm:$0xff] %v18512_v58  ;;  %2812 = vst [vmem:[#allocation3 + $0x2a1] sm:$0xff] %v18512_v58  ;;  %v2641_v31 = vsel %vm2514_vm8, %v2625_v41, %v2429_v20  ;;  %v2270_v51 = vrot.slane %v18087_v45, 6  ;;  %v2829_v12 = vld [vmem:[#allocation3 + $0x20] sm:$0xff]  ;;  %v16824_v41 = vld [vmem:[%s21659_s6 + $0x90] sm:$0xff]  }
 0x418   :  { %2811 = vst [vmem:[#allocation3 + $0x291] sm:$0xff] %v18516_v34  ;;  %2813 = vst [vmem:[#allocation3 + $0x2a9] sm:$0xff] %v18516_v34  ;;  %14227 = vmatmul.mubr.bf16.gmra.mrb[36].mxu1 %v3019_v4  ;;  %v2657_v52 = vsel %vm254_vm5, %v2641_v31, %v2429_v20  ;;  %v2334_v42 = vrot.slane %v18087_v45, 4  ;;  %v2366_v3 = vrot.slane %v18087_v45, 3  ;;  %v2302_v39 = vrot.slane %v18087_v45, 5  ;;  %v2833_v31 = vld [vmem:[#allocation3 + $0x50] sm:$0xff] }
 0x419   :  { %2814 = vst [vmem:[#allocation3 + $0x2b9] sm:$0xff] %v18519_v1  ;;  %2816 = vst [vmem:[#allocation3 + $0x2d1] sm:$0xff] %v18519_v1  ;;  %14230 = vmatprep.mubr.bf16.mxu1 %v3019_v4  ;;  %v2673_v62 = vsel %vm2547_vm9, %v2657_v52, %v18083_v30  ;;  %v2463_v40 = vsel %vm2448_vm6, %v18087_v45, %v2238_v33  ;;  %v2239_v46 = vrot.slane %v18089_v7, 7  ;;  %v2398_v47 = vrot.slane %v18087_v45, 2  ;;  %v2834_v52 = vld [vmem:[#allocation3 + $0x60] sm:$0xff] }
 0x41a   :  { %2815 = vst [vmem:[#allocation3 + $0x2c1] sm:$0xff] %v2673_v62  ;;  %2817 = vst [vmem:[#allocation3 + $0x2d9] sm:$0xff] %v2673_v62  ;;  %v2430_v56 = vrot.slane %v18087_v45, 1  ;;  %v2479_v38 = vsel %vm248_vm3, %v2463_v40, %v2238_v33  ;;  %v2578_v6 = vsel %vm2448_vm6, %v2334_v42, %v2366_v3  ;;  %v2271_v61 = vrot.slane %v18089_v7, 6  ;;  %v2837_v40 = vld [vmem:[#allocation3 + $0x80] sm:$0xff] }
 0x41b   :  { %v2496_v32 = vsel %vm2481_vm7, %v2479_v38, %v2270_v51  ;;  %v2594_v30 = vsel %vm248_vm3, %v2578_v6, %v2366_v3  ;;  %v2335_v19 = vrot.slane %v18089_v7, 4  ;;  %v2303_v25 = vrot.slane %v18089_v7, 5  ;;  %v16825_v3 = vld [vmem:[%s21659_s6 + $0x98] sm:$0xff]   ;;  %v16827_v38 = vld [vmem:[%s21659_s6 + $0xa8] sm:$0xff]  }
 0x41c   :  { %v2512_v4 = vsel %vm251_vm4, %v2496_v32, %v2270_v51  ;;  %v2610_v13 = vsel %vm2481_vm7, %v2594_v30, %v2398_v47  ;;  %v2367_v26 = vrot.slane %v18089_v7, 3  ;;  %v2399_v59 = vrot.slane %v18089_v7, 2  ;;  %v2835_v51 = vld [vmem:[#allocation3 + $0x68] sm:$0xff]  ;;  %v16828_v32 = vld [vmem:[%s21659_s6 + $0xb0] sm:$0xff]  }
 0x41d   :  { %v2529_v22 = vsel %vm2514_vm8, %v2512_v4, %v2302_v39  ;;  %v2626_v29 = vsel %vm251_vm4, %v2610_v13, %v2398_v47  ;;  %v2464_v49 = vsel %vm2448_vm6, %v18089_v7, %v2239_v46  ;;  %v2431_v20 = vrot.slane %v18089_v7, 1  ;;  %v2839_v47 = vld [vmem:[#allocation3 + $0x98] sm:$0xff]  ;;  %v2840_v30 = vld [vmem:[#allocation3 + $0xa8] sm:$0xff] }
 0x41e   :  { %v2545_v60 = vsel %vm254_vm5, %v2529_v22, %v2302_v39  ;;  %v2642_v37 = vsel %vm2514_vm8, %v2626_v29, %v2430_v56  ;;  %v2480_v63 = vsel %vm248_vm3, %v2464_v49, %v2239_v46  ;;  %v2579_v50 = vsel %vm2448_vm6, %v2335_v19, %v2367_v26  ;;  %v2836_v39 = vld [vmem:[#allocation3 + $0x78] sm:$0xff]  ;;  %v2838_v46 = vld [vmem:[#allocation3 + $0x90] sm:$0xff]  ;;  %v2843_v4 = vld [vmem:[#allocation3 + $0xc8] sm:$0xff] }
 0x41f   :  { %v2562_v44 = vsel %vm2547_vm9, %v2545_v60, %v2334_v42  ;;  %v2658_v15 = vsel %vm254_vm5, %v2642_v37, %v2430_v56  ;;  %v2497_v10 = vsel %vm2481_vm7, %v2480_v63, %v2271_v61  ;;  %v2595_v14 = vsel %vm248_vm3, %v2579_v50, %v2367_v26  ;;  %v18640_v22 = vld [vmem:[%s21659_s6 + $0xc0] sm:$0xff]   ;;  %v2844_v29 = vld [vmem:[#allocation3 + $0xd8] sm:$0xff]  ;;  %v2846_v49 = vld [vmem:[#allocation3 + $0xf0] sm:$0xff] }
 0x420   :  { %14231 = vmatmul.mubr.bf16.gmra.mrb[40].mxu1 %v3021_v48  ;;  %v2674_v11 = vsel %vm2547_vm9, %v2658_v15, %v18087_v45  ;;  %2818 = vst [vmem:[#allocation3 + $0x2e9] sm:$0xff] %v2562_v44  ;;  %2820 = vst [vmem:[#allocation3 + $0x301] sm:$0xff] %v2562_v44  ;;  %v2513_v8 = vsel %vm251_vm4, %v2497_v10, %v2271_v61  ;;  %v2611_v9 = vsel %vm2481_vm7, %v2595_v14, %v2399_v59  ;;  %v2841_v61 = vld [vmem:[#allocation3 + $0xb0] sm:$0xff]  ;;  %v2847_v60 = vld [vmem:[#allocation3 + $0xf8] sm:$0xff] }
 0x421   :  { %14234 = vmatprep.mubr.bf16.mxu1 %v3021_v48  ;;  %2819 = vst [vmem:[#allocation3 + $0x2f1] sm:$0xff] %v2674_v11  ;;  %2821 = vst [vmem:[#allocation3 + $0x309] sm:$0xff] %v2674_v11  ;;  %v2530_v27 = vsel %vm2514_vm8, %v2513_v8, %v2303_v25  ;;  %v2627_v33 = vsel %vm251_vm4, %v2611_v9, %v2399_v59  ;;  %v3023_v57 = vpack.c.bf16 %v18437_v0, %v18433_v16  ;;  %v2826_v16 = vld [vmem:[#allocation3] sm:$0xff]  ;;  %v18588_v0 = vld [vmem:[#allocation3 + $0x8] sm:$0xff] }
 0x422   :  { %v2546_v43 = vsel %vm254_vm5, %v2530_v27, %v2303_v25  ;;  %v2643_v24 = vsel %vm2514_vm8, %v2627_v33, %v2431_v20  ;;  %v3025_v17 = vpack.c.bf16 %v18464_v54, %v18460_v35  ;;  %v3027_v55 = vpack.c.bf16 %v18516_v34, %v18512_v58  ;;  %v2828_v54 = vld [vmem:[#allocation3 + $0x18] sm:$0xff]  ;;  %v16823_v34 = vld [vmem:[%s21659_s6 + $0x88] sm:$0xff]   ;;  %v2845_v59 = vld [vmem:[#allocation3 + $0xe0] sm:$0xff] }
 0x423   :  { %v2563_v45 = vsel %vm2547_vm9, %v2546_v43, %v2335_v19  ;;  %v2659_v53 = vsel %vm254_vm5, %v2643_v24, %v2431_v20  ;;  %v3031_v21 = vpack.c.bf16 %v2674_v11, %v2562_v44  ;;  %v2890_v2 = vpack.c.bf16 %v18588_v0, %v2826_v16  ;;  %v2832_v48 = vld [vmem:[#allocation3 + $0x48] sm:$0xff]  ;;  %v2842_v19 = vld [vmem:[#allocation3 + $0xc0] sm:$0xff]  ;;  %v16829_v25 = vld [vmem:[%s21659_s6 + $0xb8] sm:$0xff]  }
 0x424   :  { %v2675_v5 = vsel %vm2547_vm9, %v2659_v53, %v18089_v7  ;;  %2822 = vst [vmem:[#allocation3 + $0x319] sm:$0xff] %v2563_v45  ;;  %2824 = vst [vmem:[#allocation3 + $0x331] sm:$0xff] %v2563_v45  ;;  %v3029_v7 = vpack.c.bf16 %v2673_v62, %v18519_v1  ;;  %v18591_v58 = vpack.c.bf16 %v2829_v12, %v2828_v54  ;;  %v16826_v62 = vld [vmem:[%s21659_s6 + $0xa0] sm:$0xff]   ;;  %v2848_v50 = vld [vmem:[#allocation3 + $0x108] sm:$0xff] }
 0x425   :  { %2823 = vst [vmem:[#allocation3 + $0x321] sm:$0xff] %v2675_v5  ;;  %2825 = vst [vmem:[#allocation3 + $0x339] sm:$0xff] %v2675_v5  ;;  %v3033_v35 = vpack.c.bf16 %v2675_v5, %v2563_v45  ;;  %v18596_v1 = vpack.c.bf16 %v2831_v18, %v2830_v23  ;;  %v18604_v42 = vpack.c.bf16 %v2833_v31, %v2832_v48  ;;  %v2849_v44 = vld [vmem:[#allocation3 + $0x110] sm:$0xff]  ;;  %v2850_v15 = vld [vmem:[#allocation3 + $0x120] sm:$0xff] }
 0x426   :  { %v18616_v56 = vpack.c.bf16 %v2837_v40, %v2836_v39  ;;  %v18621_v6 = vpack.c.bf16 %v2839_v47, %v2838_v46  ;;  %v18628_v13 = vpack.c.bf16 %v2841_v61, %v2840_v30  ;;  %v18633_v26 = vpack.c.bf16 %v2843_v4, %v2842_v19  ;;  %v2851_v10 = vld [vmem:[#allocation3 + $0x128] sm:$0xff]  ;;  %v2852_v20 = vld [vmem:[#allocation3 + $0x138] sm:$0xff]  ;;  %v2853_v8 = vld [vmem:[#allocation3 + $0x140] sm:$0xff] }
 0x427   :  { %v18642_v37 = vpack.c.bf16 %v2845_v59, %v2844_v29  ;;  %v18645_v63 = vpack.c.bf16 %v2847_v60, %v2846_v49  ;;  %v18649_v14 = vpack.c.bf16 %v2849_v44, %v2848_v50  ;;  %v18651_v11 = vpack.c.bf16 %v2851_v10, %v2850_v15  ;;  %v2854_v9 = vld [vmem:[#allocation3 + $0x150] sm:$0xff]  ;;  %v2855_v27 = vld [vmem:[#allocation3 + $0x158] sm:$0xff]  ;;  %v2856_v45 = vld [vmem:[#allocation3 + $0x168] sm:$0xff] }
 0x428   :  { %14235 = vmatmul.mubr.bf16.gmra.mrb[44].mxu1 %v3023_v57  ;;  %v18655_v33 = vpack.c.bf16 %v2853_v8, %v2852_v20  ;;  %v18657_v43 = vpack.c.bf16 %v2855_v27, %v2854_v9  ;;  %v2858_v24 = vld [vmem:[#allocation3 + $0x1b0] sm:$0xff]  ;;  %v2865_v54 = vld [vmem:[#allocation3 + $0x200] sm:$0xff]  ;;  %v2867_v12 = vld [vmem:[#allocation3 + $0x218] sm:$0xff] }
 0x429   :  { %14238 = vmatprep.mubr.bf16.mxu1 %v3023_v57  ;;  %v2857_v53 = vld [vmem:[#allocation3 + $0x170] sm:$0xff]  ;;  %v2906_v5 = vpack.c.bf16 %v18588_v0, %v2858_v24  ;;  %v2870_v48 = vld [vmem:[#allocation3 + $0x240] sm:$0xff]  ;;  %v2871_v31 = vld [vmem:[#allocation3 + $0x248] sm:$0xff] }
 0x42a   :  { %v18662_v57 = vpack.c.bf16 %v2857_v53, %v2856_v45  ;;  %v2866_v0 = vld [vmem:[#allocation3 + $0x210] sm:$0xff]  ;;  %v2875_v40 = vld [vmem:[#allocation3 + $0x278] sm:$0xff]  ;;  %v2878_v30 = vld [vmem:[#allocation3 + $0x2a0] sm:$0xff] }
 0x42b   :  { %v18673_v18 = vpack.c.bf16 %v2867_v12, %v2866_v0  ;;  %v2874_v39 = vld [vmem:[#allocation3 + $0x270] sm:$0xff]  ;;  %v2879_v61 = vld [vmem:[#allocation3 + $0x2a8] sm:$0xff]  ;;  %v2881_v29 = vld [vmem:[#allocation3 + $0x2c0] sm:$0xff] }
 0x42c   :  { %v18685_v47 = vpack.c.bf16 %v2875_v40, %v2874_v39  ;;  %v18691_v4 = vpack.c.bf16 %v2879_v61, %v2878_v30  ;;  %v2882_v59 = vld [vmem:[#allocation3 + $0x2d0] sm:$0xff]  ;;  %v2883_v49 = vld [vmem:[#allocation3 + $0x2d8] sm:$0xff]  ;;  %v2884_v44 = vld [vmem:[#allocation3 + $0x2e8] sm:$0xff] }
 0x42d   :  { %v18697_v50 = vpack.c.bf16 %v2883_v49, %v2882_v59  ;;  %v2885_v15 = vld [vmem:[#allocation3 + $0x2f0] sm:$0xff]  ;;  %v2886_v10 = vld [vmem:[#allocation3 + $0x300] sm:$0xff]  ;;  %v2887_v20 = vld [vmem:[#allocation3 + $0x308] sm:$0xff] }
 0x42e   :  { %v18701_v8 = vpack.c.bf16 %v2885_v15, %v2884_v44  ;;  %v18703_v9 = vpack.c.bf16 %v2887_v20, %v2886_v10  ;;  %v3725_v27 = vld [vmem:[#allocation3 + $0x2] sm:$0xff]  ;;  %v3726_v24 = vld [vmem:[#allocation3 + $0xa] sm:$0xff]  ;;  %v2888_v45 = vld [vmem:[#allocation3 + $0x318] sm:$0xff] }
 0x42f   :  { %v2889_v53 = vld [vmem:[#allocation3 + $0x320] sm:$0xff]  ;;  %v16831_v0 = vld [vmem:[%s21659_s6 + $0xc8] sm:$0xff]   ;;  %v16833_v39 = vld [vmem:[%s21659_s6 + $0xd8] sm:$0xff]  }
 0x430   :  { %14239 = vmatmul.mubr.bf16.gmra.mrb[48].mxu1 %v3025_v17  ;;  %v16834_v40 = vld [vmem:[%s21659_s6 + $0xe0] sm:$0xff]   ;;  %v3737_v30 = vld [vmem:[#allocation3 + $0x92] sm:$0xff]  ;;  %v3739_v44 = vld [vmem:[#allocation3 + $0xaa] sm:$0xff] }
 0x431   :  { %14242 = vmatprep.mubr.bf16.mxu1 %v3025_v17  ;;  %v2860_v17 = vld [vmem:[#allocation3 + $0x1c8] sm:$0xff]  ;;  %v3738_v61 = vld [vmem:[#allocation3 + $0x9a] sm:$0xff]  ;;  %v16836_v49 = vld [vmem:[%s21659_s6 + $0xf0] sm:$0xff]  }
 0x432   :  { %v18740_v59 = vpack.c.bf16 %v3738_v61, %v3737_v30  ;;  %v3740_v15 = vld [vmem:[#allocation3 + $0xb2] sm:$0xff]  ;;  %v3741_v10 = vld [vmem:[#allocation3 + $0xc2] sm:$0xff]  ;;  %v3742_v20 = vld [vmem:[#allocation3 + $0xca] sm:$0xff] }
 0x433   :  { %v3754_v30 = vld [vmem:[#allocation3 + $0x15a] sm:$0xff] }
 0x438   :  { %14243 = vmatmul.mubr.bf16.gmra.mrb[52].mxu1 %v3027_v55 }
 0x439   :  { %14246 = vmatprep.mubr.bf16.mxu1 %v3027_v55  ;;  %v2861_v55 = vld [vmem:[#allocation3 + $0x1d0] sm:$0xff] }
 0x43a   :  { %v18665_v16 = vpack.c.bf16 %v2861_v55, %v2860_v17  ;;  %v18707_v17 = vpack.c.bf16 %v2889_v53, %v2888_v45  ;;  %v3727_v55 = vld [vmem:[#allocation3 + $0x1a] sm:$0xff]  ;;  %v18752_v45 = vpack.c.bf16 %v3742_v20, %v3741_v10  ;;  %v3756_v10 = vld [vmem:[#allocation3 + $0x172] sm:$0xff] }
 0x43b   :  { %v18759_v53 = vld [vmem:[%s21659_s6 + $0x100] sm:$0xff]  }
 0x440   :  { %14247 = vmatmul.mubr.bf16.gmra.mrb[56].mxu1 %v3029_v7 }
 0x441   :  { %14250 = vmatprep.mubr.bf16.mxu1 %v3029_v7  ;;  %v2862_v7 = vld [vmem:[#allocation3 + $0x1e0] sm:$0xff] }
 0x448   :  { %14251 = vmatmul.mubr.bf16.gmra.mrb[60].mxu1 %v3031_v21 }
 0x449   :  { %14254 = vmatprep.mubr.bf16.mxu1 %v3031_v21  ;;  %v2863_v21 = vld [vmem:[#allocation3 + $0x1e8] sm:$0xff] }
 0x450   :  { %14255 = vmatmul.mubr.bf16.gmra.mrb[64].mxu1 %v3033_v35  ;;  %v2864_v35 = vld [vmem:[#allocation3 + $0x1f8] sm:$0xff] }
 0x451   :  { %14274 = vmatprep.mubr.bf16.mxu1 %v2890_v2  ;;  %v18667_v2 = vpack.c.bf16 %v2863_v21, %v2862_v7  ;;  %v18671_v23 = vpack.c.bf16 %v2865_v54, %v2864_v35  ;;  %v3728_v7 = vld [vmem:[#allocation3 + $0x22] sm:$0xff]  ;;  %v3729_v21 = vld [vmem:[#allocation3 + $0x32] sm:$0xff]  ;;  %v3730_v35 = vld [vmem:[#allocation3 + $0x3a] sm:$0xff] }
 0x452   :  { %v18710_v54 = vpack.c.bf16 %v3728_v7, %v3727_v55  ;;  %v18715_v12 = vpack.c.bf16 %v3730_v35, %v3729_v21  ;;  %v3744_v55 = vld [vmem:[#allocation3 + $0xe2] sm:$0xff]  ;;  %v3745_v7 = vld [vmem:[#allocation3 + $0xf2] sm:$0xff]  ;;  %v3746_v21 = vld [vmem:[#allocation3 + $0xfa] sm:$0xff] }
 0x458   :  { %14275 = vmatmul.mubr.bf16.vlgmr.msra.gmra.mrb[4].mxu1 %v18591_v58 }
 0x459   :  { %14339 = vmatpush3.bf16.msra.mxu1 %v18291_v28  ;;  %14278 = vmatprep.mubr.bf16.mxu1 %v18596_v1  ;;  %v18609_v28 = vpack.c.bf16 %v2835_v51, %v2834_v52  ;;  %v18679_v51 = vpack.c.bf16 %v2871_v31, %v2870_v48  ;;  %v3732_v48 = vld [vmem:[#allocation3 + $0x52] sm:$0xff]  ;;  %v3733_v31 = vld [vmem:[#allocation3 + $0x62] sm:$0xff] }
 0x45a   :  { %14340 = vmatprep.subr.bf16.mxu1 %v16823_v34 }
 0x45d   :  { %14341 = vmatpush3.bf16.msra.mxu1 %v16823_v34  ;;  %v2868_v34 = vld [vmem:[#allocation3 + $0x228] sm:$0xff] }
 0x45e   :  { %14342 = vmatprep.subr.bf16.mxu1 %v16824_v41 }
 0x460   :  { %14279 = vmatmul.mubr.bf16.gmra.mrb[8].mxu1 %v18604_v42 }
 0x461   :  { %14282 = vmatprep.mubr.bf16.mxu1 %v18609_v28  ;;  %14343 = vmatpush3.bf16.msra.mxu1 %v16824_v41  ;;  %v2869_v41 = vld [vmem:[#allocation3 + $0x230] sm:$0xff] }
 0x462   :  { %14344 = vmatprep.subr.bf16.mxu1 %v16825_v3  ;;  %v18677_v52 = vpack.c.bf16 %v2869_v41, %v2868_v34  ;;  %v16832_v34 = vld [vmem:[%s21659_s6 + $0xd0] sm:$0xff]  }
 0x463   :  { %v3731_v41 = vld [vmem:[#allocation3 + $0x4a] sm:$0xff] }
 0x465   :  { %14345 = vmatpush3.bf16.msra.mxu1 %v16825_v3  ;;  %v2872_v3 = vld [vmem:[#allocation3 + $0x258] sm:$0xff] }
 0x466   :  { %14346 = vmatprep.subr.bf16.mxu1 %v16826_v62 }
 0x468   :  { %14283 = vmatmul.mubr.bf16.gmra.mrb[12].mxu1 %v18616_v56 }
 0x469   :  { %14286 = vmatprep.mubr.bf16.mxu1 %v18621_v6  ;;  %14347 = vmatpush3.bf16.msra.mxu1 %v16826_v62  ;;  %v2873_v62 = vld [vmem:[#allocation3 + $0x260] sm:$0xff] }
 0x46a   :  { %14348 = vmatprep.subr.bf16.mxu1 %v16827_v38  ;;  %v18683_v46 = vpack.c.bf16 %v2873_v62, %v2872_v3  ;;  %v3734_v3 = vld [vmem:[#allocation3 + $0x6a] sm:$0xff]  ;;  %v18723_v62 = vpack.c.bf16 %v3732_v48, %v3731_v41  ;;  %v3748_v41 = vld [vmem:[#allocation3 + $0x112] sm:$0xff]  ;;  %v3749_v48 = vld [vmem:[#allocation3 + $0x122] sm:$0xff] }
 0x46d   :  { %14349 = vmatpush3.bf16.msra.mxu1 %v16827_v38  ;;  %v2876_v38 = vld [vmem:[#allocation3 + $0x288] sm:$0xff] }
 0x46e   :  { %14350 = vmatprep.subr.bf16.mxu1 %v16828_v32 }
 0x470   :  { %14287 = vmatmul.mubr.bf16.gmra.mrb[16].mxu1 %v18628_v13 }
 0x471   :  { %14290 = vmatprep.mubr.bf16.mxu1 %v18633_v26  ;;  %14351 = vmatpush3.bf16.msra.mxu1 %v16828_v32  ;;  %v2877_v32 = vld [vmem:[#allocation3 + $0x290] sm:$0xff] }
 0x472   :  { %14352 = vmatprep.subr.bf16.mxu1 %v16829_v25  ;;  %v18689_v19 = vpack.c.bf16 %v2877_v32, %v2876_v38  ;;  %v3735_v38 = vld [vmem:[#allocation3 + $0x7a] sm:$0xff]  ;;  %v3736_v32 = vld [vmem:[#allocation3 + $0x82] sm:$0xff] }
 0x475   :  { %14353 = vmatpush3.bf16.msra.mxu1 %v16829_v25  ;;  %v2880_v25 = vld [vmem:[#allocation3 + $0x2b8] sm:$0xff] }
 0x476   :  { %14418 = vmatprep.subr.bf16.mxu1 %v18640_v22  ;;  %v18695_v60 = vpack.c.bf16 %v2881_v29, %v2880_v25  ;;  %v18735_v25 = vpack.c.bf16 %v3736_v32, %v3735_v38  ;;  %v16835_v29 = vld [vmem:[%s21659_s6 + $0xe8] sm:$0xff]   ;;  %v3753_v32 = vld [vmem:[#allocation3 + $0x152] sm:$0xff] }
 0x477   :  { %v3752_v38 = vld [vmem:[#allocation3 + $0x142] sm:$0xff] }
 0x478   :  { %14291 = vmatmul.mubr.bf16.gmra.mrb[20].mxu1 %v18642_v37 }
 0x479   :  { %14294 = vmatprep.mubr.bf16.mxu1 %v18645_v63 }
 0x480   :  { %14295 = vmatmul.mubr.bf16.gmra.mrb[24].mxu1 %v18649_v14 }
 0x481   :  { %14298 = vmatprep.mubr.bf16.mxu1 %v18651_v11 }
 0x488   :  { %14299 = vmatmul.mubr.bf16.gmra.mrb[28].mxu1 %v18655_v33 }
 0x489   :  { %14302 = vmatprep.mubr.bf16.mxu1 %v18657_v43 }
 0x490   :  { %14303 = vmatmul.mubr.bf16.gmra.mrb[32].mxu1 %v18662_v57 }
 0x491   :  { %14306 = vmatprep.mubr.bf16.mxu1 %v2906_v5  ;;  %v3789_v5 = vpack.c.bf16 %v3726_v24, %v3725_v27  ;;  %v18747_v27 = vpack.c.bf16 %v3740_v15, %v3739_v44  ;;  %v16837_v24 = vld [vmem:[%s21659_s6 + $0xf8] sm:$0xff]   ;;  %v3755_v15 = vld [vmem:[#allocation3 + $0x16a] sm:$0xff] }
 0x492   :  { %v3758_v44 = vld [vmem:[#allocation3 + $0x1ba] sm:$0xff] }
 0x498   :  { %14307 = vmatmul.mubr.bf16.gmra.mrb[36].mxu1 %v18665_v16 }
 0x499   :  { %14310 = vmatprep.mubr.bf16.mxu1 %v18667_v2 }
 0x4a0   :  { %14311 = vmatmul.mubr.bf16.gmra.mrb[40].mxu1 %v18671_v23 }
 0x4a1   :  { %14314 = vmatprep.mubr.bf16.mxu1 %v18673_v18 }
 0x4a8   :  { %14315 = vmatmul.mubr.bf16.gmra.mrb[44].mxu1 %v18677_v52 }
 0x4a9   :  { %14318 = vmatprep.mubr.bf16.mxu1 %v18679_v51 }
 0x4b0   :  { %14319 = vmatmul.mubr.bf16.gmra.mrb[48].mxu1 %v18683_v46 }
 0x4b1   :  { %14322 = vmatprep.mubr.bf16.mxu1 %v18685_v47 }
 0x4b8   :  { %14323 = vmatmul.mubr.bf16.gmra.mrb[52].mxu1 %v18689_v19 }
 0x4b9   :  { %14326 = vmatprep.mubr.bf16.mxu1 %v18691_v4 }
 0x4c0   :  { %14327 = vmatmul.mubr.bf16.gmra.mrb[56].mxu1 %v18695_v60 }
 0x4c1   :  { %14330 = vmatprep.mubr.bf16.mxu1 %v18697_v50 }
 0x4c8   :  { %14331 = vmatmul.mubr.bf16.gmra.mrb[60].mxu1 %v18701_v8 }
 0x4c9   :  { %14334 = vmatprep.mubr.bf16.mxu1 %v18703_v9 }
 0x4d0   :  { %14335 = vmatmul.mubr.bf16.gmra.mrb[64].mxu1 %v18707_v17 }
 0x4d1   :  { %14354 = vmatprep.mubr.bf16.mxu1 %v3789_v5  ;;  %v3743_v5 = vld [vmem:[#allocation3 + $0xda] sm:$0xff] }
 0x4d2   :  { %v18761_v35 = vpack.c.bf16 %v3744_v55, %v3743_v5  ;;  %v3759_v5 = vld [vmem:[#allocation3 + $0x1ca] sm:$0xff]  ;;  %v3760_v55 = vld [vmem:[#allocation3 + $0x1d2] sm:$0xff] }
 0x4d8   :  { %14355 = vmatmul.mubr.bf16.vlgmr.msra.gmra.mrb[4].mxu1 %v18710_v54 }
 0x4d9   :  { %14419 = vmatpush3.bf16.msra.mxu1 %v18640_v22  ;;  %14358 = vmatprep.mubr.bf16.mxu1 %v18715_v12  ;;  %v18728_v22 = vpack.c.bf16 %v3734_v3, %v3733_v31  ;;  %v3750_v31 = vld [vmem:[#allocation3 + $0x12a] sm:$0xff] }
 0x4da   :  { %14420 = vmatprep.subr.bf16.mxu1 %v16831_v0 }
 0x4dd   :  { %14421 = vmatpush3.bf16.msra.mxu1 %v16831_v0  ;;  %v18764_v0 = vpack.c.bf16 %v3746_v21, %v3745_v7  ;;  %v3761_v7 = vld [vmem:[#allocation3 + $0x1e2] sm:$0xff]  ;;  %v3762_v21 = vld [vmem:[#allocation3 + $0x1ea] sm:$0xff] }
 0x4de   :  { %14422 = vmatprep.subr.bf16.mxu1 %v16832_v34 }
 0x4e0   :  { %14359 = vmatmul.mubr.bf16.gmra.mrb[8].mxu1 %v18723_v62 }
 0x4e1   :  { %14362 = vmatprep.mubr.bf16.mxu1 %v18728_v22  ;;  %14423 = vmatpush3.bf16.msra.mxu1 %v16832_v34  ;;  %v3747_v34 = vld [vmem:[#allocation3 + $0x10a] sm:$0xff] }
 0x4e2   :  { %14424 = vmatprep.subr.bf16.mxu1 %v16833_v39  ;;  %v18768_v3 = vpack.c.bf16 %v3748_v41, %v3747_v34  ;;  %v18783_v34 = vpack.c.bf16 %v3760_v55, %v3759_v5  ;;  %v18785_v41 = vpack.c.bf16 %v3762_v21, %v3761_v7  ;;  %v3771_v55 = vld [vmem:[#allocation3 + $0x25a] sm:$0xff]  ;;  %v3772_v7 = vld [vmem:[#allocation3 + $0x262] sm:$0xff]  ;;  %v3773_v21 = vld [vmem:[#allocation3 + $0x272] sm:$0xff] }
 0x4e5   :  { %14425 = vmatpush3.bf16.msra.mxu1 %v16833_v39  ;;  %v18770_v39 = vpack.c.bf16 %v3750_v31, %v3749_v48  ;;  %v3763_v48 = vld [vmem:[#allocation3 + $0x1fa] sm:$0xff]  ;;  %v3764_v31 = vld [vmem:[#allocation3 + $0x202] sm:$0xff] }
 0x4e6   :  { %14426 = vmatprep.subr.bf16.mxu1 %v16834_v40 }
 0x4e8   :  { %14363 = vmatmul.mubr.bf16.gmra.mrb[12].mxu1 %v18735_v25 }
 0x4e9   :  { %14366 = vmatprep.mubr.bf16.mxu1 %v18740_v59  ;;  %14427 = vmatpush3.bf16.msra.mxu1 %v16834_v40  ;;  %v3751_v40 = vld [vmem:[#allocation3 + $0x13a] sm:$0xff] }
 0x4ea   :  { %14428 = vmatprep.subr.bf16.mxu1 %v16835_v29  ;;  %v18774_v61 = vpack.c.bf16 %v3752_v38, %v3751_v40  ;;  %v3765_v40 = vld [vmem:[#allocation3 + $0x212] sm:$0xff]  ;;  %v3766_v38 = vld [vmem:[#allocation3 + $0x21a] sm:$0xff] }
 0x4ed   :  { %14429 = vmatpush3.bf16.msra.mxu1 %v16835_v29  ;;  %v18776_v29 = vpack.c.bf16 %v3754_v30, %v3753_v32  ;;  %v18789_v32 = vpack.c.bf16 %v3764_v31, %v3763_v48  ;;  %v18791_v30 = vpack.c.bf16 %v3766_v38, %v3765_v40  ;;  %v3774_v48 = vld [vmem:[#allocation3 + $0x27a] sm:$0xff]  ;;  %v18801_v31 = vpack.c.bf16 %v3772_v7, %v3771_v55  ;;  %v3775_v38 = vld [vmem:[#allocation3 + $0x28a] sm:$0xff]  ;;  %v3780_v7 = vld [vmem:[#allocation3 + $0x2c2] sm:$0xff] }
 0x4ee   :  { %14430 = vmatprep.subr.bf16.mxu1 %v16836_v49  ;;  %v18803_v40 = vpack.c.bf16 %v3774_v48, %v3773_v21  ;;  %v3779_v55 = vld [vmem:[#allocation3 + $0x2ba] sm:$0xff]  ;;  %v3781_v21 = vld [vmem:[#allocation3 + $0x2d2] sm:$0xff] }
 0x4ef   :  { %21784 = vst [vmem:[#allocation7_spill] sm:$0xff] %v18801_v31  ;;  %v3782_v48 = vld [vmem:[#allocation3 + $0x2da] sm:$0xff] }
 0x4f0   :  { %14367 = vmatmul.mubr.bf16.gmra.mrb[16].mxu1 %v18747_v27  ;;  %21785 = vst [vmem:[#allocation8_spill] sm:$0xff] %v18803_v40 }
 0x4f1   :  { %14370 = vmatprep.mubr.bf16.mxu1 %v18752_v45  ;;  %14431 = vmatpush3.bf16.msra.mxu1 %v16836_v49  ;;  %v3757_v49 = vld [vmem:[#allocation3 + $0x1b2] sm:$0xff] }
 0x4f2   :  { %14432 = vmatprep.subr.bf16.mxu1 %v16837_v24  ;;  %v3805_v20 = vpack.c.bf16 %v3758_v44, %v3757_v49  ;;  %v3767_v49 = vld [vmem:[#allocation3 + $0x22a] sm:$0xff]  ;;  %v3768_v44 = vld [vmem:[#allocation3 + $0x232] sm:$0xff] }
 0x4f5   :  { %14433 = vmatpush3.bf16.msra.mxu1 %v16837_v24  ;;  %v18780_v24 = vpack.c.bf16 %v3756_v10, %v3755_v15  ;;  %v3769_v15 = vld [vmem:[#allocation3 + $0x242] sm:$0xff]  ;;  %v3770_v10 = vld [vmem:[#allocation3 + $0x24a] sm:$0xff] }
 0x4f6   :  { %14498 = vmatprep.subr.bf16.mxu1 %v18759_v53  ;;  %v18797_v5 = vpack.c.bf16 %v3770_v10, %v3769_v15  ;;  %v3778_v15 = vld [vmem:[#allocation3 + $0x2aa] sm:$0xff] }
 0x4f8   :  { %14371 = vmatmul.mubr.bf16.gmra.mrb[20].mxu1 %v18761_v35  ;;  %21783 = vst [vmem:[#allocation6_spill] sm:$0xff] %v18797_v5 }
 0x4f9   :  { %14374 = vmatprep.mubr.bf16.mxu1 %v18764_v0 }
 0x500   :  { %14375 = vmatmul.mubr.bf16.gmra.mrb[24].mxu1 %v18768_v3 }
 0x501   :  { %14378 = vmatprep.mubr.bf16.mxu1 %v18770_v39 }
 0x508   :  { %14379 = vmatmul.mubr.bf16.gmra.mrb[28].mxu1 %v18774_v61 }
 0x509   :  { %14382 = vmatprep.mubr.bf16.mxu1 %v18776_v29 }
 0x510   :  { %14383 = vmatmul.mubr.bf16.gmra.mrb[32].mxu1 %v18780_v24 }
 0x511   :  { %14386 = vmatprep.mubr.bf16.mxu1 %v3805_v20  ;;  %v18795_v20 = vpack.c.bf16 %v3768_v44, %v3767_v49  ;;  %v3776_v49 = vld [vmem:[#allocation3 + $0x292] sm:$0xff]  ;;  %v3777_v44 = vld [vmem:[#allocation3 + $0x2a2] sm:$0xff] }
 0x512   :  { %v18807_v10 = vpack.c.bf16 %v3776_v49, %v3775_v38  ;;  %v18809_v36 = vpack.c.bf16 %v3778_v15, %v3777_v44  ;;  %v3783_v38 = vld [vmem:[#allocation3 + $0x2ea] sm:$0xff]  ;;  %v3784_v49 = vld [vmem:[#allocation3 + $0x2f2] sm:$0xff]  ;;  %v3785_v44 = vld [vmem:[#allocation3 + $0x302] sm:$0xff] }
 0x513   :  { %v3786_v15 = vld [vmem:[#allocation3 + $0x30a] sm:$0xff] }
 0x514   :  { %21786 = vst [vmem:[#allocation9_spill] sm:$0xff] %v18807_v10 }
 0x518   :  { %14387 = vmatmul.mubr.bf16.gmra.mrb[36].mxu1 %v18783_v34 }
 0x519   :  { %14390 = vmatprep.mubr.bf16.mxu1 %v18785_v41 }
 0x520   :  { %14391 = vmatmul.mubr.bf16.gmra.mrb[40].mxu1 %v18789_v32 }
 0x521   :  { %14394 = vmatprep.mubr.bf16.mxu1 %v18791_v30 }
 0x528   :  { %14395 = vmatmul.mubr.bf16.gmra.mrb[44].mxu1 %v18795_v20 }
 0x529   :  { %14398 = vmatprep.mubr.bf16.mxu1 %v18797_v5  ;;  %v18813_v5 = vpack.c.bf16 %v3780_v7, %v3779_v55  ;;  %v3787_v55 = vld [vmem:[#allocation3 + $0x31a] sm:$0xff]  ;;  %v3788_v7 = vld [vmem:[#allocation3 + $0x322] sm:$0xff] }
 0x530   :  { %14399 = vmatmul.mubr.bf16.gmra.mrb[48].mxu1 %v18801_v31  ;;  %v18815_v31 = vpack.c.bf16 %v3782_v48, %v3781_v21  ;;  %v18825_v21 = vpack.c.bf16 %v3788_v7, %v3787_v55  ;;  %v16839_v48 = vld [vmem:[%s21659_s6 + $0x108] sm:$0xff]   ;;  %v4766_v55 = vld [vmem:[#allocation3 + $0xb1] sm:$0xff] }
 0x531   :  { %14402 = vmatprep.mubr.bf16.mxu1 %v18803_v40  ;;  %v18819_v40 = vpack.c.bf16 %v3784_v49, %v3783_v38  ;;  %v16840_v38 = vld [vmem:[%s21659_s6 + $0x110] sm:$0xff]  }
 0x532   :  { %v4763_v49 = vld [vmem:[#allocation3 + $0x91] sm:$0xff] }
 0x538   :  { %14403 = vmatmul.mubr.bf16.gmra.mrb[52].mxu1 %v18807_v10  ;;  %v18821_v10 = vpack.c.bf16 %v3786_v15, %v3785_v44  ;;  %v4764_v44 = vld [vmem:[#allocation3 + $0x99] sm:$0xff]  ;;  %v4765_v15 = vld [vmem:[#allocation3 + $0xa9] sm:$0xff] }
 0x539   :  { %14406 = vmatprep.mubr.bf16.mxu1 %v18809_v36  ;;  %v18913_v7 = vpack.c.bf16 %v4764_v44, %v4763_v49 }
 0x540   :  { %14407 = vmatmul.mubr.bf16.gmra.mrb[56].mxu1 %v18813_v5 }
 0x541   :  { %14410 = vmatprep.mubr.bf16.mxu1 %v18815_v31 }
 0x548   :  { %14411 = vmatmul.mubr.bf16.gmra.mrb[60].mxu1 %v18819_v40 }
 0x549   :  { %14414 = vmatprep.mubr.bf16.mxu1 %v18821_v10 }
 0x550   :  { %14415 = vmatmul.mubr.bf16.gmra.mrb[64].mxu1 %v18825_v21 }
 0x551   :  { %14434 = vmatprep.mubr.bf16.mxu1 %v18591_v58  ;;  %v16841_v58 = vld [vmem:[%s21659_s6 + $0x118] sm:$0xff]  }
 0x558   :  { %14435 = vmatmul.mubr.bf16.vlgmr.msra.gmra.mrb[4].mxu1 %v18596_v1  ;;  %v16842_v1 = vld [vmem:[%s21659_s6 + $0x120] sm:$0xff]  }
 0x559   :  { %14499 = vmatpush3.bf16.msra.mxu1 %v18759_v53  ;;  %14438 = vmatprep.mubr.bf16.mxu1 %v18604_v42  ;;  %v16843_v42 = vld [vmem:[%s21659_s6 + $0x128] sm:$0xff]   ;;  %v16850_v53 = vld [vmem:[%s21659_s6 + $0x160] sm:$0xff]  }
 0x55a   :  { %14500 = vmatprep.subr.bf16.mxu1 %v16839_v48 }
 0x55d   :  { %14501 = vmatpush3.bf16.msra.mxu1 %v16839_v48  ;;  %v16851_v48 = vld [vmem:[%s21659_s6 + $0x168] sm:$0xff]  }
 0x55e   :  { %14502 = vmatprep.subr.bf16.mxu1 %v16840_v38 }
 0x560   :  { %14439 = vmatmul.mubr.bf16.gmra.mrb[8].mxu1 %v18609_v28  ;;  %v16844_v28 = vld [vmem:[%s21659_s6 + $0x130] sm:$0xff]  }
 0x561   :  { %14442 = vmatprep.mubr.bf16.mxu1 %v18616_v56  ;;  %14503 = vmatpush3.bf16.msra.mxu1 %v16840_v38  ;;  %v16845_v56 = vld [vmem:[%s21659_s6 + $0x138] sm:$0xff]   ;;  %v18918_v38 = vpack.c.bf16 %v4766_v55, %v4765_v15  ;;  %v4783_v15 = vld [vmem:[#allocation3 + $0x181] sm:$0xff]  ;;  %v4784_v55 = vld [vmem:[#allocation3 + $0x189] sm:$0xff] }
 0x562   :  { %14504 = vmatprep.subr.bf16.mxu1 %v16841_v58 }
 0x565   :  { %14505 = vmatpush3.bf16.msra.mxu1 %v16841_v58  ;;  %v16852_v58 = vld [vmem:[%s21659_s6 + $0x170] sm:$0xff]  }
 0x566   :  { %14506 = vmatprep.subr.bf16.mxu1 %v16842_v1 }
 0x568   :  { %14443 = vmatmul.mubr.bf16.gmra.mrb[12].mxu1 %v18621_v6  ;;  %v16846_v6 = vld [vmem:[%s21659_s6 + $0x140] sm:$0xff]  }
 0x569   :  { %14446 = vmatprep.mubr.bf16.mxu1 %v18628_v13  ;;  %14507 = vmatpush3.bf16.msra.mxu1 %v16842_v1  ;;  %v4269_v13 = vld [vmem:[#allocation3 + $0x180] sm:$0xff] }
 0x56a   :  { %14508 = vmatprep.subr.bf16.mxu1 %v16843_v42  ;;  %v4767_v1 = vld [vmem:[#allocation3 + $0xc1] sm:$0xff] }
 0x56d   :  { %14509 = vmatpush3.bf16.msra.mxu1 %v16843_v42  ;;  %v4768_v42 = vld [vmem:[#allocation3 + $0xc9] sm:$0xff] }
 0x56e   :  { %14510 = vmatprep.subr.bf16.mxu1 %v16844_v28 }
 0x570   :  { %14447 = vmatmul.mubr.bf16.gmra.mrb[16].mxu1 %v18633_v26  ;;  %v4270_v26 = vld [vmem:[#allocation3 + $0x188] sm:$0xff] }
 0x571   :  { %14450 = vmatprep.mubr.bf16.mxu1 %v18642_v37  ;;  %14511 = vmatpush3.bf16.msra.mxu1 %v16844_v28  ;;  %v18868_v37 = vpack.c.bf16 %v4270_v26, %v4269_v13  ;;  %v4769_v28 = vld [vmem:[#allocation3 + $0xd9] sm:$0xff] }
 0x572   :  { %14512 = vmatprep.subr.bf16.mxu1 %v16845_v56  ;;  %v16853_v13 = vld [vmem:[%s21659_s6 + $0x178] sm:$0xff]  }
 0x575   :  { %14513 = vmatpush3.bf16.msra.mxu1 %v16845_v56  ;;  %v4770_v56 = vld [vmem:[#allocation3 + $0xe1] sm:$0xff] }
 0x576   :  { %14578 = vmatprep.subr.bf16.mxu1 %v16846_v6  ;;  %v18930_v26 = vpack.c.bf16 %v4770_v56, %v4769_v28  ;;  %v4787_v28 = vld [vmem:[#allocation3 + $0x1e1] sm:$0xff]  ;;  %v4788_v56 = vld [vmem:[#allocation3 + $0x1e9] sm:$0xff] }
 0x578   :  { %14451 = vmatmul.mubr.bf16.gmra.mrb[20].mxu1 %v18645_v63  ;;  %v4301_v63 = vld [vmem:[#allocation3 + $0x330] sm:$0xff] }
 0x579   :  { %14454 = vmatprep.mubr.bf16.mxu1 %v18649_v14  ;;  %v4302_v14 = vld [vmem:[#allocation3 + $0x338] sm:$0xff] }
 0x580   :  { %14455 = vmatmul.mubr.bf16.gmra.mrb[24].mxu1 %v18651_v11  ;;  %v4753_v11 = vld [vmem:[#allocation3 + $0x19] sm:$0xff] }
 0x581   :  { %14458 = vmatprep.mubr.bf16.mxu1 %v18655_v33  ;;  %v4754_v33 = vld [vmem:[#allocation3 + $0x21] sm:$0xff] }
 0x588   :  { %14459 = vmatmul.mubr.bf16.gmra.mrb[28].mxu1 %v18657_v43  ;;  %v18886_v43 = vpack.c.bf16 %v4302_v14, %v4301_v63  ;;  %v18937_v63 = vld [vmem:[%s21659_s6 + $0x180] sm:$0xff]   ;;  %v4771_v14 = vld [vmem:[#allocation3 + $0xf1] sm:$0xff] }
 0x589   :  { %14462 = vmatprep.mubr.bf16.mxu1 %v18662_v57  ;;  %v4817_v57 = vpack.c.bf16 %v4754_v33, %v4753_v11  ;;  %v4772_v11 = vld [vmem:[#allocation3 + $0xf9] sm:$0xff]  ;;  %v4773_v33 = vld [vmem:[#allocation3 + $0x109] sm:$0xff] }
 0x590   :  { %14463 = vmatmul.mubr.bf16.gmra.mrb[32].mxu1 %v18868_v37 }
 0x591   :  { %14466 = vmatprep.mubr.bf16.mxu1 %v18665_v16  ;;  %v4755_v16 = vld [vmem:[#allocation3 + $0x31] sm:$0xff] }
 0x598   :  { %14467 = vmatmul.mubr.bf16.gmra.mrb[36].mxu1 %v18667_v2  ;;  %v4756_v2 = vld [vmem:[#allocation3 + $0x39] sm:$0xff] }
 0x599   :  { %14470 = vmatprep.mubr.bf16.mxu1 %v18671_v23  ;;  %v4757_v23 = vld [vmem:[#allocation3 + $0x49] sm:$0xff] }
 0x5a0   :  { %14471 = vmatmul.mubr.bf16.gmra.mrb[40].mxu1 %v18673_v18  ;;  %v4758_v18 = vld [vmem:[#allocation3 + $0x51] sm:$0xff] }
 0x5a1   :  { %14474 = vmatprep.mubr.bf16.mxu1 %v18677_v52  ;;  %v18889_v52 = vpack.c.bf16 %v4756_v2, %v4755_v16  ;;  %v18939_v16 = vpack.c.bf16 %v4772_v11, %v4771_v14  ;;  %v4790_v14 = vld [vmem:[#allocation3 + $0x201] sm:$0xff]  ;;  %v18961_v11 = vpack.c.bf16 %v4788_v56, %v4787_v28  ;;  %v4801_v28 = vld [vmem:[#allocation3 + $0x289] sm:$0xff]  ;;  %v4802_v56 = vld [vmem:[#allocation3 + $0x291] sm:$0xff] }
 0x5a8   :  { %14475 = vmatmul.mubr.bf16.gmra.mrb[44].mxu1 %v18679_v51  ;;  %v16847_v51 = vld [vmem:[%s21659_s6 + $0x148] sm:$0xff]  }
 0x5a9   :  { %14478 = vmatprep.mubr.bf16.mxu1 %v18683_v46  ;;  %v18894_v46 = vpack.c.bf16 %v4758_v18, %v4757_v23  ;;  %v4775_v23 = vld [vmem:[#allocation3 + $0x121] sm:$0xff]  ;;  %v4776_v18 = vld [vmem:[#allocation3 + $0x129] sm:$0xff] }
 0x5b0   :  { %14479 = vmatmul.mubr.bf16.gmra.mrb[48].mxu1 %v18685_v47  ;;  %v16848_v47 = vld [vmem:[%s21659_s6 + $0x150] sm:$0xff]  }
 0x5b1   :  { %14482 = vmatprep.mubr.bf16.mxu1 %v18689_v19  ;;  %v4759_v19 = vld [vmem:[#allocation3 + $0x61] sm:$0xff] }
 0x5b8   :  { %14483 = vmatmul.mubr.bf16.gmra.mrb[52].mxu1 %v18691_v4  ;;  %v4760_v4 = vld [vmem:[#allocation3 + $0x69] sm:$0xff] }
 0x5b9   :  { %14486 = vmatprep.mubr.bf16.mxu1 %v18695_v60  ;;  %v4761_v60 = vld [vmem:[#allocation3 + $0x79] sm:$0xff] }
 0x5c0   :  { %14487 = vmatmul.mubr.bf16.gmra.mrb[56].mxu1 %v18697_v50  ;;  %v4762_v50 = vld [vmem:[#allocation3 + $0x81] sm:$0xff] }
 0x5c1   :  { %14490 = vmatprep.mubr.bf16.mxu1 %v18701_v8  ;;  %v18901_v8 = vpack.c.bf16 %v4760_v4, %v4759_v19  ;;  %v18946_v19 = vpack.c.bf16 %v4776_v18, %v4775_v23  ;;  %v4792_v23 = vld [vmem:[#allocation3 + $0x219] sm:$0xff]  ;;  %v4793_v18 = vld [vmem:[#allocation3 + $0x229] sm:$0xff] }
 0x5c8   :  { %14491 = vmatmul.mubr.bf16.gmra.mrb[60].mxu1 %v18703_v9  ;;  %v16849_v9 = vld [vmem:[%s21659_s6 + $0x158] sm:$0xff]  }
 0x5c9   :  { %14494 = vmatprep.mubr.bf16.mxu1 %v18707_v17  ;;  %v18906_v17 = vpack.c.bf16 %v4762_v50, %v4761_v60  ;;  %v4779_v60 = vld [vmem:[#allocation3 + $0x151] sm:$0xff]  ;;  %v4780_v50 = vld [vmem:[#allocation3 + $0x159] sm:$0xff] }
 0x5ca   :  { %v18952_v49 = vpack.c.bf16 %v4780_v50, %v4779_v60  ;;  %v4795_v50 = vld [vmem:[#allocation3 + $0x241] sm:$0xff] }
 0x5d0   :  { %14495 = vmatmul.mubr.bf16.gmra.mrb[64].mxu1 %v18886_v43 }
 0x5d1   :  { %14514 = vmatprep.mubr.bf16.mxu1 %v4817_v57  ;;  %v4774_v57 = vld [vmem:[#allocation3 + $0x111] sm:$0xff] }
 0x5d2   :  { %v18942_v2 = vpack.c.bf16 %v4774_v57, %v4773_v33  ;;  %v4791_v57 = vld [vmem:[#allocation3 + $0x211] sm:$0xff] }
 0x5d8   :  { %14515 = vmatmul.mubr.bf16.vlgmr.msra.gmra.mrb[4].mxu1 %v18889_v52 }
 0x5d9   :  { %14579 = vmatpush3.bf16.msra.mxu1 %v16846_v6  ;;  %14518 = vmatprep.mubr.bf16.mxu1 %v18894_v46  ;;  %v18925_v6 = vpack.c.bf16 %v4768_v42, %v4767_v1  ;;  %v18958_v1 = vpack.c.bf16 %v4784_v55, %v4783_v15  ;;  %v4798_v15 = vld [vmem:[#allocation3 + $0x261] sm:$0xff] }
 0x5da   :  { %14580 = vmatprep.subr.bf16.mxu1 %v16847_v51 }
 0x5dd   :  { %14581 = vmatpush3.bf16.msra.mxu1 %v16847_v51  ;;  %v4777_v51 = vld [vmem:[#allocation3 + $0x139] sm:$0xff] }
 0x5de   :  { %14582 = vmatprep.subr.bf16.mxu1 %v16848_v47 }
 0x5e0   :  { %14519 = vmatmul.mubr.bf16.gmra.mrb[8].mxu1 %v18901_v8 }
 0x5e1   :  { %14522 = vmatprep.mubr.bf16.mxu1 %v18906_v17  ;;  %14583 = vmatpush3.bf16.msra.mxu1 %v16848_v47  ;;  %v4778_v47 = vld [vmem:[#allocation3 + $0x141] sm:$0xff] }
 0x5e2   :  { %14584 = vmatprep.subr.bf16.mxu1 %v16849_v9  ;;  %v18948_v4 = vpack.c.bf16 %v4778_v47, %v4777_v51  ;;  %v4794_v51 = vld [vmem:[#allocation3 + $0x231] sm:$0xff]  ;;  %v18967_v47 = vpack.c.bf16 %v4792_v23, %v4791_v57  ;;  %v4803_v57 = vld [vmem:[#allocation3 + $0x2a1] sm:$0xff]  ;;  %v4804_v23 = vld [vmem:[#allocation3 + $0x2a9] sm:$0xff] }
 0x5e3   :  { %v18969_v60 = vpack.c.bf16 %v4794_v51, %v4793_v18  ;;  %v4805_v18 = vld [vmem:[#allocation3 + $0x2b9] sm:$0xff]  ;;  %v4806_v51 = vld [vmem:[#allocation3 + $0x2c1] sm:$0xff] }
 0x5e5   :  { %14585 = vmatpush3.bf16.msra.mxu1 %v16849_v9  ;;  %v4781_v9 = vld [vmem:[#allocation3 + $0x169] sm:$0xff] }
 0x5e6   :  { %14586 = vmatprep.subr.bf16.mxu1 %v16850_v53 }
 0x5e8   :  { %14523 = vmatmul.mubr.bf16.gmra.mrb[12].mxu1 %v18913_v7 }
 0x5e9   :  { %14526 = vmatprep.mubr.bf16.mxu1 %v18918_v38  ;;  %14587 = vmatpush3.bf16.msra.mxu1 %v16850_v53  ;;  %v4782_v53 = vld [vmem:[#allocation3 + $0x171] sm:$0xff] }
 0x5ea   :  { %14588 = vmatprep.subr.bf16.mxu1 %v16851_v48  ;;  %v18954_v44 = vpack.c.bf16 %v4782_v53, %v4781_v9  ;;  %v4796_v9 = vld [vmem:[#allocation3 + $0x249] sm:$0xff]  ;;  %v4797_v53 = vld [vmem:[#allocation3 + $0x259] sm:$0xff] }
 0x5eb   :  { %v18973_v55 = vpack.c.bf16 %v4796_v9, %v4795_v50  ;;  %v18985_v50 = vpack.c.bf16 %v4804_v23, %v4803_v57  ;;  %v18987_v9 = vpack.c.bf16 %v4806_v51, %v4805_v18  ;;  %v4811_v57 = vld [vmem:[#allocation3 + $0x301] sm:$0xff]  ;;  %v4812_v23 = vld [vmem:[#allocation3 + $0x309] sm:$0xff]  ;;  %v4813_v18 = vld [vmem:[#allocation3 + $0x319] sm:$0xff] }
 0x5ec   :  { %v4814_v51 = vld [vmem:[#allocation3 + $0x321] sm:$0xff] }
 0x5ed   :  { %14589 = vmatpush3.bf16.msra.mxu1 %v16851_v48  ;;  %v4785_v48 = vld [vmem:[#allocation3 + $0x1c9] sm:$0xff]  ;;  %21788 = vst [vmem:[#allocation11_spill] sm:$0xff] %v18985_v50 }
 0x5ee   :  { %14590 = vmatprep.subr.bf16.mxu1 %v16852_v58 }
 0x5f0   :  { %14527 = vmatmul.mubr.bf16.gmra.mrb[16].mxu1 %v18925_v6 }
 0x5f1   :  { %14530 = vmatprep.mubr.bf16.mxu1 %v18930_v26  ;;  %14591 = vmatpush3.bf16.msra.mxu1 %v16852_v58  ;;  %v4786_v58 = vld [vmem:[#allocation3 + $0x1d1] sm:$0xff] }
 0x5f2   :  { %14592 = vmatprep.subr.bf16.mxu1 %v16853_v13  ;;  %v4833_v42 = vpack.c.bf16 %v4786_v58, %v4785_v48  ;;  %v18975_v48 = vpack.c.bf16 %v4798_v15, %v4797_v53  ;;  %v4799_v58 = vld [vmem:[#allocation3 + $0x271] sm:$0xff]  ;;  %v4808_v15 = vld [vmem:[#allocation3 + $0x2d9] sm:$0xff] }
 0x5f3   :  { %v4807_v53 = vld [vmem:[#allocation3 + $0x2d1] sm:$0xff] }
 0x5f5   :  { %14593 = vmatpush3.bf16.msra.mxu1 %v16853_v13  ;;  %v4789_v13 = vld [vmem:[#allocation3 + $0x1f9] sm:$0xff] }
 0x5f6   :  { %14658 = vmatprep.subr.bf16.mxu1 %v18937_v63  ;;  %v18963_v33 = vpack.c.bf16 %v4790_v14, %v4789_v13  ;;  %v18981_v14 = vpack.c.bf16 %v4802_v56, %v4801_v28  ;;  %v18991_v28 = vpack.c.bf16 %v4808_v15, %v4807_v53  ;;  %v4815_v53 = vld [vmem:[#allocation3 + $0x331] sm:$0xff]  ;;  %v4816_v15 = vld [vmem:[#allocation3 + $0x339] sm:$0xff] }
 0x5f8   :  { %14531 = vmatmul.mubr.bf16.gmra.mrb[20].mxu1 %v18939_v16  ;;  %21787 = vst [vmem:[#allocation10_spill] sm:$0xff] %v18981_v14 }
 0x5f9   :  { %14534 = vmatprep.mubr.bf16.mxu1 %v18942_v2 }
 0x600   :  { %14535 = vmatmul.mubr.bf16.gmra.mrb[24].mxu1 %v18946_v19 }
 0x601   :  { %14538 = vmatprep.mubr.bf16.mxu1 %v18948_v4 }
 0x608   :  { %14539 = vmatmul.mubr.bf16.gmra.mrb[28].mxu1 %v18952_v49 }
 0x609   :  { %14542 = vmatprep.mubr.bf16.mxu1 %v18954_v44 }
 0x610   :  { %14543 = vmatmul.mubr.bf16.gmra.mrb[32].mxu1 %v18958_v1 }
 0x611   :  { %14546 = vmatprep.mubr.bf16.mxu1 %v4833_v42  ;;  %v4800_v42 = vld [vmem:[#allocation3 + $0x279] sm:$0xff] }
 0x612   :  { %v18979_v13 = vpack.c.bf16 %v4800_v42, %v4799_v58  ;;  %v4809_v58 = vld [vmem:[#allocation3 + $0x2e9] sm:$0xff]  ;;  %v4810_v42 = vld [vmem:[#allocation3 + $0x2f1] sm:$0xff] }
 0x613   :  { %v18993_v56 = vpack.c.bf16 %v4810_v42, %v4809_v58  ;;  %v19003_v58 = vpack.c.bf16 %v4816_v15, %v4815_v53  ;;  %v16855_v42 = vld [vmem:[%s21659_s6 + $0x188] sm:$0xff]   ;;  %v5791_v53 = vld [vmem:[#allocation3 + $0x98] sm:$0xff] }
 0x618   :  { %14547 = vmatmul.mubr.bf16.gmra.mrb[36].mxu1 %v18961_v11 }
 0x619   :  { %14550 = vmatprep.mubr.bf16.mxu1 %v18963_v33 }
 0x620   :  { %14551 = vmatmul.mubr.bf16.gmra.mrb[40].mxu1 %v18967_v47 }
 0x621   :  { %14554 = vmatprep.mubr.bf16.mxu1 %v18969_v60 }
 0x628   :  { %14555 = vmatmul.mubr.bf16.gmra.mrb[44].mxu1 %v18973_v55 }
 0x629   :  { %14558 = vmatprep.mubr.bf16.mxu1 %v18975_v48 }
 0x630   :  { %14559 = vmatmul.mubr.bf16.gmra.mrb[48].mxu1 %v18979_v13 }
 0x631   :  { %14562 = vmatprep.mubr.bf16.mxu1 %v18981_v14  ;;  %v18997_v14 = vpack.c.bf16 %v4812_v23, %v4811_v57  ;;  %v16856_v57 = vld [vmem:[%s21659_s6 + $0x190] sm:$0xff]   ;;  %v5788_v23 = vld [vmem:[#allocation3 + $0x78] sm:$0xff] }
 0x638   :  { %14563 = vmatmul.mubr.bf16.gmra.mrb[52].mxu1 %v18985_v50  ;;  %v18999_v50 = vpack.c.bf16 %v4814_v51, %v4813_v18  ;;  %v5789_v18 = vld [vmem:[#allocation3 + $0x80] sm:$0xff]  ;;  %v5790_v51 = vld [vmem:[#allocation3 + $0x90] sm:$0xff] }
 0x639   :  { %14566 = vmatprep.mubr.bf16.mxu1 %v18987_v9  ;;  %v5849_v15 = vpack.c.bf16 %v5789_v18, %v5788_v23  ;;  %v5806_v23 = vld [vmem:[#allocation3 + $0x150] sm:$0xff]  ;;  %v5807_v18 = vld [vmem:[#allocation3 + $0x158] sm:$0xff] }
 0x640   :  { %14567 = vmatmul.mubr.bf16.gmra.mrb[56].mxu1 %v18991_v28 }
 0x641   :  { %14570 = vmatprep.mubr.bf16.mxu1 %v18993_v56 }
 0x648   :  { %14571 = vmatmul.mubr.bf16.gmra.mrb[60].mxu1 %v18997_v14 }
 0x649   :  { %14574 = vmatprep.mubr.bf16.mxu1 %v18999_v50 }
 0x650   :  { %14575 = vmatmul.mubr.bf16.gmra.mrb[64].mxu1 %v19003_v58 }
 0x651   :  { %14594 = vmatprep.mubr.bf16.mxu1 %v18710_v54  ;;  %v16857_v54 = vld [vmem:[%s21659_s6 + $0x198] sm:$0xff]  }
 0x658   :  { %14595 = vmatmul.mubr.bf16.vlgmr.msra.gmra.mrb[4].mxu1 %v18715_v12  ;;  %v16858_v12 = vld [vmem:[%s21659_s6 + $0x1a0] sm:$0xff]  }
 0x659   :  { %14659 = vmatpush3.bf16.msra.mxu1 %v18937_v63  ;;  %14598 = vmatprep.mubr.bf16.mxu1 %v18723_v62  ;;  %v16859_v62 = vld [vmem:[%s21659_s6 + $0x1a8] sm:$0xff]  }
 0x65a   :  { %14660 = vmatprep.subr.bf16.mxu1 %v16855_v42 }
 0x65d   :  { %14661 = vmatpush3.bf16.msra.mxu1 %v16855_v42  ;;  %v16865_v42 = vld [vmem:[%s21659_s6 + $0x1d8] sm:$0xff]  }
 0x65e   :  { %14662 = vmatprep.subr.bf16.mxu1 %v16856_v57 }
 0x660   :  { %14599 = vmatmul.mubr.bf16.gmra.mrb[8].mxu1 %v18728_v22  ;;  %v16860_v22 = vld [vmem:[%s21659_s6 + $0x1b0] sm:$0xff]  }
 0x661   :  { %14602 = vmatprep.mubr.bf16.mxu1 %v18735_v25  ;;  %14663 = vmatpush3.bf16.msra.mxu1 %v16856_v57  ;;  %v16861_v25 = vld [vmem:[%s21659_s6 + $0x1b8] sm:$0xff]   ;;  %v5850_v57 = vpack.c.bf16 %v5791_v53, %v5790_v51  ;;  %v5858_v53 = vpack.c.bf16 %v5807_v18, %v5806_v23  ;;  %v5829_v23 = vld [vmem:[#allocation3 + $0x290] sm:$0xff]  ;;  %v5830_v18 = vld [vmem:[#allocation3 + $0x2a0] sm:$0xff] }
 0x662   :  { %14664 = vmatprep.subr.bf16.mxu1 %v16857_v54 }
 0x665   :  { %14665 = vmatpush3.bf16.msra.mxu1 %v16857_v54  ;;  %v16866_v54 = vld [vmem:[%s21659_s6 + $0x1e0] sm:$0xff]  }
 0x666   :  { %14666 = vmatprep.subr.bf16.mxu1 %v16858_v12 }
 0x668   :  { %14603 = vmatmul.mubr.bf16.gmra.mrb[12].mxu1 %v18740_v59  ;;  %v16862_v59 = vld [vmem:[%s21659_s6 + $0x1c0] sm:$0xff]  }
 0x669   :  { %14606 = vmatprep.mubr.bf16.mxu1 %v18747_v27  ;;  %14667 = vmatpush3.bf16.msra.mxu1 %v16858_v12  ;;  %v5297_v27 = vld [vmem:[#allocation3 + $0x182] sm:$0xff] }
 0x66a   :  { %14668 = vmatprep.subr.bf16.mxu1 %v16859_v62  ;;  %v5792_v12 = vld [vmem:[#allocation3 + $0xa8] sm:$0xff] }
 0x66d   :  { %14669 = vmatpush3.bf16.msra.mxu1 %v16859_v62  ;;  %v5793_v62 = vld [vmem:[#allocation3 + $0xb0] sm:$0xff] }
 0x66e   :  { %14670 = vmatprep.subr.bf16.mxu1 %v16860_v22 }
 0x670   :  { %14607 = vmatmul.mubr.bf16.gmra.mrb[16].mxu1 %v18752_v45  ;;  %v5298_v45 = vld [vmem:[#allocation3 + $0x18a] sm:$0xff] }
 0x671   :  { %14610 = vmatprep.mubr.bf16.mxu1 %v18761_v35  ;;  %14671 = vmatpush3.bf16.msra.mxu1 %v16860_v22  ;;  %v19046_v35 = vpack.c.bf16 %v5298_v45, %v5297_v27  ;;  %v5794_v22 = vld [vmem:[#allocation3 + $0xc0] sm:$0xff]  ;;  %v16867_v27 = vld [vmem:[%s21659_s6 + $0x1e8] sm:$0xff]  }
 0x672   :  { %14672 = vmatprep.subr.bf16.mxu1 %v16861_v25 }
 0x675   :  { %14673 = vmatpush3.bf16.msra.mxu1 %v16861_v25  ;;  %v5795_v25 = vld [vmem:[#allocation3 + $0xc8] sm:$0xff] }
 0x676   :  { %14738 = vmatprep.subr.bf16.mxu1 %v16862_v59  ;;  %v5852_v45 = vpack.c.bf16 %v5795_v25, %v5794_v22  ;;  %v5814_v22 = vld [vmem:[#allocation3 + $0x1e0] sm:$0xff]  ;;  %v5815_v25 = vld [vmem:[#allocation3 + $0x1e8] sm:$0xff] }
 0x678   :  { %14611 = vmatmul.mubr.bf16.gmra.mrb[20].mxu1 %v18764_v0  ;;  %v21789_v0 = vld [vmem:[#allocation6_spill] sm:$0xff] }
 0x679   :  { %14614 = vmatprep.mubr.bf16.mxu1 %v18768_v3  ;;  %v21790_v3 = vld [vmem:[#allocation7_spill] sm:$0xff] }
 0x680   :  { %14615 = vmatmul.mubr.bf16.gmra.mrb[24].mxu1 %v18770_v39  ;;  %v21791_v39 = vld [vmem:[#allocation8_spill] sm:$0xff] }
 0x681   :  { %14618 = vmatprep.mubr.bf16.mxu1 %v18774_v61  ;;  %v21792_v61 = vld [vmem:[#allocation9_spill] sm:$0xff] }
 0x688   :  { %14619 = vmatmul.mubr.bf16.gmra.mrb[28].mxu1 %v18776_v29  ;;  %v5329_v29 = vld [vmem:[#allocation3 + $0x332] sm:$0xff] }
 0x689   :  { %14622 = vmatprep.mubr.bf16.mxu1 %v18780_v24  ;;  %v5330_v24 = vld [vmem:[#allocation3 + $0x33a] sm:$0xff] }
 0x690   :  { %14623 = vmatmul.mubr.bf16.gmra.mrb[32].mxu1 %v19046_v35 }
 0x691   :  { %14626 = vmatprep.mubr.bf16.mxu1 %v18783_v34  ;;  %v5782_v34 = vld [vmem:[#allocation3 + $0x30] sm:$0xff] }
 0x698   :  { %14627 = vmatmul.mubr.bf16.gmra.mrb[36].mxu1 %v18785_v41  ;;  %v5783_v41 = vld [vmem:[#allocation3 + $0x38] sm:$0xff] }
 0x699   :  { %14630 = vmatprep.mubr.bf16.mxu1 %v18789_v32  ;;  %v19064_v32 = vpack.c.bf16 %v5330_v24, %v5329_v29  ;;  %v5799_v29 = vld [vmem:[#allocation3 + $0xf8] sm:$0xff] }
 0x6a0   :  { %14631 = vmatmul.mubr.bf16.gmra.mrb[40].mxu1 %v18791_v30  ;;  %v5846_v30 = vpack.c.bf16 %v5783_v41, %v5782_v34  ;;  %v16869_v34 = vld [vmem:[%s21659_s6 + $0x1f8] sm:$0xff]  }
 0x6a1   :  { %14634 = vmatprep.mubr.bf16.mxu1 %v18795_v20  ;;  %v5785_v20 = vld [vmem:[#allocation3 + $0x50] sm:$0xff] }
 0x6a8   :  { %14635 = vmatmul.mubr.bf16.gmra.mrb[44].mxu1 %v21789_v0  ;;  %v16868_v0 = vld [vmem:[%s21659_s6 + $0x1f0] sm:$0xff]  }
 0x6a9   :  { %14638 = vmatprep.mubr.bf16.mxu1 %v21790_v3  ;;  %v5796_v3 = vld [vmem:[#allocation3 + $0xd8] sm:$0xff] }
 0x6b0   :  { %14639 = vmatmul.mubr.bf16.gmra.mrb[48].mxu1 %v21791_v39  ;;  %v5797_v39 = vld [vmem:[#allocation3 + $0xe0] sm:$0xff] }
 0x6b1   :  { %14642 = vmatprep.mubr.bf16.mxu1 %v21792_v61  ;;  %v5798_v61 = vld [vmem:[#allocation3 + $0xf0] sm:$0xff]  ;;  %v5853_v24 = vpack.c.bf16 %v5797_v39, %v5796_v3  ;;  %v5819_v3 = vld [vmem:[#allocation3 + $0x218] sm:$0xff] }
 0x6b2   :  { %v5854_v41 = vpack.c.bf16 %v5799_v29, %v5798_v61  ;;  %v5820_v29 = vld [vmem:[#allocation3 + $0x228] sm:$0xff] }
 0x6b8   :  { %14643 = vmatmul.mubr.bf16.gmra.mrb[52].mxu1 %v18809_v36  ;;  %v5784_v36 = vld [vmem:[#allocation3 + $0x48] sm:$0xff] }
 0x6b9   :  { %14646 = vmatprep.mubr.bf16.mxu1 %v18813_v5  ;;  %v5786_v5 = vld [vmem:[#allocation3 + $0x60] sm:$0xff]  ;;  %v5847_v63 = vpack.c.bf16 %v5785_v20, %v5784_v36  ;;  %v5800_v36 = vld [vmem:[#allocation3 + $0x108] sm:$0xff]  ;;  %v5801_v20 = vld [vmem:[#allocation3 + $0x110] sm:$0xff] }
 0x6c0   :  { %14647 = vmatmul.mubr.bf16.gmra.mrb[56].mxu1 %v18815_v31  ;;  %v5787_v31 = vld [vmem:[#allocation3 + $0x68] sm:$0xff] }
 0x6c1   :  { %14650 = vmatprep.mubr.bf16.mxu1 %v18819_v40  ;;  %v16863_v40 = vld [vmem:[%s21659_s6 + $0x1c8] sm:$0xff]  }
 0x6c8   :  { %14651 = vmatmul.mubr.bf16.gmra.mrb[60].mxu1 %v18821_v10  ;;  %v5848_v10 = vpack.c.bf16 %v5787_v31, %v5786_v5  ;;  %v5802_v5 = vld [vmem:[#allocation3 + $0x120] sm:$0xff]  ;;  %v5803_v31 = vld [vmem:[#allocation3 + $0x128] sm:$0xff] }
 0x6c9   :  { %14654 = vmatprep.mubr.bf16.mxu1 %v18825_v21  ;;  %v16864_v21 = vld [vmem:[%s21659_s6 + $0x1d0] sm:$0xff]  }
 0x6d0   :  { %14655 = vmatmul.mubr.bf16.gmra.mrb[64].mxu1 %v19064_v32 }
 0x6d1   :  { %14674 = vmatprep.mubr.bf16.mxu1 %v5846_v30  ;;  %v19091_v30 = vld [vmem:[%s21659_s6 + $0x200] sm:$0xff]  }
 0x6d8   :  { %14675 = vmatmul.mubr.bf16.vlgmr.msra.gmra.mrb[4].mxu1 %v5847_v63  ;;  %v5855_v63 = vpack.c.bf16 %v5801_v20, %v5800_v36  ;;  %v5824_v20 = vld [vmem:[#allocation3 + $0x258] sm:$0xff] }
 0x6d9   :  { %14739 = vmatpush3.bf16.msra.mxu1 %v16862_v59  ;;  %14678 = vmatprep.mubr.bf16.mxu1 %v5848_v10  ;;  %v5851_v59 = vpack.c.bf16 %v5793_v62, %v5792_v12  ;;  %v5804_v10 = vld [vmem:[#allocation3 + $0x138] sm:$0xff]  ;;  %v17083_v12 = vld [vmem:[#allocation3 + $0x8] sm:$0xff] }
 0x6da   :  { %14740 = vmatprep.subr.bf16.mxu1 %v16863_v40 }
 0x6dd   :  { %14741 = vmatpush3.bf16.msra.mxu1 %v16863_v40  ;;  %v5856_v40 = vpack.c.bf16 %v5803_v31, %v5802_v5  ;;  %v5825_v5 = vld [vmem:[#allocation3 + $0x260] sm:$0xff]  ;;  %v5826_v31 = vld [vmem:[#allocation3 + $0x270] sm:$0xff] }
 0x6de   :  { %14742 = vmatprep.subr.bf16.mxu1 %v16864_v21 }
 0x6e0   :  { %14679 = vmatmul.mubr.bf16.gmra.mrb[8].mxu1 %v5849_v15  ;;  %v5808_v15 = vld [vmem:[#allocation3 + $0x168] sm:$0xff] }
 0x6e1   :  { %14682 = vmatprep.mubr.bf16.mxu1 %v5850_v57  ;;  %14743 = vmatpush3.bf16.msra.mxu1 %v16864_v21  ;;  %v5805_v21 = vld [vmem:[#allocation3 + $0x140] sm:$0xff] }
 0x6e2   :  { %14744 = vmatprep.subr.bf16.mxu1 %v16865_v42  ;;  %v5857_v51 = vpack.c.bf16 %v5805_v21, %v5804_v10  ;;  %v5828_v21 = vld [vmem:[#allocation3 + $0x288] sm:$0xff] }
 0x6e5   :  { %14745 = vmatpush3.bf16.msra.mxu1 %v16865_v42  ;;  %v5809_v42 = vld [vmem:[#allocation3 + $0x170] sm:$0xff] }
 0x6e6   :  { %14746 = vmatprep.subr.bf16.mxu1 %v16866_v54  ;;  %v5859_v57 = vpack.c.bf16 %v5809_v42, %v5808_v15  ;;  %v5832_v42 = vld [vmem:[#allocation3 + $0x2b8] sm:$0xff] }
 0x6e8   :  { %14683 = vmatmul.mubr.bf16.gmra.mrb[12].mxu1 %v5851_v59  ;;  %v5862_v59 = vpack.c.bf16 %v5815_v25, %v5814_v22 }
 0x6e9   :  { %14686 = vmatprep.mubr.bf16.mxu1 %v5852_v45  ;;  %14747 = vmatpush3.bf16.msra.mxu1 %v16866_v54  ;;  %v5812_v54 = vld [vmem:[#allocation3 + $0x198] sm:$0xff]  ;;  %v5817_v45 = vld [vmem:[#allocation3 + $0x200] sm:$0xff] }
 0x6ea   :  { %14748 = vmatprep.subr.bf16.mxu1 %v16867_v27  ;;  %v5861_v62 = vpack.c.bf16 %v17083_v12, %v5812_v54  ;;  %v5834_v54 = vld [vmem:[#allocation3 + $0x2d0] sm:$0xff] }
 0x6ed   :  { %14749 = vmatpush3.bf16.msra.mxu1 %v16867_v27  ;;  %v5816_v27 = vld [vmem:[#allocation3 + $0x1f8] sm:$0xff] }
 0x6ee   :  { %14750 = vmatprep.subr.bf16.mxu1 %v16868_v0  ;;  %v5863_v39 = vpack.c.bf16 %v5817_v45, %v5816_v27  ;;  %v5837_v27 = vld [vmem:[#allocation3 + $0x2f0] sm:$0xff]  ;;  %v5838_v45 = vld [vmem:[#allocation3 + $0x300] sm:$0xff] }
 0x6f0   :  { %14687 = vmatmul.mubr.bf16.gmra.mrb[16].mxu1 %v5853_v24  ;;  %v5821_v24 = vld [vmem:[#allocation3 + $0x230] sm:$0xff] }
 0x6f1   :  { %14690 = vmatprep.mubr.bf16.mxu1 %v5854_v41  ;;  %14751 = vmatpush3.bf16.msra.mxu1 %v16868_v0  ;;  %v5818_v0 = vld [vmem:[#allocation3 + $0x210] sm:$0xff]  ;;  %v5865_v41 = vpack.c.bf16 %v5821_v24, %v5820_v29  ;;  %v5841_v29 = vld [vmem:[#allocation3 + $0x320] sm:$0xff] }
 0x6f2   :  { %14752 = vmatprep.subr.bf16.mxu1 %v16869_v34  ;;  %v5864_v61 = vpack.c.bf16 %v5819_v3, %v5818_v0  ;;  %v5839_v0 = vld [vmem:[#allocation3 + $0x308] sm:$0xff] }
 0x6f5   :  { %14753 = vmatpush3.bf16.msra.mxu1 %v16869_v34  ;;  %v5822_v34 = vld [vmem:[#allocation3 + $0x240] sm:$0xff] }
 0x6f6   :  { %14818 = vmatprep.subr.bf16.mxu1 %v19091_v30 }
 0x6f8   :  { %14691 = vmatmul.mubr.bf16.gmra.mrb[20].mxu1 %v5855_v63  ;;  %v5827_v63 = vld [vmem:[#allocation3 + $0x278] sm:$0xff] }
 0x6f9   :  { %14694 = vmatprep.mubr.bf16.mxu1 %v5856_v40  ;;  %v5867_v40 = vpack.c.bf16 %v5825_v5, %v5824_v20  ;;  %v5868_v10 = vpack.c.bf16 %v5827_v63, %v5826_v31  ;;  %v6823_v20 = vld [vmem:[#allocation3 + $0xca] sm:$0xff]  ;;  %v6824_v63 = vld [vmem:[#allocation3 + $0xda] sm:$0xff] }
 0x700   :  { %14695 = vmatmul.mubr.bf16.gmra.mrb[24].mxu1 %v5857_v51  ;;  %v5831_v51 = vld [vmem:[#allocation3 + $0x2a8] sm:$0xff] }
 0x701   :  { %14698 = vmatprep.mubr.bf16.mxu1 %v5858_v53  ;;  %v5869_v53 = vpack.c.bf16 %v5829_v23, %v5828_v21  ;;  %v5870_v15 = vpack.c.bf16 %v5831_v51, %v5830_v18  ;;  %v6827_v21 = vld [vmem:[#allocation3 + $0xfa] sm:$0xff]  ;;  %v6828_v51 = vld [vmem:[#allocation3 + $0x10a] sm:$0xff] }
 0x708   :  { %14699 = vmatmul.mubr.bf16.gmra.mrb[28].mxu1 %v5859_v57  ;;  %v5833_v57 = vld [vmem:[#allocation3 + $0x2c0] sm:$0xff] }
 0x709   :  { %14702 = vmatprep.mubr.bf16.mxu1 %v18868_v37  ;;  %v5823_v37 = vld [vmem:[#allocation3 + $0x248] sm:$0xff]  ;;  %v5871_v22 = vpack.c.bf16 %v5833_v57, %v5832_v42 }
 0x70a   :  { %v5866_v36 = vpack.c.bf16 %v5823_v37, %v5822_v34  ;;  %v5844_v34 = vld [vmem:[#allocation3 + $0x348] sm:$0xff] }
 0x70b   :  { %v5877_v37 = vpack.c.bf16 %v17083_v12, %v5844_v34  ;;  %v6821_v12 = vld [vmem:[#allocation3 + $0xb2] sm:$0xff]  ;;  %v6831_v42 = vld [vmem:[#allocation3 + $0x12a] sm:$0xff]  ;;  %v6842_v34 = vld [vmem:[#allocation3 + $0x1e2] sm:$0xff] }
 0x710   :  { %14703 = vmatmul.mubr.bf16.gmra.mrb[32].mxu1 %v5861_v62  ;;  %v5835_v62 = vld [vmem:[#allocation3 + $0x2d8] sm:$0xff] }
 0x711   :  { %14706 = vmatprep.mubr.bf16.mxu1 %v5862_v59  ;;  %v5872_v25 = vpack.c.bf16 %v5835_v62, %v5834_v54  ;;  %v5836_v59 = vld [vmem:[#allocation3 + $0x2e8] sm:$0xff]  ;;  %v6832_v62 = vld [vmem:[#allocation3 + $0x13a] sm:$0xff] }
 0x712   :  { %v5873_v3 = vpack.c.bf16 %v5837_v27, %v5836_v59  ;;  %v6835_v59 = vld [vmem:[#allocation3 + $0x15a] sm:$0xff] }
 0x718   :  { %14707 = vmatmul.mubr.bf16.gmra.mrb[36].mxu1 %v5863_v39  ;;  %v5874_v39 = vpack.c.bf16 %v5839_v0, %v5838_v45  ;;  %v6836_v0 = vld [vmem:[#allocation3 + $0x16a] sm:$0xff] }
 0x719   :  { %14710 = vmatprep.mubr.bf16.mxu1 %v5864_v61  ;;  %v5840_v61 = vld [vmem:[#allocation3 + $0x318] sm:$0xff] }
 0x71a   :  { %v5875_v24 = vpack.c.bf16 %v5841_v29, %v5840_v61  ;;  %v6840_v61 = vld [vmem:[#allocation3 + $0x19a] sm:$0xff]  ;;  %v6841_v29 = vld [vmem:[#allocation3 + $0x1a2] sm:$0xff] }
 0x720   :  { %14711 = vmatmul.mubr.bf16.gmra.mrb[40].mxu1 %v5865_v41  ;;  %v16871_v41 = vld [vmem:[%s21659_s6 + $0x208] sm:$0xff]  }
 0x721   :  { %14714 = vmatprep.mubr.bf16.mxu1 %v5866_v36  ;;  %v6822_v36 = vld [vmem:[#allocation3 + $0xc2] sm:$0xff] }
 0x722   :  { %v6880_v31 = vpack.c.bf16 %v6823_v20, %v6822_v36  ;;  %v6866_v36 = vld [vmem:[#allocation3 + $0x302] sm:$0xff]  ;;  %v6867_v20 = vld [vmem:[#allocation3 + $0x30a] sm:$0xff] }
 0x728   :  { %14715 = vmatmul.mubr.bf16.gmra.mrb[44].mxu1 %v5867_v40  ;;  %v6825_v40 = vld [vmem:[#allocation3 + $0xe2] sm:$0xff] }
 0x729   :  { %14718 = vmatprep.mubr.bf16.mxu1 %v5868_v10  ;;  %v6826_v10 = vld [vmem:[#allocation3 + $0xf2] sm:$0xff]  ;;  %v6881_v23 = vpack.c.bf16 %v6825_v40, %v6824_v63  ;;  %v6868_v63 = vld [vmem:[#allocation3 + $0x31a] sm:$0xff]  ;;  %v6869_v40 = vld [vmem:[#allocation3 + $0x322] sm:$0xff] }
 0x72a   :  { %v6882_v18 = vpack.c.bf16 %v6827_v21, %v6826_v10  ;;  %v6903_v10 = vpack.c.bf16 %v6869_v40, %v6868_v63  ;;  %v6872_v21 = vld [vmem:[#allocation3 + $0x34a] sm:$0xff] }
 0x730   :  { %14719 = vmatmul.mubr.bf16.gmra.mrb[48].mxu1 %v5869_v53  ;;  %v6829_v53 = vld [vmem:[#allocation3 + $0x112] sm:$0xff] }
 0x731   :  { %14722 = vmatprep.mubr.bf16.mxu1 %v5870_v15  ;;  %v6830_v15 = vld [vmem:[#allocation3 + $0x122] sm:$0xff]  ;;  %v6883_v57 = vpack.c.bf16 %v6829_v53, %v6828_v51 }
 0x732   :  { %v6884_v54 = vpack.c.bf16 %v6831_v42, %v6830_v15 }
 0x738   :  { %14723 = vmatmul.mubr.bf16.gmra.mrb[52].mxu1 %v5871_v22  ;;  %v6833_v22 = vld [vmem:[#allocation3 + $0x142] sm:$0xff] }
 0x739   :  { %14726 = vmatprep.mubr.bf16.mxu1 %v5872_v25  ;;  %v6834_v25 = vld [vmem:[#allocation3 + $0x152] sm:$0xff]  ;;  %v6885_v27 = vpack.c.bf16 %v6833_v22, %v6832_v62 }
 0x73a   :  { %v6886_v45 = vpack.c.bf16 %v6835_v59, %v6834_v25 }
 0x740   :  { %14727 = vmatmul.mubr.bf16.gmra.mrb[56].mxu1 %v5873_v3  ;;  %v6837_v3 = vld [vmem:[#allocation3 + $0x172] sm:$0xff] }
 0x741   :  { %14730 = vmatprep.mubr.bf16.mxu1 %v5874_v39  ;;  %v6887_v39 = vpack.c.bf16 %v6837_v3, %v6836_v0 }
 0x748   :  { %14731 = vmatmul.mubr.bf16.gmra.mrb[60].mxu1 %v5875_v24  ;;  %v6889_v24 = vpack.c.bf16 %v6841_v29, %v6840_v61 }
 0x749   :  { %14734 = vmatprep.mubr.bf16.mxu1 %v18886_v43  ;;  %v16872_v43 = vld [vmem:[%s21659_s6 + $0x210] sm:$0xff]  }
 0x750   :  { %14735 = vmatmul.mubr.bf16.gmra.mrb[64].mxu1 %v5877_v37  ;;  %v6843_v37 = vld [vmem:[#allocation3 + $0x1ea] sm:$0xff] }
 0x751   :  { %14754 = vmatprep.mubr.bf16.mxu1 %v18889_v52  ;;  %v16873_v52 = vld [vmem:[%s21659_s6 + $0x218] sm:$0xff]  }
 0x758   :  { %14755 = vmatmul.mubr.bf16.vlgmr.msra.gmra.mrb[4].mxu1 %v18894_v46  ;;  %v16874_v46 = vld [vmem:[%s21659_s6 + $0x220] sm:$0xff]  }
 0x759   :  { %14819 = vmatpush3.bf16.msra.mxu1 %v19091_v30  ;;  %14758 = vmatprep.mubr.bf16.mxu1 %v18901_v8  ;;  %v16875_v8 = vld [vmem:[%s21659_s6 + $0x228] sm:$0xff]  }
 0x75a   :  { %14820 = vmatprep.subr.bf16.mxu1 %v16871_v41  ;;  %v6820_v30 = vld [vmem:[#allocation3 + $0xaa] sm:$0xff] }
 0x75b   :  { %v6879_v5 = vpack.c.bf16 %v6821_v12, %v6820_v30  ;;  %v6864_v30 = vld [vmem:[#allocation3 + $0x2ea] sm:$0xff]  ;;  %v6865_v12 = vld [vmem:[#allocation3 + $0x2f2] sm:$0xff] }
 0x75d   :  { %14821 = vmatpush3.bf16.msra.mxu1 %v16871_v41  ;;  %v6890_v41 = vpack.c.bf16 %v6843_v37, %v6842_v34 }
 0x75e   :  { %14822 = vmatprep.subr.bf16.mxu1 %v16872_v43 }
 0x760   :  { %14759 = vmatmul.mubr.bf16.gmra.mrb[8].mxu1 %v18906_v17  ;;  %v16876_v17 = vld [vmem:[%s21659_s6 + $0x230] sm:$0xff]  }
 0x761   :  { %14762 = vmatprep.mubr.bf16.mxu1 %v18913_v7  ;;  %14823 = vmatpush3.bf16.msra.mxu1 %v16872_v43  ;;  %v16877_v7 = vld [vmem:[%s21659_s6 + $0x238] sm:$0xff]  }
 0x762   :  { %14824 = vmatprep.subr.bf16.mxu1 %v16873_v52  ;;  %v6844_v43 = vld [vmem:[#allocation3 + $0x1fa] sm:$0xff] }
 0x765   :  { %14825 = vmatpush3.bf16.msra.mxu1 %v16873_v52  ;;  %v6845_v52 = vld [vmem:[#allocation3 + $0x202] sm:$0xff] }
 0x766   :  { %14826 = vmatprep.subr.bf16.mxu1 %v16874_v46 }
 0x768   :  { %14763 = vmatmul.mubr.bf16.gmra.mrb[12].mxu1 %v18918_v38  ;;  %v6326_v38 = vld [vmem:[#allocation3 + $0x199] sm:$0xff] }
 0x769   :  { %14766 = vmatprep.mubr.bf16.mxu1 %v18925_v6  ;;  %14827 = vmatpush3.bf16.msra.mxu1 %v16874_v46  ;;  %v6327_v6 = vld [vmem:[#allocation3 + $0x1a1] sm:$0xff]  ;;  %v6846_v46 = vld [vmem:[#allocation3 + $0x212] sm:$0xff] }
 0x76a   :  { %14828 = vmatprep.subr.bf16.mxu1 %v16875_v8 }
 0x76d   :  { %14829 = vmatpush3.bf16.msra.mxu1 %v16875_v8  ;;  %v6847_v8 = vld [vmem:[#allocation3 + $0x21a] sm:$0xff] }
 0x76e   :  { %14830 = vmatprep.subr.bf16.mxu1 %v16876_v17 }
 0x770   :  { %14767 = vmatmul.mubr.bf16.gmra.mrb[16].mxu1 %v18930_v26  ;;  %v6375_v26 = vpack.c.bf16 %v6327_v6, %v6326_v38  ;;  %v6848_v38 = vld [vmem:[#allocation3 + $0x22a] sm:$0xff]  ;;  %v6849_v6 = vld [vmem:[#allocation3 + $0x232] sm:$0xff] }
 0x771   :  { %14770 = vmatprep.mubr.bf16.mxu1 %v18939_v16  ;;  %14831 = vmatpush3.bf16.msra.mxu1 %v16876_v17  ;;  %v21793_v16 = vld [vmem:[#allocation10_spill] sm:$0xff]  ;;  %v6891_v17 = vpack.c.bf16 %v6845_v52, %v6844_v43 }
 0x772   :  { %14832 = vmatprep.subr.bf16.mxu1 %v16877_v7 }
 0x775   :  { %14833 = vmatpush3.bf16.msra.mxu1 %v16877_v7  ;;  %v6892_v7 = vpack.c.bf16 %v6847_v8, %v6846_v46 }
 0x778   :  { %14771 = vmatmul.mubr.bf16.gmra.mrb[20].mxu1 %v18942_v2  ;;  %v21794_v2 = vld [vmem:[#allocation11_spill] sm:$0xff] }
 0x779   :  { %14774 = vmatprep.mubr.bf16.mxu1 %v18946_v19  ;;  %v6358_v19 = vld [vmem:[#allocation3 + $0x349] sm:$0xff] }
 0x780   :  { %14775 = vmatmul.mubr.bf16.gmra.mrb[24].mxu1 %v18948_v4  ;;  %v6359_v4 = vld [vmem:[#allocation3 + $0x351] sm:$0xff] }
 0x781   :  { %14778 = vmatprep.mubr.bf16.mxu1 %v18952_v49  ;;  %v6391_v49 = vpack.c.bf16 %v6359_v4, %v6358_v19  ;;  %v6852_v19 = vld [vmem:[#allocation3 + $0x25a] sm:$0xff]  ;;  %v6853_v4 = vld [vmem:[#allocation3 + $0x262] sm:$0xff] }
 0x788   :  { %14779 = vmatmul.mubr.bf16.gmra.mrb[28].mxu1 %v18954_v44  ;;  %v6810_v44 = vld [vmem:[#allocation3 + $0x32] sm:$0xff] }
 0x789   :  { %14782 = vmatprep.mubr.bf16.mxu1 %v18958_v1  ;;  %v6811_v1 = vld [vmem:[#allocation3 + $0x3a] sm:$0xff] }
 0x790   :  { %14783 = vmatmul.mubr.bf16.gmra.mrb[32].mxu1 %v6375_v26  ;;  %v6850_v26 = vld [vmem:[#allocation3 + $0x242] sm:$0xff] }
 0x791   :  { %14786 = vmatprep.mubr.bf16.mxu1 %v18961_v11  ;;  %v6874_v11 = vpack.c.bf16 %v6811_v1, %v6810_v44  ;;  %v6855_v44 = vld [vmem:[#allocation3 + $0x27a] sm:$0xff]  ;;  %v6895_v1 = vpack.c.bf16 %v6853_v4, %v6852_v19 }
 0x798   :  { %14787 = vmatmul.mubr.bf16.gmra.mrb[36].mxu1 %v18963_v33  ;;  %v6812_v33 = vld [vmem:[#allocation3 + $0x4a] sm:$0xff] }
 0x799   :  { %14790 = vmatprep.mubr.bf16.mxu1 %v18967_v47  ;;  %v6813_v47 = vld [vmem:[#allocation3 + $0x52] sm:$0xff] }
 0x7a0   :  { %14791 = vmatmul.mubr.bf16.gmra.mrb[40].mxu1 %v18969_v60  ;;  %v6814_v60 = vld [vmem:[#allocation3 + $0x62] sm:$0xff] }
 0x7a1   :  { %14794 = vmatprep.mubr.bf16.mxu1 %v18973_v55  ;;  %v6815_v55 = vld [vmem:[#allocation3 + $0x6a] sm:$0xff] }
 0x7a8   :  { %14795 = vmatmul.mubr.bf16.gmra.mrb[44].mxu1 %v18975_v48  ;;  %v6875_v48 = vpack.c.bf16 %v6813_v47, %v6812_v33  ;;  %v6856_v33 = vld [vmem:[#allocation3 + $0x28a] sm:$0xff]  ;;  %v6857_v47 = vld [vmem:[#allocation3 + $0x292] sm:$0xff] }
 0x7a9   :  { %14798 = vmatprep.mubr.bf16.mxu1 %v18979_v13  ;;  %v6876_v13 = vpack.c.bf16 %v6815_v55, %v6814_v60  ;;  %v6858_v60 = vld [vmem:[#allocation3 + $0x2a2] sm:$0xff]  ;;  %v6859_v55 = vld [vmem:[#allocation3 + $0x2aa] sm:$0xff] }
 0x7b0   :  { %14799 = vmatmul.mubr.bf16.gmra.mrb[48].mxu1 %v21793_v16  ;;  %v6893_v16 = vpack.c.bf16 %v6849_v6, %v6848_v38 }
 0x7b1   :  { %14802 = vmatprep.mubr.bf16.mxu1 %v21794_v2 }
 0x7b8   :  { %14803 = vmatmul.mubr.bf16.gmra.mrb[52].mxu1 %v18987_v9  ;;  %v6818_v9 = vld [vmem:[#allocation3 + $0x92] sm:$0xff] }
 0x7b9   :  { %14806 = vmatprep.mubr.bf16.mxu1 %v18991_v28  ;;  %v6819_v28 = vld [vmem:[#allocation3 + $0x9a] sm:$0xff] }
 0x7c0   :  { %14807 = vmatmul.mubr.bf16.gmra.mrb[56].mxu1 %v18993_v56 }
 0x7c1   :  { %14810 = vmatprep.mubr.bf16.mxu1 %v18997_v14  ;;  %v6816_v14 = vld [vmem:[#allocation3 + $0x7a] sm:$0xff] }
 0x7c8   :  { %14811 = vmatmul.mubr.bf16.gmra.mrb[60].mxu1 %v18999_v50  ;;  %v6817_v50 = vld [vmem:[#allocation3 + $0x82] sm:$0xff] }
 0x7c9   :  { %14814 = vmatprep.mubr.bf16.mxu1 %v19003_v58  ;;  %v6877_v56 = vpack.c.bf16 %v6817_v50, %v6816_v14  ;;  %v6878_v58 = vpack.c.bf16 %v6819_v28, %v6818_v9  ;;  %v6860_v14 = vld [vmem:[#allocation3 + $0x2ba] sm:$0xff]  ;;  %v6861_v50 = vld [vmem:[#allocation3 + $0x2c2] sm:$0xff]  ;;  %v6862_v9 = vld [vmem:[#allocation3 + $0x2d2] sm:$0xff] }
 0x7ca   :  { %v6863_v28 = vld [vmem:[#allocation3 + $0x2da] sm:$0xff] }
 0x7d0   :  { %14815 = vmatmul.mubr.bf16.gmra.mrb[64].mxu1 %v6391_v49  ;;  %v6854_v49 = vld [vmem:[#allocation3 + $0x272] sm:$0xff] }
 0x7d1   :  { %14834 = vmatprep.mubr.bf16.mxu1 %v6874_v11  ;;  %v6896_v11 = vpack.c.bf16 %v6855_v44, %v6854_v49 }
 0x7d8   :  { %14835 = vmatmul.mubr.bf16.vlgmr.msra.gmra.mrb[4].mxu1 %v6875_v48  ;;  %v6897_v48 = vpack.c.bf16 %v6857_v47, %v6856_v33 }
 0x7d9   :  { %14838 = vmatprep.mubr.bf16.mxu1 %v6876_v13  ;;  %v6898_v13 = vpack.c.bf16 %v6859_v55, %v6858_v60 }
 0x7e0   :  { %14839 = vmatmul.mubr.bf16.gmra.mrb[8].mxu1 %v6877_v56  ;;  %v6899_v56 = vpack.c.bf16 %v6861_v50, %v6860_v14 }
 0x7e1   :  { %14842 = vmatprep.mubr.bf16.mxu1 %v6878_v58  ;;  %v6900_v58 = vpack.c.bf16 %v6863_v28, %v6862_v9 }
 0x7e8   :  { %14843 = vmatmul.mubr.bf16.gmra.mrb[12].mxu1 %v6879_v5  ;;  %v6901_v5 = vpack.c.bf16 %v6865_v12, %v6864_v30 }
 0x7e9   :  { %14846 = vmatprep.mubr.bf16.mxu1 %v6880_v31  ;;  %v6902_v31 = vpack.c.bf16 %v6867_v20, %v6866_v36 }
 0x7f0   :  { %14847 = vmatmul.mubr.bf16.gmra.mrb[16].mxu1 %v6881_v23  ;;  %v6873_v23 = vld [vmem:[#allocation3 + $0x352] sm:$0xff] }
 0x7f1   :  { %14850 = vmatprep.mubr.bf16.mxu1 %v6882_v18  ;;  %v6905_v18 = vpack.c.bf16 %v6873_v23, %v6872_v21 }
 0x7f8   :  { %14851 = vmatmul.mubr.bf16.gmra.mrb[20].mxu1 %v6883_v57 }
 0x7f9   :  { %14854 = vmatprep.mubr.bf16.mxu1 %v6884_v54 }
 0x800   :  { %14855 = vmatmul.mubr.bf16.gmra.mrb[24].mxu1 %v6885_v27 }
 0x801   :  { %14858 = vmatprep.mubr.bf16.mxu1 %v6886_v45 }
 0x808   :  { %14859 = vmatmul.mubr.bf16.gmra.mrb[28].mxu1 %v6887_v39 }
 0x809   :  { %14862 = vmatprep.mubr.bf16.mxu1 %v19046_v35  ;;  %v6851_v35 = vld [vmem:[#allocation3 + $0x24a] sm:$0xff] }
 0x80a   :  { %v6894_v2 = vpack.c.bf16 %v6851_v35, %v6850_v26 }
 0x810   :  { %14863 = vmatmul.mubr.bf16.gmra.mrb[32].mxu1 %v6889_v24 }
 0x811   :  { %14866 = vmatprep.mubr.bf16.mxu1 %v6890_v41 }
 0x818   :  { %14867 = vmatmul.mubr.bf16.gmra.mrb[36].mxu1 %v6891_v17 }
 0x819   :  { %14870 = vmatprep.mubr.bf16.mxu1 %v6892_v7 }
 0x820   :  { %14871 = vmatmul.mubr.bf16.gmra.mrb[40].mxu1 %v6893_v16 }
 0x821   :  { %14874 = vmatprep.mubr.bf16.mxu1 %v6894_v2 }
 0x828   :  { %14875 = vmatmul.mubr.bf16.gmra.mrb[44].mxu1 %v6895_v1 }
 0x829   :  { %14878 = vmatprep.mubr.bf16.mxu1 %v6896_v11 }
 0x830   :  { %14879 = vmatmul.mubr.bf16.gmra.mrb[48].mxu1 %v6897_v48 }
 0x831   :  { %14882 = vmatprep.mubr.bf16.mxu1 %v6898_v13 }
 0x838   :  { %14883 = vmatmul.mubr.bf16.gmra.mrb[52].mxu1 %v6899_v56 }
 0x839   :  { %14886 = vmatprep.mubr.bf16.mxu1 %v6900_v58 }
 0x840   :  { %14887 = vmatmul.mubr.bf16.gmra.mrb[56].mxu1 %v6901_v5 }
 0x841   :  { %14890 = vmatprep.mubr.bf16.mxu1 %v6902_v31 }
 0x848   :  { %14891 = vmatmul.mubr.bf16.gmra.mrb[60].mxu1 %v6903_v10 }
 0x849   :  { %14894 = vmatprep.mubr.bf16.mxu1 %v19064_v32 }
 0x850   :  { %14895 = vmatmul.mubr.bf16.gmra.mrb[64].mxu1 %v6905_v18 }
 0x8ab   :  { %v19150_v51 = vpop.f32.mrb[4].mxu1 }
 0x8ac   :  { %v19152_v53 = vpop.f32.mrb[5].mxu1 }
 0x8ad   :  { %v19154_v15 = vpop.f32.mrb[6].mxu1 }
 0x8ae   :  { %v19156_v42 = vpop.f32.mrb[7].mxu1 }
 0x8af   :  { %v7324_v57 = vadd.f32 %v19156_v42, %v19152_v53 }
 0x8b1   :  { %v7325_v54 = vadd.f32 %v19150_v51, %v7324_v57 }
 0x8b3   :  { %v19161_v62 = vpop.f32.mrb[8].mxu1  ;;  %v7326_v32 = vadd.f32 %v19154_v15, %v7325_v54 }
 0x8b4   :  { %v19164_v22 = vpop.f32.mrb[9].mxu1 }
 0x8b5   :  { %v7327_v25 = vadd.f32 %v7326_v32, %v19164_v22  ;;  %v19167_v59 = vpop.f32.mrb[10].mxu1 }
 0x8b6   :  { %v19169_v27 = vpop.f32.mrb[11].mxu1 }
 0x8b7   :  { %v7328_v45 = vadd.f32 %v7327_v25, %v19169_v27 }
 0x8b9   :  { %v7329_v0 = vadd.f32 %v19161_v62, %v7328_v45 }
 0x8bb   :  { %v19173_v3 = vpop.f32.mrb[12].mxu1  ;;  %v7330_v39 = vadd.f32 %v19167_v59, %v7329_v0 }
 0x8bc   :  { %v19176_v61 = vpop.f32.mrb[13].mxu1 }
 0x8bd   :  { %v7331_v29 = vadd.f32 %v7330_v39, %v19176_v61  ;;  %v19179_v24 = vpop.f32.mrb[14].mxu1 }
 0x8be   :  { %v19181_v34 = vpop.f32.mrb[15].mxu1 }
 0x8bf   :  { %v7332_v37 = vadd.f32 %v7331_v29, %v19181_v34 }
 0x8c1   :  { %v7333_v41 = vadd.f32 %v19173_v3, %v7332_v37 }
 0x8c3   :  { %v19185_v43 = vpop.f32.mrb[16].mxu1  ;;  %v7334_v52 = vadd.f32 %v19179_v24, %v7333_v41 }
 0x8c4   :  { %v19188_v46 = vpop.f32.mrb[17].mxu1 }
 0x8c5   :  { %v7335_v8 = vadd.f32 %v7334_v52, %v19188_v46  ;;  %v19191_v17 = vpop.f32.mrb[18].mxu1 }
 0x8c6   :  { %v19193_v7 = vpop.f32.mrb[19].mxu1 }
 0x8c7   :  { %v7336_v38 = vadd.f32 %v7335_v8, %v19193_v7 }
 0x8c9   :  { %v7337_v6 = vadd.f32 %v19185_v43, %v7336_v38 }
 0x8cb   :  { %v19197_v26 = vpop.f32.mrb[20].mxu1  ;;  %v7338_v35 = vadd.f32 %v19191_v17, %v7337_v6 }
 0x8cc   :  { %v19200_v16 = vpop.f32.mrb[21].mxu1 }
 0x8cd   :  { %v7339_v2 = vadd.f32 %v7338_v35, %v19200_v16  ;;  %v19203_v19 = vpop.f32.mrb[22].mxu1 }
 0x8ce   :  { %v19205_v4 = vpop.f32.mrb[23].mxu1 }
 0x8cf   :  { %v7340_v49 = vadd.f32 %v7339_v2, %v19205_v4 }
 0x8d1   :  { %v7341_v44 = vadd.f32 %v19197_v26, %v7340_v49 }
 0x8d3   :  { %v19209_v1 = vpop.f32.mrb[24].mxu1  ;;  %v7342_v11 = vadd.f32 %v19203_v19, %v7341_v44 }
 0x8d4   :  { %v19212_v33 = vpop.f32.mrb[25].mxu1 }
 0x8d5   :  { %v7343_v47 = vadd.f32 %v7342_v11, %v19212_v33  ;;  %v19215_v60 = vpop.f32.mrb[26].mxu1 }
 0x8d6   :  { %v19217_v55 = vpop.f32.mrb[27].mxu1 }
 0x8d7   :  { %v7344_v48 = vadd.f32 %v7343_v47, %v19217_v55 }
 0x8d9   :  { %v7345_v13 = vadd.f32 %v19209_v1, %v7344_v48 }
 0x8db   :  { %v19221_v14 = vpop.f32.mrb[28].mxu1  ;;  %v7346_v50 = vadd.f32 %v19215_v60, %v7345_v13 }
 0x8dc   :  { %v19224_v9 = vpop.f32.mrb[29].mxu1 }
 0x8dd   :  { %v7347_v28 = vadd.f32 %v7346_v50, %v19224_v9  ;;  %v19227_v56 = vpop.f32.mrb[30].mxu1 }
 0x8de   :  { %v19229_v58 = vpop.f32.mrb[31].mxu1 }
 0x8df   :  { %v7348_v30 = vadd.f32 %v7347_v28, %v19229_v58 }
 0x8e1   :  { %v7349_v12 = vadd.f32 %v19221_v14, %v7348_v30 }
 0x8e3   :  { %v19233_v36 = vpop.f32.mrb[32].mxu1  ;;  %v7350_v20 = vadd.f32 %v19227_v56, %v7349_v12 }
 0x8e4   :  { %v19236_v5 = vpop.f32.mrb[33].mxu1 }
 0x8e5   :  { %v7351_v31 = vadd.f32 %v7350_v20, %v19236_v5  ;;  %v19239_v63 = vpop.f32.mrb[34].mxu1 }
 0x8e6   :  { %v19241_v40 = vpop.f32.mrb[35].mxu1 }
 0x8e7   :  { %v7352_v10 = vadd.f32 %v7351_v31, %v19241_v40 }
 0x8e9   :  { %v7353_v21 = vadd.f32 %v19233_v36, %v7352_v10 }
 0x8eb   :  { %v19245_v23 = vpop.f32.mrb[36].mxu1  ;;  %v7354_v18 = vadd.f32 %v19239_v63, %v7353_v21 }
 0x8ec   :  { %v19248_v57 = vpop.f32.mrb[37].mxu1 }
 0x8ed   :  { %v7355_v54 = vadd.f32 %v7354_v18, %v19248_v57  ;;  %v19251_v32 = vpop.f32.mrb[38].mxu1 }
 0x8ee   :  { %v19253_v25 = vpop.f32.mrb[39].mxu1 }
 0x8ef   :  { %v7356_v45 = vadd.f32 %v7355_v54, %v19253_v25 }
 0x8f1   :  { %v7357_v0 = vadd.f32 %v19245_v23, %v7356_v45 }
 0x8f3   :  { %v19257_v39 = vpop.f32.mrb[40].mxu1  ;;  %v7358_v29 = vadd.f32 %v19251_v32, %v7357_v0 }
 0x8f4   :  { %v19260_v37 = vpop.f32.mrb[41].mxu1 }
 0x8f5   :  { %v7359_v41 = vadd.f32 %v7358_v29, %v19260_v37  ;;  %v19263_v52 = vpop.f32.mrb[42].mxu1 }
 0x8f6   :  { %v19265_v8 = vpop.f32.mrb[43].mxu1 }
 0x8f7   :  { %v7360_v38 = vadd.f32 %v7359_v41, %v19265_v8 }
 0x8f9   :  { %v7361_v6 = vadd.f32 %v19257_v39, %v7360_v38 }
 0x8fb   :  { %v19269_v35 = vpop.f32.mrb[44].mxu1  ;;  %v7362_v2 = vadd.f32 %v19263_v52, %v7361_v6 }
 0x8fc   :  { %v19272_v49 = vpop.f32.mrb[45].mxu1 }
 0x8fd   :  { %v7363_v44 = vadd.f32 %v7362_v2, %v19272_v49  ;;  %v19275_v11 = vpop.f32.mrb[46].mxu1 }
 0x8fe   :  { %v19277_v47 = vpop.f32.mrb[47].mxu1 }
 0x8ff   :  { %v7364_v48 = vadd.f32 %v7363_v44, %v19277_v47 }
 0x901   :  { %v7365_v13 = vadd.f32 %v19269_v35, %v7364_v48 }
 0x903   :  { %v19281_v50 = vpop.f32.mrb[48].mxu1  ;;  %v7366_v28 = vadd.f32 %v19275_v11, %v7365_v13 }
 0x904   :  { %v19284_v30 = vpop.f32.mrb[49].mxu1 }
 0x905   :  { %v7367_v12 = vadd.f32 %v7366_v28, %v19284_v30  ;;  %v19287_v20 = vpop.f32.mrb[50].mxu1 }
 0x906   :  { %v19289_v31 = vpop.f32.mrb[51].mxu1 }
 0x907   :  { %v7368_v10 = vadd.f32 %v7367_v12, %v19289_v31 }
 0x909   :  { %v7369_v21 = vadd.f32 %v19281_v50, %v7368_v10 }
 0x90b   :  { %v19293_v18 = vpop.f32.mrb[52].mxu1  ;;  %v7370_v54 = vadd.f32 %v19287_v20, %v7369_v21 }
 0x90c   :  { %21795 = vst [vmem:[#allocation6_spill] sm:$0xff] %v19293_v18  ;;  %v19296_v45 = vpop.f32.mrb[53].mxu1 }
 0x90d   :  { %21796 = vst [vmem:[#allocation7_spill] sm:$0xff] %v19296_v45  ;;  %v7371_v0 = vadd.f32 %v7370_v54, %v19296_v45  ;;  %v19299_v29 = vpop.f32.mrb[54].mxu1 }
 0x90e   :  { %21797 = vst [vmem:[#allocation8_spill] sm:$0xff] %v19299_v29  ;;  %v19301_v41 = vpop.f32.mrb[55].mxu1 }
 0x90f   :  { %21798 = vst [vmem:[#allocation9_spill] sm:$0xff] %v19301_v41  ;;  %v7372_v38 = vadd.f32 %v7371_v0, %v19301_v41 }
 0x911   :  { %v7373_v6 = vadd.f32 %v19293_v18, %v7372_v38 }
 0x913   :  { %v19305_v2 = vpop.f32.mrb[56].mxu1  ;;  %v7374_v44 = vadd.f32 %v19299_v29, %v7373_v6 }
 0x914   :  { %21799 = vst [vmem:[#allocation10_spill] sm:$0xff] %v19305_v2  ;;  %v19308_v48 = vpop.f32.mrb[57].mxu1 }
 0x915   :  { %21800 = vst [vmem:[#allocation11_spill] sm:$0xff] %v19308_v48  ;;  %v7375_v13 = vadd.f32 %v7374_v44, %v19308_v48  ;;  %v19311_v28 = vpop.f32.mrb[58].mxu1 }
 0x916   :  { %21801 = vst [vmem:[#allocation12_spill] sm:$0xff] %v19311_v28  ;;  %v19313_v12 = vpop.f32.mrb[59].mxu1 }
 0x917   :  { %21802 = vst [vmem:[#allocation13_spill] sm:$0xff] %v19313_v12  ;;  %v7376_v10 = vadd.f32 %v7375_v13, %v19313_v12 }
 0x919   :  { %v7377_v21 = vadd.f32 %v19305_v2, %v7376_v10 }
 0x91b   :  { %v19317_v54 = vpop.f32.mrb[60].mxu1  ;;  %v7378_v0 = vadd.f32 %v19311_v28, %v7377_v21 }
 0x91c   :  { %21803 = vst [vmem:[#allocation14_spill] sm:$0xff] %v19317_v54  ;;  %v19320_v38 = vpop.f32.mrb[61].mxu1 }
 0x91d   :  { %21804 = vst [vmem:[#allocation15_spill] sm:$0xff] %v19320_v38  ;;  %v7379_v6 = vadd.f32 %v7378_v0, %v19320_v38  ;;  %v19323_v29 = vpop.f32.mrb[62].mxu1 }
 0x91e   :  { %21805 = vst [vmem:[#allocation16_spill] sm:$0xff] %v19323_v29  ;;  %v19325_v18 = vpop.f32.mrb[63].mxu1 }
 0x91f   :  { %21806 = vst [vmem:[#allocation17_spill] sm:$0xff] %v19325_v18  ;;  %v7380_v44 = vadd.f32 %v7379_v6, %v19325_v18 }
 0x921   :  { %v7381_v48 = vadd.f32 %v19317_v54, %v7380_v44 }
 0x923   :  { %v19329_v41 = vpop.f32.mrb[64].mxu1  ;;  %v7382_v13 = vadd.f32 %v19323_v29, %v7381_v48 }
 0x924   :  { %v19332_v10 = vpop.f32.mrb[65].mxu1 }
 0x925   :  { %21807 = vst [vmem:[#allocation18_spill] sm:$0xff] %v19332_v10  ;;  %v7383_v21 = vadd.f32 %v7382_v13, %v19332_v10  ;;  %v19335_v28 = vpop.f32.mrb[66].mxu1 }
 0x926   :  { %v19337_v2 = vpop.f32.mrb[67].mxu1 }
 0x927   :  { %v7384_v0 = vadd.f32 %v7383_v21, %v19337_v2 }
 0x929   :  { %v7385_v38 = vadd.f32 %v19329_v41, %v7384_v0  ;;  %v21821_v0 = vld [vmem:[#allocation8_spill] sm:$0xff] }
 0x92b   :  { %v7386_v6 = vadd.f32 %v19335_v28, %v7385_v38  ;;  %v21819_v38 = vld [vmem:[#allocation6_spill] sm:$0xff] }
 0x92d   :  { %v7387_v18 = vrot.slane %v7386_v6, 4 }
 0x92f   :  { %v7388_v44 = vadd.f32 %v7387_v18, %v7386_v6  ;;  %v21823_v6 = vld [vmem:[#allocation11_spill] sm:$0xff] }
 0x931   :  { %v7389_v54 = vrot.slane %v7388_v44, 2 }
 0x933   :  { %v7390_v12 = vadd.f32 %v7389_v54, %v7388_v44  ;;  %v21817_v54 = vld [vmem:[#allocation9_spill] sm:$0xff] }
 0x934   :  { %v21825_v44 = vld [vmem:[#allocation13_spill] sm:$0xff] }
 0x935   :  { %v7391_v45 = vrot.slane %v7390_v12, 1 }
 0x937   :  { %v7392_v48 = vadd.f32 %v7391_v45, %v7390_v12  ;;  %v21816_v12 = vld [vmem:[#allocation7_spill] sm:$0xff] }
 0x939   :  { %v19342_v29 = vmul.f32 0.001953125, %v7392_v48 }
 0x93b   :  { %v19346_v13 = vsub.f32 %v19152_v53, %v19342_v29  ;;  %v19350_v10 = vsub.f32 %v19156_v42, %v19342_v29  ;;  %v19354_v21 = vsub.f32 %v19150_v51, %v19342_v29  ;;  %v19358_v18 = vsub.f32 %v19154_v15, %v19342_v29 }
 0x93c   :  { %v19362_v45 = vsub.f32 %v19164_v22, %v19342_v29  ;;  %v19366_v53 = vsub.f32 %v19169_v27, %v19342_v29  ;;  %v19370_v42 = vsub.f32 %v19161_v62, %v19342_v29  ;;  %v19374_v51 = vsub.f32 %v19167_v59, %v19342_v29 }
 0x93d   :  { %21808 = vst [vmem:[#allocation19_spill] sm:$0xff] %v19346_v13  ;;  %21809 = vst [vmem:[#allocation20_spill] sm:$0xff] %v19350_v10  ;;  %v19378_v15 = vsub.f32 %v19176_v61, %v19342_v29  ;;  %v19382_v22 = vsub.f32 %v19181_v34, %v19342_v29  ;;  %v19386_v27 = vsub.f32 %v19173_v3, %v19342_v29 }
 0x93e   :  { %21810 = vst [vmem:[#allocation21_spill] sm:$0xff] %v19354_v21  ;;  %v19390_v62 = vsub.f32 %v19179_v24, %v19342_v29  ;;  %v19394_v59 = vsub.f32 %v19188_v46, %v19342_v29  ;;  %v19398_v61 = vsub.f32 %v19193_v7, %v19342_v29  ;;  %v19402_v34 = vsub.f32 %v19185_v43, %v19342_v29 }
 0x93f   :  { %v19406_v3 = vsub.f32 %v19191_v17, %v19342_v29  ;;  %v19410_v24 = vsub.f32 %v19200_v16, %v19342_v29  ;;  %v19414_v46 = vsub.f32 %v19205_v4, %v19342_v29  ;;  %v19418_v7 = vsub.f32 %v19197_v26, %v19342_v29 }
 0x940   :  { %v19422_v43 = vsub.f32 %v19203_v19, %v19342_v29  ;;  %v19426_v17 = vsub.f32 %v19212_v33, %v19342_v29  ;;  %v19430_v16 = vsub.f32 %v19217_v55, %v19342_v29  ;;  %v19434_v4 = vsub.f32 %v19209_v1, %v19342_v29 }
 0x941   :  { %v19438_v26 = vsub.f32 %v19215_v60, %v19342_v29  ;;  %v19442_v19 = vsub.f32 %v19224_v9, %v19342_v29  ;;  %v19446_v33 = vsub.f32 %v19229_v58, %v19342_v29  ;;  %v19450_v55 = vsub.f32 %v19221_v14, %v19342_v29 }
 0x942   :  { %v19454_v1 = vsub.f32 %v19227_v56, %v19342_v29  ;;  %v19458_v60 = vsub.f32 %v19236_v5, %v19342_v29  ;;  %v19462_v9 = vsub.f32 %v19241_v40, %v19342_v29  ;;  %v19466_v58 = vsub.f32 %v19233_v36, %v19342_v29 }
 0x943   :  { %v19470_v14 = vsub.f32 %v19239_v63, %v19342_v29  ;;  %v19474_v56 = vsub.f32 %v19248_v57, %v19342_v29  ;;  %v19478_v5 = vsub.f32 %v19253_v25, %v19342_v29  ;;  %v19482_v40 = vsub.f32 %v19245_v23, %v19342_v29 }
 0x944   :  { %v19486_v36 = vsub.f32 %v19251_v32, %v19342_v29  ;;  %v19490_v63 = vsub.f32 %v19260_v37, %v19342_v29  ;;  %v19494_v57 = vsub.f32 %v19265_v8, %v19342_v29  ;;  %v19498_v25 = vsub.f32 %v19257_v39, %v19342_v29 }
 0x945   :  { %v19502_v23 = vsub.f32 %v19263_v52, %v19342_v29  ;;  %v19506_v32 = vsub.f32 %v19272_v49, %v19342_v29  ;;  %v19510_v37 = vsub.f32 %v19277_v47, %v19342_v29  ;;  %v19514_v8 = vsub.f32 %v19269_v35, %v19342_v29 }
 0x946   :  { %v19518_v39 = vsub.f32 %v19275_v11, %v19342_v29  ;;  %v19522_v52 = vsub.f32 %v19284_v30, %v19342_v29  ;;  %v19526_v49 = vsub.f32 %v19289_v31, %v19342_v29  ;;  %v19530_v47 = vsub.f32 %v19281_v50, %v19342_v29 }
 0x947   :  { %21811 = vst [vmem:[#allocation22_spill] sm:$0xff] %v19502_v23  ;;  %21812 = vst [vmem:[#allocation23_spill] sm:$0xff] %v19506_v32  ;;  %v19534_v35 = vsub.f32 %v19287_v20, %v19342_v29  ;;  %v19538_v11 = vsub.f32 %v21816_v12, %v19342_v29  ;;  %v19542_v30 = vsub.f32 %v21817_v54, %v19342_v29  ;;  %v21827_v12 = vld [vmem:[#allocation10_spill] sm:$0xff] }
 0x948   :  { %21813 = vst [vmem:[#allocation24_spill] sm:$0xff] %v19510_v37  ;;  %21814 = vst [vmem:[#allocation25_spill] sm:$0xff] %v19514_v8  ;;  %v19546_v31 = vsub.f32 %v21819_v38, %v19342_v29  ;;  %v19550_v50 = vsub.f32 %v21821_v0, %v19342_v29  ;;  %v19554_v20 = vsub.f32 %v21823_v6, %v19342_v29 }
 0x949   :  { %21815 = vst [vmem:[#allocation26_spill] sm:$0xff] %v19518_v39  ;;  %21818 = vst [vmem:[#allocation7_spill] sm:$0xff] %v19542_v30  ;;  %v19558_v48 = vsub.f32 %v21825_v44, %v19342_v29  ;;  %v19562_v54 = vsub.f32 %v21827_v12, %v19342_v29  ;;  %v21829_v30 = vld [vmem:[#allocation12_spill] sm:$0xff] }
 0x94a   :  { %21820 = vst [vmem:[#allocation9_spill] sm:$0xff] %v19546_v31  ;;  %21822 = vst [vmem:[#allocation6_spill] sm:$0xff] %v19550_v50  ;;  %v19566_v38 = vsub.f32 %v21829_v30, %v19342_v29  ;;  %v21831_v31 = vld [vmem:[#allocation15_spill] sm:$0xff]  ;;  %v21833_v50 = vld [vmem:[#allocation17_spill] sm:$0xff] }
 0x94b   :  { %21824 = vst [vmem:[#allocation8_spill] sm:$0xff] %v19554_v20  ;;  %21826 = vst [vmem:[#allocation11_spill] sm:$0xff] %v19558_v48  ;;  %v19570_v0 = vsub.f32 %v21831_v31, %v19342_v29  ;;  %v19574_v6 = vsub.f32 %v21833_v50, %v19342_v29  ;;  %v21835_v20 = vld [vmem:[#allocation14_spill] sm:$0xff]  ;;  %v21837_v48 = vld [vmem:[#allocation16_spill] sm:$0xff]  ;;  %v19590_v31 = vsub.f32 %v19337_v2, %v19342_v29 }
 0x94c   :  { %21828 = vst [vmem:[#allocation13_spill] sm:$0xff] %v19562_v54  ;;  %21830 = vst [vmem:[#allocation10_spill] sm:$0xff] %v19566_v38  ;;  %v19578_v44 = vsub.f32 %v21835_v20, %v19342_v29  ;;  %v19582_v12 = vsub.f32 %v21837_v48, %v19342_v29  ;;  %v21839_v54 = vld [vmem:[#allocation18_spill] sm:$0xff]  ;;  %v19594_v50 = vsub.f32 %v19329_v41, %v19342_v29 }
 0x94d   :  { %21832 = vst [vmem:[#allocation12_spill] sm:$0xff] %v19570_v0  ;;  %21834 = vst [vmem:[#allocation15_spill] sm:$0xff] %v19574_v6  ;;  %v19586_v30 = vsub.f32 %v21839_v54, %v19342_v29  ;;  %v19598_v20 = vsub.f32 %v19335_v28, %v19342_v29  ;;  %v7459_v48 = vmul.f32 %v19346_v13, %v19346_v13 }
 0x94e   :  { %21836 = vst [vmem:[#allocation17_spill] sm:$0xff] %v19578_v44  ;;  %21838 = vst [vmem:[#allocation14_spill] sm:$0xff] %v19582_v12  ;;  %v7460_v12 = vmul.f32 %v19350_v10, %v19350_v10  ;;  %v7461_v54 = vmul.f32 %v19354_v21, %v19354_v21  ;;  %v7462_v2 = vmul.f32 %v19358_v18, %v19358_v18 }
 0x94f   :  { %21840 = vst [vmem:[#allocation16_spill] sm:$0xff] %v19586_v30  ;;  %21841 = vst [vmem:[#allocation18_spill] sm:$0xff] %v19590_v31  ;;  %v7463_v41 = vmul.f32 %v19362_v45, %v19362_v45  ;;  %v7464_v29 = vmul.f32 %v19366_v53, %v19366_v53  ;;  %v7465_v13 = vmul.f32 %v19370_v42, %v19370_v42 }
 0x950   :  { %21842 = vst [vmem:[#allocation27_spill] sm:$0xff] %v19594_v50  ;;  %v7523_v30 = vadd.f32 %v7460_v12, %v7459_v48  ;;  %v7466_v21 = vmul.f32 %v19374_v51, %v19374_v51  ;;  %v7467_v48 = vmul.f32 %v19378_v15, %v19378_v15 }
 0x952   :  { %v7524_v31 = vadd.f32 %v7523_v30, %v7461_v54  ;;  %v7468_v54 = vmul.f32 %v19382_v22, %v19382_v22 }
 0x954   :  { %v7525_v50 = vadd.f32 %v7524_v31, %v7462_v2  ;;  %v7469_v2 = vmul.f32 %v19386_v27, %v19386_v27 }
 0x956   :  { %v7526_v28 = vadd.f32 %v7525_v50, %v7463_v41  ;;  %v7470_v41 = vmul.f32 %v19390_v62, %v19390_v62 }
 0x958   :  { %v7527_v10 = vadd.f32 %v7526_v28, %v7464_v29  ;;  %v7471_v28 = vmul.f32 %v19394_v59, %v19394_v59 }
 0x95a   :  { %v7528_v12 = vadd.f32 %v7527_v10, %v7465_v13  ;;  %v7472_v13 = vmul.f32 %v19398_v61, %v19398_v61 }
 0x95c   :  { %v7529_v30 = vadd.f32 %v7528_v12, %v7466_v21  ;;  %v7473_v12 = vmul.f32 %v19402_v34, %v19402_v34 }
 0x95e   :  { %v7530_v31 = vadd.f32 %v7529_v30, %v7467_v48  ;;  %v7474_v30 = vmul.f32 %v19406_v3, %v19406_v3 }
 0x960   :  { %v7531_v50 = vadd.f32 %v7530_v31, %v7468_v54  ;;  %v7475_v31 = vmul.f32 %v19410_v24, %v19410_v24 }
 0x962   :  { %v7532_v29 = vadd.f32 %v7531_v50, %v7469_v2  ;;  %v7476_v50 = vmul.f32 %v19414_v46, %v19414_v46 }
 0x964   :  { %v7533_v10 = vadd.f32 %v7532_v29, %v7470_v41  ;;  %v7477_v29 = vmul.f32 %v19418_v7, %v19418_v7 }
 0x966   :  { %v7534_v21 = vadd.f32 %v7533_v10, %v7471_v28  ;;  %v7478_v10 = vmul.f32 %v19422_v43, %v19422_v43 }
 0x968   :  { %v7535_v48 = vadd.f32 %v7534_v21, %v7472_v13  ;;  %v7479_v21 = vmul.f32 %v19426_v17, %v19426_v17 }
 0x96a   :  { %v7536_v54 = vadd.f32 %v7535_v48, %v7473_v12  ;;  %v7480_v48 = vmul.f32 %v19430_v16, %v19430_v16 }
 0x96c   :  { %v7537_v2 = vadd.f32 %v7536_v54, %v7474_v30  ;;  %v7481_v54 = vmul.f32 %v19434_v4, %v19434_v4 }
 0x96e   :  { %v7538_v41 = vadd.f32 %v7537_v2, %v7475_v31  ;;  %v7482_v2 = vmul.f32 %v19438_v26, %v19438_v26 }
 0x970   :  { %v7539_v28 = vadd.f32 %v7538_v41, %v7476_v50  ;;  %v7483_v41 = vmul.f32 %v19442_v19, %v19442_v19 }
 0x972   :  { %v7540_v13 = vadd.f32 %v7539_v28, %v7477_v29  ;;  %v7484_v28 = vmul.f32 %v19446_v33, %v19446_v33 }
 0x974   :  { %v7541_v12 = vadd.f32 %v7540_v13, %v7478_v10  ;;  %v16878_v13 = vld [vmem:[%s21662_s9] sm:$0xff]  }
 0x975   :  { %14978 = vmatprep.subr.bf16.mxu0 %v16878_v13 }
 0x976   :  { %v7542_v30 = vadd.f32 %v7541_v12, %v7479_v21  ;;  %v7485_v21 = vmul.f32 %v19450_v55, %v19450_v55  ;;  %14979 = vmatpush3.bf16.msra.mxu0 %v16878_v13  ;;  %v7491_v13 = vmul.f32 %v19474_v56, %v19474_v56 }
 0x978   :  { %v7543_v31 = vadd.f32 %v7542_v30, %v7480_v48  ;;  %v7486_v48 = vmul.f32 %v19454_v1, %v19454_v1 }
 0x97a   :  { %v7544_v50 = vadd.f32 %v7543_v31, %v7481_v54  ;;  %v7487_v54 = vmul.f32 %v19458_v60, %v19458_v60 }
 0x97c   :  { %v7545_v29 = vadd.f32 %v7544_v50, %v7482_v2  ;;  %v7488_v2 = vmul.f32 %v19462_v9, %v19462_v9 }
 0x97e   :  { %v7546_v10 = vadd.f32 %v7545_v29, %v7483_v41  ;;  %v7489_v41 = vmul.f32 %v19466_v58, %v19466_v58 }
 0x980   :  { %v7547_v12 = vadd.f32 %v7546_v10, %v7484_v28  ;;  %v7490_v28 = vmul.f32 %v19470_v14, %v19470_v14 }
 0x982   :  { %v7548_v30 = vadd.f32 %v7547_v12, %v7485_v21  ;;  %v7492_v12 = vmul.f32 %v19478_v5, %v19478_v5 }
 0x984   :  { %v7549_v31 = vadd.f32 %v7548_v30, %v7486_v48  ;;  %v7493_v30 = vmul.f32 %v19482_v40, %v19482_v40 }
 0x986   :  { %v7550_v50 = vadd.f32 %v7549_v31, %v7487_v54  ;;  %v7494_v31 = vmul.f32 %v19486_v36, %v19486_v36 }
 0x988   :  { %v7551_v29 = vadd.f32 %v7550_v50, %v7488_v2  ;;  %v7495_v50 = vmul.f32 %v19490_v63, %v19490_v63 }
 0x98a   :  { %v7552_v10 = vadd.f32 %v7551_v29, %v7489_v41  ;;  %v7496_v29 = vmul.f32 %v19494_v57, %v19494_v57 }
 0x98c   :  { %v7553_v21 = vadd.f32 %v7552_v10, %v7490_v28  ;;  %v7497_v10 = vmul.f32 %v19498_v25, %v19498_v25 }
 0x98e   :  { %v7554_v48 = vadd.f32 %v7553_v21, %v7491_v13  ;;  %v7498_v21 = vmul.f32 %v19502_v23, %v19502_v23 }
 0x990   :  { %v7555_v54 = vadd.f32 %v7554_v48, %v7492_v12  ;;  %v7499_v48 = vmul.f32 %v19506_v32, %v19506_v32  ;;  %v7504_v32 = vmul.f32 %v19526_v49, %v19526_v49 }
 0x992   :  { %v7556_v2 = vadd.f32 %v7555_v54, %v7493_v30  ;;  %v7500_v54 = vmul.f32 %v19510_v37, %v19510_v37 }
 0x994   :  { %v7557_v41 = vadd.f32 %v7556_v2, %v7494_v31  ;;  %v16879_v2 = vld [vmem:[%s21662_s9 + $0x40] sm:$0xff]  }
 0x995   :  { %14898 = vmatprep.subr.bf16.mxu1 %v16879_v2 }
 0x996   :  { %v7558_v28 = vadd.f32 %v7557_v41, %v7495_v50  ;;  %v16880_v50 = vld [vmem:[%s21662_s9 + $0x8] sm:$0xff]   ;;  %14899 = vmatpush3.bf16.msra.mxu1 %v16879_v2  ;;  %v7503_v2 = vmul.f32 %v19522_v52, %v19522_v52 }
 0x997   :  { %v16881_v41 = vld [vmem:[%s21662_s9 + $0x48] sm:$0xff]   ;;  %14980 = vmatprep.subr.bf16.mxu0 %v16880_v50 }
 0x998   :  { %v7559_v13 = vadd.f32 %v7558_v28, %v7496_v29  ;;  %v16882_v29 = vld [vmem:[%s21662_s9 + $0x10] sm:$0xff]   ;;  %v7501_v28 = vmul.f32 %v19514_v8, %v19514_v8  ;;  %14981 = vmatpush3.bf16.msra.mxu0 %v16880_v50  ;;  %14900 = vmatprep.subr.bf16.mxu1 %v16881_v41  ;;  %v17084_v8 = vld [vmem:[#allocation3 + $0x8] sm:$0xff] }
 0x999   :  { %14982 = vmatprep.subr.bf16.mxu0 %v16882_v29 }
 0x99a   :  { %v7560_v12 = vadd.f32 %v7559_v13, %v7497_v10  ;;  %v7502_v13 = vmul.f32 %v19518_v39, %v19518_v39  ;;  %14901 = vmatpush3.bf16.msra.mxu1 %v16881_v41  ;;  %v7506_v41 = vmul.f32 %v19534_v35, %v19534_v35 }
 0x99c   :  { %v7561_v30 = vadd.f32 %v7560_v12, %v7498_v21  ;;  %v16883_v12 = vld [vmem:[%s21662_s9 + $0x50] sm:$0xff]   ;;  %14983 = vmatpush3.bf16.msra.mxu0 %v16882_v29 }
 0x99d   :  { %14902 = vmatprep.subr.bf16.mxu1 %v16883_v12 }
 0x99e   :  { %v7562_v31 = vadd.f32 %v7561_v30, %v7499_v48  ;;  %v16884_v48 = vld [vmem:[%s21662_s9 + $0x18] sm:$0xff]   ;;  %v8064_v30 = vld [vmem:[#allocation4 + $0x1] sm:$0xff]  ;;  %14903 = vmatpush3.bf16.msra.mxu1 %v16883_v12  ;;  %v21843_v12 = vld [vmem:[#allocation7_spill] sm:$0xff] }
 0x99f   :  { %14984 = vmatprep.subr.bf16.mxu0 %v16884_v48 }
 0x9a0   :  { %v7563_v10 = vadd.f32 %v7562_v31, %v7500_v54  ;;  %v8065_v54 = vld [vmem:[#allocation4 + $0x9] sm:$0xff]  ;;  %v7952_v31 = vld [vmem:[#allocation4] sm:$0xff]  ;;  %14985 = vmatpush3.bf16.msra.mxu0 %v16884_v48  ;;  %v7508_v48 = vmul.f32 %v21843_v12, %v21843_v12 }
 0x9a1   :  { %v8128_v39 = vpack.c.bf16 %v8065_v54, %v8064_v30  ;;  %v8016_v37 = vpack.c.bf16 %v17084_v8, %v7952_v31  ;;  %v16887_v30 = vld [vmem:[%s21662_s9 + $0x60] sm:$0xff]   ;;  %v16888_v8 = vld [vmem:[%s21662_s9 + $0x28] sm:$0xff]  }
 0x9a2   :  { %v7564_v21 = vadd.f32 %v7563_v10, %v7501_v28  ;;  %v16885_v28 = vld [vmem:[%s21662_s9 + $0x58] sm:$0xff]   ;;  %v16886_v10 = vld [vmem:[%s21662_s9 + $0x20] sm:$0xff]  }
 0x9a3   :  { %14914 = vmatprep.mubr.bf16.mxu1 %v8128_v39  ;;  %14994 = vmatprep.mubr.bf16.mxu0 %v8016_v37  ;;  %v7507_v37 = vmul.f32 %v19538_v11, %v19538_v11  ;;  %v16890_v39 = vld [vmem:[%s21662_s9 + $0x30] sm:$0xff]   ;;  %v21844_v31 = vld [vmem:[#allocation9_spill] sm:$0xff] }
 0x9a4   :  { %v7565_v50 = vadd.f32 %v7564_v21, %v7502_v13  ;;  %v7505_v13 = vmul.f32 %v19530_v47, %v19530_v47  ;;  %14904 = vmatprep.subr.bf16.mxu1 %v16885_v28  ;;  %14986 = vmatprep.subr.bf16.mxu0 %v16886_v10 }
 0x9a5   :  { %14905 = vmatpush3.bf16.msra.mxu1 %v16885_v28  ;;  %14987 = vmatpush3.bf16.msra.mxu0 %v16886_v10  ;;  %v21845_v28 = vld [vmem:[#allocation6_spill] sm:$0xff] }
 0x9a6   :  { %v7566_v23 = vadd.f32 %v7565_v50, %v7503_v2  ;;  %14906 = vmatprep.subr.bf16.mxu1 %v16887_v30  ;;  %14988 = vmatprep.subr.bf16.mxu0 %v16888_v8  ;;  %v7509_v2 = vmul.f32 %v21844_v31, %v21844_v31  ;;  %v7510_v10 = vmul.f32 %v21845_v28, %v21845_v28 }
 0x9a8   :  { %v7567_v21 = vadd.f32 %v7566_v23, %v7504_v32  ;;  %v16889_v32 = vld [vmem:[%s21662_s9 + $0x68] sm:$0xff]  }
 0x9a9   :  { %14907 = vmatpush3.bf16.msra.mxu1 %v16887_v30  ;;  %14989 = vmatpush3.bf16.msra.mxu0 %v16888_v8  ;;  %v16893_v30 = vld [vmem:[%s21662_s9 + $0x78] sm:$0xff]   ;;  %v19759_v8 = vld [vmem:[%s21662_s9 + $0x80] sm:$0xff]  }
 0x9aa   :  { %v7568_v29 = vadd.f32 %v7567_v21, %v7505_v13  ;;  %v16891_v13 = vld [vmem:[%s21662_s9 + $0x70] sm:$0xff]   ;;  %v16892_v21 = vld [vmem:[%s21662_s9 + $0x38] sm:$0xff]   ;;  %14908 = vmatprep.subr.bf16.mxu1 %v16889_v32  ;;  %14990 = vmatprep.subr.bf16.mxu0 %v16890_v39  ;;  %21848 = vst [vmem:[#allocation7_spill] sm:$0xff] %v19759_v8 }
 0x9ac   :  { %v7569_v23 = vadd.f32 %v7568_v29, %v7506_v41  ;;  %v21846_v29 = vld [vmem:[#allocation8_spill] sm:$0xff] }
 0x9ad   :  { %14909 = vmatpush3.bf16.msra.mxu1 %v16889_v32  ;;  %14991 = vmatpush3.bf16.msra.mxu0 %v16890_v39  ;;  %v7514_v39 = vmul.f32 %v19566_v38, %v19566_v38 }
 0x9ae   :  { %v7570_v54 = vadd.f32 %v7569_v23, %v7507_v37  ;;  %v7511_v37 = vmul.f32 %v21846_v29, %v21846_v29  ;;  %14910 = vmatprep.subr.bf16.mxu1 %v16891_v13  ;;  %14992 = vmatprep.subr.bf16.mxu0 %v16892_v21 }
 0x9b0   :  { %v7571_v50 = vadd.f32 %v7570_v54, %v7508_v48  ;;  %v21847_v48 = vld [vmem:[#allocation11_spill] sm:$0xff] }
 0x9b1   :  { %v7512_v54 = vmul.f32 %v21847_v48, %v21847_v48  ;;  %14911 = vmatpush3.bf16.msra.mxu1 %v16891_v13  ;;  %14993 = vmatpush3.bf16.msra.mxu0 %v16892_v21  ;;  %v21850_v21 = vld [vmem:[#allocation14_spill] sm:$0xff] }
 0x9b2   :  { %v7572_v41 = vadd.f32 %v7571_v50, %v7509_v2  ;;  %v21849_v2 = vld [vmem:[#allocation13_spill] sm:$0xff]  ;;  %14912 = vmatprep.subr.bf16.mxu1 %v16893_v30  ;;  %15058 = vmatprep.subr.bf16.mxu0 %v19759_v8 }
 0x9b3   :  { %v7513_v50 = vmul.f32 %v21849_v2, %v21849_v2  ;;  %v21852_v2 = vld [vmem:[#allocation18_spill] sm:$0xff] }
 0x9b4   :  { %v7573_v23 = vadd.f32 %v7572_v41, %v7510_v10  ;;  %v7515_v41 = vmul.f32 %v19570_v0, %v19570_v0 }
 0x9b5   :  { %14913 = vmatpush3.bf16.msra.mxu1 %v16893_v30 }
 0x9b6   :  { %v7574_v31 = vadd.f32 %v7573_v23, %v7511_v37  ;;  %v7516_v23 = vmul.f32 %v19574_v6, %v19574_v6 }
 0x9b8   :  { %v7575_v32 = vadd.f32 %v7574_v31, %v7512_v54  ;;  %v7517_v31 = vmul.f32 %v19578_v44, %v19578_v44  ;;  %v7518_v54 = vmul.f32 %v21850_v21, %v21850_v21 }
 0x9ba   :  { %v7576_v10 = vadd.f32 %v7575_v32, %v7513_v50  ;;  %v21851_v32 = vld [vmem:[#allocation16_spill] sm:$0xff] }
 0x9bb   :  { %v7519_v8 = vmul.f32 %v21851_v32, %v21851_v32 }
 0x9bc   :  { %v7577_v37 = vadd.f32 %v7576_v10, %v7514_v39  ;;  %v7520_v39 = vmul.f32 %v21852_v2, %v21852_v2  ;;  %v21853_v10 = vld [vmem:[#allocation27_spill] sm:$0xff] }
 0x9bd   :  { %v7521_v6 = vmul.f32 %v21853_v10, %v21853_v10 }
 0x9be   :  { %v7578_v48 = vadd.f32 %v7577_v37, %v7515_v41  ;;  %v7522_v37 = vmul.f32 %v19598_v20, %v19598_v20 }
 0x9c0   :  { %v7579_v13 = vadd.f32 %v7578_v48, %v7516_v23 }
 0x9c2   :  { %v7580_v50 = vadd.f32 %v7579_v13, %v7517_v31 }
 0x9c4   :  { %v7581_v38 = vadd.f32 %v7580_v50, %v7518_v54 }
 0x9c6   :  { %v7582_v30 = vadd.f32 %v7581_v38, %v7519_v8  ;;  %v7593_v38 = vld [vmem:[%s21663_s7] sm:$0x1] }
 0x9c8   :  { %v7583_v41 = vadd.f32 %v7582_v30, %v7520_v39  ;;  %v21854_v30 = vld [vmem:[#allocation5_spill] sm:$0xff] }
 0x9ca   :  { %v7584_v48 = vadd.f32 %v7583_v41, %v7521_v6  ;;  %v19791_v6 = vld [vmem:[%s21664_s8] ss:$0 sm:$0xff] }
 0x9cc   :  { %v7585_v23 = vadd.f32 %v7584_v48, %v7522_v37  ;;  %v21857_v37 = vld [vmem:[#allocation21_spill] sm:$0xff] }
 0x9ce   :  { %v7586_v44 = vrot.slane %v7585_v23, 4 }
 0x9d0   :  { %v7587_v21 = vadd.f32 %v7586_v44, %v7585_v23  ;;  %v21855_v44 = vld [vmem:[#allocation19_spill] sm:$0xff] }
 0x9d2   :  { %v7588_v31 = vrot.slane %v7587_v21, 2 }
 0x9d4   :  { %v7589_v13 = vadd.f32 %v7588_v31, %v7587_v21 }
 0x9d6   :  { %v7590_v0 = vrot.slane %v7589_v13, 1 }
 0x9d8   :  { %v7591_v32 = vadd.f32 %v7590_v0, %v7589_v13 }
 0x9da   :  { %v7592_v54 = vmul.f32 0.001953125, %v7591_v32  ;;  %v21856_v32 = vld [vmem:[#allocation20_spill] sm:$0xff] }
 0x9dc   :  { %v7594_v50 = vadd.f32 1e-05, %v7592_v54 }
 0x9de   :  { %16952 = vrsqrt.f32 %v7594_v50 }
 0x9e8   :  { %v16953_v8 = vpop.eup %16952 }
 0x9e9   :  { %v7596_v39 = vmul.f32 %v16953_v8, %v7593_v38  ;;  %v21858_v8 = vld [vmem:[#allocation22_spill] sm:$0xff] }
 0x9eb   :  { %v19786_v10 = vrot.slane %v7596_v39, %v21854_v30  ;;  %v21859_v39 = vld [vmem:[#allocation23_spill] sm:$0xff]  ;;  %v21860_v30 = vld [vmem:[#allocation24_spill] sm:$0xff] }
 0x9ed   :  { %v7664_v0 = vmul.f32 %v19786_v10, %v21852_v2  ;;  %v19797_v21 = vmul.f32 %v19786_v10, %v21855_v44  ;;  %v19801_v41 = vmul.f32 %v19786_v10, %v21856_v32  ;;  %v19805_v48 = vmul.f32 %v19786_v10, %v21857_v37  ;;  %v21862_v44 = vld [vmem:[#allocation26_spill] sm:$0xff] }
 0x9ee   :  { %v19809_v23 = vmul.f32 %v19786_v10, %v19358_v18  ;;  %v19813_v31 = vmul.f32 %v19786_v10, %v19362_v45  ;;  %v19817_v2 = vmul.f32 %v19786_v10, %v19366_v53  ;;  %v19821_v13 = vmul.f32 %v19786_v10, %v19370_v42 }
 0x9ef   :  { %v7735_v54 = vadd.f32 %v19791_v6, %v7664_v0  ;;  %v19826_v50 = vmul.f32 %v19786_v10, %v19374_v51  ;;  %v19830_v18 = vmul.f32 %v19786_v10, %v19378_v15  ;;  %v19834_v45 = vmul.f32 %v19786_v10, %v19382_v22  ;;  %v21861_v0 = vld [vmem:[#allocation25_spill] sm:$0xff] }
 0x9f0   :  { %v19838_v53 = vmul.f32 %v19786_v10, %v19386_v27  ;;  %v19842_v42 = vmul.f32 %v19786_v10, %v19390_v62  ;;  %v19846_v51 = vmul.f32 %v19786_v10, %v19394_v59  ;;  %v19850_v15 = vmul.f32 %v19786_v10, %v19398_v61 }
 0x9f1   :  { %v7799_v38 = vmax.f32 %v7735_v54, 0.0  ;;  %v19854_v22 = vmul.f32 %v19786_v10, %v19402_v34  ;;  %v19858_v27 = vmul.f32 %v19786_v10, %v19406_v3  ;;  %v19862_v62 = vmul.f32 %v19786_v10, %v19410_v24 }
 0x9f2   :  { %v19866_v59 = vmul.f32 %v19786_v10, %v19414_v46  ;;  %v19870_v61 = vmul.f32 %v19786_v10, %v19418_v7  ;;  %v19874_v34 = vmul.f32 %v19786_v10, %v19422_v43  ;;  %v19878_v3 = vmul.f32 %v19786_v10, %v19426_v17 }
 0x9f3   :  { %7949 = vst [vmem:[#allocation4 + $0x321] sm:$0xff] %v7799_v38  ;;  %v19882_v24 = vmul.f32 %v19786_v10, %v19430_v16  ;;  %v19886_v46 = vmul.f32 %v19786_v10, %v19434_v4  ;;  %v19890_v7 = vmul.f32 %v19786_v10, %v19438_v26  ;;  %v19894_v43 = vmul.f32 %v19786_v10, %v19442_v19 }
 0x9f4   :  { %v19898_v17 = vmul.f32 %v19786_v10, %v19446_v33  ;;  %v19902_v16 = vmul.f32 %v19786_v10, %v19450_v55  ;;  %v19906_v4 = vmul.f32 %v19786_v10, %v19454_v1  ;;  %v19910_v26 = vmul.f32 %v19786_v10, %v19458_v60 }
 0x9f5   :  { %v19914_v19 = vmul.f32 %v19786_v10, %v19462_v9  ;;  %v19918_v33 = vmul.f32 %v19786_v10, %v19466_v58  ;;  %v19922_v55 = vmul.f32 %v19786_v10, %v19470_v14  ;;  %v19926_v1 = vmul.f32 %v19786_v10, %v19474_v56 }
 0x9f6   :  { %v19930_v60 = vmul.f32 %v19786_v10, %v19478_v5  ;;  %v19934_v9 = vmul.f32 %v19786_v10, %v19482_v40  ;;  %v19938_v58 = vmul.f32 %v19786_v10, %v19486_v36  ;;  %v19942_v14 = vmul.f32 %v19786_v10, %v19490_v63 }
 0x9f7   :  { %v19946_v56 = vmul.f32 %v19786_v10, %v19494_v57  ;;  %v19950_v5 = vmul.f32 %v19786_v10, %v19498_v25  ;;  %v19954_v40 = vmul.f32 %v19786_v10, %v21858_v8  ;;  %v19958_v36 = vmul.f32 %v19786_v10, %v21859_v39  ;;  %v21863_v39 = vld [vmem:[#allocation9_spill] sm:$0xff] }
 0x9f8   :  { %v19962_v63 = vmul.f32 %v19786_v10, %v21860_v30  ;;  %v19966_v57 = vmul.f32 %v19786_v10, %v21861_v0  ;;  %v19970_v25 = vmul.f32 %v19786_v10, %v21862_v44  ;;  %v19974_v32 = vmul.f32 %v19786_v10, %v19522_v52  ;;  %v21867_v30 = vld [vmem:[#allocation11_spill] sm:$0xff]  ;;  %v21869_v0 = vld [vmem:[#allocation13_spill] sm:$0xff]  ;;  %v21871_v44 = vld [vmem:[#allocation10_spill] sm:$0xff] }
 0x9f9   :  { %v19978_v37 = vmul.f32 %v19786_v10, %v19526_v49  ;;  %v19982_v54 = vmul.f32 %v19786_v10, %v19530_v47  ;;  %v19986_v38 = vmul.f32 %v19786_v10, %v19534_v35  ;;  %v19990_v8 = vmul.f32 %v19786_v10, %v19538_v11 }
 0x9fa   :  { %v19994_v52 = vmul.f32 %v19786_v10, %v21843_v12  ;;  %v19998_v49 = vmul.f32 %v19786_v10, %v21863_v39  ;;  %v20002_v47 = vmul.f32 %v19786_v10, %v21845_v28  ;;  %v20006_v35 = vmul.f32 %v19786_v10, %v21846_v29 }
 0x9fb   :  { %v20010_v11 = vmul.f32 %v19786_v10, %v21867_v30  ;;  %v20014_v12 = vmul.f32 %v19786_v10, %v21869_v0  ;;  %v20018_v39 = vmul.f32 %v19786_v10, %v21871_v44 }
 0x9fc   :  { %21864 = vst [vmem:[#allocation6_spill] sm:$0xff] %v19998_v49  ;;  %21865 = vst [vmem:[#allocation8_spill] sm:$0xff] %v20002_v47  ;;  %v21873_v49 = vld [vmem:[#allocation12_spill] sm:$0xff]  ;;  %v21874_v47 = vld [vmem:[#allocation15_spill] sm:$0xff] }
 0x9fd   :  { %21866 = vst [vmem:[#allocation18_spill] sm:$0xff] %v20006_v35  ;;  %21868 = vst [vmem:[#allocation5_spill] sm:$0xff] %v20010_v11  ;;  %v20022_v28 = vmul.f32 %v19786_v10, %v21873_v49  ;;  %v20026_v29 = vmul.f32 %v19786_v10, %v21874_v47  ;;  %v21875_v35 = vld [vmem:[#allocation17_spill] sm:$0xff]  ;;  %v21876_v11 = vld [vmem:[#allocation14_spill] sm:$0xff]  ;;  %v20046_v47 = vmul.f32 %v19786_v10, %v19598_v20 }
 0x9fe   :  { %21870 = vst [vmem:[#allocation19_spill] sm:$0xff] %v20014_v12  ;;  %21872 = vst [vmem:[#allocation20_spill] sm:$0xff] %v20018_v39  ;;  %v20030_v30 = vmul.f32 %v19786_v10, %v21875_v35  ;;  %v20034_v0 = vmul.f32 %v19786_v10, %v21876_v11  ;;  %v21877_v12 = vld [vmem:[#allocation16_spill] sm:$0xff]  ;;  %v21878_v39 = vld [vmem:[#allocation27_spill] sm:$0xff]  ;;  %v20050_v35 = vadd.f32 %v19791_v6, %v19797_v21 }
 0x9ff   :  { %v20038_v44 = vmul.f32 %v19786_v10, %v21877_v12  ;;  %v20042_v49 = vmul.f32 %v19786_v10, %v21878_v39  ;;  %v20054_v11 = vadd.f32 %v19791_v6, %v19801_v41  ;;  %v20058_v12 = vadd.f32 %v19791_v6, %v19805_v48 }
 0xa00   :  { %v20062_v39 = vadd.f32 %v19791_v6, %v19809_v23  ;;  %v20066_v20 = vadd.f32 %v19791_v6, %v19813_v31  ;;  %v20070_v10 = vadd.f32 %v19791_v6, %v19817_v2  ;;  %v20074_v21 = vadd.f32 %v19791_v6, %v19821_v13 }
 0xa01   :  { %v20078_v41 = vadd.f32 %v19791_v6, %v19826_v50  ;;  %v20082_v48 = vadd.f32 %v19791_v6, %v19830_v18  ;;  %v20086_v23 = vadd.f32 %v19791_v6, %v19834_v45  ;;  %v20090_v31 = vadd.f32 %v19791_v6, %v19838_v53 }
 0xa02   :  { %v20094_v2 = vadd.f32 %v19791_v6, %v19842_v42  ;;  %v20098_v13 = vadd.f32 %v19791_v6, %v19846_v51  ;;  %v20102_v50 = vadd.f32 %v19791_v6, %v19850_v15  ;;  %v20106_v18 = vadd.f32 %v19791_v6, %v19854_v22 }
 0xa03   :  { %v20110_v45 = vadd.f32 %v19791_v6, %v19858_v27  ;;  %v20114_v53 = vadd.f32 %v19791_v6, %v19862_v62  ;;  %v20118_v42 = vadd.f32 %v19791_v6, %v19866_v59  ;;  %v20122_v51 = vadd.f32 %v19791_v6, %v19870_v61 }
 0xa04   :  { %v20126_v15 = vadd.f32 %v19791_v6, %v19874_v34  ;;  %v20130_v22 = vadd.f32 %v19791_v6, %v19878_v3  ;;  %v20134_v27 = vadd.f32 %v19791_v6, %v19882_v24  ;;  %v20138_v62 = vadd.f32 %v19791_v6, %v19886_v46 }
 0xa05   :  { %21879 = vst [vmem:[#allocation21_spill] sm:$0xff] %v20114_v53  ;;  %21880 = vst [vmem:[#allocation22_spill] sm:$0xff] %v20118_v42  ;;  %v20142_v59 = vadd.f32 %v19791_v6, %v19890_v7  ;;  %v20146_v61 = vadd.f32 %v19791_v6, %v19894_v43  ;;  %v20150_v34 = vadd.f32 %v19791_v6, %v19898_v17 }
 0xa06   :  { %21881 = vst [vmem:[#allocation23_spill] sm:$0xff] %v20122_v51  ;;  %21882 = vst [vmem:[#allocation24_spill] sm:$0xff] %v20126_v15  ;;  %v20154_v3 = vadd.f32 %v19791_v6, %v19902_v16  ;;  %v20158_v24 = vadd.f32 %v19791_v6, %v19906_v4  ;;  %v20162_v46 = vadd.f32 %v19791_v6, %v19910_v26 }
 0xa07   :  { %21883 = vst [vmem:[#allocation25_spill] sm:$0xff] %v20130_v22  ;;  %21884 = vst [vmem:[#allocation26_spill] sm:$0xff] %v20134_v27  ;;  %v20166_v7 = vadd.f32 %v19791_v6, %v19914_v19  ;;  %v20170_v43 = vadd.f32 %v19791_v6, %v19918_v33  ;;  %v20174_v17 = vadd.f32 %v19791_v6, %v19922_v55 }
 0xa08   :  { %21885 = vst [vmem:[#allocation9_spill] sm:$0xff] %v20138_v62  ;;  %21886 = vst [vmem:[#allocation11_spill] sm:$0xff] %v20142_v59  ;;  %v20178_v16 = vadd.f32 %v19791_v6, %v19926_v1  ;;  %v20182_v4 = vadd.f32 %v19791_v6, %v19930_v60  ;;  %v20186_v26 = vadd.f32 %v19791_v6, %v19934_v9 }
 0xa09   :  { %21887 = vst [vmem:[#allocation13_spill] sm:$0xff] %v20146_v61  ;;  %21888 = vst [vmem:[#allocation10_spill] sm:$0xff] %v20150_v34  ;;  %v20190_v19 = vadd.f32 %v19791_v6, %v19938_v58  ;;  %v20194_v33 = vadd.f32 %v19791_v6, %v19942_v14  ;;  %v20198_v55 = vadd.f32 %v19791_v6, %v19946_v56 }
 0xa0a   :  { %21889 = vst [vmem:[#allocation12_spill] sm:$0xff] %v20154_v3  ;;  %21890 = vst [vmem:[#allocation15_spill] sm:$0xff] %v20158_v24  ;;  %v20202_v1 = vadd.f32 %v19791_v6, %v19950_v5  ;;  %v20206_v60 = vadd.f32 %v19791_v6, %v19954_v40  ;;  %v20210_v9 = vadd.f32 %v19791_v6, %v19958_v36 }
 0xa0b   :  { %v20214_v58 = vadd.f32 %v19791_v6, %v19962_v63  ;;  %v20218_v14 = vadd.f32 %v19791_v6, %v19966_v57  ;;  %v20222_v56 = vadd.f32 %v19791_v6, %v19970_v25  ;;  %v20226_v5 = vadd.f32 %v19791_v6, %v19974_v32  ;;  %v21896_v32 = vld [vmem:[#allocation6_spill] sm:$0xff] }
 0xa0c   :  { %v20230_v40 = vadd.f32 %v19791_v6, %v19978_v37  ;;  %v20234_v36 = vadd.f32 %v19791_v6, %v19982_v54  ;;  %v20238_v63 = vadd.f32 %v19791_v6, %v19986_v38  ;;  %v20242_v57 = vadd.f32 %v19791_v6, %v19990_v8 }
 0xa0d   :  { %v20246_v25 = vadd.f32 %v19791_v6, %v19994_v52  ;;  %v20250_v37 = vadd.f32 %v19791_v6, %v21896_v32 }
 0xa0e   :  { %21891 = vst [vmem:[#allocation17_spill] sm:$0xff] %v20230_v40  ;;  %21892 = vst [vmem:[#allocation14_spill] sm:$0xff] %v20234_v36  ;;  %v21897_v40 = vld [vmem:[#allocation8_spill] sm:$0xff]  ;;  %v21898_v36 = vld [vmem:[#allocation18_spill] sm:$0xff] }
 0xa0f   :  { %21893 = vst [vmem:[#allocation16_spill] sm:$0xff] %v20238_v63  ;;  %21894 = vst [vmem:[#allocation27_spill] sm:$0xff] %v20242_v57  ;;  %v20254_v54 = vadd.f32 %v19791_v6, %v21897_v40  ;;  %v20258_v38 = vadd.f32 %v19791_v6, %v21898_v36  ;;  %v21899_v63 = vld [vmem:[#allocation5_spill] sm:$0xff]  ;;  %v21900_v57 = vld [vmem:[#allocation19_spill] sm:$0xff]  ;;  %v20274_v40 = vadd.f32 %v19791_v6, %v20022_v28 }
 0xa10   :  { %21895 = vst [vmem:[#allocation28_spill] sm:$0xff] %v20246_v25  ;;  %v20262_v8 = vadd.f32 %v19791_v6, %v21899_v63  ;;  %v20266_v52 = vadd.f32 %v19791_v6, %v21900_v57  ;;  %v21901_v25 = vld [vmem:[#allocation20_spill] sm:$0xff]  ;;  %v20278_v36 = vadd.f32 %v19791_v6, %v20026_v29  ;;  %v20282_v63 = vadd.f32 %v19791_v6, %v20030_v30 }
 0xa11   :  { %v20270_v32 = vadd.f32 %v19791_v6, %v21901_v25  ;;  %v20286_v57 = vadd.f32 %v19791_v6, %v20034_v0  ;;  %v20290_v25 = vadd.f32 %v19791_v6, %v20038_v44  ;;  %v20294_v28 = vadd.f32 %v19791_v6, %v20042_v49 }
 0xa12   :  { %21902 = vst [vmem:[#allocation6_spill] sm:$0xff] %v20278_v36  ;;  %21903 = vst [vmem:[#allocation8_spill] sm:$0xff] %v20282_v63  ;;  %v20298_v29 = vadd.f32 %v19791_v6, %v20046_v47  ;;  %v21721_v36 = vmax.f32 %v20050_v35, 0.0  ;;  %v21722_v30 = vmax.f32 %v20054_v11, 0.0  ;;  %v21723_v63 = vmax.f32 %v20058_v12, 0.0 }
 0xa13   :  { %21904 = vst [vmem:[#allocation18_spill] sm:$0xff] %v20286_v57  ;;  %21905 = vst [vmem:[#allocation5_spill] sm:$0xff] %v20290_v25  ;;  %v21724_v0 = vmax.f32 %v20062_v39, 0.0  ;;  %v21725_v57 = vmax.f32 %v20066_v20, 0.0  ;;  %v21726_v6 = vmax.f32 %v20086_v23, 0.0  ;;  %v21727_v47 = vmax.f32 %v20090_v31, 0.0 }
 0xa14   :  { %21906 = vst [vmem:[#allocation19_spill] sm:$0xff] %v20294_v28  ;;  %7888 = vst [vmem:[#allocation4 + $0x19] sm:$0xff] %v21721_v36  ;;  %v21907_v36 = vmax.f32 %v20070_v10, 0.0  ;;  %v21729_v25 = vmax.f32 %v20114_v53, 0.0  ;;  %v21909_v44 = vmax.f32 %v20078_v41, 0.0  ;;  %v21911_v49 = vmax.f32 %v20094_v2, 0.0 }
 0xa15   :  { %7889 = vst [vmem:[#allocation4 + $0x21] sm:$0xff] %v21722_v30  ;;  %7890 = vst [vmem:[#allocation4 + $0x31] sm:$0xff] %v21723_v63  ;;  %v21908_v30 = vmax.f32 %v20074_v21, 0.0  ;;  %v21728_v63 = vmax.f32 %v20110_v45, 0.0  ;;  %v7768_v28 = vmax.f32 %v20170_v43, 0.0  ;;  %v21738_v43 = vmax.f32 %v20202_v1, 0.0 }
 0xa16   :  { %7891 = vst [vmem:[#allocation4 + $0x39] sm:$0xff] %v21724_v0  ;;  %7892 = vst [vmem:[#allocation4 + $0x49] sm:$0xff] %v21725_v57  ;;  %v21910_v0 = vmax.f32 %v20082_v48, 0.0  ;;  %v21735_v57 = vmax.f32 %v20182_v4, 0.0 }
 0xa17   :  { %7893 = vst [vmem:[#allocation4 + $0x51] sm:$0xff] %v21907_v36  ;;  %7894 = vst [vmem:[#allocation4 + $0x61] sm:$0xff] %v21908_v30  ;;  %v21730_v36 = vmax.f32 %v20126_v15, 0.0  ;;  %v21732_v30 = vmax.f32 %v20146_v61, 0.0 }
 0xa18   :  { %7895 = vst [vmem:[#allocation4 + $0x69] sm:$0xff] %v21909_v44  ;;  %7896 = vst [vmem:[#allocation4 + $0x79] sm:$0xff] %v21910_v0  ;;  %v21912_v44 = vmax.f32 %v20098_v13, 0.0  ;;  %v21913_v0 = vmax.f32 %v20102_v50, 0.0 }
 0xa19   :  { %7897 = vst [vmem:[#allocation4 + $0x81] sm:$0xff] %v21726_v6  ;;  %7898 = vst [vmem:[#allocation4 + $0x91] sm:$0xff] %v21727_v47  ;;  %v21914_v6 = vmax.f32 %v20106_v18, 0.0  ;;  %v21731_v47 = vmax.f32 %v20142_v59, 0.0  ;;  %v21940_v61 = vld [vmem:[#allocation6_spill] sm:$0xff]  ;;  %v21941_v59 = vld [vmem:[#allocation8_spill] sm:$0xff] }
 0xa1a   :  { %7899 = vst [vmem:[#allocation4 + $0x99] sm:$0xff] %v21911_v49  ;;  %7900 = vst [vmem:[#allocation4 + $0xa9] sm:$0xff] %v21912_v44  ;;  %v21915_v49 = vmax.f32 %v20118_v42, 0.0  ;;  %v21916_v44 = vmax.f32 %v20122_v51, 0.0  ;;  %v21949_v51 = vmax.f32 %v20254_v54, 0.0 }
 0xa1b   :  { %7901 = vst [vmem:[#allocation4 + $0xb1] sm:$0xff] %v21913_v0  ;;  %7902 = vst [vmem:[#allocation4 + $0xc1] sm:$0xff] %v21914_v6  ;;  %v21733_v6 = vmax.f32 %v20158_v24, 0.0  ;;  %v21734_v0 = vmax.f32 %v20178_v16, 0.0  ;;  %v21932_v24 = vmax.f32 %v20206_v60, 0.0  ;;  %v21948_v15 = vld [vmem:[#allocation19_spill] sm:$0xff] }
 0xa1c   :  { %7903 = vst [vmem:[#allocation4 + $0xc9] sm:$0xff] %v21728_v63  ;;  %7904 = vst [vmem:[#allocation4 + $0xd9] sm:$0xff] %v21729_v25  ;;  %v21917_v63 = vmax.f32 %v20130_v22, 0.0  ;;  %v21918_v25 = vmax.f32 %v20134_v27, 0.0  ;;  %v21946_v27 = vld [vmem:[#allocation18_spill] sm:$0xff]  ;;  %v21947_v22 = vld [vmem:[#allocation5_spill] sm:$0xff] }
 0xa1d   :  { %7905 = vst [vmem:[#allocation4 + $0xe1] sm:$0xff] %v21915_v49  ;;  %7906 = vst [vmem:[#allocation4 + $0xf1] sm:$0xff] %v21916_v44  ;;  %v21919_v49 = vmax.f32 %v20138_v62, 0.0  ;;  %v7769_v44 = vmax.f32 %v20174_v17, 0.0  ;;  %v21737_v17 = vmax.f32 %v20190_v19, 0.0  ;;  %v7801_v62 = vmax.f32 %v20298_v29, 0.0 }
 0xa1e   :  { %7907 = vst [vmem:[#allocation4 + $0xf9] sm:$0xff] %v21730_v36  ;;  %7908 = vst [vmem:[#allocation4 + $0x109] sm:$0xff] %v21917_v63  ;;  %v21920_v63 = vmax.f32 %v20150_v34, 0.0  ;;  %v21931_v36 = vld [vmem:[#allocation28_spill] sm:$0xff]  ;;  %v7956_v34 = vld [vmem:[#allocation4 + $0x30] sm:$0xff]  ;;  %v21957_v29 = vmax.f32 %v20050_v35, 0.0 }
 0xa1f   :  { %7909 = vst [vmem:[#allocation4 + $0x111] sm:$0xff] %v21918_v25  ;;  %7910 = vst [vmem:[#allocation4 + $0x121] sm:$0xff] %v21919_v49  ;;  %v21921_v25 = vmax.f32 %v20154_v3, 0.0  ;;  %v7800_v3 = vmax.f32 %v21948_v15, 0.0  ;;  %v21954_v49 = vmax.f32 %v20274_v40, 0.0  ;;  %v21955_v15 = vmax.f32 %v21940_v61, 0.0 }
 0xa20   :  { %7911 = vst [vmem:[#allocation4 + $0x129] sm:$0xff] %v21731_v47  ;;  %7912 = vst [vmem:[#allocation4 + $0x139] sm:$0xff] %v21732_v30  ;;  %v21922_v47 = vmax.f32 %v20162_v46, 0.0  ;;  %v21923_v30 = vmax.f32 %v20166_v7, 0.0  ;;  %v21962_v35 = vmax.f32 %v21947_v22, 0.0 }
 0xa21   :  { %7913 = vst [vmem:[#allocation4 + $0x141] sm:$0xff] %v21920_v63  ;;  %7914 = vst [vmem:[#allocation4 + $0x151] sm:$0xff] %v21921_v25  ;;  %v21926_v63 = vld [vmem:[#allocation14_spill] sm:$0xff] }
 0xa22   :  { %7915 = vst [vmem:[#allocation4 + $0x159] sm:$0xff] %v21733_v6  ;;  %7916 = vst [vmem:[#allocation4 + $0x169] sm:$0xff] %v21922_v47  ;;  %v21924_v47 = vmax.f32 %v20186_v26, 0.0  ;;  %v21925_v6 = vld [vmem:[#allocation17_spill] sm:$0xff] }
 0xa23   :  { %7917 = vst [vmem:[#allocation4 + $0x171] sm:$0xff] %v21923_v30  ;;  %7918 = vst [vmem:[#allocation4 + $0x181] sm:$0xff] %v7768_v28  ;;  %v21930_v28 = vld [vmem:[#allocation27_spill] sm:$0xff]  ;;  %v7957_v30 = vld [vmem:[#allocation4 + $0x38] sm:$0xff] }
 0xa24   :  { %7919 = vst [vmem:[#allocation4 + $0x189] sm:$0xff] %v7769_v44  ;;  %7920 = vst [vmem:[#allocation4 + $0x1c9] sm:$0xff] %v21734_v0  ;;  %v21927_v44 = vmax.f32 %v20194_v33, 0.0  ;;  %v21928_v0 = vmax.f32 %v20198_v55, 0.0  ;;  %v20487_v53 = vpack.c.bf16 %v7957_v30, %v7956_v34  ;;  %v7959_v34 = vld [vmem:[#allocation4 + $0x50] sm:$0xff] }
 0xa25   :  { %7921 = vst [vmem:[#allocation4 + $0x1d1] sm:$0xff] %v21735_v57  ;;  %7922 = vst [vmem:[#allocation4 + $0x1e1] sm:$0xff] %v21924_v47  ;;  %v21929_v47 = vld [vmem:[#allocation16_spill] sm:$0xff]  ;;  %v7955_v57 = vld [vmem:[#allocation4 + $0x20] sm:$0xff] }
 0xa26   :  { %7923 = vst [vmem:[#allocation4 + $0x1e9] sm:$0xff] %v21737_v17  ;;  %7924 = vst [vmem:[#allocation4 + $0x1f9] sm:$0xff] %v21927_v44  ;;  %v21933_v17 = vmax.f32 %v20210_v9, 0.0  ;;  %v21934_v44 = vmax.f32 %v20214_v58, 0.0 }
 0xa27   :  { %7925 = vst [vmem:[#allocation4 + $0x201] sm:$0xff] %v21928_v0  ;;  %7926 = vst [vmem:[#allocation4 + $0x211] sm:$0xff] %v21738_v43  ;;  %v21935_v0 = vmax.f32 %v20218_v14, 0.0  ;;  %v7954_v43 = vld [vmem:[#allocation4 + $0x18] sm:$0xff] }
 0xa28   :  { %7927 = vst [vmem:[#allocation4 + $0x219] sm:$0xff] %v21932_v24  ;;  %7928 = vst [vmem:[#allocation4 + $0x229] sm:$0xff] %v21933_v17  ;;  %v21936_v24 = vmax.f32 %v20222_v56, 0.0  ;;  %v21937_v17 = vmax.f32 %v20226_v5, 0.0  ;;  %v20481_v25 = vpack.c.bf16 %v7955_v57, %v7954_v43  ;;  %v7960_v57 = vld [vmem:[#allocation4 + $0x60] sm:$0xff]  ;;  %v7961_v43 = vld [vmem:[#allocation4 + $0x68] sm:$0xff] }
 0xa29   :  { %7929 = vst [vmem:[#allocation4 + $0x231] sm:$0xff] %v21934_v44  ;;  %7930 = vst [vmem:[#allocation4 + $0x241] sm:$0xff] %v21935_v0  ;;  %v21938_v44 = vmax.f32 %v21925_v6, 0.0  ;;  %v21939_v0 = vmax.f32 %v21926_v63, 0.0 }
 0xa2a   :  { %7931 = vst [vmem:[#allocation4 + $0x249] sm:$0xff] %v21936_v24  ;;  %7932 = vst [vmem:[#allocation4 + $0x259] sm:$0xff] %v21937_v17  ;;  %v21942_v24 = vmax.f32 %v21929_v47, 0.0  ;;  %v21943_v17 = vmax.f32 %v21930_v28, 0.0  ;;  %14995 = vmatmul.mubr.bf16.vlgmr.msra.gmra.mrb[20].mxu0 %v20481_v25 }
 0xa2b   :  { %7933 = vst [vmem:[#allocation4 + $0x261] sm:$0xff] %v21938_v44  ;;  %7934 = vst [vmem:[#allocation4 + $0x271] sm:$0xff] %v21939_v0  ;;  %v21944_v44 = vmax.f32 %v21931_v36, 0.0  ;;  %v21945_v0 = vmax.f32 %v20250_v37, 0.0  ;;  %14998 = vmatprep.mubr.bf16.mxu0 %v20487_v53 }
 0xa2c   :  { %7935 = vst [vmem:[#allocation4 + $0x279] sm:$0xff] %v21942_v24  ;;  %7936 = vst [vmem:[#allocation4 + $0x289] sm:$0xff] %v21943_v17  ;;  %v21950_v24 = vmax.f32 %v20258_v38, 0.0  ;;  %v21951_v17 = vmax.f32 %v20262_v8, 0.0 }
 0xa2d   :  { %7937 = vst [vmem:[#allocation4 + $0x291] sm:$0xff] %v21944_v44  ;;  %7938 = vst [vmem:[#allocation4 + $0x2a1] sm:$0xff] %v21945_v0  ;;  %v21952_v44 = vmax.f32 %v20266_v52, 0.0  ;;  %v21953_v0 = vmax.f32 %v20270_v32, 0.0 }
 0xa2e   :  { %7939 = vst [vmem:[#allocation4 + $0x2a9] sm:$0xff] %v21949_v51  ;;  %7940 = vst [vmem:[#allocation4 + $0x2b9] sm:$0xff] %v21950_v24  ;;  %v21956_v51 = vmax.f32 %v21941_v59, 0.0  ;;  %v21958_v24 = vmax.f32 %v20054_v11, 0.0  ;;  %v21963_v11 = vld [vmem:[#allocation7_spill] sm:$0xff] }
 0xa2f   :  { %7941 = vst [vmem:[#allocation4 + $0x2c1] sm:$0xff] %v21951_v17  ;;  %7942 = vst [vmem:[#allocation4 + $0x2d1] sm:$0xff] %v21952_v44  ;;  %v21959_v44 = vmax.f32 %v20058_v12, 0.0  ;;  %15059 = vmatpush3.bf16.msra.mxu0 %v21963_v11  ;;  %v16896_v12 = vld [vmem:[%s21662_s9 + $0x90] sm:$0xff]   ;;  %v21975_v11 = vmax.f32 %v20198_v55, 0.0  ;;  %v21981_v55 = vmax.f32 %v20222_v56, 0.0 }
 0xa30   :  { %7943 = vst [vmem:[#allocation4 + $0x2d9] sm:$0xff] %v21953_v0  ;;  %7944 = vst [vmem:[#allocation4 + $0x2e9] sm:$0xff] %v21954_v49  ;;  %v8129_v17 = vpack.c.bf16 %v21958_v24, %v21957_v29  ;;  %v21960_v0 = vmax.f32 %v20062_v39, 0.0  ;;  %v16895_v49 = vld [vmem:[%s21662_s9 + $0x88] sm:$0xff]  }
 0xa31   :  { %7945 = vst [vmem:[#allocation4 + $0x2f1] sm:$0xff] %v21955_v15  ;;  %7946 = vst [vmem:[#allocation4 + $0x301] sm:$0xff] %v21956_v51  ;;  %v21961_v15 = vmax.f32 %v21946_v27, 0.0  ;;  %15060 = vmatprep.subr.bf16.mxu0 %v16895_v49  ;;  %v7958_v39 = vld [vmem:[#allocation4 + $0x48] sm:$0xff]  ;;  %v21967_v51 = vmax.f32 %v20070_v10, 0.0  ;;  %v21973_v10 = vmax.f32 %v20078_v41, 0.0 }
 0xa32   :  { %v8130_v42 = vpack.c.bf16 %v21960_v0, %v21959_v44  ;;  %7948 = vst [vmem:[#allocation4 + $0x319] sm:$0xff] %v21962_v35  ;;  %7950 = vst [vmem:[#allocation4 + $0x331] sm:$0xff] %v7800_v3  ;;  %14915 = vmatmul.mubr.bf16.vlgmr.msra.gmra.mrb[68].mxu1 %v8129_v17  ;;  %v21965_v3 = vmax.f32 %v20166_v7, 0.0  ;;  %v20512_v24 = vpack.c.bf16 %v7959_v34, %v7958_v39  ;;  %v21968_v17 = vmax.f32 %v20178_v16, 0.0  ;;  %v16897_v16 = vld [vmem:[%s21662_s9 + $0x98] sm:$0xff]  }
 0xa33   :  { %7947 = vst [vmem:[#allocation4 + $0x309] sm:$0xff] %v21961_v15  ;;  %7951 = vst [vmem:[#allocation4 + $0x339] sm:$0xff] %v7801_v62  ;;  %15061 = vmatpush3.bf16.msra.mxu0 %v16895_v49  ;;  %v21964_v62 = vmax.f32 %v20162_v46, 0.0  ;;  %v21969_v44 = vmax.f32 %v20182_v4, 0.0  ;;  %v21970_v46 = vmax.f32 %v20186_v26, 0.0  ;;  %v21971_v7 = vmax.f32 %v20190_v19, 0.0 }
 0xa34   :  { %14918 = vmatprep.mubr.bf16.mxu1 %v8130_v42  ;;  %v21966_v42 = vmax.f32 %v20066_v20, 0.0  ;;  %15062 = vmatprep.subr.bf16.mxu0 %v16896_v12  ;;  %v21972_v20 = vmax.f32 %v20074_v21, 0.0  ;;  %v20530_v35 = vpack.c.bf16 %v7961_v43, %v7960_v57  ;;  %v21974_v4 = vmax.f32 %v20194_v33, 0.0 }
 0xa35   :  { %v20506_v30 = vpack.c.bf16 %v21965_v3, %v21964_v62  ;;  %v20518_v0 = vpack.c.bf16 %v21969_v44, %v21968_v17  ;;  %v20524_v49 = vpack.c.bf16 %v21971_v7, %v21970_v46  ;;  %v21976_v19 = vmax.f32 %v20202_v1, 0.0  ;;  %14999 = vmatmul.mubr.bf16.gmra.mrb[24].mxu0 %v20512_v24  ;;  %v7964_v17 = vld [vmem:[#allocation4 + $0x90] sm:$0xff]  ;;  %v7965_v44 = vld [vmem:[#allocation4 + $0x98] sm:$0xff] }
 0xa36   :  { %v8131_v29 = vpack.c.bf16 %v21967_v51, %v21966_v42  ;;  %v8132_v15 = vpack.c.bf16 %v21973_v10, %v21972_v20  ;;  %v20539_v26 = vpack.c.bf16 %v21975_v11, %v21974_v4  ;;  %v21977_v39 = vmax.f32 %v20206_v60, 0.0  ;;  %15002 = vmatprep.mubr.bf16.mxu0 %v20530_v35  ;;  %v7962_v51 = vld [vmem:[#allocation4 + $0x78] sm:$0xff] }
 0xa37   :  { %v21978_v41 = vmax.f32 %v20210_v9, 0.0  ;;  %v21979_v34 = vmax.f32 %v20214_v58, 0.0  ;;  %v21980_v33 = vmax.f32 %v20218_v14, 0.0  ;;  %v21982_v60 = vmax.f32 %v20226_v5, 0.0  ;;  %15063 = vmatpush3.bf16.msra.mxu0 %v16896_v12  ;;  %v16898_v5 = vld [vmem:[%s21662_s9 + $0xa0] sm:$0xff]  }
 0xa38   :  { %v20545_v21 = vpack.c.bf16 %v21977_v39, %v21976_v19  ;;  %v21983_v43 = vmax.f32 %v21925_v6, 0.0  ;;  %v21984_v9 = vmax.f32 %v21926_v63, 0.0  ;;  %v21985_v58 = vmax.f32 %v21929_v47, 0.0  ;;  %15064 = vmatprep.subr.bf16.mxu0 %v16897_v16 }
 0xa39   :  { %v20552_v57 = vpack.c.bf16 %v21979_v34, %v21978_v41  ;;  %v20559_v1 = vpack.c.bf16 %v21981_v55, %v21980_v33  ;;  %v21986_v42 = vmax.f32 %v21930_v28, 0.0  ;;  %v21987_v14 = vmax.f32 %v21931_v36, 0.0 }
 0xa3a   :  { %14919 = vmatmul.mubr.bf16.gmra.mrb[72].mxu1 %v8131_v29  ;;  %v20565_v62 = vpack.c.bf16 %v21983_v43, %v21982_v60  ;;  %v20571_v3 = vpack.c.bf16 %v21985_v58, %v21984_v9  ;;  %v7963_v29 = vld [vmem:[#allocation4 + $0x80] sm:$0xff]  ;;  %v21988_v6 = vmax.f32 %v20250_v37, 0.0  ;;  %v21989_v63 = vmax.f32 %v20254_v54, 0.0  ;;  %v16901_v58 = vld [vmem:[%s21662_s9 + $0xb8] sm:$0xff]  }
 0xa3b   :  { %14922 = vmatprep.mubr.bf16.mxu1 %v8132_v15  ;;  %v20577_v56 = vpack.c.bf16 %v21987_v14, %v21986_v42  ;;  %v21990_v12 = vmax.f32 %v20258_v38, 0.0  ;;  %v21991_v28 = vmax.f32 %v20262_v8, 0.0  ;;  %v21992_v46 = vmax.f32 %v20266_v52, 0.0  ;;  %15065 = vmatpush3.bf16.msra.mxu0 %v16897_v16  ;;  %v7973_v42 = vld [vmem:[#allocation4 + $0xf8] sm:$0xff]  ;;  %v22006_v14 = vld [vmem:[#allocation21_spill] sm:$0xff] }
 0xa3c   :  { %v20586_v47 = vpack.c.bf16 %v21989_v63, %v21988_v6  ;;  %v21993_v7 = vmax.f32 %v20270_v32, 0.0  ;;  %v21994_v37 = vmax.f32 %v20274_v40, 0.0  ;;  %v21995_v54 = vmax.f32 %v21940_v61, 0.0  ;;  %15066 = vmatprep.subr.bf16.mxu0 %v16898_v5 }
 0xa3d   :  { %v20592_v36 = vpack.c.bf16 %v21991_v28, %v21990_v12  ;;  %v21996_v38 = vmax.f32 %v21941_v59, 0.0  ;;  %v21997_v8 = vmax.f32 %v21946_v27, 0.0  ;;  %v21998_v4 = vmax.f32 %v20082_v48, 0.0  ;;  %v16899_v27 = vld [vmem:[%s21662_s9 + $0xa8] sm:$0xff]   ;;  %v22010_v12 = vld [vmem:[#allocation23_spill] sm:$0xff] }
 0xa3e   :  { %v20598_v20 = vpack.c.bf16 %v21993_v7, %v21992_v46  ;;  %v20604_v10 = vpack.c.bf16 %v21995_v54, %v21994_v37  ;;  %v21999_v52 = vmax.f32 %v20086_v23, 0.0  ;;  %v20616_v32 = vpack.c.bf16 %v7963_v29, %v7962_v51  ;;  %v7966_v48 = vld [vmem:[#allocation4 + $0xa8] sm:$0xff]  ;;  %v7967_v23 = vld [vmem:[#allocation4 + $0xb0] sm:$0xff] }
 0xa3f   :  { %v20610_v15 = vpack.c.bf16 %v21997_v8, %v21996_v38  ;;  %v22000_v40 = vmax.f32 %v20090_v31, 0.0  ;;  %v22001_v61 = vmax.f32 %v20094_v2, 0.0  ;;  %v20622_v39 = vpack.c.bf16 %v7965_v44, %v7964_v17  ;;  %15067 = vmatpush3.bf16.msra.mxu0 %v16898_v5  ;;  %v16900_v31 = vld [vmem:[%s21662_s9 + $0xb0] sm:$0xff]   ;;  %v7968_v2 = vld [vmem:[#allocation4 + $0xc0] sm:$0xff]  ;;  %v7969_v59 = vld [vmem:[#allocation4 + $0xc8] sm:$0xff] }
 0xa40   :  { %v8133_v11 = vpack.c.bf16 %v21999_v52, %v21998_v4  ;;  %15003 = vmatmul.mubr.bf16.gmra.mrb[28].mxu0 %v20616_v32  ;;  %15068 = vmatprep.subr.bf16.mxu0 %v16899_v27  ;;  %v22002_v16 = vmax.f32 %v20098_v13, 0.0  ;;  %v22003_v41 = vmax.f32 %v20102_v50, 0.0  ;;  %v20636_v33 = vpack.c.bf16 %v7967_v23, %v7966_v48  ;;  %v7970_v13 = vld [vmem:[#allocation4 + $0xd8] sm:$0xff]  ;;  %v7971_v50 = vld [vmem:[#allocation4 + $0xe0] sm:$0xff]  ;;  %v22008_v29 = vld [vmem:[#allocation22_spill] sm:$0xff] }
 0xa41   :  { %v8134_v19 = vpack.c.bf16 %v22001_v61, %v22000_v40  ;;  %15006 = vmatprep.mubr.bf16.mxu0 %v20622_v39  ;;  %v22004_v55 = vmax.f32 %v20106_v18, 0.0  ;;  %v22005_v60 = vmax.f32 %v20110_v45, 0.0  ;;  %v20642_v9 = vpack.c.bf16 %v7969_v59, %v7968_v2  ;;  %v20652_v18 = vld [vmem:[%s21662_s9 + $0xc0] sm:$0xff]   ;;  %v7972_v45 = vld [vmem:[#allocation4 + $0xf0] sm:$0xff]  ;;  %v22012_v17 = vld [vmem:[#allocation24_spill] sm:$0xff] }
 0xa42   :  { %14923 = vmatmul.mubr.bf16.gmra.mrb[76].mxu1 %v8133_v11  ;;  %v8135_v34 = vpack.c.bf16 %v22003_v41, %v22002_v16  ;;  %v22007_v51 = vmax.f32 %v22006_v14, 0.0  ;;  %v22009_v5 = vmax.f32 %v22008_v29, 0.0  ;;  %v20658_v63 = vpack.c.bf16 %v7971_v50, %v7970_v13  ;;  %v7974_v37 = vld [vmem:[#allocation4 + $0x108] sm:$0xff]  ;;  %v7975_v54 = vld [vmem:[#allocation4 + $0x110] sm:$0xff]  ;;  %v7976_v38 = vld [vmem:[#allocation4 + $0x120] sm:$0xff] }
 0xa43   :  { %14926 = vmatprep.mubr.bf16.mxu1 %v8134_v19  ;;  %15069 = vmatpush3.bf16.msra.mxu0 %v16899_v27  ;;  %v8136_v43 = vpack.c.bf16 %v22005_v60, %v22004_v55  ;;  %v22011_v28 = vmax.f32 %v22010_v12, 0.0  ;;  %v22013_v44 = vmax.f32 %v22012_v17, 0.0  ;;  %v20664_v7 = vpack.c.bf16 %v7973_v42, %v7972_v45  ;;  %v7977_v8 = vld [vmem:[#allocation4 + $0x128] sm:$0xff]  ;;  %v22014_v4 = vld [vmem:[#allocation25_spill] sm:$0xff]  ;;  %v22020_v23 = vld [vmem:[#allocation11_spill] sm:$0xff] }
 0xa44   :  { %15070 = vmatprep.subr.bf16.mxu0 %v16900_v31  ;;  %v8137_v6 = vpack.c.bf16 %v22009_v5, %v22007_v51  ;;  %v22015_v52 = vmax.f32 %v22014_v4, 0.0  ;;  %v22016_v11 = vld [vmem:[#allocation26_spill] sm:$0xff]  ;;  %v20673_v19 = vpack.c.bf16 %v7975_v54, %v7974_v37  ;;  %v22018_v27 = vld [vmem:[#allocation9_spill] sm:$0xff]  ;;  %v20679_v59 = vpack.c.bf16 %v7977_v8, %v7976_v38  ;;  %v7978_v16 = vld [vmem:[#allocation4 + $0x138] sm:$0xff] }
 0xa45   :  { %v8138_v46 = vpack.c.bf16 %v22013_v44, %v22011_v28  ;;  %v22017_v40 = vmax.f32 %v22016_v11, 0.0  ;;  %v22019_v48 = vmax.f32 %v22018_v27, 0.0  ;;  %v7979_v41 = vld [vmem:[#allocation4 + $0x140] sm:$0xff]  ;;  %v7981_v55 = vld [vmem:[#allocation4 + $0x158] sm:$0xff]  ;;  %v22028_v51 = vld [vmem:[#allocation15_spill] sm:$0xff] }
 0xa46   :  { %v22022_v60 = vld [vmem:[#allocation13_spill] sm:$0xff]  ;;  %v20687_v45 = vpack.c.bf16 %v7979_v41, %v7978_v16  ;;  %v22026_v42 = vld [vmem:[#allocation12_spill] sm:$0xff]  ;;  %v22029_v29 = vmax.f32 %v22028_v51, 0.0  ;;  %v7984_v17 = vld [vmem:[#allocation4 + $0x1b0] sm:$0xff] }
 0xa47   :  { %15071 = vmatpush3.bf16.msra.mxu0 %v16900_v31  ;;  %v8139_v61 = vpack.c.bf16 %v22017_v40, %v22015_v52  ;;  %v22021_v31 = vmax.f32 %v22020_v23, 0.0  ;;  %v22027_v14 = vmax.f32 %v22026_v42, 0.0  ;;  %v8096_v12 = vld [vmem:[#allocation4 + $0x1b1] sm:$0xff]  ;;  %v8097_v28 = vld [vmem:[#allocation4 + $0x1b9] sm:$0xff]  ;;  %v7982_v44 = vld [vmem:[#allocation4 + $0x168] sm:$0xff] }
 0xa48   :  { %15007 = vmatmul.mubr.bf16.gmra.mrb[32].mxu0 %v20636_v33  ;;  %15072 = vmatprep.subr.bf16.mxu0 %v16901_v58  ;;  %v8144_v37 = vpack.c.bf16 %v8097_v28, %v8096_v12  ;;  %v17085_v54 = vld [vmem:[#allocation3 + $0x8] sm:$0xff]  ;;  %v7987_v52 = vld [vmem:[#allocation4 + $0x1d0] sm:$0xff]  ;;  %v7988_v11 = vld [vmem:[#allocation4 + $0x1e0] sm:$0xff] }
 0xa49   :  { %15010 = vmatprep.mubr.bf16.mxu0 %v20642_v9  ;;  %v8140_v2 = vpack.c.bf16 %v22021_v31, %v22019_v48  ;;  %v8142_v5 = vpack.c.bf16 %v22029_v29, %v22027_v14  ;;  %v8032_v38 = vpack.c.bf16 %v17085_v54, %v7984_v17  ;;  %v7986_v4 = vld [vmem:[#allocation4 + $0x1c8] sm:$0xff]  ;;  %v7991_v48 = vld [vmem:[#allocation4 + $0x200] sm:$0xff]  ;;  %v7992_v23 = vld [vmem:[#allocation4 + $0x210] sm:$0xff] }
 0xa4a   :  { %14927 = vmatmul.mubr.bf16.gmra.mrb[80].mxu1 %v8135_v34  ;;  %v7980_v34 = vld [vmem:[#allocation4 + $0x150] sm:$0xff]  ;;  %v7989_v40 = vld [vmem:[#allocation4 + $0x1e8] sm:$0xff]  ;;  %v7993_v31 = vld [vmem:[#allocation4 + $0x218] sm:$0xff] }
 0xa4b   :  { %14930 = vmatprep.mubr.bf16.mxu1 %v8136_v43  ;;  %15073 = vmatpush3.bf16.msra.mxu0 %v16901_v58  ;;  %v22023_v43 = vmax.f32 %v22022_v60, 0.0  ;;  %v22024_v58 = vld [vmem:[#allocation10_spill] sm:$0xff]  ;;  %v20703_v27 = vpack.c.bf16 %v7989_v40, %v7988_v11  ;;  %v20711_v16 = vpack.c.bf16 %v7993_v31, %v7992_v23  ;;  %v7996_v41 = vld [vmem:[#allocation4 + $0x240] sm:$0xff]  ;;  %v8009_v12 = vld [vmem:[#allocation4 + $0x2d8] sm:$0xff]  ;;  %v22030_v40 = vmax.f32 %v21947_v22, 0.0 }
 0xa4c   :  { %15138 = vmatprep.subr.bf16.mxu0 %v20652_v18  ;;  %v22025_v13 = vmax.f32 %v22024_v58, 0.0  ;;  %v8001_v58 = vld [vmem:[#allocation4 + $0x278] sm:$0xff]  ;;  %v8004_v42 = vld [vmem:[#allocation4 + $0x2a0] sm:$0xff]  ;;  %v8005_v14 = vld [vmem:[#allocation4 + $0x2a8] sm:$0xff] }
 0xa4d   :  { %v20735_v29 = vpack.c.bf16 %v8005_v14, %v8004_v42  ;;  %v8854_v23 = vld [vmem:[#allocation4 + $0x22] sm:$0xff]  ;;  %v8856_v31 = vld [vmem:[#allocation4 + $0x3a] sm:$0xff]  ;;  %v16904_v22 = vld [vmem:[%s21662_s9 + $0xd0] sm:$0xff]  }
 0xa4e   :  { %v8141_v50 = vpack.c.bf16 %v22025_v13, %v22023_v43  ;;  %v8000_v43 = vld [vmem:[#allocation4 + $0x270] sm:$0xff]  ;;  %v8861_v42 = vld [vmem:[#allocation4 + $0x7a] sm:$0xff]  ;;  %v8862_v14 = vld [vmem:[#allocation4 + $0x82] sm:$0xff] }
 0xa50   :  { %15011 = vmatmul.mubr.bf16.gmra.mrb[36].mxu0 %v20658_v63 }
 0xa51   :  { %15014 = vmatprep.mubr.bf16.mxu0 %v20664_v7 }
 0xa52   :  { %14931 = vmatmul.mubr.bf16.gmra.mrb[84].mxu1 %v8137_v6  ;;  %v20693_v6 = vpack.c.bf16 %v7981_v55, %v7980_v34  ;;  %v7997_v34 = vld [vmem:[#allocation4 + $0x248] sm:$0xff] }
 0xa53   :  { %14934 = vmatprep.mubr.bf16.mxu1 %v8138_v46  ;;  %v7983_v46 = vld [vmem:[#allocation4 + $0x170] sm:$0xff]  ;;  %v20719_v60 = vpack.c.bf16 %v7997_v34, %v7996_v41 }
 0xa54   :  { %v20697_v8 = vpack.c.bf16 %v7983_v46, %v7982_v44  ;;  %v8012_v44 = vld [vmem:[#allocation4 + $0x300] sm:$0xff]  ;;  %v8013_v46 = vld [vmem:[#allocation4 + $0x308] sm:$0xff] }
 0xa55   :  { %v20751_v54 = vpack.c.bf16 %v8013_v46, %v8012_v44  ;;  %v8857_v34 = vld [vmem:[#allocation4 + $0x4a] sm:$0xff]  ;;  %v8866_v46 = vld [vmem:[#allocation4 + $0xb2] sm:$0xff] }
 0xa56   :  { %v8865_v44 = vld [vmem:[#allocation4 + $0xaa] sm:$0xff] }
 0xa58   :  { %15015 = vmatmul.mubr.bf16.gmra.mrb[40].mxu0 %v20673_v19 }
 0xa59   :  { %15018 = vmatprep.mubr.bf16.mxu0 %v20679_v59 }
 0xa5a   :  { %14935 = vmatmul.mubr.bf16.gmra.mrb[88].mxu1 %v8139_v61  ;;  %v20701_v61 = vpack.c.bf16 %v7987_v52, %v7986_v4  ;;  %v8014_v4 = vld [vmem:[#allocation4 + $0x318] sm:$0xff]  ;;  %v8015_v52 = vld [vmem:[#allocation4 + $0x320] sm:$0xff] }
 0xa5b   :  { %14938 = vmatprep.mubr.bf16.mxu1 %v8140_v2 }
 0xa60   :  { %15019 = vmatmul.mubr.bf16.gmra.mrb[44].mxu0 %v20687_v45 }
 0xa61   :  { %15022 = vmatprep.mubr.bf16.mxu0 %v20693_v6 }
 0xa62   :  { %14939 = vmatmul.mubr.bf16.gmra.mrb[92].mxu1 %v8141_v50  ;;  %v20727_v50 = vpack.c.bf16 %v8001_v58, %v8000_v43  ;;  %v8860_v43 = vld [vmem:[#allocation4 + $0x6a] sm:$0xff] }
 0xa63   :  { %14942 = vmatprep.mubr.bf16.mxu1 %v8142_v5  ;;  %v8008_v5 = vld [vmem:[#allocation4 + $0x2d0] sm:$0xff] }
 0xa64   :  { %v20743_v17 = vpack.c.bf16 %v8009_v12, %v8008_v5  ;;  %v8920_v5 = vpack.c.bf16 %v8862_v14, %v8861_v42  ;;  %v16907_v12 = vld [vmem:[%s21662_s9 + $0xe8] sm:$0xff]   ;;  %v8883_v42 = vld [vmem:[#allocation4 + $0x1b2] sm:$0xff]  ;;  %v8884_v14 = vld [vmem:[#allocation4 + $0x1ba] sm:$0xff] }
 0xa68   :  { %15023 = vmatmul.mubr.bf16.gmra.mrb[48].mxu0 %v20697_v8 }
 0xa69   :  { %15026 = vmatprep.mubr.bf16.mxu0 %v8032_v38  ;;  %v8127_v38 = vld [vmem:[#allocation4 + $0x321] sm:$0xff] }
 0xa6a   :  { %14943 = vmatmul.mubr.bf16.gmra.mrb[96].mxu1 %v20506_v30  ;;  %v7990_v30 = vld [vmem:[#allocation4 + $0x1f8] sm:$0xff] }
 0xa6b   :  { %14946 = vmatprep.mubr.bf16.mxu1 %v8144_v37  ;;  %v20709_v2 = vpack.c.bf16 %v7991_v48, %v7990_v30  ;;  %v8159_v30 = vpack.c.bf16 %v8127_v38, %v22030_v40  ;;  %v20759_v48 = vpack.c.bf16 %v8015_v52, %v8014_v4  ;;  %v8922_v38 = vpack.c.bf16 %v8866_v46, %v8865_v44  ;;  %v16909_v4 = vld [vmem:[%s21662_s9 + $0xf8] sm:$0xff]   ;;  %v8887_v44 = vld [vmem:[#allocation4 + $0x1e2] sm:$0xff]  ;;  %v8888_v46 = vld [vmem:[#allocation4 + $0x1ea] sm:$0xff] }
 0xa6c   :  { %v8869_v40 = vld [vmem:[#allocation4 + $0xda] sm:$0xff] }
 0xa70   :  { %15027 = vmatmul.mubr.bf16.gmra.mrb[52].mxu0 %v20701_v61 }
 0xa71   :  { %15030 = vmatprep.mubr.bf16.mxu0 %v20703_v27 }
 0xa72   :  { %14947 = vmatmul.mubr.bf16.gmra.mrb[100].mxu1 %v20518_v0  ;;  %v7994_v0 = vld [vmem:[#allocation4 + $0x228] sm:$0xff] }
 0xa73   :  { %14950 = vmatprep.mubr.bf16.mxu1 %v20524_v49  ;;  %v7995_v49 = vld [vmem:[#allocation4 + $0x230] sm:$0xff] }
 0xa74   :  { %v20717_v55 = vpack.c.bf16 %v7995_v49, %v7994_v0  ;;  %v16903_v49 = vld [vmem:[%s21662_s9 + $0xc8] sm:$0xff]  }
 0xa78   :  { %15031 = vmatmul.mubr.bf16.gmra.mrb[56].mxu0 %v20709_v2 }
 0xa79   :  { %15034 = vmatprep.mubr.bf16.mxu0 %v20711_v16 }
 0xa7a   :  { %14951 = vmatmul.mubr.bf16.gmra.mrb[104].mxu1 %v20539_v26  ;;  %v7998_v26 = vld [vmem:[#allocation4 + $0x258] sm:$0xff] }
 0xa7b   :  { %14954 = vmatprep.mubr.bf16.mxu1 %v20545_v21  ;;  %v7999_v21 = vld [vmem:[#allocation4 + $0x260] sm:$0xff] }
 0xa7c   :  { %v20725_v13 = vpack.c.bf16 %v7999_v21, %v7998_v26  ;;  %v8858_v26 = vld [vmem:[#allocation4 + $0x52] sm:$0xff]  ;;  %v8859_v21 = vld [vmem:[#allocation4 + $0x62] sm:$0xff] }
 0xa7d   :  { %v8918_v58 = vpack.c.bf16 %v8858_v26, %v8857_v34 }
 0xa80   :  { %15035 = vmatmul.mubr.bf16.gmra.mrb[60].mxu0 %v20717_v55 }
 0xa81   :  { %15038 = vmatprep.mubr.bf16.mxu0 %v20719_v60 }
 0xa82   :  { %14955 = vmatmul.mubr.bf16.gmra.mrb[108].mxu1 %v20552_v57  ;;  %v8002_v57 = vld [vmem:[#allocation4 + $0x288] sm:$0xff] }
 0xa83   :  { %14958 = vmatprep.mubr.bf16.mxu1 %v20559_v1  ;;  %v8003_v1 = vld [vmem:[#allocation4 + $0x290] sm:$0xff] }
 0xa84   :  { %v20733_v51 = vpack.c.bf16 %v8003_v1, %v8002_v57  ;;  %v16905_v57 = vld [vmem:[%s21662_s9 + $0xd8] sm:$0xff]   ;;  %v8919_v1 = vpack.c.bf16 %v8860_v43, %v8859_v21  ;;  %v8878_v43 = vld [vmem:[#allocation4 + $0x142] sm:$0xff] }
 0xa85   :  { %v8877_v21 = vld [vmem:[#allocation4 + $0x13a] sm:$0xff] }
 0xa88   :  { %15039 = vmatmul.mubr.bf16.gmra.mrb[64].mxu0 %v20725_v13 }
 0xa89   :  { %15042 = vmatprep.mubr.bf16.mxu0 %v20727_v50 }
 0xa8a   :  { %14959 = vmatmul.mubr.bf16.gmra.mrb[112].mxu1 %v20565_v62  ;;  %v8006_v62 = vld [vmem:[#allocation4 + $0x2b8] sm:$0xff] }
 0xa8b   :  { %14962 = vmatprep.mubr.bf16.mxu1 %v20571_v3  ;;  %v8007_v3 = vld [vmem:[#allocation4 + $0x2c0] sm:$0xff] }
 0xa8c   :  { %v20741_v28 = vpack.c.bf16 %v8007_v3, %v8006_v62  ;;  %v8863_v62 = vld [vmem:[#allocation4 + $0x92] sm:$0xff]  ;;  %v8864_v3 = vld [vmem:[#allocation4 + $0x9a] sm:$0xff] }
 0xa90   :  { %15043 = vmatmul.mubr.bf16.gmra.mrb[68].mxu0 %v20733_v51 }
 0xa91   :  { %15046 = vmatprep.mubr.bf16.mxu0 %v20735_v29 }
 0xa92   :  { %14963 = vmatmul.mubr.bf16.gmra.mrb[116].mxu1 %v20577_v56  ;;  %v8010_v56 = vld [vmem:[#allocation4 + $0x2e8] sm:$0xff] }
 0xa93   :  { %14966 = vmatprep.mubr.bf16.mxu1 %v20586_v47  ;;  %v8011_v47 = vld [vmem:[#allocation4 + $0x2f0] sm:$0xff] }
 0xa94   :  { %v20749_v37 = vpack.c.bf16 %v8011_v47, %v8010_v56  ;;  %v8921_v56 = vpack.c.bf16 %v8864_v3, %v8863_v62  ;;  %v16908_v47 = vld [vmem:[%s21662_s9 + $0xf0] sm:$0xff]  }
 0xa95   :  { %v8881_v62 = vld [vmem:[#allocation4 + $0x16a] sm:$0xff]  ;;  %v8882_v3 = vld [vmem:[#allocation4 + $0x172] sm:$0xff] }
 0xa98   :  { %15047 = vmatmul.mubr.bf16.gmra.mrb[72].mxu0 %v20741_v28 }
 0xa99   :  { %15050 = vmatprep.mubr.bf16.mxu0 %v20743_v17 }
 0xa9a   :  { %14967 = vmatmul.mubr.bf16.gmra.mrb[120].mxu1 %v20592_v36  ;;  %v8851_v36 = vld [vmem:[#allocation4 + $0x2] sm:$0xff] }
 0xa9b   :  { %14970 = vmatprep.mubr.bf16.mxu1 %v20598_v20  ;;  %v8852_v20 = vld [vmem:[#allocation4 + $0xa] sm:$0xff] }
 0xa9c   :  { %v8915_v11 = vpack.c.bf16 %v8852_v20, %v8851_v36  ;;  %v8867_v36 = vld [vmem:[#allocation4 + $0xc2] sm:$0xff]  ;;  %v8868_v20 = vld [vmem:[#allocation4 + $0xca] sm:$0xff] }
 0xa9d   :  { %v8923_v52 = vpack.c.bf16 %v8868_v20, %v8867_v36  ;;  %v8933_v20 = vpack.c.bf16 %v8888_v46, %v8887_v44 }
 0xaa0   :  { %15051 = vmatmul.mubr.bf16.gmra.mrb[76].mxu0 %v20749_v37 }
 0xaa1   :  { %15054 = vmatprep.mubr.bf16.mxu0 %v20751_v54 }
 0xaa2   :  { %14971 = vmatmul.mubr.bf16.gmra.mrb[124].mxu1 %v20604_v10  ;;  %v8853_v10 = vld [vmem:[#allocation4 + $0x1a] sm:$0xff] }
 0xaa3   :  { %14974 = vmatprep.mubr.bf16.mxu1 %v20610_v15  ;;  %v8855_v15 = vld [vmem:[#allocation4 + $0x32] sm:$0xff]  ;;  %v8916_v0 = vpack.c.bf16 %v8854_v23, %v8853_v10  ;;  %v8872_v23 = vld [vmem:[#allocation4 + $0xfa] sm:$0xff] }
 0xaa4   :  { %v8917_v41 = vpack.c.bf16 %v8856_v31, %v8855_v15  ;;  %v8871_v10 = vld [vmem:[#allocation4 + $0xf2] sm:$0xff] }
 0xaa5   :  { %v8925_v31 = vpack.c.bf16 %v8872_v23, %v8871_v10  ;;  %v8893_v23 = vld [vmem:[#allocation4 + $0x22a] sm:$0xff] }
 0xaa8   :  { %15055 = vmatmul.mubr.bf16.gmra.mrb[80].mxu0 %v20759_v48 }
 0xaa9   :  { %15074 = vmatprep.mubr.bf16.mxu0 %v8915_v11  ;;  %v20787_v11 = vld [vmem:[%s21662_s9 + $0x100] sm:$0xff]  }
 0xaaa   :  { %14975 = vmatmul.mubr.bf16.gmra.mrb[128].mxu1 %v8159_v30  ;;  %v8870_v30 = vld [vmem:[#allocation4 + $0xe2] sm:$0xff] }
 0xaab   :  { %v8924_v15 = vpack.c.bf16 %v8870_v30, %v8869_v40  ;;  %v8892_v40 = vld [vmem:[#allocation4 + $0x21a] sm:$0xff] }
 0xab0   :  { %15075 = vmatmul.mubr.bf16.vlgmr.msra.gmra.mrb[20].mxu0 %v8916_v0  ;;  %v8873_v0 = vld [vmem:[#allocation4 + $0x10a] sm:$0xff] }
 0xab1   :  { %15139 = vmatpush3.bf16.msra.mxu0 %v20652_v18  ;;  %15078 = vmatprep.mubr.bf16.mxu0 %v8917_v41  ;;  %v16906_v18 = vld [vmem:[%s21662_s9 + $0xe0] sm:$0xff]  }
 0xab2   :  { %15140 = vmatprep.subr.bf16.mxu0 %v16903_v49  ;;  %v8875_v41 = vld [vmem:[#allocation4 + $0x122] sm:$0xff] }
 0xab5   :  { %15141 = vmatpush3.bf16.msra.mxu0 %v16903_v49  ;;  %v8874_v49 = vld [vmem:[#allocation4 + $0x112] sm:$0xff] }
 0xab6   :  { %15142 = vmatprep.subr.bf16.mxu0 %v16904_v22  ;;  %v8926_v34 = vpack.c.bf16 %v8874_v49, %v8873_v0  ;;  %v8896_v0 = vld [vmem:[#allocation4 + $0x24a] sm:$0xff] }
 0xab8   :  { %15079 = vmatmul.mubr.bf16.gmra.mrb[24].mxu0 %v8918_v58  ;;  %v8879_v58 = vld [vmem:[#allocation4 + $0x152] sm:$0xff] }
 0xab9   :  { %15082 = vmatprep.mubr.bf16.mxu0 %v8919_v1  ;;  %15143 = vmatpush3.bf16.msra.mxu0 %v16904_v22  ;;  %v8876_v22 = vld [vmem:[#allocation4 + $0x12a] sm:$0xff]  ;;  %v8928_v1 = vpack.c.bf16 %v8878_v43, %v8877_v21  ;;  %v8899_v43 = vld [vmem:[#allocation4 + $0x272] sm:$0xff] }
 0xaba   :  { %15144 = vmatprep.subr.bf16.mxu0 %v16905_v57  ;;  %v8927_v26 = vpack.c.bf16 %v8876_v22, %v8875_v41 }
 0xabd   :  { %15145 = vmatpush3.bf16.msra.mxu0 %v16905_v57  ;;  %v8880_v57 = vld [vmem:[#allocation4 + $0x15a] sm:$0xff] }
 0xabe   :  { %15146 = vmatprep.subr.bf16.mxu0 %v16906_v18 }
 0xac0   :  { %15083 = vmatmul.mubr.bf16.gmra.mrb[28].mxu0 %v8920_v5  ;;  %v8931_v5 = vpack.c.bf16 %v8884_v14, %v8883_v42 }
 0xac1   :  { %15086 = vmatprep.mubr.bf16.mxu0 %v8921_v56  ;;  %15147 = vmatpush3.bf16.msra.mxu0 %v16906_v18  ;;  %v8929_v18 = vpack.c.bf16 %v8880_v57, %v8879_v58  ;;  %v8885_v56 = vld [vmem:[#allocation4 + $0x1ca] sm:$0xff]  ;;  %v8900_v58 = vld [vmem:[#allocation4 + $0x27a] sm:$0xff] }
 0xac2   :  { %15148 = vmatprep.subr.bf16.mxu0 %v16907_v12  ;;  %v8939_v42 = vpack.c.bf16 %v8900_v58, %v8899_v43  ;;  %v8912_v43 = vld [vmem:[#allocation4 + $0x30a] sm:$0xff] }
 0xac5   :  { %15149 = vmatpush3.bf16.msra.mxu0 %v16907_v12  ;;  %v8930_v12 = vpack.c.bf16 %v8882_v3, %v8881_v62  ;;  %v8901_v62 = vld [vmem:[#allocation4 + $0x28a] sm:$0xff]  ;;  %v8902_v3 = vld [vmem:[#allocation4 + $0x292] sm:$0xff] }
 0xac6   :  { %15150 = vmatprep.subr.bf16.mxu0 %v16908_v47  ;;  %v8940_v46 = vpack.c.bf16 %v8902_v3, %v8901_v62 }
 0xac8   :  { %15087 = vmatmul.mubr.bf16.gmra.mrb[32].mxu0 %v8922_v38  ;;  %v8889_v38 = vld [vmem:[#allocation4 + $0x1fa] sm:$0xff] }
 0xac9   :  { %15090 = vmatprep.mubr.bf16.mxu0 %v8923_v52  ;;  %15151 = vmatpush3.bf16.msra.mxu0 %v16908_v47  ;;  %v8886_v47 = vld [vmem:[#allocation4 + $0x1d2] sm:$0xff] }
 0xaca   :  { %15152 = vmatprep.subr.bf16.mxu0 %v16909_v4  ;;  %v8932_v36 = vpack.c.bf16 %v8886_v47, %v8885_v56  ;;  %v8891_v52 = vld [vmem:[#allocation4 + $0x212] sm:$0xff]  ;;  %v8904_v56 = vld [vmem:[#allocation4 + $0x2aa] sm:$0xff] }
 0xacb   :  { %v8935_v10 = vpack.c.bf16 %v8892_v40, %v8891_v52  ;;  %v8907_v40 = vld [vmem:[#allocation4 + $0x2d2] sm:$0xff] }
 0xacd   :  { %15153 = vmatpush3.bf16.msra.mxu0 %v16909_v4  ;;  %v8890_v4 = vld [vmem:[#allocation4 + $0x202] sm:$0xff] }
 0xace   :  { %15218 = vmatprep.subr.bf16.mxu0 %v20787_v11  ;;  %v8934_v30 = vpack.c.bf16 %v8890_v4, %v8889_v38  ;;  %v8905_v38 = vld [vmem:[#allocation4 + $0x2ba] sm:$0xff]  ;;  %v8906_v4 = vld [vmem:[#allocation4 + $0x2c2] sm:$0xff] }
 0xad0   :  { %15091 = vmatmul.mubr.bf16.gmra.mrb[36].mxu0 %v8924_v15  ;;  %v8894_v15 = vld [vmem:[#allocation4 + $0x232] sm:$0xff] }
 0xad1   :  { %15094 = vmatprep.mubr.bf16.mxu0 %v8925_v31  ;;  %v8895_v31 = vld [vmem:[#allocation4 + $0x242] sm:$0xff]  ;;  %v8936_v49 = vpack.c.bf16 %v8894_v15, %v8893_v23  ;;  %v8942_v15 = vpack.c.bf16 %v8906_v4, %v8905_v38 }
 0xad2   :  { %v8937_v41 = vpack.c.bf16 %v8896_v0, %v8895_v31 }
 0xad8   :  { %15095 = vmatmul.mubr.bf16.gmra.mrb[40].mxu0 %v8926_v34  ;;  %v8897_v34 = vld [vmem:[#allocation4 + $0x25a] sm:$0xff] }
 0xad9   :  { %15098 = vmatprep.mubr.bf16.mxu0 %v8927_v26  ;;  %v8898_v26 = vld [vmem:[#allocation4 + $0x262] sm:$0xff] }
 0xae0   :  { %15099 = vmatmul.mubr.bf16.gmra.mrb[44].mxu0 %v8928_v1 }
 0xae1   :  { %15102 = vmatprep.mubr.bf16.mxu0 %v8929_v18  ;;  %v8938_v18 = vpack.c.bf16 %v8898_v26, %v8897_v34  ;;  %v8911_v26 = vld [vmem:[#allocation4 + $0x302] sm:$0xff] }
 0xae2   :  { %v8945_v62 = vpack.c.bf16 %v8912_v43, %v8911_v26 }
 0xae8   :  { %15103 = vmatmul.mubr.bf16.gmra.mrb[48].mxu0 %v8930_v12  ;;  %v8903_v12 = vld [vmem:[#allocation4 + $0x2a2] sm:$0xff] }
 0xae9   :  { %15106 = vmatprep.mubr.bf16.mxu0 %v8931_v5 }
 0xaf0   :  { %15107 = vmatmul.mubr.bf16.gmra.mrb[52].mxu0 %v8932_v36  ;;  %v8941_v36 = vpack.c.bf16 %v8904_v56, %v8903_v12  ;;  %v8913_v12 = vld [vmem:[#allocation4 + $0x31a] sm:$0xff]  ;;  %v8914_v56 = vld [vmem:[#allocation4 + $0x322] sm:$0xff] }
 0xaf1   :  { %15110 = vmatprep.mubr.bf16.mxu0 %v8933_v20  ;;  %v8946_v4 = vpack.c.bf16 %v8914_v56, %v8913_v12 }
 0xaf8   :  { %15111 = vmatmul.mubr.bf16.gmra.mrb[56].mxu0 %v8934_v30  ;;  %v8908_v30 = vld [vmem:[#allocation4 + $0x2da] sm:$0xff] }
 0xaf9   :  { %15114 = vmatprep.mubr.bf16.mxu0 %v8935_v10  ;;  %v8943_v31 = vpack.c.bf16 %v8908_v30, %v8907_v40 }
 0xb00   :  { %15115 = vmatmul.mubr.bf16.gmra.mrb[60].mxu0 %v8936_v49  ;;  %v8909_v49 = vld [vmem:[#allocation4 + $0x2ea] sm:$0xff] }
 0xb01   :  { %15118 = vmatprep.mubr.bf16.mxu0 %v8937_v41  ;;  %v8910_v41 = vld [vmem:[#allocation4 + $0x2f2] sm:$0xff] }
 0xb05   :  { %v20790_v22 = vpop.f32.mrb[68].mxu1 }
 0xb06   :  { %22031 = vst [vmem:[#allocation20_spill] sm:$0xff] %v20790_v22  ;;  %v20792_v21 = vpop.f32.mrb[69].mxu1 }
 0xb07   :  { %22032 = vst [vmem:[#allocation17_spill] sm:$0xff] %v20792_v21  ;;  %v20794_v57 = vpop.f32.mrb[70].mxu1 }
 0xb08   :  { %22033 = vst [vmem:[#allocation14_spill] sm:$0xff] %v20794_v57  ;;  %v20796_v1 = vpop.f32.mrb[71].mxu1  ;;  %15119 = vmatmul.mubr.bf16.gmra.mrb[64].mxu0 %v8938_v18 }
 0xb09   :  { %22034 = vst [vmem:[#allocation16_spill] sm:$0xff] %v20796_v1  ;;  %15122 = vmatprep.mubr.bf16.mxu0 %v8939_v42  ;;  %v8944_v42 = vpack.c.bf16 %v8910_v41, %v8909_v49  ;;  %v16911_v49 = vld [vmem:[%s21662_s9 + $0x108] sm:$0xff]   ;;  %v10432_v1 = vld [vmem:[#allocation4 + $0x21a] sm:$0xff] }
 0xb0d   :  { %v20798_v14 = vpop.f32.mrb[72].mxu1 }
 0xb0e   :  { %22035 = vst [vmem:[#allocation27_spill] sm:$0xff] %v20798_v14  ;;  %v20800_v5 = vpop.f32.mrb[73].mxu1  ;;  %v10431_v14 = vld [vmem:[#allocation4 + $0x212] sm:$0xff] }
 0xb0f   :  { %22036 = vst [vmem:[#allocation28_spill] sm:$0xff] %v20800_v5  ;;  %v20802_v47 = vpop.f32.mrb[74].mxu1  ;;  %v10428_v5 = vld [vmem:[#allocation4 + $0x1ea] sm:$0xff] }
 0xb10   :  { %22037 = vst [vmem:[#allocation6_spill] sm:$0xff] %v20802_v47  ;;  %v20804_v44 = vpop.f32.mrb[75].mxu1  ;;  %15123 = vmatmul.mubr.bf16.gmra.mrb[68].mxu0 %v8940_v46  ;;  %v10427_v47 = vld [vmem:[#allocation4 + $0x1e2] sm:$0xff] }
 0xb11   :  { %22038 = vst [vmem:[#allocation8_spill] sm:$0xff] %v20804_v44  ;;  %15126 = vmatprep.mubr.bf16.mxu0 %v8941_v36 }
 0xb15   :  { %v20806_v20 = vpop.f32.mrb[76].mxu1 }
 0xb16   :  { %22039 = vst [vmem:[#allocation18_spill] sm:$0xff] %v20806_v20  ;;  %v20808_v52 = vpop.f32.mrb[77].mxu1 }
 0xb17   :  { %22040 = vst [vmem:[#allocation5_spill] sm:$0xff] %v20808_v52  ;;  %v20810_v10 = vpop.f32.mrb[78].mxu1 }
 0xb18   :  { %22041 = vst [vmem:[#allocation19_spill] sm:$0xff] %v20810_v10  ;;  %v20812_v23 = vpop.f32.mrb[79].mxu1  ;;  %15127 = vmatmul.mubr.bf16.gmra.mrb[72].mxu0 %v8942_v15 }
 0xb19   :  { %22042 = vst [vmem:[#allocation7_spill] sm:$0xff] %v20812_v23  ;;  %15130 = vmatprep.mubr.bf16.mxu0 %v8943_v31 }
 0xb1d   :  { %v20814_v0 = vpop.f32.mrb[80].mxu1 }
 0xb1e   :  { %22043 = vst [vmem:[#allocation21_spill] sm:$0xff] %v20814_v0  ;;  %v20816_v34 = vpop.f32.mrb[81].mxu1  ;;  %v10418_v0 = vld [vmem:[#allocation4 + $0x142] sm:$0xff] }
 0xb1f   :  { %22044 = vst [vmem:[#allocation22_spill] sm:$0xff] %v20816_v34  ;;  %v20818_v58 = vpop.f32.mrb[82].mxu1  ;;  %v10417_v34 = vld [vmem:[#allocation4 + $0x13a] sm:$0xff] }
 0xb20   :  { %22045 = vst [vmem:[#allocation23_spill] sm:$0xff] %v20818_v58  ;;  %v20820_v18 = vpop.f32.mrb[83].mxu1  ;;  %15131 = vmatmul.mubr.bf16.gmra.mrb[76].mxu0 %v8944_v42  ;;  %v21160_v10 = vpack.c.bf16 %v10418_v0, %v10417_v34  ;;  %v10425_v0 = vld [vmem:[#allocation4 + $0x1ca] sm:$0xff]  ;;  %v10426_v34 = vld [vmem:[#allocation4 + $0x1d2] sm:$0xff] }
 0xb21   :  { %22046 = vst [vmem:[#allocation24_spill] sm:$0xff] %v20820_v18  ;;  %15134 = vmatprep.mubr.bf16.mxu0 %v8945_v62  ;;  %v10414_v18 = vld [vmem:[#allocation4 + $0x112] sm:$0xff]  ;;  %v10473_v44 = vpack.c.bf16 %v10426_v34, %v10425_v0  ;;  %v21179_v0 = vpack.c.bf16 %v10432_v1, %v10431_v14  ;;  %v10440_v14 = vld [vmem:[#allocation4 + $0x27a] sm:$0xff] }
 0xb22   :  { %v10439_v1 = vld [vmem:[#allocation4 + $0x272] sm:$0xff] }
 0xb23   :  { %22099 = vst [vmem:[#allocation73_spill] sm:$0xff] %v21179_v0  ;;  %v21191_v21 = vpack.c.bf16 %v10440_v14, %v10439_v1  ;;  %v10447_v1 = vld [vmem:[#allocation4 + $0x2d2] sm:$0xff]  ;;  %v10448_v14 = vld [vmem:[#allocation4 + $0x2da] sm:$0xff] }
 0xb25   :  { %v20822_v3 = vpop.f32.mrb[84].mxu1  ;;  %22103 = vst [vmem:[#allocation77_spill] sm:$0xff] %v21191_v21 }
 0xb26   :  { %22047 = vst [vmem:[#allocation25_spill] sm:$0xff] %v20822_v3  ;;  %v20824_v46 = vpop.f32.mrb[85].mxu1 }
 0xb27   :  { %22048 = vst [vmem:[#allocation26_spill] sm:$0xff] %v20824_v46  ;;  %v20826_v36 = vpop.f32.mrb[86].mxu1  ;;  %v10410_v46 = vld [vmem:[#allocation4 + $0xe2] sm:$0xff] }
 0xb28   :  { %22049 = vst [vmem:[#allocation9_spill] sm:$0xff] %v20826_v36  ;;  %v20828_v38 = vpop.f32.mrb[87].mxu1  ;;  %15135 = vmatmul.mubr.bf16.gmra.mrb[80].mxu0 %v8946_v4 }
 0xb29   :  { %22050 = vst [vmem:[#allocation11_spill] sm:$0xff] %v20828_v38  ;;  %15154 = vmatprep.mubr.bf16.mxu0 %v20481_v25  ;;  %v16912_v25 = vld [vmem:[%s21662_s9 + $0x110] sm:$0xff]  }
 0xb2d   :  { %v20831_v40 = vpop.f32.mrb[88].mxu1 }
 0xb2e   :  { %22051 = vst [vmem:[#allocation13_spill] sm:$0xff] %v20831_v40  ;;  %v20833_v30 = vpop.f32.mrb[89].mxu1  ;;  %v10396_v40 = vld [vmem:[#allocation4 + $0x3a] sm:$0xff] }
 0xb2f   :  { %22052 = vst [vmem:[#allocation10_spill] sm:$0xff] %v20833_v30  ;;  %v20835_v15 = vpop.f32.mrb[90].mxu1  ;;  %v10395_v30 = vld [vmem:[#allocation4 + $0x32] sm:$0xff] }
 0xb30   :  { %22053 = vst [vmem:[#allocation12_spill] sm:$0xff] %v20835_v15  ;;  %v20837_v31 = vpop.f32.mrb[91].mxu1  ;;  %15155 = vmatmul.mubr.bf16.vlgmr.msra.gmra.mrb[20].mxu0 %v20487_v53  ;;  %v16913_v53 = vld [vmem:[%s21662_s9 + $0x118] sm:$0xff]  }
 0xb31   :  { %22054 = vst [vmem:[#allocation15_spill] sm:$0xff] %v20837_v31  ;;  %15219 = vmatpush3.bf16.msra.mxu0 %v20787_v11  ;;  %15158 = vmatprep.mubr.bf16.mxu0 %v20512_v24  ;;  %v16914_v24 = vld [vmem:[%s21662_s9 + $0x120] sm:$0xff]  }
 0xb32   :  { %15220 = vmatprep.subr.bf16.mxu0 %v16911_v49 }
 0xb35   :  { %v20848_v41 = vpop.f32.mrb[92].mxu1  ;;  %15221 = vmatpush3.bf16.msra.mxu0 %v16911_v49 }
 0xb36   :  { %22055 = vst [vmem:[#allocation29_spill] sm:$0xff] %v20848_v41  ;;  %v20850_v26 = vpop.f32.mrb[93].mxu1  ;;  %15222 = vmatprep.subr.bf16.mxu0 %v16912_v25 }
 0xb37   :  { %22056 = vst [vmem:[#allocation30_spill] sm:$0xff] %v20850_v26  ;;  %v20852_v43 = vpop.f32.mrb[94].mxu1 }
 0xb38   :  { %22057 = vst [vmem:[#allocation31_spill] sm:$0xff] %v20852_v43  ;;  %v20854_v42 = vpop.f32.mrb[95].mxu1  ;;  %15159 = vmatmul.mubr.bf16.gmra.mrb[24].mxu0 %v20530_v35  ;;  %v16915_v35 = vld [vmem:[%s21662_s9 + $0x128] sm:$0xff]  }
 0xb39   :  { %22058 = vst [vmem:[#allocation32_spill] sm:$0xff] %v20854_v42  ;;  %15162 = vmatprep.mubr.bf16.mxu0 %v20616_v32  ;;  %15223 = vmatpush3.bf16.msra.mxu0 %v16912_v25  ;;  %v16916_v32 = vld [vmem:[%s21662_s9 + $0x130] sm:$0xff]  }
 0xb3a   :  { %15224 = vmatprep.subr.bf16.mxu0 %v16913_v53 }
 0xb3d   :  { %v20864_v11 = vpop.f32.mrb[96].mxu1  ;;  %15225 = vmatpush3.bf16.msra.mxu0 %v16913_v53 }
 0xb3e   :  { %22059 = vst [vmem:[#allocation33_spill] sm:$0xff] %v20864_v11  ;;  %v20866_v62 = vpop.f32.mrb[97].mxu1  ;;  %15226 = vmatprep.subr.bf16.mxu0 %v16914_v24 }
 0xb3f   :  { %22060 = vst [vmem:[#allocation34_spill] sm:$0xff] %v20866_v62  ;;  %v20868_v12 = vpop.f32.mrb[98].mxu1 }
 0xb40   :  { %22061 = vst [vmem:[#allocation35_spill] sm:$0xff] %v20868_v12  ;;  %v20870_v56 = vpop.f32.mrb[99].mxu1  ;;  %15163 = vmatmul.mubr.bf16.gmra.mrb[28].mxu0 %v20622_v39  ;;  %v16917_v39 = vld [vmem:[%s21662_s9 + $0x138] sm:$0xff]  }
 0xb41   :  { %22062 = vst [vmem:[#allocation36_spill] sm:$0xff] %v20870_v56  ;;  %15166 = vmatprep.mubr.bf16.mxu0 %v20636_v33  ;;  %15227 = vmatpush3.bf16.msra.mxu0 %v16914_v24  ;;  %v20896_v33 = vld [vmem:[%s21662_s9 + $0x140] sm:$0xff]  }
 0xb42   :  { %15228 = vmatprep.subr.bf16.mxu0 %v16915_v35 }
 0xb45   :  { %v20880_v4 = vpop.f32.mrb[100].mxu1  ;;  %15229 = vmatpush3.bf16.msra.mxu0 %v16915_v35 }
 0xb46   :  { %22063 = vst [vmem:[#allocation37_spill] sm:$0xff] %v20880_v4  ;;  %v20882_v49 = vpop.f32.mrb[101].mxu1  ;;  %15230 = vmatprep.subr.bf16.mxu0 %v16916_v32 }
 0xb47   :  { %22064 = vst [vmem:[#allocation38_spill] sm:$0xff] %v20882_v49  ;;  %v20884_v25 = vpop.f32.mrb[102].mxu1  ;;  %v9918_v49 = vld [vmem:[#allocation4 + $0x219] sm:$0xff] }
 0xb48   :  { %22065 = vst [vmem:[#allocation39_spill] sm:$0xff] %v20884_v25  ;;  %v20886_v53 = vpop.f32.mrb[103].mxu1  ;;  %15167 = vmatmul.mubr.bf16.gmra.mrb[32].mxu0 %v20642_v9 }
 0xb49   :  { %22066 = vst [vmem:[#allocation40_spill] sm:$0xff] %v20886_v53  ;;  %15170 = vmatprep.mubr.bf16.mxu0 %v20658_v63  ;;  %15231 = vmatpush3.bf16.msra.mxu0 %v16916_v32 }
 0xb4a   :  { %15232 = vmatprep.subr.bf16.mxu0 %v16917_v39 }
 0xb4d   :  { %v20898_v24 = vpop.f32.mrb[104].mxu1  ;;  %15233 = vmatpush3.bf16.msra.mxu0 %v16917_v39 }
 0xb4e   :  { %22067 = vst [vmem:[#allocation41_spill] sm:$0xff] %v20898_v24  ;;  %v20900_v35 = vpop.f32.mrb[105].mxu1  ;;  %15298 = vmatprep.subr.bf16.mxu0 %v20896_v33 }
 0xb4f   :  { %22068 = vst [vmem:[#allocation42_spill] sm:$0xff] %v20900_v35  ;;  %v20902_v53 = vpop.f32.mrb[106].mxu1  ;;  %v9917_v35 = vld [vmem:[#allocation4 + $0x211] sm:$0xff] }
 0xb50   :  { %22069 = vst [vmem:[#allocation43_spill] sm:$0xff] %v20902_v53  ;;  %v20904_v25 = vpop.f32.mrb[107].mxu1  ;;  %15171 = vmatmul.mubr.bf16.gmra.mrb[36].mxu0 %v20664_v7 }
 0xb51   :  { %22070 = vst [vmem:[#allocation44_spill] sm:$0xff] %v20904_v25  ;;  %15174 = vmatprep.mubr.bf16.mxu0 %v20673_v19 }
 0xb55   :  { %v20909_v9 = vpop.f32.mrb[108].mxu1 }
 0xb56   :  { %22071 = vst [vmem:[#allocation45_spill] sm:$0xff] %v20909_v9  ;;  %v20911_v63 = vpop.f32.mrb[109].mxu1  ;;  %v9914_v9 = vld [vmem:[#allocation4 + $0x1e9] sm:$0xff] }
 0xb57   :  { %22072 = vst [vmem:[#allocation46_spill] sm:$0xff] %v20911_v63  ;;  %v20913_v32 = vpop.f32.mrb[110].mxu1 }
 0xb58   :  { %22073 = vst [vmem:[#allocation47_spill] sm:$0xff] %v20913_v32  ;;  %v20915_v24 = vpop.f32.mrb[111].mxu1  ;;  %15175 = vmatmul.mubr.bf16.gmra.mrb[40].mxu0 %v20679_v59  ;;  %v9395_v32 = vld [vmem:[#allocation4 + $0x180] sm:$0xff] }
 0xb59   :  { %22074 = vst [vmem:[#allocation48_spill] sm:$0xff] %v20915_v24  ;;  %15178 = vmatprep.mubr.bf16.mxu0 %v20687_v45  ;;  %v9396_v24 = vld [vmem:[#allocation4 + $0x188] sm:$0xff] }
 0xb5d   :  { %v20919_v39 = vpop.f32.mrb[112].mxu1 }
 0xb5e   :  { %22075 = vst [vmem:[#allocation49_spill] sm:$0xff] %v20919_v39  ;;  %v20921_v25 = vpop.f32.mrb[113].mxu1  ;;  %v20937_v39 = vpack.c.bf16 %v9396_v24, %v9395_v32 }
 0xb5f   :  { %22076 = vst [vmem:[#allocation50_spill] sm:$0xff] %v20921_v25  ;;  %v20923_v53 = vpop.f32.mrb[114].mxu1  ;;  %v9913_v25 = vld [vmem:[#allocation4 + $0x1e1] sm:$0xff] }
 0xb60   :  { %22077 = vst [vmem:[#allocation51_spill] sm:$0xff] %v20923_v53  ;;  %v20925_v7 = vpop.f32.mrb[115].mxu1  ;;  %15179 = vmatmul.mubr.bf16.gmra.mrb[44].mxu0 %v20693_v6 }
 0xb61   :  { %22078 = vst [vmem:[#allocation52_spill] sm:$0xff] %v20925_v7  ;;  %15182 = vmatprep.mubr.bf16.mxu0 %v20697_v8 }
 0xb65   :  { %v20929_v19 = vpop.f32.mrb[116].mxu1 }
 0xb66   :  { %22079 = vst [vmem:[#allocation53_spill] sm:$0xff] %v20929_v19  ;;  %v20931_v63 = vpop.f32.mrb[117].mxu1 }
 0xb67   :  { %22080 = vst [vmem:[#allocation54_spill] sm:$0xff] %v20931_v63  ;;  %v20933_v59 = vpop.f32.mrb[118].mxu1 }
 0xb68   :  { %22081 = vst [vmem:[#allocation55_spill] sm:$0xff] %v20933_v59  ;;  %v20935_v45 = vpop.f32.mrb[119].mxu1  ;;  %15183 = vmatmul.mubr.bf16.gmra.mrb[48].mxu0 %v20937_v39 }
 0xb69   :  { %22082 = vst [vmem:[#allocation56_spill] sm:$0xff] %v20935_v45  ;;  %15186 = vmatprep.mubr.bf16.mxu0 %v20701_v61 }
 0xb6d   :  { %v20941_v7 = vpop.f32.mrb[120].mxu1 }
 0xb6e   :  { %22083 = vst [vmem:[#allocation57_spill] sm:$0xff] %v20941_v7  ;;  %v20943_v6 = vpop.f32.mrb[121].mxu1 }
 0xb6f   :  { %22084 = vst [vmem:[#allocation58_spill] sm:$0xff] %v20943_v6  ;;  %v20945_v8 = vpop.f32.mrb[122].mxu1 }
 0xb70   :  { %22085 = vst [vmem:[#allocation59_spill] sm:$0xff] %v20945_v8  ;;  %v20947_v19 = vpop.f32.mrb[123].mxu1  ;;  %15187 = vmatmul.mubr.bf16.gmra.mrb[52].mxu0 %v20703_v27 }
 0xb71   :  { %22086 = vst [vmem:[#allocation60_spill] sm:$0xff] %v20947_v19  ;;  %15190 = vmatprep.mubr.bf16.mxu0 %v20709_v2  ;;  %v9427_v2 = vld [vmem:[#allocation4 + $0x330] sm:$0xff] }
 0xb75   :  { %v20951_v59 = vpop.f32.mrb[124].mxu1 }
 0xb76   :  { %22087 = vst [vmem:[#allocation61_spill] sm:$0xff] %v20951_v59  ;;  %v20953_v24 = vpop.f32.mrb[125].mxu1 }
 0xb77   :  { %22088 = vst [vmem:[#allocation62_spill] sm:$0xff] %v20953_v24  ;;  %v20955_v32 = vpop.f32.mrb[126].mxu1  ;;  %v9904_v24 = vld [vmem:[#allocation4 + $0x141] sm:$0xff] }
 0xb78   :  { %22089 = vst [vmem:[#allocation63_spill] sm:$0xff] %v20955_v32  ;;  %v20957_v45 = vpop.f32.mrb[127].mxu1  ;;  %15191 = vmatmul.mubr.bf16.gmra.mrb[56].mxu0 %v20711_v16  ;;  %v9428_v16 = vld [vmem:[#allocation4 + $0x338] sm:$0xff] }
 0xb79   :  { %22090 = vst [vmem:[#allocation64_spill] sm:$0xff] %v20957_v45  ;;  %15194 = vmatprep.mubr.bf16.mxu0 %v20717_v55  ;;  %v9879_v55 = vld [vmem:[#allocation4 + $0x19] sm:$0xff] }
 0xb7a   :  { %v9903_v32 = vld [vmem:[#allocation4 + $0x139] sm:$0xff] }
 0xb7b   :  { %v21042_v6 = vpack.c.bf16 %v9904_v24, %v9903_v32  ;;  %v9911_v24 = vld [vmem:[#allocation4 + $0x1c9] sm:$0xff]  ;;  %v9912_v32 = vld [vmem:[#allocation4 + $0x1d1] sm:$0xff] }
 0xb7c   :  { %v9959_v53 = vpack.c.bf16 %v9912_v32, %v9911_v24  ;;  %v21061_v24 = vpack.c.bf16 %v9918_v49, %v9917_v35  ;;  %v9925_v49 = vld [vmem:[#allocation4 + $0x271] sm:$0xff]  ;;  %v9926_v35 = vld [vmem:[#allocation4 + $0x279] sm:$0xff] }
 0xb7d   :  { %v20961_v61 = vpop.f32.mrb[128].mxu1  ;;  %v21073_v56 = vpack.c.bf16 %v9926_v35, %v9925_v49  ;;  %v9933_v49 = vld [vmem:[#allocation4 + $0x2d1] sm:$0xff]  ;;  %v9934_v35 = vld [vmem:[#allocation4 + $0x2d9] sm:$0xff] }
 0xb7e   :  { %22091 = vst [vmem:[#allocation65_spill] sm:$0xff] %v20961_v61  ;;  %v20963_v8 = vpop.f32.mrb[129].mxu1  ;;  %v9900_v61 = vld [vmem:[#allocation4 + $0x111] sm:$0xff]  ;;  %v21085_v42 = vpack.c.bf16 %v9934_v35, %v9933_v49  ;;  %v9942_v35 = vld [vmem:[#allocation4 + $0x339] sm:$0xff] }
 0xb7f   :  { %22092 = vst [vmem:[#allocation66_spill] sm:$0xff] %v20963_v8  ;;  %v20965_v19 = vpop.f32.mrb[130].mxu1  ;;  %v9941_v49 = vld [vmem:[#allocation4 + $0x331] sm:$0xff] }
 0xb80   :  { %22093 = vst [vmem:[#allocation67_spill] sm:$0xff] %v20965_v19  ;;  %v20967_v27 = vpop.f32.mrb[131].mxu1  ;;  %15195 = vmatmul.mubr.bf16.gmra.mrb[60].mxu0 %v20719_v60  ;;  %v9880_v60 = vld [vmem:[#allocation4 + $0x21] sm:$0xff]  ;;  %v21097_v31 = vpack.c.bf16 %v9942_v35, %v9941_v49 }
 0xb81   :  { %22094 = vst [vmem:[#allocation68_spill] sm:$0xff] %v20967_v27  ;;  %15198 = vmatprep.mubr.bf16.mxu0 %v20725_v13  ;;  %v20979_v13 = vpack.c.bf16 %v9428_v16, %v9427_v2  ;;  %v9885_v2 = vld [vmem:[#allocation4 + $0x61] sm:$0xff]  ;;  %v9886_v16 = vld [vmem:[#allocation4 + $0x69] sm:$0xff] }
 0xb82   :  { %v9896_v19 = vld [vmem:[#allocation4 + $0xe1] sm:$0xff] }
 0xb83   :  { %v10399_v49 = vld [vmem:[#allocation4 + $0x62] sm:$0xff] }
 0xb84   :  { %v10402_v35 = vld [vmem:[#allocation4 + $0x82] sm:$0xff] }
 0xb88   :  { %15199 = vmatmul.mubr.bf16.gmra.mrb[64].mxu0 %v20727_v50  ;;  %v9943_v50 = vpack.c.bf16 %v9880_v60, %v9879_v55  ;;  %v9887_v55 = vld [vmem:[#allocation4 + $0x79] sm:$0xff]  ;;  %v9888_v60 = vld [vmem:[#allocation4 + $0x81] sm:$0xff] }
 0xb89   :  { %15202 = vmatprep.mubr.bf16.mxu0 %v20733_v51  ;;  %v9881_v51 = vld [vmem:[#allocation4 + $0x31] sm:$0xff] }
 0xb90   :  { %15203 = vmatmul.mubr.bf16.gmra.mrb[68].mxu0 %v20735_v29  ;;  %v9882_v29 = vld [vmem:[#allocation4 + $0x39] sm:$0xff] }
 0xb91   :  { %15206 = vmatprep.mubr.bf16.mxu0 %v20741_v28  ;;  %v9883_v28 = vld [vmem:[#allocation4 + $0x49] sm:$0xff]  ;;  %v20982_v27 = vpack.c.bf16 %v9882_v29, %v9881_v51  ;;  %v16921_v51 = vld [vmem:[%s21662_s9 + $0x158] sm:$0xff]   ;;  %v16922_v29 = vld [vmem:[%s21662_s9 + $0x160] sm:$0xff]  }
 0xb98   :  { %15207 = vmatmul.mubr.bf16.gmra.mrb[72].mxu0 %v20743_v17  ;;  %v9884_v17 = vld [vmem:[#allocation4 + $0x51] sm:$0xff] }
 0xb99   :  { %15210 = vmatprep.mubr.bf16.mxu0 %v20749_v37  ;;  %v16919_v37 = vld [vmem:[%s21662_s9 + $0x148] sm:$0xff]  }
 0xba0   :  { %15211 = vmatmul.mubr.bf16.gmra.mrb[76].mxu0 %v20751_v54  ;;  %v20987_v54 = vpack.c.bf16 %v9884_v17, %v9883_v28  ;;  %v9889_v28 = vld [vmem:[#allocation4 + $0x91] sm:$0xff]  ;;  %v9890_v17 = vld [vmem:[#allocation4 + $0x99] sm:$0xff] }
 0xba1   :  { %15214 = vmatprep.mubr.bf16.mxu0 %v20759_v48  ;;  %v16920_v48 = vld [vmem:[%s21662_s9 + $0x150] sm:$0xff]  }
 0xba8   :  { %15215 = vmatmul.mubr.bf16.gmra.mrb[80].mxu0 %v20979_v13 }
 0xba9   :  { %15234 = vmatprep.mubr.bf16.mxu0 %v9943_v50  ;;  %v20995_v50 = vpack.c.bf16 %v9886_v16, %v9885_v2  ;;  %v9892_v2 = vld [vmem:[#allocation4 + $0xb1] sm:$0xff]  ;;  %v21007_v16 = vpack.c.bf16 %v9890_v17, %v9889_v28  ;;  %v9894_v28 = vld [vmem:[#allocation4 + $0xc9] sm:$0xff]  ;;  %v9895_v17 = vld [vmem:[#allocation4 + $0xd9] sm:$0xff] }
 0xbb0   :  { %15235 = vmatmul.mubr.bf16.vlgmr.msra.gmra.mrb[20].mxu0 %v20982_v27 }
 0xbb1   :  { %15299 = vmatpush3.bf16.msra.mxu0 %v20896_v33  ;;  %15238 = vmatprep.mubr.bf16.mxu0 %v20987_v54  ;;  %v21000_v33 = vpack.c.bf16 %v9888_v60, %v9887_v55  ;;  %v16923_v55 = vld [vmem:[%s21662_s9 + $0x168] sm:$0xff]  }
 0xbb2   :  { %15300 = vmatprep.subr.bf16.mxu0 %v16919_v37 }
 0xbb5   :  { %15301 = vmatpush3.bf16.msra.mxu0 %v16919_v37  ;;  %v9891_v37 = vld [vmem:[#allocation4 + $0xa9] sm:$0xff] }
 0xbb6   :  { %15302 = vmatprep.subr.bf16.mxu0 %v16920_v48  ;;  %v21012_v60 = vpack.c.bf16 %v9892_v2, %v9891_v37  ;;  %v16925_v37 = vld [vmem:[%s21662_s9 + $0x178] sm:$0xff]   ;;  %v21024_v2 = vpack.c.bf16 %v9896_v19, %v9895_v17  ;;  %v9902_v17 = vld [vmem:[#allocation4 + $0x129] sm:$0xff] }
 0xbb8   :  { %15239 = vmatmul.mubr.bf16.gmra.mrb[24].mxu0 %v20995_v50 }
 0xbb9   :  { %15242 = vmatprep.mubr.bf16.mxu0 %v21000_v33  ;;  %15303 = vmatpush3.bf16.msra.mxu0 %v16920_v48  ;;  %v16924_v48 = vld [vmem:[%s21662_s9 + $0x170] sm:$0xff]  }
 0xbba   :  { %15304 = vmatprep.subr.bf16.mxu0 %v16921_v51 }
 0xbbd   :  { %15305 = vmatpush3.bf16.msra.mxu0 %v16921_v51  ;;  %v9893_v51 = vld [vmem:[#allocation4 + $0xc1] sm:$0xff] }
 0xbbe   :  { %15306 = vmatprep.subr.bf16.mxu0 %v16922_v29  ;;  %v21019_v8 = vpack.c.bf16 %v9894_v28, %v9893_v51  ;;  %v9898_v51 = vld [vmem:[#allocation4 + $0xf9] sm:$0xff]  ;;  %v9899_v28 = vld [vmem:[#allocation4 + $0x109] sm:$0xff] }
 0xbbf   :  { %v21036_v19 = vpack.c.bf16 %v9900_v61, %v9899_v28  ;;  %v9907_v61 = vld [vmem:[#allocation4 + $0x169] sm:$0xff] }
 0xbc0   :  { %15243 = vmatmul.mubr.bf16.gmra.mrb[28].mxu0 %v21007_v16 }
 0xbc1   :  { %15246 = vmatprep.mubr.bf16.mxu0 %v21012_v60  ;;  %15307 = vmatpush3.bf16.msra.mxu0 %v16922_v29  ;;  %v21031_v29 = vld [vmem:[%s21662_s9 + $0x180] sm:$0xff]  }
 0xbc2   :  { %15308 = vmatprep.subr.bf16.mxu0 %v16923_v55 }
 0xbc5   :  { %15309 = vmatpush3.bf16.msra.mxu0 %v16923_v55  ;;  %v9897_v55 = vld [vmem:[#allocation4 + $0xf1] sm:$0xff] }
 0xbc6   :  { %15310 = vmatprep.subr.bf16.mxu0 %v16924_v48  ;;  %v21033_v45 = vpack.c.bf16 %v9898_v51, %v9897_v55  ;;  %v9906_v55 = vld [vmem:[#allocation4 + $0x159] sm:$0xff]  ;;  %v9908_v51 = vld [vmem:[#allocation4 + $0x171] sm:$0xff] }
 0xbc7   :  { %v21048_v7 = vpack.c.bf16 %v9908_v51, %v9907_v61  ;;  %v21055_v61 = vpack.c.bf16 %v9914_v9, %v9913_v25  ;;  %v9921_v25 = vld [vmem:[#allocation4 + $0x241] sm:$0xff]  ;;  %v9923_v9 = vld [vmem:[#allocation4 + $0x259] sm:$0xff] }
 0xbc8   :  { %15247 = vmatmul.mubr.bf16.gmra.mrb[32].mxu0 %v21019_v8 }
 0xbc9   :  { %15250 = vmatprep.mubr.bf16.mxu0 %v21024_v2  ;;  %15311 = vmatpush3.bf16.msra.mxu0 %v16924_v48  ;;  %v9901_v48 = vld [vmem:[#allocation4 + $0x121] sm:$0xff] }
 0xbca   :  { %15312 = vmatprep.subr.bf16.mxu0 %v16925_v37  ;;  %v21040_v59 = vpack.c.bf16 %v9902_v17, %v9901_v48  ;;  %v9909_v48 = vld [vmem:[#allocation4 + $0x181] sm:$0xff]  ;;  %v9910_v17 = vld [vmem:[#allocation4 + $0x189] sm:$0xff] }
 0xbcb   :  { %v21052_v63 = vpack.c.bf16 %v9910_v17, %v9909_v48  ;;  %v9919_v48 = vld [vmem:[#allocation4 + $0x229] sm:$0xff]  ;;  %v9920_v17 = vld [vmem:[#allocation4 + $0x231] sm:$0xff] }
 0xbcc   :  { %v21063_v32 = vpack.c.bf16 %v9920_v17, %v9919_v48  ;;  %v9927_v48 = vld [vmem:[#allocation4 + $0x289] sm:$0xff]  ;;  %v9928_v17 = vld [vmem:[#allocation4 + $0x291] sm:$0xff] }
 0xbcd   :  { %15313 = vmatpush3.bf16.msra.mxu0 %v16925_v37  ;;  %v9905_v37 = vld [vmem:[#allocation4 + $0x151] sm:$0xff]  ;;  %v21075_v12 = vpack.c.bf16 %v9928_v17, %v9927_v48  ;;  %v9935_v48 = vld [vmem:[#allocation4 + $0x2e9] sm:$0xff] }
 0xbce   :  { %15378 = vmatprep.subr.bf16.mxu0 %v21031_v29  ;;  %v21046_v28 = vpack.c.bf16 %v9906_v55, %v9905_v37  ;;  %v9915_v37 = vld [vmem:[#allocation4 + $0x1f9] sm:$0xff]  ;;  %v9916_v55 = vld [vmem:[#allocation4 + $0x201] sm:$0xff]  ;;  %v9936_v17 = vld [vmem:[#allocation4 + $0x2f1] sm:$0xff] }
 0xbcf   :  { %v21057_v51 = vpack.c.bf16 %v9916_v55, %v9915_v37  ;;  %v9924_v37 = vld [vmem:[#allocation4 + $0x261] sm:$0xff]  ;;  %v21087_v43 = vpack.c.bf16 %v9936_v17, %v9935_v48 }
 0xbd0   :  { %15251 = vmatmul.mubr.bf16.gmra.mrb[36].mxu0 %v21033_v45  ;;  %v21069_v4 = vpack.c.bf16 %v9924_v37, %v9923_v9  ;;  %v9931_v9 = vld [vmem:[#allocation4 + $0x2b9] sm:$0xff]  ;;  %v9932_v37 = vld [vmem:[#allocation4 + $0x2c1] sm:$0xff] }
 0xbd1   :  { %15254 = vmatprep.mubr.bf16.mxu0 %v21036_v19  ;;  %v21081_v11 = vpack.c.bf16 %v9932_v37, %v9931_v9  ;;  %v9939_v9 = vld [vmem:[#allocation4 + $0x319] sm:$0xff]  ;;  %v9940_v37 = vld [vmem:[#allocation4 + $0x321] sm:$0xff] }
 0xbd2   :  { %v21093_v41 = vpack.c.bf16 %v9940_v37, %v9939_v9  ;;  %v10393_v48 = vld [vmem:[#allocation4 + $0x1a] sm:$0xff]  ;;  %v10394_v17 = vld [vmem:[#allocation4 + $0x22] sm:$0xff]  ;;  %v21100_v9 = vpack.c.bf16 %v10396_v40, %v10395_v30  ;;  %v10400_v40 = vld [vmem:[#allocation4 + $0x6a] sm:$0xff] }
 0xbd3   :  { %v10457_v15 = vpack.c.bf16 %v10394_v17, %v10393_v48  ;;  %v16927_v37 = vld [vmem:[%s21662_s9 + $0x188] sm:$0xff]   ;;  %v10401_v30 = vld [vmem:[#allocation4 + $0x7a] sm:$0xff]  ;;  %v21113_v48 = vpack.c.bf16 %v10400_v40, %v10399_v49  ;;  %v10406_v40 = vld [vmem:[#allocation4 + $0xb2] sm:$0xff] }
 0xbd4   :  { %v16929_v17 = vld [vmem:[%s21662_s9 + $0x198] sm:$0xff]   ;;  %v10405_v49 = vld [vmem:[#allocation4 + $0xaa] sm:$0xff] }
 0xbd8   :  { %15255 = vmatmul.mubr.bf16.gmra.mrb[40].mxu0 %v21040_v59 }
 0xbd9   :  { %15258 = vmatprep.mubr.bf16.mxu0 %v21042_v6 }
 0xbe0   :  { %15259 = vmatmul.mubr.bf16.gmra.mrb[44].mxu0 %v21046_v28 }
 0xbe1   :  { %15262 = vmatprep.mubr.bf16.mxu0 %v21048_v7 }
 0xbe8   :  { %15263 = vmatmul.mubr.bf16.gmra.mrb[48].mxu0 %v21052_v63 }
 0xbe9   :  { %15266 = vmatprep.mubr.bf16.mxu0 %v9959_v53  ;;  %v9922_v53 = vld [vmem:[#allocation4 + $0x249] sm:$0xff] }
 0xbea   :  { %v21067_v55 = vpack.c.bf16 %v9922_v53, %v9921_v25  ;;  %v9929_v25 = vld [vmem:[#allocation4 + $0x2a1] sm:$0xff]  ;;  %v9930_v53 = vld [vmem:[#allocation4 + $0x2a9] sm:$0xff] }
 0xbeb   :  { %v21079_v62 = vpack.c.bf16 %v9930_v53, %v9929_v25  ;;  %v9937_v25 = vld [vmem:[#allocation4 + $0x301] sm:$0xff]  ;;  %v9938_v53 = vld [vmem:[#allocation4 + $0x309] sm:$0xff] }
 0xbec   :  { %v21091_v26 = vpack.c.bf16 %v9938_v53, %v9937_v25  ;;  %v10397_v25 = vld [vmem:[#allocation4 + $0x4a] sm:$0xff]  ;;  %v10398_v53 = vld [vmem:[#allocation4 + $0x52] sm:$0xff] }
 0xbed   :  { %v21105_v38 = vpack.c.bf16 %v10398_v53, %v10397_v25  ;;  %v16930_v25 = vld [vmem:[%s21662_s9 + $0x1a0] sm:$0xff]   ;;  %v10403_v53 = vld [vmem:[#allocation4 + $0x92] sm:$0xff] }
 0xbf0   :  { %15267 = vmatmul.mubr.bf16.gmra.mrb[52].mxu0 %v21055_v61 }
 0xbf1   :  { %15270 = vmatprep.mubr.bf16.mxu0 %v21057_v51 }
 0xbf8   :  { %15271 = vmatmul.mubr.bf16.gmra.mrb[56].mxu0 %v21061_v24 }
 0xbf9   :  { %15274 = vmatprep.mubr.bf16.mxu0 %v21063_v32 }
 0xc00   :  { %15275 = vmatmul.mubr.bf16.gmra.mrb[60].mxu0 %v21067_v55 }
 0xc01   :  { %15278 = vmatprep.mubr.bf16.mxu0 %v21069_v4 }
 0xc08   :  { %15279 = vmatmul.mubr.bf16.gmra.mrb[64].mxu0 %v21073_v56 }
 0xc09   :  { %15282 = vmatprep.mubr.bf16.mxu0 %v21075_v12 }
 0xc10   :  { %15283 = vmatmul.mubr.bf16.gmra.mrb[68].mxu0 %v21079_v62 }
 0xc11   :  { %15286 = vmatprep.mubr.bf16.mxu0 %v21081_v11 }
 0xc18   :  { %15287 = vmatmul.mubr.bf16.gmra.mrb[72].mxu0 %v21085_v42 }
 0xc19   :  { %15290 = vmatprep.mubr.bf16.mxu0 %v21087_v43 }
 0xc20   :  { %15291 = vmatmul.mubr.bf16.gmra.mrb[76].mxu0 %v21091_v26 }
 0xc21   :  { %15294 = vmatprep.mubr.bf16.mxu0 %v21093_v41 }
 0xc28   :  { %15295 = vmatmul.mubr.bf16.gmra.mrb[80].mxu0 %v21097_v31 }
 0xc29   :  { %15314 = vmatprep.mubr.bf16.mxu0 %v10457_v15  ;;  %v16928_v15 = vld [vmem:[%s21662_s9 + $0x190] sm:$0xff]  }
 0xc30   :  { %15315 = vmatmul.mubr.bf16.vlgmr.msra.gmra.mrb[20].mxu0 %v21100_v9 }
 0xc31   :  { %15379 = vmatpush3.bf16.msra.mxu0 %v21031_v29  ;;  %15318 = vmatprep.mubr.bf16.mxu0 %v21105_v38  ;;  %v21118_v29 = vpack.c.bf16 %v10402_v35, %v10401_v30  ;;  %v16931_v30 = vld [vmem:[%s21662_s9 + $0x1a8] sm:$0xff]   ;;  %v21130_v35 = vpack.c.bf16 %v10406_v40, %v10405_v49  ;;  %v16933_v49 = vld [vmem:[%s21662_s9 + $0x1b8] sm:$0xff]  }
 0xc32   :  { %15380 = vmatprep.subr.bf16.mxu0 %v16927_v37 }
 0xc35   :  { %15381 = vmatpush3.bf16.msra.mxu0 %v16927_v37  ;;  %v10404_v37 = vld [vmem:[#allocation4 + $0x9a] sm:$0xff] }
 0xc36   :  { %15382 = vmatprep.subr.bf16.mxu0 %v16928_v15  ;;  %v21125_v36 = vpack.c.bf16 %v10404_v37, %v10403_v53  ;;  %v10408_v53 = vld [vmem:[#allocation4 + $0xca] sm:$0xff]  ;;  %v10409_v37 = vld [vmem:[#allocation4 + $0xda] sm:$0xff] }
 0xc37   :  { %v21142_v40 = vpack.c.bf16 %v10410_v46, %v10409_v37  ;;  %v10416_v37 = vld [vmem:[#allocation4 + $0x12a] sm:$0xff] }
 0xc38   :  { %15319 = vmatmul.mubr.bf16.gmra.mrb[24].mxu0 %v21113_v48 }
 0xc39   :  { %15322 = vmatprep.mubr.bf16.mxu0 %v21118_v29  ;;  %15383 = vmatpush3.bf16.msra.mxu0 %v16928_v15  ;;  %v16932_v15 = vld [vmem:[%s21662_s9 + $0x1b0] sm:$0xff]  }
 0xc3a   :  { %15384 = vmatprep.subr.bf16.mxu0 %v16929_v17 }
 0xc3d   :  { %15385 = vmatpush3.bf16.msra.mxu0 %v16929_v17  ;;  %v10407_v17 = vld [vmem:[#allocation4 + $0xc2] sm:$0xff] }
 0xc3e   :  { %15386 = vmatprep.subr.bf16.mxu0 %v16930_v25  ;;  %v21137_v3 = vpack.c.bf16 %v10408_v53, %v10407_v17  ;;  %v10412_v17 = vld [vmem:[#allocation4 + $0xfa] sm:$0xff]  ;;  %v10413_v53 = vld [vmem:[#allocation4 + $0x10a] sm:$0xff] }
 0xc3f   :  { %v21154_v46 = vpack.c.bf16 %v10414_v18, %v10413_v53  ;;  %v10421_v18 = vld [vmem:[#allocation4 + $0x16a] sm:$0xff] }
 0xc40   :  { %15323 = vmatmul.mubr.bf16.gmra.mrb[28].mxu0 %v21125_v36 }
 0xc41   :  { %15326 = vmatprep.mubr.bf16.mxu0 %v21130_v35  ;;  %15387 = vmatpush3.bf16.msra.mxu0 %v16930_v25  ;;  %v21149_v25 = vld [vmem:[%s21662_s9 + $0x1c0] sm:$0xff]  }
 0xc42   :  { %15388 = vmatprep.subr.bf16.mxu0 %v16931_v30 }
 0xc45   :  { %15389 = vmatpush3.bf16.msra.mxu0 %v16931_v30  ;;  %v10411_v30 = vld [vmem:[#allocation4 + $0xf2] sm:$0xff] }
 0xc46   :  { %15390 = vmatprep.subr.bf16.mxu0 %v16932_v15  ;;  %v21151_v58 = vpack.c.bf16 %v10412_v17, %v10411_v30  ;;  %v10420_v30 = vld [vmem:[#allocation4 + $0x15a] sm:$0xff]  ;;  %v10422_v17 = vld [vmem:[#allocation4 + $0x172] sm:$0xff] }
 0xc47   :  { %v21166_v52 = vpack.c.bf16 %v10422_v17, %v10421_v18  ;;  %v21173_v18 = vpack.c.bf16 %v10428_v5, %v10427_v47  ;;  %v10435_v5 = vld [vmem:[#allocation4 + $0x242] sm:$0xff]  ;;  %v10436_v47 = vld [vmem:[#allocation4 + $0x24a] sm:$0xff] }
 0xc48   :  { %15327 = vmatmul.mubr.bf16.gmra.mrb[32].mxu0 %v21137_v3 }
 0xc49   :  { %15330 = vmatprep.mubr.bf16.mxu0 %v21142_v40  ;;  %15391 = vmatpush3.bf16.msra.mxu0 %v16932_v15  ;;  %v10415_v15 = vld [vmem:[#allocation4 + $0x122] sm:$0xff]  ;;  %22095 = vst [vmem:[#allocation69_spill] sm:$0xff] %v21166_v52  ;;  %22097 = vst [vmem:[#allocation71_spill] sm:$0xff] %v21173_v18 }
 0xc4a   :  { %15392 = vmatprep.subr.bf16.mxu0 %v16933_v49  ;;  %v21158_v23 = vpack.c.bf16 %v10416_v37, %v10415_v15  ;;  %v10423_v15 = vld [vmem:[#allocation4 + $0x182] sm:$0xff]  ;;  %v10424_v37 = vld [vmem:[#allocation4 + $0x18a] sm:$0xff] }
 0xc4b   :  { %v21170_v20 = vpack.c.bf16 %v10424_v37, %v10423_v15  ;;  %v10433_v15 = vld [vmem:[#allocation4 + $0x22a] sm:$0xff]  ;;  %v10434_v37 = vld [vmem:[#allocation4 + $0x232] sm:$0xff] }
 0xc4c   :  { %v21181_v34 = vpack.c.bf16 %v10434_v37, %v10433_v15  ;;  %v10441_v15 = vld [vmem:[#allocation4 + $0x28a] sm:$0xff]  ;;  %v10442_v37 = vld [vmem:[#allocation4 + $0x292] sm:$0xff] }
 0xc4d   :  { %15393 = vmatpush3.bf16.msra.mxu0 %v16933_v49  ;;  %v10419_v49 = vld [vmem:[#allocation4 + $0x152] sm:$0xff]  ;;  %22096 = vst [vmem:[#allocation70_spill] sm:$0xff] %v21170_v20  ;;  %v21193_v22 = vpack.c.bf16 %v10442_v37, %v10441_v15  ;;  %v10449_v15 = vld [vmem:[#allocation4 + $0x2ea] sm:$0xff] }
 0xc4e   :  { %15458 = vmatprep.subr.bf16.mxu0 %v21149_v25  ;;  %v21164_v53 = vpack.c.bf16 %v10420_v30, %v10419_v49  ;;  %v10429_v49 = vld [vmem:[#allocation4 + $0x1fa] sm:$0xff]  ;;  %v10430_v30 = vld [vmem:[#allocation4 + $0x202] sm:$0xff]  ;;  %22100 = vst [vmem:[#allocation74_spill] sm:$0xff] %v21181_v34  ;;  %v10450_v37 = vld [vmem:[#allocation4 + $0x2f2] sm:$0xff] }
 0xc4f   :  { %v21175_v17 = vpack.c.bf16 %v10430_v30, %v10429_v49  ;;  %v10438_v49 = vld [vmem:[#allocation4 + $0x262] sm:$0xff]  ;;  %v21185_v30 = vpack.c.bf16 %v10436_v47, %v10435_v5  ;;  %22104 = vst [vmem:[#allocation78_spill] sm:$0xff] %v21193_v22  ;;  %v10444_v47 = vld [vmem:[#allocation4 + $0x2aa] sm:$0xff] }
 0xc50   :  { %15331 = vmatmul.mubr.bf16.gmra.mrb[36].mxu0 %v21151_v58  ;;  %v10443_v5 = vld [vmem:[#allocation4 + $0x2a2] sm:$0xff] }
 0xc51   :  { %15334 = vmatprep.mubr.bf16.mxu0 %v21154_v46  ;;  %22098 = vst [vmem:[#allocation72_spill] sm:$0xff] %v21175_v17  ;;  %22101 = vst [vmem:[#allocation75_spill] sm:$0xff] %v21185_v30 }
 0xc58   :  { %15335 = vmatmul.mubr.bf16.gmra.mrb[40].mxu0 %v21158_v23 }
 0xc59   :  { %15338 = vmatprep.mubr.bf16.mxu0 %v21160_v10 }
 0xc60   :  { %15339 = vmatmul.mubr.bf16.gmra.mrb[44].mxu0 %v21164_v53 }
 0xc61   :  { %15342 = vmatprep.mubr.bf16.mxu0 %v21166_v52 }
 0xc68   :  { %15343 = vmatmul.mubr.bf16.gmra.mrb[48].mxu0 %v21170_v20  ;;  %v10943_v20 = vld [vmem:[#allocation4 + $0x200] sm:$0xff] }
 0xc69   :  { %15346 = vmatprep.mubr.bf16.mxu0 %v10473_v44  ;;  %v10437_v44 = vld [vmem:[#allocation4 + $0x25a] sm:$0xff] }
 0xc6a   :  { %v21187_v57 = vpack.c.bf16 %v10438_v49, %v10437_v44  ;;  %v10445_v44 = vld [vmem:[#allocation4 + $0x2ba] sm:$0xff]  ;;  %v10446_v49 = vld [vmem:[#allocation4 + $0x2c2] sm:$0xff] }
 0xc6c   :  { %22102 = vst [vmem:[#allocation76_spill] sm:$0xff] %v21187_v57 }
 0xc70   :  { %15347 = vmatmul.mubr.bf16.gmra.mrb[52].mxu0 %v21173_v18 }
 0xc71   :  { %15350 = vmatprep.mubr.bf16.mxu0 %v21175_v17  ;;  %v10935_v17 = vld [vmem:[#allocation4 + $0x170] sm:$0xff] }
 0xc78   :  { %15351 = vmatmul.mubr.bf16.gmra.mrb[56].mxu0 %v21179_v0  ;;  %v10911_v0 = vld [vmem:[#allocation4 + $0x50] sm:$0xff] }
 0xc79   :  { %15354 = vmatprep.mubr.bf16.mxu0 %v21181_v34  ;;  %v21197_v34 = vpack.c.bf16 %v10444_v47, %v10443_v5  ;;  %v10451_v5 = vld [vmem:[#allocation4 + $0x302] sm:$0xff]  ;;  %v10452_v47 = vld [vmem:[#allocation4 + $0x30a] sm:$0xff] }
 0xc7b   :  { %22105 = vst [vmem:[#allocation79_spill] sm:$0xff] %v21197_v34 }
 0xc80   :  { %15355 = vmatmul.mubr.bf16.gmra.mrb[60].mxu0 %v21185_v30  ;;  %v21199_v30 = vpack.c.bf16 %v10446_v49, %v10445_v44  ;;  %v10453_v44 = vld [vmem:[#allocation4 + $0x31a] sm:$0xff]  ;;  %v10454_v49 = vld [vmem:[#allocation4 + $0x322] sm:$0xff] }
 0xc81   :  { %15358 = vmatprep.mubr.bf16.mxu0 %v21187_v57  ;;  %v21203_v57 = vpack.c.bf16 %v10448_v14, %v10447_v1  ;;  %v10455_v1 = vld [vmem:[#allocation4 + $0x332] sm:$0xff]  ;;  %v10456_v14 = vld [vmem:[#allocation4 + $0x33a] sm:$0xff] }
 0xc82   :  { %22106 = vst [vmem:[#allocation80_spill] sm:$0xff] %v21199_v30 }
 0xc83   :  { %22107 = vst [vmem:[#allocation81_spill] sm:$0xff] %v21203_v57 }
 0xc88   :  { %15359 = vmatmul.mubr.bf16.gmra.mrb[64].mxu0 %v21191_v21  ;;  %v21205_v21 = vpack.c.bf16 %v10450_v37, %v10449_v15  ;;  %v10908_v15 = vld [vmem:[#allocation4 + $0x30] sm:$0xff]  ;;  %v10909_v37 = vld [vmem:[#allocation4 + $0x38] sm:$0xff] }
 0xc89   :  { %15362 = vmatprep.mubr.bf16.mxu0 %v21193_v22  ;;  %v21209_v22 = vpack.c.bf16 %v10452_v47, %v10451_v5  ;;  %v10912_v5 = vld [vmem:[#allocation4 + $0x60] sm:$0xff]  ;;  %v10913_v47 = vld [vmem:[#allocation4 + $0x68] sm:$0xff] }
 0xc8a   :  { %22108 = vst [vmem:[#allocation82_spill] sm:$0xff] %v21205_v21 }
 0xc8b   :  { %22109 = vst [vmem:[#allocation83_spill] sm:$0xff] %v21209_v22 }
 0xc90   :  { %15363 = vmatmul.mubr.bf16.gmra.mrb[68].mxu0 %v21197_v34  ;;  %v21211_v34 = vpack.c.bf16 %v10454_v49, %v10453_v44  ;;  %v16935_v49 = vld [vmem:[%s21662_s9 + $0x1c8] sm:$0xff]  }
 0xc91   :  { %15366 = vmatprep.mubr.bf16.mxu0 %v21199_v30  ;;  %v21215_v30 = vpack.c.bf16 %v10456_v14, %v10455_v1  ;;  %v16936_v1 = vld [vmem:[%s21662_s9 + $0x1d0] sm:$0xff]   ;;  %v10915_v14 = vld [vmem:[#allocation4 + $0x80] sm:$0xff] }
 0xc92   :  { %22110 = vst [vmem:[#allocation84_spill] sm:$0xff] %v21211_v34 }
 0xc93   :  { %22111 = vst [vmem:[#allocation85_spill] sm:$0xff] %v21215_v30 }
 0xc98   :  { %15367 = vmatmul.mubr.bf16.gmra.mrb[72].mxu0 %v21203_v57  ;;  %v10972_v57 = vpack.c.bf16 %v10909_v37, %v10908_v15  ;;  %v10916_v15 = vld [vmem:[#allocation4 + $0x90] sm:$0xff]  ;;  %v10917_v37 = vld [vmem:[#allocation4 + $0x98] sm:$0xff] }
 0xc99   :  { %15370 = vmatprep.mubr.bf16.mxu0 %v21205_v21  ;;  %v10910_v21 = vld [vmem:[#allocation4 + $0x48] sm:$0xff] }
 0xc9a   :  { %v10973_v44 = vpack.c.bf16 %v10911_v0, %v10910_v21  ;;  %v16937_v0 = vld [vmem:[%s21662_s9 + $0x1d8] sm:$0xff]  }
 0xca0   :  { %15371 = vmatmul.mubr.bf16.gmra.mrb[76].mxu0 %v21209_v22  ;;  %v10934_v22 = vld [vmem:[#allocation4 + $0x168] sm:$0xff] }
 0xca1   :  { %15374 = vmatprep.mubr.bf16.mxu0 %v21211_v34  ;;  %v10974_v34 = vpack.c.bf16 %v10913_v47, %v10912_v5  ;;  %v10976_v5 = vpack.c.bf16 %v10917_v37, %v10916_v15  ;;  %v10919_v47 = vld [vmem:[#allocation4 + $0xb0] sm:$0xff]  ;;  %v10922_v15 = vld [vmem:[#allocation4 + $0xd8] sm:$0xff]  ;;  %v10923_v37 = vld [vmem:[#allocation4 + $0xe0] sm:$0xff]  ;;  %v10985_v18 = vpack.c.bf16 %v10935_v17, %v10934_v22 }
 0xca2   :  { %v10946_v22 = vld [vmem:[#allocation4 + $0x228] sm:$0xff]  ;;  %v10948_v17 = vld [vmem:[#allocation4 + $0x240] sm:$0xff] }
 0xca8   :  { %15375 = vmatmul.mubr.bf16.gmra.mrb[80].mxu0 %v21215_v30  ;;  %v10921_v30 = vld [vmem:[#allocation4 + $0xc8] sm:$0xff] }
 0xca9   :  { %15394 = vmatprep.mubr.bf16.mxu0 %v10972_v57  ;;  %v10914_v57 = vld [vmem:[#allocation4 + $0x78] sm:$0xff] }
 0xcaa   :  { %v10975_v21 = vpack.c.bf16 %v10915_v14, %v10914_v57  ;;  %v16939_v57 = vld [vmem:[%s21662_s9 + $0x1e8] sm:$0xff]  }
 0xcb0   :  { %15395 = vmatmul.mubr.bf16.vlgmr.msra.gmra.mrb[20].mxu0 %v10973_v44  ;;  %v10920_v44 = vld [vmem:[#allocation4 + $0xc0] sm:$0xff] }
 0xcb1   :  { %15459 = vmatpush3.bf16.msra.mxu0 %v21149_v25  ;;  %15398 = vmatprep.mubr.bf16.mxu0 %v10974_v34  ;;  %v16938_v25 = vld [vmem:[%s21662_s9 + $0x1e0] sm:$0xff]   ;;  %v10918_v34 = vld [vmem:[#allocation4 + $0xa8] sm:$0xff]  ;;  %v10978_v14 = vpack.c.bf16 %v10921_v30, %v10920_v44  ;;  %v10927_v44 = vld [vmem:[#allocation4 + $0x110] sm:$0xff] }
 0xcb2   :  { %15460 = vmatprep.subr.bf16.mxu0 %v16935_v49 }
 0xcb5   :  { %15461 = vmatpush3.bf16.msra.mxu0 %v16935_v49  ;;  %v10977_v49 = vpack.c.bf16 %v10919_v47, %v10918_v34  ;;  %v16941_v34 = vld [vmem:[%s21662_s9 + $0x1f8] sm:$0xff]   ;;  %v10926_v47 = vld [vmem:[#allocation4 + $0x108] sm:$0xff] }
 0xcb6   :  { %15462 = vmatprep.subr.bf16.mxu0 %v16936_v1 }
 0xcb8   :  { %15399 = vmatmul.mubr.bf16.gmra.mrb[24].mxu0 %v10975_v21  ;;  %v10924_v21 = vld [vmem:[#allocation4 + $0xf0] sm:$0xff] }
 0xcb9   :  { %15402 = vmatprep.mubr.bf16.mxu0 %v10976_v5  ;;  %15463 = vmatpush3.bf16.msra.mxu0 %v16936_v1  ;;  %v16940_v1 = vld [vmem:[%s21662_s9 + $0x1f0] sm:$0xff]   ;;  %v10925_v5 = vld [vmem:[#allocation4 + $0xf8] sm:$0xff] }
 0xcba   :  { %15464 = vmatprep.subr.bf16.mxu0 %v16937_v0  ;;  %v10980_v30 = vpack.c.bf16 %v10925_v5, %v10924_v21  ;;  %v10931_v21 = vld [vmem:[#allocation4 + $0x140] sm:$0xff]  ;;  %v10933_v5 = vld [vmem:[#allocation4 + $0x158] sm:$0xff] }
 0xcbd   :  { %15465 = vmatpush3.bf16.msra.mxu0 %v16937_v0  ;;  %v10979_v0 = vpack.c.bf16 %v10923_v37, %v10922_v15  ;;  %v10930_v37 = vld [vmem:[#allocation4 + $0x138] sm:$0xff] }
 0xcbe   :  { %15466 = vmatprep.subr.bf16.mxu0 %v16938_v25 }
 0xcc0   :  { %15403 = vmatmul.mubr.bf16.gmra.mrb[28].mxu0 %v10977_v49  ;;  %v10928_v49 = vld [vmem:[#allocation4 + $0x120] sm:$0xff] }
 0xcc1   :  { %15406 = vmatprep.mubr.bf16.mxu0 %v10978_v14  ;;  %15467 = vmatpush3.bf16.msra.mxu0 %v16938_v25  ;;  %v21243_v25 = vld [vmem:[%s21662_s9 + $0x200] sm:$0xff]   ;;  %v10981_v14 = vpack.c.bf16 %v10927_v44, %v10926_v47  ;;  %v17086_v47 = vld [vmem:[#allocation3 + $0x8] sm:$0xff] }
 0xcc2   :  { %15468 = vmatprep.subr.bf16.mxu0 %v16939_v57 }
 0xcc5   :  { %15469 = vmatpush3.bf16.msra.mxu0 %v16939_v57  ;;  %v10929_v57 = vld [vmem:[#allocation4 + $0x128] sm:$0xff] }
 0xcc6   :  { %15470 = vmatprep.subr.bf16.mxu0 %v16940_v1  ;;  %v10982_v15 = vpack.c.bf16 %v10929_v57, %v10928_v49  ;;  %v10940_v49 = vld [vmem:[#allocation4 + $0x1e0] sm:$0xff]  ;;  %v10941_v57 = vld [vmem:[#allocation4 + $0x1e8] sm:$0xff] }
 0xcc8   :  { %15407 = vmatmul.mubr.bf16.gmra.mrb[32].mxu0 %v10979_v0  ;;  %v10983_v0 = vpack.c.bf16 %v10931_v21, %v10930_v37  ;;  %v10944_v37 = vld [vmem:[#allocation4 + $0x210] sm:$0xff]  ;;  %v10945_v21 = vld [vmem:[#allocation4 + $0x218] sm:$0xff] }
 0xcc9   :  { %15410 = vmatprep.mubr.bf16.mxu0 %v10980_v30  ;;  %15471 = vmatpush3.bf16.msra.mxu0 %v16940_v1  ;;  %v10932_v1 = vld [vmem:[#allocation4 + $0x150] sm:$0xff] }
 0xcca   :  { %15472 = vmatprep.subr.bf16.mxu0 %v16941_v34  ;;  %v10984_v30 = vpack.c.bf16 %v10933_v5, %v10932_v1  ;;  %v10990_v5 = vpack.c.bf16 %v10945_v21, %v10944_v37  ;;  %v10956_v37 = vld [vmem:[#allocation4 + $0x2a0] sm:$0xff]  ;;  %v10957_v21 = vld [vmem:[#allocation4 + $0x2a8] sm:$0xff] }
 0xccd   :  { %15473 = vmatpush3.bf16.msra.mxu0 %v16941_v34  ;;  %v10938_v34 = vld [vmem:[#allocation4 + $0x198] sm:$0xff] }
 0xcce   :  { %15538 = vmatprep.subr.bf16.mxu0 %v21243_v25  ;;  %v10987_v44 = vpack.c.bf16 %v17086_v47, %v10938_v34  ;;  %v10950_v34 = vld [vmem:[#allocation4 + $0x258] sm:$0xff] }
 0xcd0   :  { %15411 = vmatmul.mubr.bf16.gmra.mrb[36].mxu0 %v10981_v14  ;;  %v10988_v14 = vpack.c.bf16 %v10941_v57, %v10940_v49  ;;  %v10951_v49 = vld [vmem:[#allocation4 + $0x260] sm:$0xff]  ;;  %v10953_v57 = vld [vmem:[#allocation4 + $0x278] sm:$0xff] }
 0xcd1   :  { %15414 = vmatprep.mubr.bf16.mxu0 %v10982_v15  ;;  %v10942_v15 = vld [vmem:[#allocation4 + $0x1f8] sm:$0xff] }
 0xcd2   :  { %v10989_v1 = vpack.c.bf16 %v10943_v20, %v10942_v15  ;;  %v10954_v20 = vld [vmem:[#allocation4 + $0x288] sm:$0xff]  ;;  %v10955_v15 = vld [vmem:[#allocation4 + $0x290] sm:$0xff] }
 0xcd8   :  { %15415 = vmatmul.mubr.bf16.gmra.mrb[40].mxu0 %v10983_v0 }
 0xcd9   :  { %15418 = vmatprep.mubr.bf16.mxu0 %v10984_v30 }
 0xce0   :  { %15419 = vmatmul.mubr.bf16.gmra.mrb[44].mxu0 %v10985_v18  ;;  %v10947_v18 = vld [vmem:[#allocation4 + $0x230] sm:$0xff] }
 0xce1   :  { %15422 = vmatprep.mubr.bf16.mxu0 %v20937_v39  ;;  %v10949_v39 = vld [vmem:[#allocation4 + $0x248] sm:$0xff]  ;;  %v10991_v0 = vpack.c.bf16 %v10947_v18, %v10946_v22  ;;  %v10958_v22 = vld [vmem:[#allocation4 + $0x2b8] sm:$0xff]  ;;  %v10959_v18 = vld [vmem:[#allocation4 + $0x2c0] sm:$0xff] }
 0xce2   :  { %v10992_v30 = vpack.c.bf16 %v10949_v39, %v10948_v17  ;;  %v10960_v17 = vld [vmem:[#allocation4 + $0x2d0] sm:$0xff]  ;;  %v10961_v39 = vld [vmem:[#allocation4 + $0x2d8] sm:$0xff] }
 0xce8   :  { %15423 = vmatmul.mubr.bf16.gmra.mrb[48].mxu0 %v10987_v44  ;;  %v10952_v44 = vld [vmem:[#allocation4 + $0x270] sm:$0xff] }
 0xce9   :  { %15426 = vmatprep.mubr.bf16.mxu0 %v10988_v14  ;;  %v10993_v14 = vpack.c.bf16 %v10951_v49, %v10950_v34  ;;  %v10994_v52 = vpack.c.bf16 %v10953_v57, %v10952_v44  ;;  %v10962_v34 = vld [vmem:[#allocation4 + $0x2e8] sm:$0xff]  ;;  %v10963_v49 = vld [vmem:[#allocation4 + $0x2f0] sm:$0xff]  ;;  %v10964_v44 = vld [vmem:[#allocation4 + $0x300] sm:$0xff] }
 0xcea   :  { %v10999_v57 = vpack.c.bf16 %v10963_v49, %v10962_v34  ;;  %v22133_v49 = vld [vmem:[#allocation27_spill] sm:$0xff] }
 0xcf0   :  { %15427 = vmatmul.mubr.bf16.gmra.mrb[52].mxu0 %v10989_v1  ;;  %v10995_v1 = vpack.c.bf16 %v10955_v15, %v10954_v20  ;;  %v10966_v20 = vld [vmem:[#allocation4 + $0x318] sm:$0xff]  ;;  %v10967_v15 = vld [vmem:[#allocation4 + $0x320] sm:$0xff] }
 0xcf1   :  { %15430 = vmatprep.mubr.bf16.mxu0 %v10990_v5  ;;  %v10996_v5 = vpack.c.bf16 %v10957_v21, %v10956_v37  ;;  %v11001_v37 = vpack.c.bf16 %v10967_v15, %v10966_v20  ;;  %v10970_v21 = vld [vmem:[#allocation4 + $0x348] sm:$0xff] }
 0xcf8   :  { %15431 = vmatmul.mubr.bf16.gmra.mrb[56].mxu0 %v10991_v0  ;;  %v10997_v0 = vpack.c.bf16 %v10959_v18, %v10958_v22 }
 0xcf9   :  { %15434 = vmatprep.mubr.bf16.mxu0 %v10992_v30  ;;  %v10998_v30 = vpack.c.bf16 %v10961_v39, %v10960_v17  ;;  %v22132_v17 = vld [vmem:[#allocation16_spill] sm:$0xff] }
 0xd00   :  { %15435 = vmatmul.mubr.bf16.gmra.mrb[60].mxu0 %v10993_v14 }
 0xd01   :  { %15438 = vmatprep.mubr.bf16.mxu0 %v10994_v52  ;;  %v10965_v52 = vld [vmem:[#allocation4 + $0x308] sm:$0xff] }
 0xd02   :  { %v11000_v14 = vpack.c.bf16 %v10965_v52, %v10964_v44 }
 0xd08   :  { %15439 = vmatmul.mubr.bf16.gmra.mrb[64].mxu0 %v10995_v1  ;;  %v11003_v1 = vpack.c.bf16 %v17086_v47, %v10970_v21 }
 0xd09   :  { %15442 = vmatprep.mubr.bf16.mxu0 %v10996_v5  ;;  %v16943_v5 = vld [vmem:[%s21662_s9 + $0x208] sm:$0xff]  }
 0xd10   :  { %15443 = vmatmul.mubr.bf16.gmra.mrb[68].mxu0 %v10997_v0 }
 0xd11   :  { %15446 = vmatprep.mubr.bf16.mxu0 %v10998_v30 }
 0xd18   :  { %15447 = vmatmul.mubr.bf16.gmra.mrb[72].mxu0 %v10999_v57  ;;  %v22134_v57 = vld [vmem:[#allocation28_spill] sm:$0xff] }
 0xd19   :  { %15450 = vmatprep.mubr.bf16.mxu0 %v11000_v14 }
 0xd20   :  { %15451 = vmatmul.mubr.bf16.gmra.mrb[76].mxu0 %v11001_v37  ;;  %v22135_v37 = vld [vmem:[#allocation6_spill] sm:$0xff] }
 0xd21   :  { %15454 = vmatprep.mubr.bf16.mxu0 %v20979_v13  ;;  %v16944_v13 = vld [vmem:[%s21662_s9 + $0x210] sm:$0xff]  }
 0xd28   :  { %15455 = vmatmul.mubr.bf16.gmra.mrb[80].mxu0 %v11003_v1 }
 0xd29   :  { %15474 = vmatprep.mubr.bf16.mxu0 %v20982_v27  ;;  %v16945_v27 = vld [vmem:[%s21662_s9 + $0x218] sm:$0xff]  }
 0xd30   :  { %15475 = vmatmul.mubr.bf16.vlgmr.msra.gmra.mrb[20].mxu0 %v20987_v54  ;;  %v16946_v54 = vld [vmem:[%s21662_s9 + $0x220] sm:$0xff]  }
 0xd31   :  { %15539 = vmatpush3.bf16.msra.mxu0 %v21243_v25  ;;  %15478 = vmatprep.mubr.bf16.mxu0 %v20995_v50  ;;  %v16947_v50 = vld [vmem:[%s21662_s9 + $0x228] sm:$0xff]  }
 0xd32   :  { %15540 = vmatprep.subr.bf16.mxu0 %v16943_v5  ;;  %v22131_v25 = vld [vmem:[#allocation14_spill] sm:$0xff] }
 0xd35   :  { %15541 = vmatpush3.bf16.msra.mxu0 %v16943_v5 }
 0xd36   :  { %15542 = vmatprep.subr.bf16.mxu0 %v16944_v13 }
 0xd38   :  { %15479 = vmatmul.mubr.bf16.gmra.mrb[24].mxu0 %v21000_v33  ;;  %v16948_v33 = vld [vmem:[%s21662_s9 + $0x230] sm:$0xff]  }
 0xd39   :  { %15482 = vmatprep.mubr.bf16.mxu0 %v21007_v16  ;;  %15543 = vmatpush3.bf16.msra.mxu0 %v16944_v13  ;;  %v16949_v16 = vld [vmem:[%s21662_s9 + $0x238] sm:$0xff]  }
 0xd3a   :  { %15544 = vmatprep.subr.bf16.mxu0 %v16945_v27  ;;  %v22136_v13 = vld [vmem:[#allocation8_spill] sm:$0xff] }
 0xd3d   :  { %15545 = vmatpush3.bf16.msra.mxu0 %v16945_v27 }
 0xd3e   :  { %15546 = vmatprep.subr.bf16.mxu0 %v16946_v54 }
 0xd40   :  { %15483 = vmatmul.mubr.bf16.gmra.mrb[28].mxu0 %v21012_v60  ;;  %v11453_v60 = vld [vmem:[#allocation4 + $0x1a1] sm:$0xff] }
 0xd41   :  { %15486 = vmatprep.mubr.bf16.mxu0 %v21019_v8  ;;  %15547 = vmatpush3.bf16.msra.mxu0 %v16946_v54  ;;  %v11452_v8 = vld [vmem:[#allocation4 + $0x199] sm:$0xff] }
 0xd42   :  { %15548 = vmatprep.subr.bf16.mxu0 %v16947_v50 }
 0xd45   :  { %15549 = vmatpush3.bf16.msra.mxu0 %v16947_v50 }
 0xd46   :  { %15550 = vmatprep.subr.bf16.mxu0 %v16948_v33 }
 0xd48   :  { %15487 = vmatmul.mubr.bf16.gmra.mrb[32].mxu0 %v21024_v2  ;;  %v11501_v2 = vpack.c.bf16 %v11453_v60, %v11452_v8 }
 0xd49   :  { %15490 = vmatprep.mubr.bf16.mxu0 %v21033_v45  ;;  %15551 = vmatpush3.bf16.msra.mxu0 %v16948_v33  ;;  %v22125_v45 = vld [vmem:[#allocation82_spill] sm:$0xff] }
 0xd4a   :  { %15552 = vmatprep.subr.bf16.mxu0 %v16949_v16 }
 0xd4d   :  { %15553 = vmatpush3.bf16.msra.mxu0 %v16949_v16 }
 0xd50   :  { %15491 = vmatmul.mubr.bf16.gmra.mrb[36].mxu0 %v21036_v19  ;;  %v22127_v19 = vld [vmem:[#allocation84_spill] sm:$0xff] }
 0xd51   :  { %15494 = vmatprep.mubr.bf16.mxu0 %v21040_v59  ;;  %v22124_v59 = vld [vmem:[#allocation81_spill] sm:$0xff] }
 0xd58   :  { %15495 = vmatmul.mubr.bf16.gmra.mrb[40].mxu0 %v21042_v6  ;;  %v22126_v6 = vld [vmem:[#allocation83_spill] sm:$0xff] }
 0xd59   :  { %15498 = vmatprep.mubr.bf16.mxu0 %v21046_v28  ;;  %v22128_v28 = vld [vmem:[#allocation85_spill] sm:$0xff] }
 0xd60   :  { %15499 = vmatmul.mubr.bf16.gmra.mrb[44].mxu0 %v21048_v7 }
 0xd61   :  { %15502 = vmatprep.mubr.bf16.mxu0 %v21052_v63  ;;  %v11484_v63 = vld [vmem:[#allocation4 + $0x349] sm:$0xff] }
 0xd68   :  { %15503 = vmatmul.mubr.bf16.gmra.mrb[48].mxu0 %v11501_v2  ;;  %v22137_v2 = vld [vmem:[#allocation18_spill] sm:$0xff] }
 0xd69   :  { %15506 = vmatprep.mubr.bf16.mxu0 %v21055_v61  ;;  %v11998_v61 = vld [vmem:[#allocation4 + $0x34a] sm:$0xff] }
 0xd70   :  { %15507 = vmatmul.mubr.bf16.gmra.mrb[52].mxu0 %v21057_v51  ;;  %v11999_v51 = vld [vmem:[#allocation4 + $0x352] sm:$0xff] }
 0xd71   :  { %15510 = vmatprep.mubr.bf16.mxu0 %v21061_v24  ;;  %v12031_v24 = vpack.c.bf16 %v11999_v51, %v11998_v61  ;;  %v22142_v61 = vld [vmem:[#allocation22_spill] sm:$0xff] }
 0xd78   :  { %15511 = vmatmul.mubr.bf16.gmra.mrb[56].mxu0 %v21063_v32 }
 0xd79   :  { %15514 = vmatprep.mubr.bf16.mxu0 %v21067_v55  ;;  %v21333_v55 = vld [vmem:[%s21665_s10] ss:$0 sm:$0xff] }
 0xd80   :  { %15515 = vmatmul.mubr.bf16.gmra.mrb[60].mxu0 %v21069_v4  ;;  %v11485_v4 = vld [vmem:[#allocation4 + $0x351] sm:$0xff] }
 0xd81   :  { %15518 = vmatprep.mubr.bf16.mxu0 %v21073_v56  ;;  %v11517_v7 = vpack.c.bf16 %v11485_v4, %v11484_v63  ;;  %v22123_v56 = vld [vmem:[#allocation80_spill] sm:$0xff] }
 0xd88   :  { %15519 = vmatmul.mubr.bf16.gmra.mrb[64].mxu0 %v21075_v12  ;;  %v22122_v12 = vld [vmem:[#allocation79_spill] sm:$0xff] }
 0xd89   :  { %15522 = vmatprep.mubr.bf16.mxu0 %v21079_v62  ;;  %v22121_v62 = vld [vmem:[#allocation78_spill] sm:$0xff] }
 0xd90   :  { %15523 = vmatmul.mubr.bf16.gmra.mrb[68].mxu0 %v21081_v11  ;;  %v22120_v11 = vld [vmem:[#allocation77_spill] sm:$0xff] }
 0xd91   :  { %15526 = vmatprep.mubr.bf16.mxu0 %v21085_v42  ;;  %v22117_v42 = vld [vmem:[#allocation74_spill] sm:$0xff] }
 0xd98   :  { %15527 = vmatmul.mubr.bf16.gmra.mrb[72].mxu0 %v21087_v43  ;;  %v22115_v43 = vld [vmem:[#allocation72_spill] sm:$0xff] }
 0xd99   :  { %15530 = vmatprep.mubr.bf16.mxu0 %v21091_v26 }
 0xda0   :  { %15531 = vmatmul.mubr.bf16.gmra.mrb[76].mxu0 %v21093_v41  ;;  %v11967_v41 = vld [vmem:[#allocation4 + $0x1a2] sm:$0xff] }
 0xda1   :  { %15534 = vmatprep.mubr.bf16.mxu0 %v21097_v31  ;;  %v22113_v31 = vld [vmem:[#allocation70_spill] sm:$0xff] }
 0xda8   :  { %15535 = vmatmul.mubr.bf16.gmra.mrb[80].mxu0 %v11517_v7 }
 0xda9   :  { %15554 = vmatprep.mubr.bf16.mxu0 %v21100_v9  ;;  %v22129_v9 = vld [vmem:[#allocation20_spill] sm:$0xff] }
 0xdb0   :  { %15555 = vmatmul.mubr.bf16.vlgmr.msra.gmra.mrb[20].mxu0 %v21105_v38  ;;  %v22112_v38 = vld [vmem:[#allocation69_spill] sm:$0xff] }
 0xdb1   :  { %15558 = vmatprep.mubr.bf16.mxu0 %v21113_v48 }
 0xdb8   :  { %15559 = vmatmul.mubr.bf16.gmra.mrb[24].mxu0 %v21118_v29 }
 0xdb9   :  { %15562 = vmatprep.mubr.bf16.mxu0 %v21125_v36  ;;  %v11966_v36 = vld [vmem:[#allocation4 + $0x19a] sm:$0xff] }
 0xdba   :  { %v12015_v26 = vpack.c.bf16 %v11967_v41, %v11966_v36 }
 0xdc0   :  { %15563 = vmatmul.mubr.bf16.gmra.mrb[28].mxu0 %v21130_v35  ;;  %v22130_v35 = vld [vmem:[#allocation17_spill] sm:$0xff] }
 0xdc1   :  { %15566 = vmatprep.mubr.bf16.mxu0 %v21137_v3  ;;  %v22114_v3 = vld [vmem:[#allocation71_spill] sm:$0xff] }
 0xdc8   :  { %15567 = vmatmul.mubr.bf16.gmra.mrb[32].mxu0 %v21142_v40 }
 0xdc9   :  { %15570 = vmatprep.mubr.bf16.mxu0 %v21151_v58  ;;  %v22116_v58 = vld [vmem:[#allocation73_spill] sm:$0xff] }
 0xdd0   :  { %15571 = vmatmul.mubr.bf16.gmra.mrb[36].mxu0 %v21154_v46 }
 0xdd1   :  { %15574 = vmatprep.mubr.bf16.mxu0 %v21158_v23  ;;  %v22118_v23 = vld [vmem:[#allocation75_spill] sm:$0xff] }
 0xdd8   :  { %15575 = vmatmul.mubr.bf16.gmra.mrb[40].mxu0 %v21160_v10  ;;  %v22119_v10 = vld [vmem:[#allocation76_spill] sm:$0xff] }
 0xdd9   :  { %15578 = vmatprep.mubr.bf16.mxu0 %v21164_v53 }
 0xde0   :  { %15579 = vmatmul.mubr.bf16.gmra.mrb[44].mxu0 %v22112_v38  ;;  %v22138_v38 = vld [vmem:[#allocation5_spill] sm:$0xff] }
 0xde1   :  { %15582 = vmatprep.mubr.bf16.mxu0 %v22113_v31 }
 0xde8   :  { %15583 = vmatmul.mubr.bf16.gmra.mrb[48].mxu0 %v12015_v26  ;;  %v22139_v26 = vld [vmem:[#allocation19_spill] sm:$0xff] }
 0xde9   :  { %15586 = vmatprep.mubr.bf16.mxu0 %v22114_v3 }
 0xdf0   :  { %15587 = vmatmul.mubr.bf16.gmra.mrb[52].mxu0 %v22115_v43 }
 0xdf1   :  { %15590 = vmatprep.mubr.bf16.mxu0 %v22116_v58 }
 0xdf8   :  { %15591 = vmatmul.mubr.bf16.gmra.mrb[56].mxu0 %v22117_v42  ;;  %v22140_v42 = vld [vmem:[#allocation7_spill] sm:$0xff] }
 0xdf9   :  { %15594 = vmatprep.mubr.bf16.mxu0 %v22118_v23 }
 0xe00   :  { %15595 = vmatmul.mubr.bf16.gmra.mrb[60].mxu0 %v22119_v10 }
 0xe01   :  { %15598 = vmatprep.mubr.bf16.mxu0 %v22120_v11 }
 0xe08   :  { %15599 = vmatmul.mubr.bf16.gmra.mrb[64].mxu0 %v22121_v62 }
 0xe09   :  { %15602 = vmatprep.mubr.bf16.mxu0 %v22122_v12 }
 0xe10   :  { %15603 = vmatmul.mubr.bf16.gmra.mrb[68].mxu0 %v22123_v56 }
 0xe11   :  { %15606 = vmatprep.mubr.bf16.mxu0 %v22124_v59 }
 0xe18   :  { %15607 = vmatmul.mubr.bf16.gmra.mrb[72].mxu0 %v22125_v45  ;;  %v22141_v45 = vld [vmem:[#allocation21_spill] sm:$0xff] }
 0xe19   :  { %15610 = vmatprep.mubr.bf16.mxu0 %v22126_v6 }
 0xe20   :  { %15611 = vmatmul.mubr.bf16.gmra.mrb[76].mxu0 %v22127_v19 }
 0xe21   :  { %15614 = vmatprep.mubr.bf16.mxu0 %v22128_v28 }
 0xe28   :  { %15615 = vmatmul.mubr.bf16.gmra.mrb[80].mxu0 %v12031_v24 }
 0xe83   :  { %v15556_v32 = vpop.f32.mrb[20].mxu0 }
 0xe84   :  { %v15618_v48 = vadd.f32 %v15556_v32, %v22129_v9  ;;  %v12131_v29 = vpop.f32.mrb[21].mxu0  ;;  %v22143_v9 = vld [vmem:[#allocation23_spill] sm:$0xff] }
 0xe85   :  { %v15619_v40 = vadd.f32 %v12131_v29, %v22130_v35  ;;  %v15557_v46 = vpop.f32.mrb[22].mxu0 }
 0xe86   :  { %v12459_v53 = vadd.f32 %v15618_v48, %v21333_v55  ;;  %v15620_v47 = vadd.f32 %v15557_v46, %v22131_v25  ;;  %v12134_v22 = vpop.f32.mrb[23].mxu0 }
 0xe87   :  { %v12457_v18 = vadd.f32 %v15619_v40, %v21333_v55  ;;  %v15621_v39 = vadd.f32 %v12134_v22, %v22132_v17  ;;  %v22144_v40 = vld [vmem:[#allocation24_spill] sm:$0xff] }
 0xe88   :  { %16954 = vtanh.f32 %v12459_v53  ;;  %v12460_v0 = vadd.f32 %v15620_v47, %v21333_v55 }
 0xe89   :  { %16956 = vtanh.f32 %v12457_v18  ;;  %v12458_v30 = vadd.f32 %v15621_v39, %v21333_v55  ;;  %v22145_v39 = vld [vmem:[#allocation25_spill] sm:$0xff] }
 0xe8a   :  { %16958 = vtanh.f32 %v12460_v0 }
 0xe8b   :  { %16960 = vtanh.f32 %v12458_v30  ;;  %v15560_v34 = vpop.f32.mrb[24].mxu0 }
 0xe8c   :  { %v15622_v44 = vadd.f32 %v15560_v34, %v22133_v49  ;;  %v12147_v52 = vpop.f32.mrb[25].mxu0  ;;  %v22146_v49 = vld [vmem:[#allocation26_spill] sm:$0xff] }
 0xe8d   :  { %v15623_v14 = vadd.f32 %v12147_v52, %v22134_v57  ;;  %v15561_v20 = vpop.f32.mrb[26].mxu0 }
 0xe8e   :  { %v12463_v15 = vadd.f32 %v15622_v44, %v21333_v55  ;;  %v15624_v21 = vadd.f32 %v15561_v20, %v22135_v37  ;;  %v12150_v1 = vpop.f32.mrb[27].mxu0 }
 0xe8f   :  { %v12461_v5 = vadd.f32 %v15623_v14, %v21333_v55  ;;  %v15625_v27 = vadd.f32 %v12150_v1, %v22136_v13  ;;  %v22147_v14 = vld [vmem:[#allocation9_spill] sm:$0xff] }
 0xe90   :  { %16962 = vtanh.f32 %v12463_v15  ;;  %v12464_v54 = vadd.f32 %v15624_v21, %v21333_v55  ;;  %v22148_v21 = vld [vmem:[#allocation11_spill] sm:$0xff] }
 0xe91   :  { %16964 = vtanh.f32 %v12461_v5  ;;  %v12462_v50 = vadd.f32 %v15625_v27, %v21333_v55 }
 0xe92   :  { %v16955_v33 = vpop.eup %16954  ;;  %16966 = vtanh.f32 %v12464_v54 }
 0xe93   :  { %v16957_v16 = vpop.eup %16956  ;;  %12587 = vst [vmem:[%s21666_s11 + $0x10] sm:$0xff] %v16955_v33  ;;  %16968 = vtanh.f32 %v12462_v50  ;;  %v15564_v8 = vpop.f32.mrb[28].mxu0 }
 0xe94   :  { %v16959_v60 = vpop.eup %16958  ;;  %12585 = vst [vmem:[%s21666_s11] sm:$0xff] %v16957_v16  ;;  %v15626_v63 = vadd.f32 %v15564_v8, %v22137_v2  ;;  %v12163_v4 = vpop.f32.mrb[29].mxu0  ;;  %v22149_v16 = vld [vmem:[#allocation13_spill] sm:$0xff] }
 0xe95   :  { %v16961_v7 = vpop.eup %16960  ;;  %12588 = vst [vmem:[%s21666_s11 + $0x18] sm:$0xff] %v16959_v60  ;;  %v15627_v31 = vadd.f32 %v12163_v4, %v22138_v38  ;;  %v15565_v36 = vpop.f32.mrb[30].mxu0 }
 0xe96   :  { %12586 = vst [vmem:[%s21666_s11 + $0x8] sm:$0xff] %v16961_v7  ;;  %v12467_v41 = vadd.f32 %v15626_v63, %v21333_v55  ;;  %v15628_v3 = vadd.f32 %v15565_v36, %v22139_v26  ;;  %v12166_v43 = vpop.f32.mrb[31].mxu0  ;;  %v22150_v63 = vld [vmem:[#allocation10_spill] sm:$0xff] }
 0xe97   :  { %v12465_v58 = vadd.f32 %v15627_v31, %v21333_v55  ;;  %v15629_v23 = vadd.f32 %v12166_v43, %v22140_v42  ;;  %v22151_v31 = vld [vmem:[#allocation12_spill] sm:$0xff] }
 0xe98   :  { %16970 = vtanh.f32 %v12467_v41  ;;  %v12468_v10 = vadd.f32 %v15628_v3, %v21333_v55  ;;  %v22152_v3 = vld [vmem:[#allocation15_spill] sm:$0xff] }
 0xe99   :  { %16972 = vtanh.f32 %v12465_v58  ;;  %v12466_v11 = vadd.f32 %v15629_v23, %v21333_v55 }
 0xe9a   :  { %v16963_v62 = vpop.eup %16962  ;;  %16974 = vtanh.f32 %v12468_v10 }
 0xe9b   :  { %v16965_v12 = vpop.eup %16964  ;;  %12591 = vst [vmem:[%s21666_s11 + $0x30] sm:$0xff] %v16963_v62  ;;  %16976 = vtanh.f32 %v12466_v11  ;;  %v15568_v56 = vpop.f32.mrb[32].mxu0 }
 0xe9c   :  { %v16967_v59 = vpop.eup %16966  ;;  %12589 = vst [vmem:[%s21666_s11 + $0x20] sm:$0xff] %v16965_v12  ;;  %v15630_v6 = vadd.f32 %v15568_v56, %v22141_v45  ;;  %v12179_v19 = vpop.f32.mrb[33].mxu0  ;;  %v22153_v12 = vld [vmem:[#allocation29_spill] sm:$0xff] }
 0xe9d   :  { %v16969_v28 = vpop.eup %16968  ;;  %12592 = vst [vmem:[%s21666_s11 + $0x38] sm:$0xff] %v16967_v59  ;;  %v15631_v51 = vadd.f32 %v12179_v19, %v22142_v61  ;;  %v15569_v24 = vpop.f32.mrb[34].mxu0 }
 0xe9e   :  { %12590 = vst [vmem:[%s21666_s11 + $0x28] sm:$0xff] %v16969_v28  ;;  %v12471_v32 = vadd.f32 %v15630_v6, %v21333_v55  ;;  %v15632_v48 = vadd.f32 %v15569_v24, %v22143_v9  ;;  %v12182_v29 = vpop.f32.mrb[35].mxu0  ;;  %v22154_v6 = vld [vmem:[#allocation30_spill] sm:$0xff] }
 0xe9f   :  { %v12469_v35 = vadd.f32 %v15631_v51, %v21333_v55  ;;  %v15633_v46 = vadd.f32 %v12182_v29, %v22144_v40  ;;  %v22155_v51 = vld [vmem:[#allocation31_spill] sm:$0xff] }
 0xea0   :  { %16978 = vtanh.f32 %v12471_v32  ;;  %v12472_v53 = vadd.f32 %v15632_v48, %v21333_v55  ;;  %v22156_v48 = vld [vmem:[#allocation32_spill] sm:$0xff] }
 0xea1   :  { %16980 = vtanh.f32 %v12469_v35  ;;  %v12470_v25 = vadd.f32 %v15633_v46, %v21333_v55 }
 0xea2   :  { %v16971_v47 = vpop.eup %16970  ;;  %16982 = vtanh.f32 %v12472_v53 }
 0xea3   :  { %v16973_v22 = vpop.eup %16972  ;;  %12595 = vst [vmem:[%s21666_s11 + $0x50] sm:$0xff] %v16971_v47  ;;  %16984 = vtanh.f32 %v12470_v25  ;;  %v15572_v18 = vpop.f32.mrb[36].mxu0 }
 0xea4   :  { %v16975_v17 = vpop.eup %16974  ;;  %12593 = vst [vmem:[%s21666_s11 + $0x40] sm:$0xff] %v16973_v22  ;;  %v15634_v0 = vadd.f32 %v15572_v18, %v22145_v39  ;;  %v12195_v30 = vpop.f32.mrb[37].mxu0  ;;  %v22157_v22 = vld [vmem:[#allocation33_spill] sm:$0xff] }
 0xea5   :  { %v16977_v34 = vpop.eup %16976  ;;  %12596 = vst [vmem:[%s21666_s11 + $0x58] sm:$0xff] %v16975_v17  ;;  %v15635_v44 = vadd.f32 %v12195_v30, %v22146_v49  ;;  %v15573_v52 = vpop.f32.mrb[38].mxu0 }
 0xea6   :  { %12594 = vst [vmem:[%s21666_s11 + $0x48] sm:$0xff] %v16977_v34  ;;  %v12475_v57 = vadd.f32 %v15634_v0, %v21333_v55  ;;  %v15636_v20 = vadd.f32 %v15573_v52, %v22147_v14  ;;  %v12198_v15 = vpop.f32.mrb[39].mxu0  ;;  %v22158_v0 = vld [vmem:[#allocation34_spill] sm:$0xff] }
 0xea7   :  { %v12473_v37 = vadd.f32 %v15635_v44, %v21333_v55  ;;  %v15637_v1 = vadd.f32 %v12198_v15, %v22148_v21  ;;  %v22159_v44 = vld [vmem:[#allocation35_spill] sm:$0xff] }
 0xea8   :  { %16986 = vtanh.f32 %v12475_v57  ;;  %v12476_v5 = vadd.f32 %v15636_v20, %v21333_v55  ;;  %v22160_v20 = vld [vmem:[#allocation36_spill] sm:$0xff] }
 0xea9   :  { %16988 = vtanh.f32 %v12473_v37  ;;  %v12474_v13 = vadd.f32 %v15637_v1, %v21333_v55 }
 0xeaa   :  { %v16979_v27 = vpop.eup %16978  ;;  %16990 = vtanh.f32 %v12476_v5 }
 0xeab   :  { %v16981_v54 = vpop.eup %16980  ;;  %12599 = vst [vmem:[%s21666_s11 + $0x70] sm:$0xff] %v16979_v27  ;;  %16992 = vtanh.f32 %v12474_v13  ;;  %v15576_v50 = vpop.f32.mrb[40].mxu0 }
 0xeac   :  { %v16983_v33 = vpop.eup %16982  ;;  %12597 = vst [vmem:[%s21666_s11 + $0x60] sm:$0xff] %v16981_v54  ;;  %v15638_v8 = vadd.f32 %v15576_v50, %v22149_v16  ;;  %v12211_v60 = vpop.f32.mrb[41].mxu0  ;;  %v22161_v54 = vld [vmem:[#allocation37_spill] sm:$0xff] }
 0xead   :  { %v16985_v2 = vpop.eup %16984  ;;  %12600 = vst [vmem:[%s21666_s11 + $0x78] sm:$0xff] %v16983_v33  ;;  %v15639_v4 = vadd.f32 %v12211_v60, %v22150_v63  ;;  %v15577_v7 = vpop.f32.mrb[42].mxu0 }
 0xeae   :  { %12598 = vst [vmem:[%s21666_s11 + $0x68] sm:$0xff] %v16985_v2  ;;  %v12479_v38 = vadd.f32 %v15638_v8, %v21333_v55  ;;  %v15640_v36 = vadd.f32 %v15577_v7, %v22151_v31  ;;  %v12214_v41 = vpop.f32.mrb[43].mxu0  ;;  %v22162_v8 = vld [vmem:[#allocation38_spill] sm:$0xff] }
 0xeaf   :  { %v12477_v26 = vadd.f32 %v15639_v4, %v21333_v55  ;;  %v15641_v43 = vadd.f32 %v12214_v41, %v22152_v3  ;;  %v22163_v4 = vld [vmem:[#allocation39_spill] sm:$0xff] }
 0xeb0   :  { %16994 = vtanh.f32 %v12479_v38  ;;  %v12480_v58 = vadd.f32 %v15640_v36, %v21333_v55  ;;  %v22164_v36 = vld [vmem:[#allocation40_spill] sm:$0xff] }
 0xeb1   :  { %16996 = vtanh.f32 %v12477_v26  ;;  %v12478_v42 = vadd.f32 %v15641_v43, %v21333_v55 }
 0xeb2   :  { %v16987_v23 = vpop.eup %16986  ;;  %16998 = vtanh.f32 %v12480_v58 }
 0xeb3   :  { %v16989_v10 = vpop.eup %16988  ;;  %12603 = vst [vmem:[%s21666_s11 + $0x90] sm:$0xff] %v16987_v23  ;;  %17000 = vtanh.f32 %v12478_v42  ;;  %v15580_v11 = vpop.f32.mrb[44].mxu0 }
 0xeb4   :  { %v16991_v62 = vpop.eup %16990  ;;  %12601 = vst [vmem:[%s21666_s11 + $0x80] sm:$0xff] %v16989_v10  ;;  %v15642_v56 = vadd.f32 %v15580_v11, %v22153_v12  ;;  %v12227_v59 = vpop.f32.mrb[45].mxu0  ;;  %v22165_v10 = vld [vmem:[#allocation41_spill] sm:$0xff] }
 0xeb5   :  { %v16993_v45 = vpop.eup %16992  ;;  %12604 = vst [vmem:[%s21666_s11 + $0x98] sm:$0xff] %v16991_v62  ;;  %v15643_v19 = vadd.f32 %v12227_v59, %v22154_v6  ;;  %v15581_v28 = vpop.f32.mrb[46].mxu0 }
 0xeb6   :  { %12602 = vst [vmem:[%s21666_s11 + $0x88] sm:$0xff] %v16993_v45  ;;  %v12483_v61 = vadd.f32 %v15642_v56, %v21333_v55  ;;  %v15644_v24 = vadd.f32 %v15581_v28, %v22155_v51  ;;  %v12230_v32 = vpop.f32.mrb[47].mxu0  ;;  %v22166_v56 = vld [vmem:[#allocation42_spill] sm:$0xff] }
 0xeb7   :  { %v12481_v9 = vadd.f32 %v15643_v19, %v21333_v55  ;;  %v15645_v29 = vadd.f32 %v12230_v32, %v22156_v48  ;;  %v22167_v19 = vld [vmem:[#allocation43_spill] sm:$0xff] }
 0xeb8   :  { %17002 = vtanh.f32 %v12483_v61  ;;  %v12484_v35 = vadd.f32 %v15644_v24, %v21333_v55  ;;  %v22168_v24 = vld [vmem:[#allocation44_spill] sm:$0xff] }
 0xeb9   :  { %17004 = vtanh.f32 %v12481_v9  ;;  %v12482_v40 = vadd.f32 %v15645_v29, %v21333_v55 }
 0xeba   :  { %v16995_v46 = vpop.eup %16994  ;;  %17006 = vtanh.f32 %v12484_v35 }
 0xebb   :  { %v16997_v53 = vpop.eup %16996  ;;  %12607 = vst [vmem:[%s21666_s11 + $0xb0] sm:$0xff] %v16995_v46  ;;  %17008 = vtanh.f32 %v12482_v40  ;;  %v15584_v25 = vpop.f32.mrb[48].mxu0 }
 0xebc   :  { %v16999_v47 = vpop.eup %16998  ;;  %12605 = vst [vmem:[%s21666_s11 + $0xa0] sm:$0xff] %v16997_v53  ;;  %v15646_v18 = vadd.f32 %v15584_v25, %v22157_v22  ;;  %v12243_v17 = vpop.f32.mrb[49].mxu0  ;;  %v22169_v53 = vld [vmem:[#allocation45_spill] sm:$0xff] }
 0xebd   :  { %v17001_v39 = vpop.eup %17000  ;;  %12608 = vst [vmem:[%s21666_s11 + $0xb8] sm:$0xff] %v16999_v47  ;;  %v15647_v30 = vadd.f32 %v12243_v17, %v22158_v0  ;;  %v15585_v34 = vpop.f32.mrb[50].mxu0 }
 0xebe   :  { %12606 = vst [vmem:[%s21666_s11 + $0xa8] sm:$0xff] %v17001_v39  ;;  %v12487_v49 = vadd.f32 %v15646_v18, %v21333_v55  ;;  %v15648_v52 = vadd.f32 %v15585_v34, %v22159_v44  ;;  %v12246_v57 = vpop.f32.mrb[51].mxu0  ;;  %v22170_v18 = vld [vmem:[#allocation46_spill] sm:$0xff] }
 0xebf   :  { %v12485_v14 = vadd.f32 %v15647_v30, %v21333_v55  ;;  %v15649_v15 = vadd.f32 %v12246_v57, %v22160_v20  ;;  %v22171_v30 = vld [vmem:[#allocation47_spill] sm:$0xff] }
 0xec0   :  { %17010 = vtanh.f32 %v12487_v49  ;;  %v12488_v37 = vadd.f32 %v15648_v52, %v21333_v55  ;;  %v22172_v52 = vld [vmem:[#allocation48_spill] sm:$0xff] }
 0xec1   :  { %17012 = vtanh.f32 %v12485_v14  ;;  %v12486_v21 = vadd.f32 %v15649_v15, %v21333_v55 }
 0xec2   :  { %v17003_v1 = vpop.eup %17002  ;;  %17014 = vtanh.f32 %v12488_v37 }
 0xec3   :  { %v17005_v5 = vpop.eup %17004  ;;  %12611 = vst [vmem:[%s21666_s11 + $0xd0] sm:$0xff] %v17003_v1  ;;  %17016 = vtanh.f32 %v12486_v21  ;;  %v15588_v13 = vpop.f32.mrb[52].mxu0 }
 0xec4   :  { %v17007_v27 = vpop.eup %17006  ;;  %12609 = vst [vmem:[%s21666_s11 + $0xc0] sm:$0xff] %v17005_v5  ;;  %v15650_v50 = vadd.f32 %v15588_v13, %v22161_v54  ;;  %v12259_v33 = vpop.f32.mrb[53].mxu0  ;;  %v22173_v5 = vld [vmem:[#allocation49_spill] sm:$0xff] }
 0xec5   :  { %v17009_v16 = vpop.eup %17008  ;;  %12612 = vst [vmem:[%s21666_s11 + $0xd8] sm:$0xff] %v17007_v27  ;;  %v15651_v60 = vadd.f32 %v12259_v33, %v22162_v8  ;;  %v15589_v2 = vpop.f32.mrb[54].mxu0 }
 0xec6   :  { %12610 = vst [vmem:[%s21666_s11 + $0xc8] sm:$0xff] %v17009_v16  ;;  %v12491_v63 = vadd.f32 %v15650_v50, %v21333_v55  ;;  %v15652_v7 = vadd.f32 %v15589_v2, %v22163_v4  ;;  %v12262_v38 = vpop.f32.mrb[55].mxu0  ;;  %v22174_v50 = vld [vmem:[#allocation50_spill] sm:$0xff] }
 0xec7   :  { %v12489_v31 = vadd.f32 %v15651_v60, %v21333_v55  ;;  %v15653_v41 = vadd.f32 %v12262_v38, %v22164_v36  ;;  %v22175_v60 = vld [vmem:[#allocation51_spill] sm:$0xff] }
 0xec8   :  { %17018 = vtanh.f32 %v12491_v63  ;;  %v12492_v26 = vadd.f32 %v15652_v7, %v21333_v55  ;;  %v22176_v7 = vld [vmem:[#allocation52_spill] sm:$0xff] }
 0xec9   :  { %17020 = vtanh.f32 %v12489_v31  ;;  %v12490_v3 = vadd.f32 %v15653_v41, %v21333_v55 }
 0xeca   :  { %v17011_v43 = vpop.eup %17010  ;;  %17022 = vtanh.f32 %v12492_v26 }
 0xecb   :  { %v17013_v58 = vpop.eup %17012  ;;  %12615 = vst [vmem:[%s21666_s11 + $0xf0] sm:$0xff] %v17011_v43  ;;  %17024 = vtanh.f32 %v12490_v3  ;;  %v15592_v42 = vpop.f32.mrb[56].mxu0 }
 0xecc   :  { %v17015_v23 = vpop.eup %17014  ;;  %12613 = vst [vmem:[%s21666_s11 + $0xe0] sm:$0xff] %v17013_v58  ;;  %v15654_v11 = vadd.f32 %v15592_v42, %v22165_v10  ;;  %v12275_v62 = vpop.f32.mrb[57].mxu0  ;;  %v22177_v58 = vld [vmem:[#allocation53_spill] sm:$0xff] }
 0xecd   :  { %v17017_v12 = vpop.eup %17016  ;;  %12616 = vst [vmem:[%s21666_s11 + $0xf8] sm:$0xff] %v17015_v23  ;;  %v15655_v59 = vadd.f32 %v12275_v62, %v22166_v56  ;;  %v15593_v45 = vpop.f32.mrb[58].mxu0 }
 0xece   :  { %12614 = vst [vmem:[%s21666_s11 + $0xe8] sm:$0xff] %v17017_v12  ;;  %v12495_v6 = vadd.f32 %v15654_v11, %v21333_v55  ;;  %v15656_v28 = vadd.f32 %v15593_v45, %v22167_v19  ;;  %v12278_v61 = vpop.f32.mrb[59].mxu0  ;;  %v22178_v11 = vld [vmem:[#allocation54_spill] sm:$0xff] }
 0xecf   :  { %v12493_v51 = vadd.f32 %v15655_v59, %v21333_v55  ;;  %v15657_v32 = vadd.f32 %v12278_v61, %v22168_v24  ;;  %v22179_v59 = vld [vmem:[#allocation55_spill] sm:$0xff] }
 0xed0   :  { %17026 = vtanh.f32 %v12495_v6  ;;  %v12496_v9 = vadd.f32 %v15656_v28, %v21333_v55  ;;  %v22180_v28 = vld [vmem:[#allocation56_spill] sm:$0xff] }
 0xed1   :  { %17028 = vtanh.f32 %v12493_v51  ;;  %v12494_v48 = vadd.f32 %v15657_v32, %v21333_v55 }
 0xed2   :  { %v17019_v29 = vpop.eup %17018  ;;  %17030 = vtanh.f32 %v12496_v9 }
 0xed3   :  { %v17021_v35 = vpop.eup %17020  ;;  %12619 = vst [vmem:[%s21666_s11 + $0x110] sm:$0xff] %v17019_v29  ;;  %17032 = vtanh.f32 %v12494_v48  ;;  %v15596_v40 = vpop.f32.mrb[60].mxu0 }
 0xed4   :  { %v17023_v46 = vpop.eup %17022  ;;  %12617 = vst [vmem:[%s21666_s11 + $0x100] sm:$0xff] %v17021_v35  ;;  %v15658_v25 = vadd.f32 %v15596_v40, %v22169_v53  ;;  %v12291_v47 = vpop.f32.mrb[61].mxu0  ;;  %v22181_v35 = vld [vmem:[#allocation57_spill] sm:$0xff] }
 0xed5   :  { %v17025_v22 = vpop.eup %17024  ;;  %12620 = vst [vmem:[%s21666_s11 + $0x118] sm:$0xff] %v17023_v46  ;;  %v15659_v17 = vadd.f32 %v12291_v47, %v22170_v18  ;;  %v15597_v39 = vpop.f32.mrb[62].mxu0 }
 0xed6   :  { %12618 = vst [vmem:[%s21666_s11 + $0x108] sm:$0xff] %v17025_v22  ;;  %v12499_v0 = vadd.f32 %v15658_v25, %v21333_v55  ;;  %v15660_v34 = vadd.f32 %v15597_v39, %v22171_v30  ;;  %v12294_v49 = vpop.f32.mrb[63].mxu0  ;;  %v22182_v25 = vld [vmem:[#allocation58_spill] sm:$0xff] }
 0xed7   :  { %v12497_v44 = vadd.f32 %v15659_v17, %v21333_v55  ;;  %v15661_v57 = vadd.f32 %v12294_v49, %v22172_v52  ;;  %v22183_v17 = vld [vmem:[#allocation59_spill] sm:$0xff] }
 0xed8   :  { %17034 = vtanh.f32 %v12499_v0  ;;  %v12500_v14 = vadd.f32 %v15660_v34, %v21333_v55  ;;  %v22184_v34 = vld [vmem:[#allocation60_spill] sm:$0xff] }
 0xed9   :  { %17036 = vtanh.f32 %v12497_v44  ;;  %v12498_v20 = vadd.f32 %v15661_v57, %v21333_v55 }
 0xeda   :  { %v17027_v15 = vpop.eup %17026  ;;  %17038 = vtanh.f32 %v12500_v14 }
 0xedb   :  { %v17029_v37 = vpop.eup %17028  ;;  %12623 = vst [vmem:[%s21666_s11 + $0x130] sm:$0xff] %v17027_v15  ;;  %17040 = vtanh.f32 %v12498_v20  ;;  %v15600_v21 = vpop.f32.mrb[64].mxu0 }
 0xedc   :  { %v17031_v1 = vpop.eup %17030  ;;  %12621 = vst [vmem:[%s21666_s11 + $0x120] sm:$0xff] %v17029_v37  ;;  %v15662_v13 = vadd.f32 %v15600_v21, %v22173_v5  ;;  %v12307_v27 = vpop.f32.mrb[65].mxu0  ;;  %v22185_v37 = vld [vmem:[#allocation61_spill] sm:$0xff] }
 0xedd   :  { %v17033_v54 = vpop.eup %17032  ;;  %12624 = vst [vmem:[%s21666_s11 + $0x138] sm:$0xff] %v17031_v1  ;;  %v15663_v33 = vadd.f32 %v12307_v27, %v22174_v50  ;;  %v15601_v16 = vpop.f32.mrb[66].mxu0 }
 0xede   :  { %12622 = vst [vmem:[%s21666_s11 + $0x128] sm:$0xff] %v17033_v54  ;;  %v12503_v8 = vadd.f32 %v15662_v13, %v21333_v55  ;;  %v15664_v2 = vadd.f32 %v15601_v16, %v22175_v60  ;;  %v12310_v63 = vpop.f32.mrb[67].mxu0  ;;  %v22186_v13 = vld [vmem:[#allocation62_spill] sm:$0xff] }
 0xedf   :  { %v12501_v4 = vadd.f32 %v15663_v33, %v21333_v55  ;;  %v15665_v38 = vadd.f32 %v12310_v63, %v22176_v7  ;;  %v22187_v33 = vld [vmem:[#allocation63_spill] sm:$0xff] }
 0xee0   :  { %17042 = vtanh.f32 %v12503_v8  ;;  %v12504_v31 = vadd.f32 %v15664_v2, %v21333_v55  ;;  %v22188_v2 = vld [vmem:[#allocation64_spill] sm:$0xff] }
 0xee1   :  { %17044 = vtanh.f32 %v12501_v4  ;;  %v12502_v36 = vadd.f32 %v15665_v38, %v21333_v55 }
 0xee2   :  { %v17035_v41 = vpop.eup %17034  ;;  %17046 = vtanh.f32 %v12504_v31 }
 0xee3   :  { %v17037_v26 = vpop.eup %17036  ;;  %12627 = vst [vmem:[%s21666_s11 + $0x150] sm:$0xff] %v17035_v41  ;;  %17048 = vtanh.f32 %v12502_v36  ;;  %v15604_v3 = vpop.f32.mrb[68].mxu0 }
 0xee4   :  { %v17039_v43 = vpop.eup %17038  ;;  %12625 = vst [vmem:[%s21666_s11 + $0x140] sm:$0xff] %v17037_v26  ;;  %v15666_v42 = vadd.f32 %v15604_v3, %v22177_v58  ;;  %v12323_v23 = vpop.f32.mrb[69].mxu0  ;;  %v22189_v26 = vld [vmem:[#allocation65_spill] sm:$0xff] }
 0xee5   :  { %v17041_v10 = vpop.eup %17040  ;;  %12628 = vst [vmem:[%s21666_s11 + $0x158] sm:$0xff] %v17039_v43  ;;  %v15667_v62 = vadd.f32 %v12323_v23, %v22178_v11  ;;  %v15605_v12 = vpop.f32.mrb[70].mxu0 }
 0xee6   :  { %12626 = vst [vmem:[%s21666_s11 + $0x148] sm:$0xff] %v17041_v10  ;;  %v12507_v56 = vadd.f32 %v15666_v42, %v21333_v55  ;;  %v15668_v45 = vadd.f32 %v15605_v12, %v22179_v59  ;;  %v12326_v6 = vpop.f32.mrb[71].mxu0  ;;  %v22190_v42 = vld [vmem:[#allocation66_spill] sm:$0xff] }
 0xee7   :  { %v12505_v19 = vadd.f32 %v15667_v62, %v21333_v55  ;;  %v15669_v61 = vadd.f32 %v12326_v6, %v22180_v28  ;;  %v22191_v62 = vld [vmem:[#allocation67_spill] sm:$0xff] }
 0xee8   :  { %17050 = vtanh.f32 %v12507_v56  ;;  %v12508_v51 = vadd.f32 %v15668_v45, %v21333_v55  ;;  %v22192_v45 = vld [vmem:[#allocation68_spill] sm:$0xff] }
 0xee9   :  { %17052 = vtanh.f32 %v12505_v19  ;;  %v12506_v24 = vadd.f32 %v15669_v61, %v21333_v55 }
 0xeea   :  { %v17043_v32 = vpop.eup %17042  ;;  %17054 = vtanh.f32 %v12508_v51 }
 0xeeb   :  { %v17045_v9 = vpop.eup %17044  ;;  %12631 = vst [vmem:[%s21666_s11 + $0x170] sm:$0xff] %v17043_v32  ;;  %17056 = vtanh.f32 %v12506_v24  ;;  %v15608_v48 = vpop.f32.mrb[72].mxu0 }
 0xeec   :  { %v17047_v29 = vpop.eup %17046  ;;  %12629 = vst [vmem:[%s21666_s11 + $0x160] sm:$0xff] %v17045_v9  ;;  %v15670_v40 = vadd.f32 %v15608_v48, %v22181_v35  ;;  %v12339_v46 = vpop.f32.mrb[73].mxu0 }
 0xeed   :  { %v17049_v53 = vpop.eup %17048  ;;  %12632 = vst [vmem:[%s21666_s11 + $0x178] sm:$0xff] %v17047_v29  ;;  %v15671_v47 = vadd.f32 %v12339_v46, %v22182_v25  ;;  %v15609_v22 = vpop.f32.mrb[74].mxu0 }
 0xeee   :  { %12630 = vst [vmem:[%s21666_s11 + $0x168] sm:$0xff] %v17049_v53  ;;  %v12511_v18 = vadd.f32 %v15670_v40, %v21333_v55  ;;  %v15672_v39 = vadd.f32 %v15609_v22, %v22183_v17  ;;  %v12342_v0 = vpop.f32.mrb[75].mxu0 }
 0xeef   :  { %v12509_v30 = vadd.f32 %v15671_v47, %v21333_v55  ;;  %v15673_v49 = vadd.f32 %v12342_v0, %v22184_v34 }
 0xef0   :  { %17058 = vtanh.f32 %v12511_v18  ;;  %v12512_v44 = vadd.f32 %v15672_v39, %v21333_v55 }
 0xef1   :  { %17060 = vtanh.f32 %v12509_v30  ;;  %v12510_v52 = vadd.f32 %v15673_v49, %v21333_v55 }
 0xef2   :  { %v17051_v57 = vpop.eup %17050  ;;  %17062 = vtanh.f32 %v12512_v44 }
 0xef3   :  { %v17053_v14 = vpop.eup %17052  ;;  %12635 = vst [vmem:[%s21666_s11 + $0x190] sm:$0xff] %v17051_v57  ;;  %17064 = vtanh.f32 %v12510_v52  ;;  %v15612_v20 = vpop.f32.mrb[76].mxu0 }
 0xef4   :  { %v17055_v15 = vpop.eup %17054  ;;  %12633 = vst [vmem:[%s21666_s11 + $0x180] sm:$0xff] %v17053_v14  ;;  %v15674_v21 = vadd.f32 %v15612_v20, %v22185_v37  ;;  %v12355_v1 = vpop.f32.mrb[77].mxu0 }
 0xef5   :  { %v17057_v5 = vpop.eup %17056  ;;  %12636 = vst [vmem:[%s21666_s11 + $0x198] sm:$0xff] %v17055_v15  ;;  %v15675_v27 = vadd.f32 %v12355_v1, %v22186_v13  ;;  %v15613_v54 = vpop.f32.mrb[78].mxu0 }
 0xef6   :  { %12634 = vst [vmem:[%s21666_s11 + $0x188] sm:$0xff] %v17057_v5  ;;  %v12515_v50 = vadd.f32 %v15674_v21, %v21333_v55  ;;  %v15676_v16 = vadd.f32 %v15613_v54, %v22187_v33  ;;  %v12358_v8 = vpop.f32.mrb[79].mxu0 }
 0xef7   :  { %v12513_v60 = vadd.f32 %v15675_v27, %v21333_v55  ;;  %v15677_v63 = vadd.f32 %v12358_v8, %v22188_v2 }
 0xef8   :  { %17066 = vtanh.f32 %v12515_v50  ;;  %v12516_v4 = vadd.f32 %v15676_v16, %v21333_v55 }
 0xef9   :  { %17068 = vtanh.f32 %v12513_v60  ;;  %v12514_v7 = vadd.f32 %v15677_v63, %v21333_v55 }
 0xefa   :  { %v17059_v38 = vpop.eup %17058  ;;  %17070 = vtanh.f32 %v12516_v4 }
 0xefb   :  { %v17061_v31 = vpop.eup %17060  ;;  %12639 = vst [vmem:[%s21666_s11 + $0x1b0] sm:$0xff] %v17059_v38  ;;  %17072 = vtanh.f32 %v12514_v7  ;;  %v15616_v36 = vpop.f32.mrb[80].mxu0 }
 0xefc   :  { %v17063_v41 = vpop.eup %17062  ;;  %12637 = vst [vmem:[%s21666_s11 + $0x1a0] sm:$0xff] %v17061_v31  ;;  %v15678_v3 = vadd.f32 %v15616_v36, %v22189_v26  ;;  %v12371_v43 = vpop.f32.mrb[81].mxu0 }
 0xefd   :  { %v17065_v58 = vpop.eup %17064  ;;  %12640 = vst [vmem:[%s21666_s11 + $0x1b8] sm:$0xff] %v17063_v41  ;;  %v15679_v23 = vadd.f32 %v12371_v43, %v22190_v42  ;;  %v15617_v10 = vpop.f32.mrb[82].mxu0 }
 0xefe   :  { %12638 = vst [vmem:[%s21666_s11 + $0x1a8] sm:$0xff] %v17065_v58  ;;  %v12519_v11 = vadd.f32 %v15678_v3, %v21333_v55  ;;  %v15680_v12 = vadd.f32 %v15617_v10, %v22191_v62  ;;  %v12374_v56 = vpop.f32.mrb[83].mxu0 }
 0xeff   :  { %v12517_v59 = vadd.f32 %v15679_v23, %v21333_v55  ;;  %v15681_v6 = vadd.f32 %v12374_v56, %v22192_v45 }
 0xf00   :  { %17074 = vtanh.f32 %v12519_v11  ;;  %v12520_v19 = vadd.f32 %v15680_v12, %v21333_v55 }
 0xf01   :  { %17076 = vtanh.f32 %v12517_v59  ;;  %v12518_v28 = vadd.f32 %v15681_v6, %v21333_v55 }
 0xf02   :  { %v17067_v61 = vpop.eup %17066  ;;  %17078 = vtanh.f32 %v12520_v19 }
 0xf03   :  { %v17069_v51 = vpop.eup %17068  ;;  %12643 = vst [vmem:[%s21666_s11 + $0x1d0] sm:$0xff] %v17067_v61  ;;  %17080 = vtanh.f32 %v12518_v28 }
 0xf04   :  { %v17071_v24 = vpop.eup %17070  ;;  %12641 = vst [vmem:[%s21666_s11 + $0x1c0] sm:$0xff] %v17069_v51 }
 0xf05   :  { %v17073_v32 = vpop.eup %17072  ;;  %12644 = vst [vmem:[%s21666_s11 + $0x1d8] sm:$0xff] %v17071_v24 }
 0xf06   :  { %12642 = vst [vmem:[%s21666_s11 + $0x1c8] sm:$0xff] %v17073_v32 }
 0xf0a   :  { %v17075_v55 = vpop.eup %17074 }
 0xf0b   :  { %v17077_v9 = vpop.eup %17076  ;;  %12647 = vst [vmem:[%s21666_s11 + $0x1f0] sm:$0xff] %v17075_v55 }
 0xf0c   :  { %v17079_v48 = vpop.eup %17078  ;;  %12645 = vst [vmem:[%s21666_s11 + $0x1e0] sm:$0xff] %v17077_v9 }
 0xf0d   :  { %v17081_v29 = vpop.eup %17080  ;;  %12648 = vst [vmem:[%s21666_s11 + $0x1f8] sm:$0xff] %v17079_v48 }
 0xf0e   :  { %12646 = vst [vmem:[%s21666_s11 + $0x1e8] sm:$0xff] %v17081_v29 }

</bundles_post_ra>
